<compile_context>
chip_gen: v7x
topology: tpu7x:2x2x1
jax: 0.10.0
libtpu: 0.0.40
codegen_flags: <defaults>
</compile_context>

<pallas_src>
import functools

import jax
import jax.numpy as jnp
import numpy as np
from jax import lax
from jax.experimental import pallas as pl
from jax.experimental.pallas import tpu as pltpu

FRAMES_PER_STEP = 4


# ----------------------------------------------------------------------------
# Pallas kernel
# ----------------------------------------------------------------------------
def core_decoder_kernel(
    # inputs
    z_ref, h10_ref, h20_ref, h30_ref,
    w1_ref, b1_ref, w2_ref, b2_ref, w3_ref, b3_ref, w4_ref, b4_ref, w5_ref, b5_ref,
    wih1_ref, whh1_ref, bi1_ref, bnh1_ref,
    wih2_ref, whh2_ref, bg2_ref,
    wih3_ref, whh3_ref, bg3_ref,
    wo1_ref, wo2_ref, wo3_ref, wo4_ref, wo5_ref, wo6_ref, wo7_ref, wo8_ref,
    bout_ref,
    # output
    out_ref,
    *, T, rb,
):
    f32 = jnp.float32
    bf16 = jnp.bfloat16

    def mm(x, w):
        # bf16 x bf16 operands, f32 accumulation on the MXU.
        return jnp.dot(x, w, preferred_element_type=f32)

    def gru_step(gr, gu, gn, h, hb, whh_ref, bnh):
        # Per-gate Whh blocks: no lane slicing of a packed (·, 3H) result.
        # gr/gu already contain bih_{r,u} + bhh_{r,u} (folded in the wrapper);
        # gn contains bih_n; bnh is bhh_n, pre-broadcast to (rb, H).
        r = jax.nn.sigmoid(gr + mm(hb, whh_ref[0]))
        u = jax.nn.sigmoid(gu + mm(hb, whh_ref[1]))
        n = jnp.tanh(gn + r * (mm(hb, whh_ref[2]) + bnh))
        return (1.0 - u) * n + u * h

    # -------- batched front end over all T*rb rows (off the serial chain) ----
    x1 = jnp.tanh(mm(z_ref[...], w1_ref[...]) + b1_ref[...])           # (R, C2)
    x1b = x1.astype(bf16)
    gi1_r = mm(x1b, wih1_ref[0]) + bi1_ref[0]
    gi1_u = mm(x1b, wih1_ref[1]) + bi1_ref[1]
    gi1_n = mm(x1b, wih1_ref[2]) + bi1_ref[2]
    out_pre = bout_ref[...] + mm(x1b, wo1_ref[...])                    # (R, P)

    h1 = h10_ref[...]; h1b = h1.astype(bf16)
    h2 = h20_ref[...]; h2b = h2.astype(bf16)
    h3 = h30_ref[...]; h3b = h3.astype(bf16)

    gi2_c = c1_c = gi3_c = c2_c = None         # one-superstep carries

    # -------- wavefront: superstep s -> GRU1@t=s, GRU2@t=s-1, GRU3@t=s-2 -----
    for s in range(T + 2):                     # fully unrolled (T is small)
        gi2_n_, c1_n_, gi3_n_, c2_n_ = gi2_c, c1_c, gi3_c, c2_c

        if s < T:                              # ---- GRU1, time t = s ----
            r0 = s * rb
            h1 = gru_step(gi1_r[r0:r0 + rb], gi1_u[r0:r0 + rb], gi1_n[r0:r0 + rb],
                          h1, h1b, whh1_ref, bnh1_ref[...])
            h1b = h1.astype(bf16)                                      # x2[s]
            x3 = jnp.tanh(mm(h1b, w2_ref[...]) + b2_ref[...])
            x3b = x3.astype(bf16)
            gi2_n_ = (mm(x3b, wih2_ref[0]) + bg2_ref[0],
                      mm(x3b, wih2_ref[1]) + bg2_ref[1],
                      mm(x3b, wih2_ref[2]) + bg2_ref[2])
            c1_n_ = mm(h1b, wo2_ref[...]) + mm(x3b, wo3_ref[...])      # out head

        if 1 <= s <= T:                        # ---- GRU2, time t = s-1 ----
            h2 = gru_step(gi2_c[0], gi2_c[1], gi2_c[2],
                          h2, h2b, whh2_ref, bg2_ref[3])
            h2b = h2.astype(bf16)                                      # x4[s-1]
            x5 = jnp.tanh(mm(h2b, w3_ref[...]) + b3_ref[...])
            x5b = x5.astype(bf16)
            gi3_n_ = (mm(x5b, wih3_ref[0]) + bg3_ref[0],
                      mm(x5b, wih3_ref[1]) + bg3_ref[1],
                      mm(x5b, wih3_ref[2]) + bg3_ref[2])
            c2_n_ = c1_c + mm(h2b, wo4_ref[...]) + mm(x5b, wo5_ref[...])

        if s >= 2:                             # ---- GRU3, time t = s-2 ----
            h3 = gru_step(gi3_c[0], gi3_c[1], gi3_c[2],
                          h3, h3b, whh3_ref, bg3_ref[3])
            h3b = h3.astype(bf16)                                      # x6[s-2]
            x7 = jnp.tanh(mm(h3b, w4_ref[...]) + b4_ref[...])
            x7b = x7.astype(bf16)
            x8 = jnp.tanh(mm(x7b, w5_ref[...]) + b5_ref[...])
            tail = (mm(h3b, wo6_ref[...]) + mm(x7b, wo7_ref[...])
                    + mm(x8.astype(bf16), wo8_ref[...]))
            r3 = (s - 2) * rb
            # exactly one lane-dense (rb, 128k) unmasked store per time step
            out_ref[r3:r3 + rb, :] = out_pre[r3:r3 + rb, :] + c2_c + tail

        gi2_c, c1_c, gi3_c, c2_c = gi2_n_, c1_n_, gi3_n_, c2_n_


# ----------------------------------------------------------------------------
# Wrapper
# ----------------------------------------------------------------------------
def core_decoder_forward(z, initial_state, params, *, output_dim):
    """z: (B, T, input_dim); initial_state: (B, state_size) -> (B, T*4, output_dim)."""
    B, T, Din = z.shape
    p = params
    C = p["gru_1_whh"].shape[-1]          # cond_size  (GRU hidden width)
    C2 = p["dense_1_w"].shape[0]          # cond_size2 (dense width)
    assert C % 8 == 0 and C2 % 8 == 0, "cond sizes must be sublane-aligned"

    rb = 8                                # batch rows per grid block (sublane tile)
    nb = -(-B // rb)                      # batch-parallel grid blocks (2nd TC on v7x)
    Bp = nb * rb
    R = T * rb
    Dp = max(16, -(-Din // 16) * 16)      # pad first-matmul K for bf16 tiling

    f32, bf16 = jnp.float32, jnp.bfloat16

    # ---- activations: time-major within each block, batch padded to rb rows ----
    z_p = jnp.pad(z, ((0, Bp - B), (0, 0), (0, Dp - Din)))
    z_p = (z_p.reshape(nb, rb, T, Dp).transpose(0, 2, 1, 3)
              .reshape(nb, R, Dp).astype(bf16))

    def init_h(name):                     # GRU initial states hoisted out of kernel
        h = jnp.tanh(initial_state @ p[name + "_w"].T + p[name + "_b"])
        return jnp.pad(h, ((0, Bp - B), (0, 0))).astype(f32).reshape(nb, rb, C)

    h10, h20, h30 = init_h("gru_1_init"), init_h("gru_2_init"), init_h("gru_3_init")

    # ---- weights: transposed, bf16 for the MXU; biases f32, pre-broadcast ----
    def dense_w(name, pad_in=0):
        w = p[name + "_w"].T              # (in, out)
        if pad_in:
            w = jnp.pad(w, ((0, pad_in - w.shape[0]), (0, 0)))
        return w.astype(bf16)

    def bias_row(name):                   # (1, out) -> used once, batched
        return p[name + "_b"][None, :].astype(f32)

    def bias_rows(name):                  # (rb, out) -> used per step, no broadcast
        b = p[name + "_b"].astype(f32)
        return jnp.broadcast_to(b[None, :], (rb, b.shape[0]))

    w1, b1 = dense_w("dense_1", pad_in=Dp), bias_row("dense_1")
    w2, b2 = dense_w("dense_2"), bias_rows("dense_2")
    w3, b3 = dense_w("dense_3"), bias_rows("dense_3")
    w4, b4 = dense_w("dense_4"), bias_rows("dense_4")
    w5, b5 = dense_w("dense_5"), bias_rows("dense_5")

    def gru_pack(name):
        wih, whh = p[name + "_wih"], p[name + "_whh"]      # (3H, in), (3H, H)
        bih, bhh = p[name + "_bih"], p[name + "_bhh"]
        wih_g = jnp.stack([wih[g * C:(g + 1) * C].T for g in range(3)]).astype(bf16)
        whh_g = jnp.stack([whh[g * C:(g + 1) * C].T for g in range(3)]).astype(bf16)
        # Fold bhh_r / bhh_u into the input-side biases (r,u = sigmoid(gi+gh));
        # bhh_n must stay separate, inside r * (Whh_n h + bhh_n).
        br = (bih[:C] + bhh[:C]).astype(f32)
        bu = (bih[C:2 * C] + bhh[C:2 * C]).astype(f32)
        bn_i = bih[2 * C:].astype(f32)
        bn_h = bhh[2 * C:].astype(f32)
        return wih_g, whh_g, br, bu, bn_i, bn_h

    wih1, whh1, br1, bu1, bni1, bnh1v = gru_pack("gru_1")
    wih2, whh2, br2, bu2, bni2, bnh2v = gru_pack("gru_2")
    wih3, whh3, br3, bu3, bni3, bnh3v = gru_pack("gru_3")

    bi1 = jnp.stack([br1, bu1, bni1])[:, None, :]                      # (3, 1, C)
    bnh1 = jnp.broadcast_to(bnh1v[None, :], (rb, C))                   # (rb, C)

    def gate_bias_rows(br, bu, bn_i, bn_h):                            # (4, rb, C)
        return jnp.stack([jnp.broadcast_to(v[None, :], (rb, C))
                          for v in (br, bu, bn_i, bn_h)])

    bg2 = gate_bias_rows(br2, bu2, bni2, bnh2v)
    bg3 = gate_bias_rows(br3, bu3, bni3, bnh3v)

    # ---- output head: Wout^T split per concat block, lane-padded to 128 ----
    out_cols = p["output_w"].shape[0]                 # FRAMES_PER_STEP * output_dim
    P = -(-out_cols // 128) * 128
    woutT = jnp.pad(p["output_w"].T, ((0, 0), (0, P - out_cols))).astype(bf16)
    widths = (C2, C, C2, C, C2, C, C2, C2)            # x1..x8 widths
    offs = np.cumsum((0,) + widths[:-1])
    wo = tuple(woutT[int(o):int(o) + int(w), :] for o, w in zip(offs, widths))
    bout = jnp.pad(p["output_b"], ((0, P - out_cols),))[None, :].astype(f32)

    inputs = (z_p, h10, h20, h30,
              w1, b1, w2, b2, w3, b3, w4, b4, w5, b5,
              wih1, whh1, bi1, bnh1,
              wih2, whh2, bg2,
              wih3, whh3, bg3,
              *wo, bout)

    def blk_spec(a):      # batch-blocked: one grid block per rb batch rows
        return pl.BlockSpec((None,) + tuple(a.shape[1:]),
                            lambda i, _nd=a.ndim: (i,) + (0,) * (_nd - 1))

    def rep_spec(a):      # replicated across grid blocks (weights / biases)
        return pl.BlockSpec(tuple(a.shape), lambda i, _z=(0,) * a.ndim: _z)

    in_specs = [blk_spec(z_p), blk_spec(h10), blk_spec(h20), blk_spec(h30)]
    in_specs += [rep_spec(a) for a in inputs[4:]]
    out_spec = pl.BlockSpec((None, R, P), lambda i: (i, 0, 0))

    # VMEM budget guard: per-block footprint grows linearly with T.
    est_bytes = 2 * sum(int(np.prod(a.shape)) * a.dtype.itemsize for a in inputs)
    est_bytes += 2 * R * P * 4                     # output block (double-buffered)
    est_bytes += R * (2 * P + 4 * C) * 4           # out_pre + gi1 gates + x1 live values
    vmem_limit = 32 * 1024 * 1024                  # safe on v5e/v6e/v7x
    assert est_bytes < vmem_limit // 2, (
        "TODO(synk): tile T across an 'arbitrary' grid axis with carried h state "
        "once the per-block footprint approaches the VMEM limit")

    kernel = functools.partial(core_decoder_kernel, T=T, rb=rb)

    out_flat = pl.pallas_call(
        kernel,
        out_shape=jax.ShapeDtypeStruct((nb, R, P), f32),
        grid_spec=pltpu.PrefetchScalarGridSpec(
            num_scalar_prefetch=0,
            grid=(nb,),
            in_specs=in_specs,
            out_specs=out_spec,
        ),
        compiler_params=pltpu.CompilerParams(
            dimension_semantics=("parallel",),     # batch blocks -> both TCs on v7x
            vmem_limit_bytes=vmem_limit),
    )(*inputs)

    # (nb, T*rb, P) -> (B, T, out_cols) -> (B, T*4, output_dim)
    out = out_flat.reshape(nb, T, rb, P)[..., :out_cols]
    out = out.transpose(0, 2, 1, 3).reshape(Bp, T, out_cols)[:B]
    return out.reshape(B, T * FRAMES_PER_STEP, output_dim)


# ----------------------------------------------------------------------------
# Pure-JAX f32 reference (for correctness check)
# ----------------------------------------------------------------------------
def _ref_gru(x_seq, h0, wih, whh, bih, bhh):
    def step(h, x):
        H = h.shape[-1]
        gi = x @ wih.T + bih
        gh = h @ whh.T + bhh
        r = jax.nn.sigmoid(gi[:, :H] + gh[:, :H])
        u = jax.nn.sigmoid(gi[:, H:2 * H] + gh[:, H:2 * H])
        n = jnp.tanh(gi[:, 2 * H:] + r * gh[:, 2 * H:])
        hn = (1.0 - u) * n + u * h
        return hn, hn

    _, ys = lax.scan(step, h0, jnp.swapaxes(x_seq, 0, 1))
    return jnp.swapaxes(ys, 0, 1)


def core_decoder_reference(z, s0, p, *, output_dim):
    lin = lambda n, x: x @ p[n + "_w"].T + p[n + "_b"]
    h1 = jnp.tanh(lin("gru_1_init", s0))
    h2 = jnp.tanh(lin("gru_2_init", s0))
    h3 = jnp.tanh(lin("gru_3_init", s0))
    x1 = jnp.tanh(lin("dense_1", z))
    x2 = _ref_gru(x1, h1, p["gru_1_wih"], p["gru_1_whh"], p["gru_1_bih"], p["gru_1_bhh"])
    x3 = jnp.tanh(lin("dense_2", x2))
    x4 = _ref_gru(x3, h2, p["gru_2_wih"], p["gru_2_whh"], p["gru_2_bih"], p["gru_2_bhh"])
    x5 = jnp.tanh(lin("dense_3", x4))
    x6 = _ref_gru(x5, h3, p["gru_3_wih"], p["gru_3_whh"], p["gru_3_bih"], p["gru_3_bhh"])
    x7 = jnp.tanh(lin("dense_4", x6))
    x8 = jnp.tanh(lin("dense_5", x7))
    x9 = jnp.concatenate((x1, x2, x3, x4, x5, x6, x7, x8), axis=-1)
    x10 = lin("output", x9)
    B, T, Cc = x10.shape
    return x10.reshape(B, T * FRAMES_PER_STEP, Cc // FRAMES_PER_STEP)


# ----------------------------------------------------------------------------
# Deterministic parameter init (PyTorch-style uniform bounds)
# ----------------------------------------------------------------------------
def init_params(key, input_dim, output_dim, cond_size, cond_size2, state_size):
    p = {}
    keys = iter(jax.random.split(key, 64))

    def uni(shape, bound):
        return jax.random.uniform(next(keys), shape, jnp.float32, -bound, bound)

    def add_linear(name, out_d, in_d):
        k = 1.0 / np.sqrt(in_d)
        p[name + "_w"] = uni((out_d, in_d), k)
        p[name + "_b"] = uni((out_d,), k)

    def add_gru(name, in_d, hid):
        k = 1.0 / np.sqrt(hid)
        p[name + "_wih"] = uni((3 * hid, in_d), k)
        # TODO(synk): orthogonal init of weight_hh (init_weights) skipped; plain uniform used
        p[name + "_whh"] = uni((3 * hid, hid), k)
        p[name + "_bih"] = uni((3 * hid,), k)
        p[name + "_bhh"] = uni((3 * hid,), k)

    concat_size = 4 * cond_size + 4 * cond_size2
    add_linear("dense_1", cond_size2, input_dim)
    add_gru("gru_1", cond_size2, cond_size)
    add_linear("dense_2", cond_size2, cond_size)
    add_gru("gru_2", cond_size2, cond_size)
    add_linear("dense_3", cond_size2, cond_size)
    add_gru("gru_3", cond_size2, cond_size)
    add_linear("dense_4", cond_size2, cond_size)
    add_linear("dense_5", cond_size2, cond_size2)
    add_linear("output", FRAMES_PER_STEP * output_dim, concat_size)
    add_linear("gru_1_init", cond_size, state_size)
    add_linear("gru_2_init", cond_size, state_size)
    add_linear("gru_3_init", cond_size, state_size)
    return p


# ----------------------------------------------------------------------------
if __name__ == "__main__":
    B, T = 2, 8
    input_dim, output_dim = 20, 20
    cond_size, cond_size2, state_size = 32, 32, 24

    root = jax.random.PRNGKey(0)
    k_z, k_s, k_p = jax.random.split(root, 3)
    z = jax.random.normal(k_z, (B, T, input_dim), jnp.float32)
    s0 = jax.random.normal(k_s, (B, state_size), jnp.float32)
    params = init_params(k_p, input_dim, output_dim, cond_size, cond_size2, state_size)

    fwd = jax.jit(functools.partial(core_decoder_forward, output_dim=output_dim))
    out = jax.block_until_ready(fwd(z, s0, params))

    ref = jax.block_until_ready(
        core_decoder_reference(z, s0, params, output_dim=output_dim))

    assert out.shape == (B, T * FRAMES_PER_STEP, output_dim), out.shape
    # Kernel uses bf16 matmul operands (f32 accumulation); tolerance is loosened
    # accordingly vs. the pure-f32 reference (still far tighter than any gate-
    # ordering / bias-folding bug would produce).
    np.testing.assert_allclose(np.asarray(out), np.asarray(ref), rtol=5e-2, atol=5e-2)

    print("KERNEL_OK")
</pallas_src>

<mosaic_0001>
module attributes {stable_mosaic.version = 11 : i64} {
  func.func @core_decoder_kernel(%arg0: i32, %arg1: memref<1x64x32xbf16, #tpu.memory_space<vmem>>, %arg2: memref<1x8x32xf32, #tpu.memory_space<vmem>>, %arg3: memref<1x8x32xf32, #tpu.memory_space<vmem>>, %arg4: memref<1x8x32xf32, #tpu.memory_space<vmem>>, %arg5: memref<32x32xbf16, #tpu.memory_space<vmem>>, %arg6: memref<1x32xf32, #tpu.memory_space<vmem>>, %arg7: memref<32x32xbf16, #tpu.memory_space<vmem>>, %arg8: memref<8x32xf32, #tpu.memory_space<vmem>>, %arg9: memref<32x32xbf16, #tpu.memory_space<vmem>>, %arg10: memref<8x32xf32, #tpu.memory_space<vmem>>, %arg11: memref<32x32xbf16, #tpu.memory_space<vmem>>, %arg12: memref<8x32xf32, #tpu.memory_space<vmem>>, %arg13: memref<32x32xbf16, #tpu.memory_space<vmem>>, %arg14: memref<8x32xf32, #tpu.memory_space<vmem>>, %arg15: memref<3x32x32xbf16, #tpu.memory_space<vmem>>, %arg16: memref<3x32x32xbf16, #tpu.memory_space<vmem>>, %arg17: memref<3x1x32xf32, #tpu.memory_space<vmem>>, %arg18: memref<8x32xf32, #tpu.memory_space<vmem>>, %arg19: memref<3x32x32xbf16, #tpu.memory_space<vmem>>, %arg20: memref<3x32x32xbf16, #tpu.memory_space<vmem>>, %arg21: memref<4x8x32xf32, #tpu.memory_space<vmem>>, %arg22: memref<3x32x32xbf16, #tpu.memory_space<vmem>>, %arg23: memref<3x32x32xbf16, #tpu.memory_space<vmem>>, %arg24: memref<4x8x32xf32, #tpu.memory_space<vmem>>, %arg25: memref<32x128xbf16, #tpu.memory_space<vmem>>, %arg26: memref<32x128xbf16, #tpu.memory_space<vmem>>, %arg27: memref<32x128xbf16, #tpu.memory_space<vmem>>, %arg28: memref<32x128xbf16, #tpu.memory_space<vmem>>, %arg29: memref<32x128xbf16, #tpu.memory_space<vmem>>, %arg30: memref<32x128xbf16, #tpu.memory_space<vmem>>, %arg31: memref<32x128xbf16, #tpu.memory_space<vmem>>, %arg32: memref<32x128xbf16, #tpu.memory_space<vmem>>, %arg33: memref<1x128xf32, #tpu.memory_space<vmem>>, %arg34: memref<1x64x128xf32, #tpu.memory_space<vmem>>) attributes {dimension_semantics = [#tpu.dimension_semantics<parallel>], iteration_bounds = array<i64: 1>, scalar_prefetch = 0 : i64, scratch_operands = 0 : i64, tpu.core_type = #tpu.core_type<tc>, window_params = [{transform_indices = @transform_0, window_bounds = array<i64: 1, 64, 32>}, {transform_indices = @transform_1, window_bounds = array<i64: 1, 8, 32>}, {transform_indices = @transform_2, window_bounds = array<i64: 1, 8, 32>}, {transform_indices = @transform_3, window_bounds = array<i64: 1, 8, 32>}, {pipeline_mode = #tpu.pipeline_mode<synchronous>, transform_indices = @transform_4, window_bounds = array<i64: 32, 32>}, {pipeline_mode = #tpu.pipeline_mode<synchronous>, transform_indices = @transform_5, window_bounds = array<i64: 1, 32>}, {pipeline_mode = #tpu.pipeline_mode<synchronous>, transform_indices = @transform_6, window_bounds = array<i64: 32, 32>}, {pipeline_mode = #tpu.pipeline_mode<synchronous>, transform_indices = @transform_7, window_bounds = array<i64: 8, 32>}, {pipeline_mode = #tpu.pipeline_mode<synchronous>, transform_indices = @transform_8, window_bounds = array<i64: 32, 32>}, {pipeline_mode = #tpu.pipeline_mode<synchronous>, transform_indices = @transform_9, window_bounds = array<i64: 8, 32>}, {pipeline_mode = #tpu.pipeline_mode<synchronous>, transform_indices = @transform_10, window_bounds = array<i64: 32, 32>}, {pipeline_mode = #tpu.pipeline_mode<synchronous>, transform_indices = @transform_11, window_bounds = array<i64: 8, 32>}, {pipeline_mode = #tpu.pipeline_mode<synchronous>, transform_indices = @transform_12, window_bounds = array<i64: 32, 32>}, {pipeline_mode = #tpu.pipeline_mode<synchronous>, transform_indices = @transform_13, window_bounds = array<i64: 8, 32>}, {pipeline_mode = #tpu.pipeline_mode<synchronous>, transform_indices = @transform_14, window_bounds = array<i64: 3, 32, 32>}, {pipeline_mode = #tpu.pipeline_mode<synchronous>, transform_indices = @transform_15, window_bounds = array<i64: 3, 32, 32>}, {pipeline_mode = #tpu.pipeline_mode<synchronous>, transform_indices = @transform_16, window_bounds = array<i64: 3, 1, 32>}, {pipeline_mode = #tpu.pipeline_mode<synchronous>, transform_indices = @transform_17, window_bounds = array<i64: 8, 32>}, {pipeline_mode = #tpu.pipeline_mode<synchronous>, transform_indices = @transform_18, window_bounds = array<i64: 3, 32, 32>}, {pipeline_mode = #tpu.pipeline_mode<synchronous>, transform_indices = @transform_19, window_bounds = array<i64: 3, 32, 32>}, {pipeline_mode = #tpu.pipeline_mode<synchronous>, transform_indices = @transform_20, window_bounds = array<i64: 4, 8, 32>}, {pipeline_mode = #tpu.pipeline_mode<synchronous>, transform_indices = @transform_21, window_bounds = array<i64: 3, 32, 32>}, {pipeline_mode = #tpu.pipeline_mode<synchronous>, transform_indices = @transform_22, window_bounds = array<i64: 3, 32, 32>}, {pipeline_mode = #tpu.pipeline_mode<synchronous>, transform_indices = @transform_23, window_bounds = array<i64: 4, 8, 32>}, {pipeline_mode = #tpu.pipeline_mode<synchronous>, transform_indices = @transform_24, window_bounds = array<i64: 32, 128>}, {pipeline_mode = #tpu.pipeline_mode<synchronous>, transform_indices = @transform_25, window_bounds = array<i64: 32, 128>}, {pipeline_mode = #tpu.pipeline_mode<synchronous>, transform_indices = @transform_26, window_bounds = array<i64: 32, 128>}, {pipeline_mode = #tpu.pipeline_mode<synchronous>, transform_indices = @transform_27, window_bounds = array<i64: 32, 128>}, {pipeline_mode = #tpu.pipeline_mode<synchronous>, transform_indices = @transform_28, window_bounds = array<i64: 32, 128>}, {pipeline_mode = #tpu.pipeline_mode<synchronous>, transform_indices = @transform_29, window_bounds = array<i64: 32, 128>}, {pipeline_mode = #tpu.pipeline_mode<synchronous>, transform_indices = @transform_30, window_bounds = array<i64: 32, 128>}, {pipeline_mode = #tpu.pipeline_mode<synchronous>, transform_indices = @transform_31, window_bounds = array<i64: 32, 128>}, {pipeline_mode = #tpu.pipeline_mode<synchronous>, transform_indices = @transform_32, window_bounds = array<i64: 1, 128>}, {transform_indices = @transform_33, window_bounds = array<i64: 1, 64, 128>}]} {
    %c0 = arith.constant 0 : index
    %c0_0 = arith.constant 0 : index
    %c0_1 = arith.constant 0 : index
    %0 = vector.load %arg1[%c0, %c0_0, %c0_1] : memref<1x64x32xbf16, #tpu.memory_space<vmem>>, vector<1x64x32xbf16>
    %1 = vector.shape_cast %0 : vector<1x64x32xbf16> to vector<64x32xbf16>
    %c0_2 = arith.constant 0 : index
    %c0_3 = arith.constant 0 : index
    %2 = vector.load %arg5[%c0_2, %c0_3] : memref<32x32xbf16, #tpu.memory_space<vmem>>, vector<32x32xbf16>
    %cst = arith.constant dense<0.000000e+00> : vector<64x32xf32>
    %3 = tpu.matmul %1, %2, %cst {dimension_numbers = #tpu.dot_dimension_numbers<[1], [0], [0], [1], [0, 0, 1, 1], [], []>} : vector<64x32xbf16>, vector<32x32xbf16>, vector<64x32xf32> -> vector<64x32xf32>
    %c0_4 = arith.constant 0 : index
    %c0_5 = arith.constant 0 : index
    %4 = vector.load %arg6[%c0_4, %c0_5] : memref<1x32xf32, #tpu.memory_space<vmem>>, vector<1x32xf32>
    %5 = vector.broadcast %4 : vector<1x32xf32> to vector<64x32xf32>
    %6 = arith.addf %3, %5 : vector<64x32xf32>
    %7 = math.tanh %6 : vector<64x32xf32>
    %8 = arith.truncf %7 : vector<64x32xf32> to vector<64x32xbf16>
    %c0_6 = arith.constant 0 : index
    %c0_7 = arith.constant 0 : index
    %c0_8 = arith.constant 0 : index
    %9 = vector.load %arg15[%c0_6, %c0_7, %c0_8] : memref<3x32x32xbf16, #tpu.memory_space<vmem>>, vector<1x32x32xbf16>
    %10 = vector.shape_cast %9 : vector<1x32x32xbf16> to vector<32x32xbf16>
    %cst_9 = arith.constant dense<0.000000e+00> : vector<64x32xf32>
    %11 = tpu.matmul %8, %10, %cst_9 {dimension_numbers = #tpu.dot_dimension_numbers<[1], [0], [0], [1], [0, 0, 1, 1], [], []>} : vector<64x32xbf16>, vector<32x32xbf16>, vector<64x32xf32> -> vector<64x32xf32>
    %c0_10 = arith.constant 0 : index
    %c0_11 = arith.constant 0 : index
    %c0_12 = arith.constant 0 : index
    %12 = vector.load %arg17[%c0_10, %c0_11, %c0_12] : memref<3x1x32xf32, #tpu.memory_space<vmem>>, vector<1x1x32xf32>
    %13 = vector.shape_cast %12 : vector<1x1x32xf32> to vector<1x32xf32>
    %14 = vector.broadcast %13 : vector<1x32xf32> to vector<64x32xf32>
    %15 = arith.addf %11, %14 : vector<64x32xf32>
    %c1 = arith.constant 1 : index
    %c0_13 = arith.constant 0 : index
    %c0_14 = arith.constant 0 : index
    %16 = vector.load %arg15[%c1, %c0_13, %c0_14] : memref<3x32x32xbf16, #tpu.memory_space<vmem>>, vector<1x32x32xbf16>
    %17 = vector.shape_cast %16 : vector<1x32x32xbf16> to vector<32x32xbf16>
    %cst_15 = arith.constant dense<0.000000e+00> : vector<64x32xf32>
    %18 = tpu.matmul %8, %17, %cst_15 {dimension_numbers = #tpu.dot_dimension_numbers<[1], [0], [0], [1], [0, 0, 1, 1], [], []>} : vector<64x32xbf16>, vector<32x32xbf16>, vector<64x32xf32> -> vector<64x32xf32>
    %c1_16 = arith.constant 1 : index
    %c0_17 = arith.constant 0 : index
    %c0_18 = arith.constant 0 : index
    %19 = vector.load %arg17[%c1_16, %c0_17, %c0_18] : memref<3x1x32xf32, #tpu.memory_space<vmem>>, vector<1x1x32xf32>
    %20 = vector.shape_cast %19 : vector<1x1x32xf32> to vector<1x32xf32>
    %21 = vector.broadcast %20 : vector<1x32xf32> to vector<64x32xf32>
    %22 = arith.addf %18, %21 : vector<64x32xf32>
    %c2 = arith.constant 2 : index
    %c0_19 = arith.constant 0 : index
    %c0_20 = arith.constant 0 : index
    %23 = vector.load %arg15[%c2, %c0_19, %c0_20] : memref<3x32x32xbf16, #tpu.memory_space<vmem>>, vector<1x32x32xbf16>
    %24 = vector.shape_cast %23 : vector<1x32x32xbf16> to vector<32x32xbf16>
    %cst_21 = arith.constant dense<0.000000e+00> : vector<64x32xf32>
    %25 = tpu.matmul %8, %24, %cst_21 {dimension_numbers = #tpu.dot_dimension_numbers<[1], [0], [0], [1], [0, 0, 1, 1], [], []>} : vector<64x32xbf16>, vector<32x32xbf16>, vector<64x32xf32> -> vector<64x32xf32>
    %c2_22 = arith.constant 2 : index
    %c0_23 = arith.constant 0 : index
    %c0_24 = arith.constant 0 : index
    %26 = vector.load %arg17[%c2_22, %c0_23, %c0_24] : memref<3x1x32xf32, #tpu.memory_space<vmem>>, vector<1x1x32xf32>
    %27 = vector.shape_cast %26 : vector<1x1x32xf32> to vector<1x32xf32>
    %28 = vector.broadcast %27 : vector<1x32xf32> to vector<64x32xf32>
    %29 = arith.addf %25, %28 : vector<64x32xf32>
    %c0_25 = arith.constant 0 : index
    %c0_26 = arith.constant 0 : index
    %30 = vector.load %arg33[%c0_25, %c0_26] : memref<1x128xf32, #tpu.memory_space<vmem>>, vector<1x128xf32>
    %c0_27 = arith.constant 0 : index
    %c0_28 = arith.constant 0 : index
    %31 = vector.load %arg25[%c0_27, %c0_28] : memref<32x128xbf16, #tpu.memory_space<vmem>>, vector<32x128xbf16>
    %cst_29 = arith.constant dense<0.000000e+00> : vector<64x128xf32>
    %32 = tpu.matmul %8, %31, %cst_29 {dimension_numbers = #tpu.dot_dimension_numbers<[1], [0], [0], [1], [0, 0, 1, 1], [], []>} : vector<64x32xbf16>, vector<32x128xbf16>, vector<64x128xf32> -> vector<64x128xf32>
    %33 = vector.broadcast %30 : vector<1x128xf32> to vector<64x128xf32>
    %34 = arith.addf %33, %32 : vector<64x128xf32>
    %c0_30 = arith.constant 0 : index
    %c0_31 = arith.constant 0 : index
    %c0_32 = arith.constant 0 : index
    %35 = vector.load %arg2[%c0_30, %c0_31, %c0_32] : memref<1x8x32xf32, #tpu.memory_space<vmem>>, vector<1x8x32xf32>
    %36 = vector.shape_cast %35 : vector<1x8x32xf32> to vector<8x32xf32>
    %37 = arith.truncf %36 : vector<8x32xf32> to vector<8x32xbf16>
    %c0_33 = arith.constant 0 : index
    %c0_34 = arith.constant 0 : index
    %c0_35 = arith.constant 0 : index
    %38 = vector.load %arg3[%c0_33, %c0_34, %c0_35] : memref<1x8x32xf32, #tpu.memory_space<vmem>>, vector<1x8x32xf32>
    %39 = vector.shape_cast %38 : vector<1x8x32xf32> to vector<8x32xf32>
    %40 = arith.truncf %39 : vector<8x32xf32> to vector<8x32xbf16>
    %c0_36 = arith.constant 0 : index
    %c0_37 = arith.constant 0 : index
    %c0_38 = arith.constant 0 : index
    %41 = vector.load %arg4[%c0_36, %c0_37, %c0_38] : memref<1x8x32xf32, #tpu.memory_space<vmem>>, vector<1x8x32xf32>
    %42 = vector.shape_cast %41 : vector<1x8x32xf32> to vector<8x32xf32>
    %43 = arith.truncf %42 : vector<8x32xf32> to vector<8x32xbf16>
    %44 = vector.extract_strided_slice %15 {offsets = [0, 0], sizes = [8, 32], strides = [1, 1]} : vector<64x32xf32> to vector<8x32xf32>
    %45 = vector.extract_strided_slice %22 {offsets = [0, 0], sizes = [8, 32], strides = [1, 1]} : vector<64x32xf32> to vector<8x32xf32>
    %46 = vector.extract_strided_slice %29 {offsets = [0, 0], sizes = [8, 32], strides = [1, 1]} : vector<64x32xf32> to vector<8x32xf32>
    %c0_39 = arith.constant 0 : index
    %c0_40 = arith.constant 0 : index
    %47 = vector.load %arg18[%c0_39, %c0_40] : memref<8x32xf32, #tpu.memory_space<vmem>>, vector<8x32xf32>
    %c0_41 = arith.constant 0 : index
    %c0_42 = arith.constant 0 : index
    %c0_43 = arith.constant 0 : index
    %48 = vector.load %arg16[%c0_41, %c0_42, %c0_43] : memref<3x32x32xbf16, #tpu.memory_space<vmem>>, vector<1x32x32xbf16>
    %49 = vector.shape_cast %48 : vector<1x32x32xbf16> to vector<32x32xbf16>
    %cst_44 = arith.constant dense<0.000000e+00> : vector<8x32xf32>
    %50 = tpu.matmul %37, %49, %cst_44 {dimension_numbers = #tpu.dot_dimension_numbers<[1], [0], [0], [1], [0, 0, 1, 1], [], []>} : vector<8x32xbf16>, vector<32x32xbf16>, vector<8x32xf32> -> vector<8x32xf32>
    %51 = arith.addf %44, %50 : vector<8x32xf32>
    %52 = arith.negf %51 : vector<8x32xf32>
    %53 = math.exp %52 : vector<8x32xf32>
    %cst_45 = arith.constant 1.000000e+00 : f32
    %54 = vector.broadcast %cst_45 : f32 to vector<8x32xf32>
    %55 = arith.addf %54, %53 : vector<8x32xf32>
    %56 = arith.divf %54, %55 : vector<8x32xf32>
    %c1_46 = arith.constant 1 : index
    %c0_47 = arith.constant 0 : index
    %c0_48 = arith.constant 0 : index
    %57 = vector.load %arg16[%c1_46, %c0_47, %c0_48] : memref<3x32x32xbf16, #tpu.memory_space<vmem>>, vector<1x32x32xbf16>
    %58 = vector.shape_cast %57 : vector<1x32x32xbf16> to vector<32x32xbf16>
    %cst_49 = arith.constant dense<0.000000e+00> : vector<8x32xf32>
    %59 = tpu.matmul %37, %58, %cst_49 {dimension_numbers = #tpu.dot_dimension_numbers<[1], [0], [0], [1], [0, 0, 1, 1], [], []>} : vector<8x32xbf16>, vector<32x32xbf16>, vector<8x32xf32> -> vector<8x32xf32>
    %60 = arith.addf %45, %59 : vector<8x32xf32>
    %61 = arith.negf %60 : vector<8x32xf32>
    %62 = math.exp %61 : vector<8x32xf32>
    %cst_50 = arith.constant 1.000000e+00 : f32
    %63 = vector.broadcast %cst_50 : f32 to vector<8x32xf32>
    %64 = arith.addf %63, %62 : vector<8x32xf32>
    %65 = arith.divf %63, %64 : vector<8x32xf32>
    %c2_51 = arith.constant 2 : index
    %c0_52 = arith.constant 0 : index
    %c0_53 = arith.constant 0 : index
    %66 = vector.load %arg16[%c2_51, %c0_52, %c0_53] : memref<3x32x32xbf16, #tpu.memory_space<vmem>>, vector<1x32x32xbf16>
    %67 = vector.shape_cast %66 : vector<1x32x32xbf16> to vector<32x32xbf16>
    %cst_54 = arith.constant dense<0.000000e+00> : vector<8x32xf32>
    %68 = tpu.matmul %37, %67, %cst_54 {dimension_numbers = #tpu.dot_dimension_numbers<[1], [0], [0], [1], [0, 0, 1, 1], [], []>} : vector<8x32xbf16>, vector<32x32xbf16>, vector<8x32xf32> -> vector<8x32xf32>
    %69 = arith.addf %68, %47 : vector<8x32xf32>
    %70 = arith.mulf %56, %69 : vector<8x32xf32>
    %71 = arith.addf %46, %70 : vector<8x32xf32>
    %72 = math.tanh %71 : vector<8x32xf32>
    %cst_55 = arith.constant 1.000000e+00 : f32
    %73 = vector.broadcast %cst_55 : f32 to vector<8x32xf32>
    %74 = arith.subf %73, %65 : vector<8x32xf32>
    %75 = arith.mulf %74, %72 : vector<8x32xf32>
    %76 = arith.mulf %65, %36 : vector<8x32xf32>
    %77 = arith.addf %75, %76 : vector<8x32xf32>
    %78 = arith.truncf %77 : vector<8x32xf32> to vector<8x32xbf16>
    %c0_56 = arith.constant 0 : index
    %c0_57 = arith.constant 0 : index
    %79 = vector.load %arg7[%c0_56, %c0_57] : memref<32x32xbf16, #tpu.memory_space<vmem>>, vector<32x32xbf16>
    %cst_58 = arith.constant dense<0.000000e+00> : vector<8x32xf32>
    %80 = tpu.matmul %78, %79, %cst_58 {dimension_numbers = #tpu.dot_dimension_numbers<[1], [0], [0], [1], [0, 0, 1, 1], [], []>} : vector<8x32xbf16>, vector<32x32xbf16>, vector<8x32xf32> -> vector<8x32xf32>
    %c0_59 = arith.constant 0 : index
    %c0_60 = arith.constant 0 : index
    %81 = vector.load %arg8[%c0_59, %c0_60] : memref<8x32xf32, #tpu.memory_space<vmem>>, vector<8x32xf32>
    %82 = arith.addf %80, %81 : vector<8x32xf32>
    %83 = math.tanh %82 : vector<8x32xf32>
    %84 = arith.truncf %83 : vector<8x32xf32> to vector<8x32xbf16>
    %c0_61 = arith.constant 0 : index
    %c0_62 = arith.constant 0 : index
    %c0_63 = arith.constant 0 : index
    %85 = vector.load %arg19[%c0_61, %c0_62, %c0_63] : memref<3x32x32xbf16, #tpu.memory_space<vmem>>, vector<1x32x32xbf16>
    %86 = vector.shape_cast %85 : vector<1x32x32xbf16> to vector<32x32xbf16>
    %cst_64 = arith.constant dense<0.000000e+00> : vector<8x32xf32>
    %87 = tpu.matmul %84, %86, %cst_64 {dimension_numbers = #tpu.dot_dimension_numbers<[1], [0], [0], [1], [0, 0, 1, 1], [], []>} : vector<8x32xbf16>, vector<32x32xbf16>, vector<8x32xf32> -> vector<8x32xf32>
    %c0_65 = arith.constant 0 : index
    %c0_66 = arith.constant 0 : index
    %c0_67 = arith.constant 0 : index
    %88 = vector.load %arg21[%c0_65, %c0_66, %c0_67] : memref<4x8x32xf32, #tpu.memory_space<vmem>>, vector<1x8x32xf32>
    %89 = vector.shape_cast %88 : vector<1x8x32xf32> to vector<8x32xf32>
    %90 = arith.addf %87, %89 : vector<8x32xf32>
    %c1_68 = arith.constant 1 : index
    %c0_69 = arith.constant 0 : index
    %c0_70 = arith.constant 0 : index
    %91 = vector.load %arg19[%c1_68, %c0_69, %c0_70] : memref<3x32x32xbf16, #tpu.memory_space<vmem>>, vector<1x32x32xbf16>
    %92 = vector.shape_cast %91 : vector<1x32x32xbf16> to vector<32x32xbf16>
    %cst_71 = arith.constant dense<0.000000e+00> : vector<8x32xf32>
    %93 = tpu.matmul %84, %92, %cst_71 {dimension_numbers = #tpu.dot_dimension_numbers<[1], [0], [0], [1], [0, 0, 1, 1], [], []>} : vector<8x32xbf16>, vector<32x32xbf16>, vector<8x32xf32> -> vector<8x32xf32>
    %c1_72 = arith.constant 1 : index
    %c0_73 = arith.constant 0 : index
    %c0_74 = arith.constant 0 : index
    %94 = vector.load %arg21[%c1_72, %c0_73, %c0_74] : memref<4x8x32xf32, #tpu.memory_space<vmem>>, vector<1x8x32xf32>
    %95 = vector.shape_cast %94 : vector<1x8x32xf32> to vector<8x32xf32>
    %96 = arith.addf %93, %95 : vector<8x32xf32>
    %c2_75 = arith.constant 2 : index
    %c0_76 = arith.constant 0 : index
    %c0_77 = arith.constant 0 : index
    %97 = vector.load %arg19[%c2_75, %c0_76, %c0_77] : memref<3x32x32xbf16, #tpu.memory_space<vmem>>, vector<1x32x32xbf16>
    %98 = vector.shape_cast %97 : vector<1x32x32xbf16> to vector<32x32xbf16>
    %cst_78 = arith.constant dense<0.000000e+00> : vector<8x32xf32>
    %99 = tpu.matmul %84, %98, %cst_78 {dimension_numbers = #tpu.dot_dimension_numbers<[1], [0], [0], [1], [0, 0, 1, 1], [], []>} : vector<8x32xbf16>, vector<32x32xbf16>, vector<8x32xf32> -> vector<8x32xf32>
    %c2_79 = arith.constant 2 : index
    %c0_80 = arith.constant 0 : index
    %c0_81 = arith.constant 0 : index
    %100 = vector.load %arg21[%c2_79, %c0_80, %c0_81] : memref<4x8x32xf32, #tpu.memory_space<vmem>>, vector<1x8x32xf32>
    %101 = vector.shape_cast %100 : vector<1x8x32xf32> to vector<8x32xf32>
    %102 = arith.addf %99, %101 : vector<8x32xf32>
    %c0_82 = arith.constant 0 : index
    %c0_83 = arith.constant 0 : index
    %103 = vector.load %arg26[%c0_82, %c0_83] : memref<32x128xbf16, #tpu.memory_space<vmem>>, vector<32x128xbf16>
    %cst_84 = arith.constant dense<0.000000e+00> : vector<8x128xf32>
    %104 = tpu.matmul %78, %103, %cst_84 {dimension_numbers = #tpu.dot_dimension_numbers<[1], [0], [0], [1], [0, 0, 1, 1], [], []>} : vector<8x32xbf16>, vector<32x128xbf16>, vector<8x128xf32> -> vector<8x128xf32>
    %c0_85 = arith.constant 0 : index
    %c0_86 = arith.constant 0 : index
    %105 = vector.load %arg27[%c0_85, %c0_86] : memref<32x128xbf16, #tpu.memory_space<vmem>>, vector<32x128xbf16>
    %cst_87 = arith.constant dense<0.000000e+00> : vector<8x128xf32>
    %106 = tpu.matmul %84, %105, %cst_87 {dimension_numbers = #tpu.dot_dimension_numbers<[1], [0], [0], [1], [0, 0, 1, 1], [], []>} : vector<8x32xbf16>, vector<32x128xbf16>, vector<8x128xf32> -> vector<8x128xf32>
    %107 = arith.addf %104, %106 : vector<8x128xf32>
    %108 = vector.extract_strided_slice %15 {offsets = [8, 0], sizes = [8, 32], strides = [1, 1]} : vector<64x32xf32> to vector<8x32xf32>
    %109 = vector.extract_strided_slice %22 {offsets = [8, 0], sizes = [8, 32], strides = [1, 1]} : vector<64x32xf32> to vector<8x32xf32>
    %110 = vector.extract_strided_slice %29 {offsets = [8, 0], sizes = [8, 32], strides = [1, 1]} : vector<64x32xf32> to vector<8x32xf32>
    %c0_88 = arith.constant 0 : index
    %c0_89 = arith.constant 0 : index
    %111 = vector.load %arg18[%c0_88, %c0_89] : memref<8x32xf32, #tpu.memory_space<vmem>>, vector<8x32xf32>
    %c0_90 = arith.constant 0 : index
    %c0_91 = arith.constant 0 : index
    %c0_92 = arith.constant 0 : index
    %112 = vector.load %arg16[%c0_90, %c0_91, %c0_92] : memref<3x32x32xbf16, #tpu.memory_space<vmem>>, vector<1x32x32xbf16>
    %113 = vector.shape_cast %112 : vector<1x32x32xbf16> to vector<32x32xbf16>
    %cst_93 = arith.constant dense<0.000000e+00> : vector<8x32xf32>
    %114 = tpu.matmul %78, %113, %cst_93 {dimension_numbers = #tpu.dot_dimension_numbers<[1], [0], [0], [1], [0, 0, 1, 1], [], []>} : vector<8x32xbf16>, vector<32x32xbf16>, vector<8x32xf32> -> vector<8x32xf32>
    %115 = arith.addf %108, %114 : vector<8x32xf32>
    %116 = arith.negf %115 : vector<8x32xf32>
    %117 = math.exp %116 : vector<8x32xf32>
    %cst_94 = arith.constant 1.000000e+00 : f32
    %118 = vector.broadcast %cst_94 : f32 to vector<8x32xf32>
    %119 = arith.addf %118, %117 : vector<8x32xf32>
    %120 = arith.divf %118, %119 : vector<8x32xf32>
    %c1_95 = arith.constant 1 : index
    %c0_96 = arith.constant 0 : index
    %c0_97 = arith.constant 0 : index
    %121 = vector.load %arg16[%c1_95, %c0_96, %c0_97] : memref<3x32x32xbf16, #tpu.memory_space<vmem>>, vector<1x32x32xbf16>
    %122 = vector.shape_cast %121 : vector<1x32x32xbf16> to vector<32x32xbf16>
    %cst_98 = arith.constant dense<0.000000e+00> : vector<8x32xf32>
    %123 = tpu.matmul %78, %122, %cst_98 {dimension_numbers = #tpu.dot_dimension_numbers<[1], [0], [0], [1], [0, 0, 1, 1], [], []>} : vector<8x32xbf16>, vector<32x32xbf16>, vector<8x32xf32> -> vector<8x32xf32>
    %124 = arith.addf %109, %123 : vector<8x32xf32>
    %125 = arith.negf %124 : vector<8x32xf32>
    %126 = math.exp %125 : vector<8x32xf32>
    %cst_99 = arith.constant 1.000000e+00 : f32
    %127 = vector.broadcast %cst_99 : f32 to vector<8x32xf32>
    %128 = arith.addf %127, %126 : vector<8x32xf32>
    %129 = arith.divf %127, %128 : vector<8x32xf32>
    %c2_100 = arith.constant 2 : index
    %c0_101 = arith.constant 0 : index
    %c0_102 = arith.constant 0 : index
    %130 = vector.load %arg16[%c2_100, %c0_101, %c0_102] : memref<3x32x32xbf16, #tpu.memory_space<vmem>>, vector<1x32x32xbf16>
    %131 = vector.shape_cast %130 : vector<1x32x32xbf16> to vector<32x32xbf16>
    %cst_103 = arith.constant dense<0.000000e+00> : vector<8x32xf32>
    %132 = tpu.matmul %78, %131, %cst_103 {dimension_numbers = #tpu.dot_dimension_numbers<[1], [0], [0], [1], [0, 0, 1, 1], [], []>} : vector<8x32xbf16>, vector<32x32xbf16>, vector<8x32xf32> -> vector<8x32xf32>
    %133 = arith.addf %132, %111 : vector<8x32xf32>
    %134 = arith.mulf %120, %133 : vector<8x32xf32>
    %135 = arith.addf %110, %134 : vector<8x32xf32>
    %136 = math.tanh %135 : vector<8x32xf32>
    %cst_104 = arith.constant 1.000000e+00 : f32
    %137 = vector.broadcast %cst_104 : f32 to vector<8x32xf32>
    %138 = arith.subf %137, %129 : vector<8x32xf32>
    %139 = arith.mulf %138, %136 : vector<8x32xf32>
    %140 = arith.mulf %129, %77 : vector<8x32xf32>
    %141 = arith.addf %139, %140 : vector<8x32xf32>
    %142 = arith.truncf %141 : vector<8x32xf32> to vector<8x32xbf16>
    %c0_105 = arith.constant 0 : index
    %c0_106 = arith.constant 0 : index
    %143 = vector.load %arg7[%c0_105, %c0_106] : memref<32x32xbf16, #tpu.memory_space<vmem>>, vector<32x32xbf16>
    %cst_107 = arith.constant dense<0.000000e+00> : vector<8x32xf32>
    %144 = tpu.matmul %142, %143, %cst_107 {dimension_numbers = #tpu.dot_dimension_numbers<[1], [0], [0], [1], [0, 0, 1, 1], [], []>} : vector<8x32xbf16>, vector<32x32xbf16>, vector<8x32xf32> -> vector<8x32xf32>
    %c0_108 = arith.constant 0 : index
    %c0_109 = arith.constant 0 : index
    %145 = vector.load %arg8[%c0_108, %c0_109] : memref<8x32xf32, #tpu.memory_space<vmem>>, vector<8x32xf32>
    %146 = arith.addf %144, %145 : vector<8x32xf32>
    %147 = math.tanh %146 : vector<8x32xf32>
    %148 = arith.truncf %147 : vector<8x32xf32> to vector<8x32xbf16>
    %c0_110 = arith.constant 0 : index
    %c0_111 = arith.constant 0 : index
    %c0_112 = arith.constant 0 : index
    %149 = vector.load %arg19[%c0_110, %c0_111, %c0_112] : memref<3x32x32xbf16, #tpu.memory_space<vmem>>, vector<1x32x32xbf16>
    %150 = vector.shape_cast %149 : vector<1x32x32xbf16> to vector<32x32xbf16>
    %cst_113 = arith.constant dense<0.000000e+00> : vector<8x32xf32>
    %151 = tpu.matmul %148, %150, %cst_113 {dimension_numbers = #tpu.dot_dimension_numbers<[1], [0], [0], [1], [0, 0, 1, 1], [], []>} : vector<8x32xbf16>, vector<32x32xbf16>, vector<8x32xf32> -> vector<8x32xf32>
    %c0_114 = arith.constant 0 : index
    %c0_115 = arith.constant 0 : index
    %c0_116 = arith.constant 0 : index
    %152 = vector.load %arg21[%c0_114, %c0_115, %c0_116] : memref<4x8x32xf32, #tpu.memory_space<vmem>>, vector<1x8x32xf32>
    %153 = vector.shape_cast %152 : vector<1x8x32xf32> to vector<8x32xf32>
    %154 = arith.addf %151, %153 : vector<8x32xf32>
    %c1_117 = arith.constant 1 : index
    %c0_118 = arith.constant 0 : index
    %c0_119 = arith.constant 0 : index
    %155 = vector.load %arg19[%c1_117, %c0_118, %c0_119] : memref<3x32x32xbf16, #tpu.memory_space<vmem>>, vector<1x32x32xbf16>
    %156 = vector.shape_cast %155 : vector<1x32x32xbf16> to vector<32x32xbf16>
    %cst_120 = arith.constant dense<0.000000e+00> : vector<8x32xf32>
    %157 = tpu.matmul %148, %156, %cst_120 {dimension_numbers = #tpu.dot_dimension_numbers<[1], [0], [0], [1], [0, 0, 1, 1], [], []>} : vector<8x32xbf16>, vector<32x32xbf16>, vector<8x32xf32> -> vector<8x32xf32>
    %c1_121 = arith.constant 1 : index
    %c0_122 = arith.constant 0 : index
    %c0_123 = arith.constant 0 : index
    %158 = vector.load %arg21[%c1_121, %c0_122, %c0_123] : memref<4x8x32xf32, #tpu.memory_space<vmem>>, vector<1x8x32xf32>
    %159 = vector.shape_cast %158 : vector<1x8x32xf32> to vector<8x32xf32>
    %160 = arith.addf %157, %159 : vector<8x32xf32>
    %c2_124 = arith.constant 2 : index
    %c0_125 = arith.constant 0 : index
    %c0_126 = arith.constant 0 : index
    %161 = vector.load %arg19[%c2_124, %c0_125, %c0_126] : memref<3x32x32xbf16, #tpu.memory_space<vmem>>, vector<1x32x32xbf16>
    %162 = vector.shape_cast %161 : vector<1x32x32xbf16> to vector<32x32xbf16>
    %cst_127 = arith.constant dense<0.000000e+00> : vector<8x32xf32>
    %163 = tpu.matmul %148, %162, %cst_127 {dimension_numbers = #tpu.dot_dimension_numbers<[1], [0], [0], [1], [0, 0, 1, 1], [], []>} : vector<8x32xbf16>, vector<32x32xbf16>, vector<8x32xf32> -> vector<8x32xf32>
    %c2_128 = arith.constant 2 : index
    %c0_129 = arith.constant 0 : index
    %c0_130 = arith.constant 0 : index
    %164 = vector.load %arg21[%c2_128, %c0_129, %c0_130] : memref<4x8x32xf32, #tpu.memory_space<vmem>>, vector<1x8x32xf32>
    %165 = vector.shape_cast %164 : vector<1x8x32xf32> to vector<8x32xf32>
    %166 = arith.addf %163, %165 : vector<8x32xf32>
    %c0_131 = arith.constant 0 : index
    %c0_132 = arith.constant 0 : index
    %167 = vector.load %arg26[%c0_131, %c0_132] : memref<32x128xbf16, #tpu.memory_space<vmem>>, vector<32x128xbf16>
    %cst_133 = arith.constant dense<0.000000e+00> : vector<8x128xf32>
    %168 = tpu.matmul %142, %167, %cst_133 {dimension_numbers = #tpu.dot_dimension_numbers<[1], [0], [0], [1], [0, 0, 1, 1], [], []>} : vector<8x32xbf16>, vector<32x128xbf16>, vector<8x128xf32> -> vector<8x128xf32>
    %c0_134 = arith.constant 0 : index
    %c0_135 = arith.constant 0 : index
    %169 = vector.load %arg27[%c0_134, %c0_135] : memref<32x128xbf16, #tpu.memory_space<vmem>>, vector<32x128xbf16>
    %cst_136 = arith.constant dense<0.000000e+00> : vector<8x128xf32>
    %170 = tpu.matmul %148, %169, %cst_136 {dimension_numbers = #tpu.dot_dimension_numbers<[1], [0], [0], [1], [0, 0, 1, 1], [], []>} : vector<8x32xbf16>, vector<32x128xbf16>, vector<8x128xf32> -> vector<8x128xf32>
    %171 = arith.addf %168, %170 : vector<8x128xf32>
    %c3 = arith.constant 3 : index
    %c0_137 = arith.constant 0 : index
    %c0_138 = arith.constant 0 : index
    %172 = vector.load %arg21[%c3, %c0_137, %c0_138] : memref<4x8x32xf32, #tpu.memory_space<vmem>>, vector<1x8x32xf32>
    %173 = vector.shape_cast %172 : vector<1x8x32xf32> to vector<8x32xf32>
    %c0_139 = arith.constant 0 : index
    %c0_140 = arith.constant 0 : index
    %c0_141 = arith.constant 0 : index
    %174 = vector.load %arg20[%c0_139, %c0_140, %c0_141] : memref<3x32x32xbf16, #tpu.memory_space<vmem>>, vector<1x32x32xbf16>
    %175 = vector.shape_cast %174 : vector<1x32x32xbf16> to vector<32x32xbf16>
    %cst_142 = arith.constant dense<0.000000e+00> : vector<8x32xf32>
    %176 = tpu.matmul %40, %175, %cst_142 {dimension_numbers = #tpu.dot_dimension_numbers<[1], [0], [0], [1], [0, 0, 1, 1], [], []>} : vector<8x32xbf16>, vector<32x32xbf16>, vector<8x32xf32> -> vector<8x32xf32>
    %177 = arith.addf %90, %176 : vector<8x32xf32>
    %178 = arith.negf %177 : vector<8x32xf32>
    %179 = math.exp %178 : vector<8x32xf32>
    %cst_143 = arith.constant 1.000000e+00 : f32
    %180 = vector.broadcast %cst_143 : f32 to vector<8x32xf32>
    %181 = arith.addf %180, %179 : vector<8x32xf32>
    %182 = arith.divf %180, %181 : vector<8x32xf32>
    %c1_144 = arith.constant 1 : index
    %c0_145 = arith.constant 0 : index
    %c0_146 = arith.constant 0 : index
    %183 = vector.load %arg20[%c1_144, %c0_145, %c0_146] : memref<3x32x32xbf16, #tpu.memory_space<vmem>>, vector<1x32x32xbf16>
    %184 = vector.shape_cast %183 : vector<1x32x32xbf16> to vector<32x32xbf16>
    %cst_147 = arith.constant dense<0.000000e+00> : vector<8x32xf32>
    %185 = tpu.matmul %40, %184, %cst_147 {dimension_numbers = #tpu.dot_dimension_numbers<[1], [0], [0], [1], [0, 0, 1, 1], [], []>} : vector<8x32xbf16>, vector<32x32xbf16>, vector<8x32xf32> -> vector<8x32xf32>
    %186 = arith.addf %96, %185 : vector<8x32xf32>
    %187 = arith.negf %186 : vector<8x32xf32>
    %188 = math.exp %187 : vector<8x32xf32>
    %cst_148 = arith.constant 1.000000e+00 : f32
    %189 = vector.broadcast %cst_148 : f32 to vector<8x32xf32>
    %190 = arith.addf %189, %188 : vector<8x32xf32>
    %191 = arith.divf %189, %190 : vector<8x32xf32>
    %c2_149 = arith.constant 2 : index
    %c0_150 = arith.constant 0 : index
    %c0_151 = arith.constant 0 : index
    %192 = vector.load %arg20[%c2_149, %c0_150, %c0_151] : memref<3x32x32xbf16, #tpu.memory_space<vmem>>, vector<1x32x32xbf16>
    %193 = vector.shape_cast %192 : vector<1x32x32xbf16> to vector<32x32xbf16>
    %cst_152 = arith.constant dense<0.000000e+00> : vector<8x32xf32>
    %194 = tpu.matmul %40, %193, %cst_152 {dimension_numbers = #tpu.dot_dimension_numbers<[1], [0], [0], [1], [0, 0, 1, 1], [], []>} : vector<8x32xbf16>, vector<32x32xbf16>, vector<8x32xf32> -> vector<8x32xf32>
    %195 = arith.addf %194, %173 : vector<8x32xf32>
    %196 = arith.mulf %182, %195 : vector<8x32xf32>
    %197 = arith.addf %102, %196 : vector<8x32xf32>
    %198 = math.tanh %197 : vector<8x32xf32>
    %cst_153 = arith.constant 1.000000e+00 : f32
    %199 = vector.broadcast %cst_153 : f32 to vector<8x32xf32>
    %200 = arith.subf %199, %191 : vector<8x32xf32>
    %201 = arith.mulf %200, %198 : vector<8x32xf32>
    %202 = arith.mulf %191, %39 : vector<8x32xf32>
    %203 = arith.addf %201, %202 : vector<8x32xf32>
    %204 = arith.truncf %203 : vector<8x32xf32> to vector<8x32xbf16>
    %c0_154 = arith.constant 0 : index
    %c0_155 = arith.constant 0 : index
    %205 = vector.load %arg9[%c0_154, %c0_155] : memref<32x32xbf16, #tpu.memory_space<vmem>>, vector<32x32xbf16>
    %cst_156 = arith.constant dense<0.000000e+00> : vector<8x32xf32>
    %206 = tpu.matmul %204, %205, %cst_156 {dimension_numbers = #tpu.dot_dimension_numbers<[1], [0], [0], [1], [0, 0, 1, 1], [], []>} : vector<8x32xbf16>, vector<32x32xbf16>, vector<8x32xf32> -> vector<8x32xf32>
    %c0_157 = arith.constant 0 : index
    %c0_158 = arith.constant 0 : index
    %207 = vector.load %arg10[%c0_157, %c0_158] : memref<8x32xf32, #tpu.memory_space<vmem>>, vector<8x32xf32>
    %208 = arith.addf %206, %207 : vector<8x32xf32>
    %209 = math.tanh %208 : vector<8x32xf32>
    %210 = arith.truncf %209 : vector<8x32xf32> to vector<8x32xbf16>
    %c0_159 = arith.constant 0 : index
    %c0_160 = arith.constant 0 : index
    %c0_161 = arith.constant 0 : index
    %211 = vector.load %arg22[%c0_159, %c0_160, %c0_161] : memref<3x32x32xbf16, #tpu.memory_space<vmem>>, vector<1x32x32xbf16>
    %212 = vector.shape_cast %211 : vector<1x32x32xbf16> to vector<32x32xbf16>
    %cst_162 = arith.constant dense<0.000000e+00> : vector<8x32xf32>
    %213 = tpu.matmul %210, %212, %cst_162 {dimension_numbers = #tpu.dot_dimension_numbers<[1], [0], [0], [1], [0, 0, 1, 1], [], []>} : vector<8x32xbf16>, vector<32x32xbf16>, vector<8x32xf32> -> vector<8x32xf32>
    %c0_163 = arith.constant 0 : index
    %c0_164 = arith.constant 0 : index
    %c0_165 = arith.constant 0 : index
    %214 = vector.load %arg24[%c0_163, %c0_164, %c0_165] : memref<4x8x32xf32, #tpu.memory_space<vmem>>, vector<1x8x32xf32>
    %215 = vector.shape_cast %214 : vector<1x8x32xf32> to vector<8x32xf32>
    %216 = arith.addf %213, %215 : vector<8x32xf32>
    %c1_166 = arith.constant 1 : index
    %c0_167 = arith.constant 0 : index
    %c0_168 = arith.constant 0 : index
    %217 = vector.load %arg22[%c1_166, %c0_167, %c0_168] : memref<3x32x32xbf16, #tpu.memory_space<vmem>>, vector<1x32x32xbf16>
    %218 = vector.shape_cast %217 : vector<1x32x32xbf16> to vector<32x32xbf16>
    %cst_169 = arith.constant dense<0.000000e+00> : vector<8x32xf32>
    %219 = tpu.matmul %210, %218, %cst_169 {dimension_numbers = #tpu.dot_dimension_numbers<[1], [0], [0], [1], [0, 0, 1, 1], [], []>} : vector<8x32xbf16>, vector<32x32xbf16>, vector<8x32xf32> -> vector<8x32xf32>
    %c1_170 = arith.constant 1 : index
    %c0_171 = arith.constant 0 : index
    %c0_172 = arith.constant 0 : index
    %220 = vector.load %arg24[%c1_170, %c0_171, %c0_172] : memref<4x8x32xf32, #tpu.memory_space<vmem>>, vector<1x8x32xf32>
    %221 = vector.shape_cast %220 : vector<1x8x32xf32> to vector<8x32xf32>
    %222 = arith.addf %219, %221 : vector<8x32xf32>
    %c2_173 = arith.constant 2 : index
    %c0_174 = arith.constant 0 : index
    %c0_175 = arith.constant 0 : index
    %223 = vector.load %arg22[%c2_173, %c0_174, %c0_175] : memref<3x32x32xbf16, #tpu.memory_space<vmem>>, vector<1x32x32xbf16>
    %224 = vector.shape_cast %223 : vector<1x32x32xbf16> to vector<32x32xbf16>
    %cst_176 = arith.constant dense<0.000000e+00> : vector<8x32xf32>
    %225 = tpu.matmul %210, %224, %cst_176 {dimension_numbers = #tpu.dot_dimension_numbers<[1], [0], [0], [1], [0, 0, 1, 1], [], []>} : vector<8x32xbf16>, vector<32x32xbf16>, vector<8x32xf32> -> vector<8x32xf32>
    %c2_177 = arith.constant 2 : index
    %c0_178 = arith.constant 0 : index
    %c0_179 = arith.constant 0 : index
    %226 = vector.load %arg24[%c2_177, %c0_178, %c0_179] : memref<4x8x32xf32, #tpu.memory_space<vmem>>, vector<1x8x32xf32>
    %227 = vector.shape_cast %226 : vector<1x8x32xf32> to vector<8x32xf32>
    %228 = arith.addf %225, %227 : vector<8x32xf32>
    %c0_180 = arith.constant 0 : index
    %c0_181 = arith.constant 0 : index
    %229 = vector.load %arg28[%c0_180, %c0_181] : memref<32x128xbf16, #tpu.memory_space<vmem>>, vector<32x128xbf16>
    %cst_182 = arith.constant dense<0.000000e+00> : vector<8x128xf32>
    %230 = tpu.matmul %204, %229, %cst_182 {dimension_numbers = #tpu.dot_dimension_numbers<[1], [0], [0], [1], [0, 0, 1, 1], [], []>} : vector<8x32xbf16>, vector<32x128xbf16>, vector<8x128xf32> -> vector<8x128xf32>
    %231 = arith.addf %107, %230 : vector<8x128xf32>
    %c0_183 = arith.constant 0 : index
    %c0_184 = arith.constant 0 : index
    %232 = vector.load %arg29[%c0_183, %c0_184] : memref<32x128xbf16, #tpu.memory_space<vmem>>, vector<32x128xbf16>
    %cst_185 = arith.constant dense<0.000000e+00> : vector<8x128xf32>
    %233 = tpu.matmul %210, %232, %cst_185 {dimension_numbers = #tpu.dot_dimension_numbers<[1], [0], [0], [1], [0, 0, 1, 1], [], []>} : vector<8x32xbf16>, vector<32x128xbf16>, vector<8x128xf32> -> vector<8x128xf32>
    %234 = arith.addf %231, %233 : vector<8x128xf32>
    %235 = vector.extract_strided_slice %15 {offsets = [16, 0], sizes = [8, 32], strides = [1, 1]} : vector<64x32xf32> to vector<8x32xf32>
    %236 = vector.extract_strided_slice %22 {offsets = [16, 0], sizes = [8, 32], strides = [1, 1]} : vector<64x32xf32> to vector<8x32xf32>
    %237 = vector.extract_strided_slice %29 {offsets = [16, 0], sizes = [8, 32], strides = [1, 1]} : vector<64x32xf32> to vector<8x32xf32>
    %c0_186 = arith.constant 0 : index
    %c0_187 = arith.constant 0 : index
    %238 = vector.load %arg18[%c0_186, %c0_187] : memref<8x32xf32, #tpu.memory_space<vmem>>, vector<8x32xf32>
    %c0_188 = arith.constant 0 : index
    %c0_189 = arith.constant 0 : index
    %c0_190 = arith.constant 0 : index
    %239 = vector.load %arg16[%c0_188, %c0_189, %c0_190] : memref<3x32x32xbf16, #tpu.memory_space<vmem>>, vector<1x32x32xbf16>
    %240 = vector.shape_cast %239 : vector<1x32x32xbf16> to vector<32x32xbf16>
    %cst_191 = arith.constant dense<0.000000e+00> : vector<8x32xf32>
    %241 = tpu.matmul %142, %240, %cst_191 {dimension_numbers = #tpu.dot_dimension_numbers<[1], [0], [0], [1], [0, 0, 1, 1], [], []>} : vector<8x32xbf16>, vector<32x32xbf16>, vector<8x32xf32> -> vector<8x32xf32>
    %242 = arith.addf %235, %241 : vector<8x32xf32>
    %243 = arith.negf %242 : vector<8x32xf32>
    %244 = math.exp %243 : vector<8x32xf32>
    %cst_192 = arith.constant 1.000000e+00 : f32
    %245 = vector.broadcast %cst_192 : f32 to vector<8x32xf32>
    %246 = arith.addf %245, %244 : vector<8x32xf32>
    %247 = arith.divf %245, %246 : vector<8x32xf32>
    %c1_193 = arith.constant 1 : index
    %c0_194 = arith.constant 0 : index
    %c0_195 = arith.constant 0 : index
    %248 = vector.load %arg16[%c1_193, %c0_194, %c0_195] : memref<3x32x32xbf16, #tpu.memory_space<vmem>>, vector<1x32x32xbf16>
    %249 = vector.shape_cast %248 : vector<1x32x32xbf16> to vector<32x32xbf16>
    %cst_196 = arith.constant dense<0.000000e+00> : vector<8x32xf32>
    %250 = tpu.matmul %142, %249, %cst_196 {dimension_numbers = #tpu.dot_dimension_numbers<[1], [0], [0], [1], [0, 0, 1, 1], [], []>} : vector<8x32xbf16>, vector<32x32xbf16>, vector<8x32xf32> -> vector<8x32xf32>
    %251 = arith.addf %236, %250 : vector<8x32xf32>
    %252 = arith.negf %251 : vector<8x32xf32>
    %253 = math.exp %252 : vector<8x32xf32>
    %cst_197 = arith.constant 1.000000e+00 : f32
    %254 = vector.broadcast %cst_197 : f32 to vector<8x32xf32>
    %255 = arith.addf %254, %253 : vector<8x32xf32>
    %256 = arith.divf %254, %255 : vector<8x32xf32>
    %c2_198 = arith.constant 2 : index
    %c0_199 = arith.constant 0 : index
    %c0_200 = arith.constant 0 : index
    %257 = vector.load %arg16[%c2_198, %c0_199, %c0_200] : memref<3x32x32xbf16, #tpu.memory_space<vmem>>, vector<1x32x32xbf16>
    %258 = vector.shape_cast %257 : vector<1x32x32xbf16> to vector<32x32xbf16>
    %cst_201 = arith.constant dense<0.000000e+00> : vector<8x32xf32>
    %259 = tpu.matmul %142, %258, %cst_201 {dimension_numbers = #tpu.dot_dimension_numbers<[1], [0], [0], [1], [0, 0, 1, 1], [], []>} : vector<8x32xbf16>, vector<32x32xbf16>, vector<8x32xf32> -> vector<8x32xf32>
    %260 = arith.addf %259, %238 : vector<8x32xf32>
    %261 = arith.mulf %247, %260 : vector<8x32xf32>
    %262 = arith.addf %237, %261 : vector<8x32xf32>
    %263 = math.tanh %262 : vector<8x32xf32>
    %cst_202 = arith.constant 1.000000e+00 : f32
    %264 = vector.broadcast %cst_202 : f32 to vector<8x32xf32>
    %265 = arith.subf %264, %256 : vector<8x32xf32>
    %266 = arith.mulf %265, %263 : vector<8x32xf32>
    %267 = arith.mulf %256, %141 : vector<8x32xf32>
    %268 = arith.addf %266, %267 : vector<8x32xf32>
    %269 = arith.truncf %268 : vector<8x32xf32> to vector<8x32xbf16>
    %c0_203 = arith.constant 0 : index
    %c0_204 = arith.constant 0 : index
    %270 = vector.load %arg7[%c0_203, %c0_204] : memref<32x32xbf16, #tpu.memory_space<vmem>>, vector<32x32xbf16>
    %cst_205 = arith.constant dense<0.000000e+00> : vector<8x32xf32>
    %271 = tpu.matmul %269, %270, %cst_205 {dimension_numbers = #tpu.dot_dimension_numbers<[1], [0], [0], [1], [0, 0, 1, 1], [], []>} : vector<8x32xbf16>, vector<32x32xbf16>, vector<8x32xf32> -> vector<8x32xf32>
    %c0_206 = arith.constant 0 : index
    %c0_207 = arith.constant 0 : index
    %272 = vector.load %arg8[%c0_206, %c0_207] : memref<8x32xf32, #tpu.memory_space<vmem>>, vector<8x32xf32>
    %273 = arith.addf %271, %272 : vector<8x32xf32>
    %274 = math.tanh %273 : vector<8x32xf32>
    %275 = arith.truncf %274 : vector<8x32xf32> to vector<8x32xbf16>
    %c0_208 = arith.constant 0 : index
    %c0_209 = arith.constant 0 : index
    %c0_210 = arith.constant 0 : index
    %276 = vector.load %arg19[%c0_208, %c0_209, %c0_210] : memref<3x32x32xbf16, #tpu.memory_space<vmem>>, vector<1x32x32xbf16>
    %277 = vector.shape_cast %276 : vector<1x32x32xbf16> to vector<32x32xbf16>
    %cst_211 = arith.constant dense<0.000000e+00> : vector<8x32xf32>
    %278 = tpu.matmul %275, %277, %cst_211 {dimension_numbers = #tpu.dot_dimension_numbers<[1], [0], [0], [1], [0, 0, 1, 1], [], []>} : vector<8x32xbf16>, vector<32x32xbf16>, vector<8x32xf32> -> vector<8x32xf32>
    %c0_212 = arith.constant 0 : index
    %c0_213 = arith.constant 0 : index
    %c0_214 = arith.constant 0 : index
    %279 = vector.load %arg21[%c0_212, %c0_213, %c0_214] : memref<4x8x32xf32, #tpu.memory_space<vmem>>, vector<1x8x32xf32>
    %280 = vector.shape_cast %279 : vector<1x8x32xf32> to vector<8x32xf32>
    %281 = arith.addf %278, %280 : vector<8x32xf32>
    %c1_215 = arith.constant 1 : index
    %c0_216 = arith.constant 0 : index
    %c0_217 = arith.constant 0 : index
    %282 = vector.load %arg19[%c1_215, %c0_216, %c0_217] : memref<3x32x32xbf16, #tpu.memory_space<vmem>>, vector<1x32x32xbf16>
    %283 = vector.shape_cast %282 : vector<1x32x32xbf16> to vector<32x32xbf16>
    %cst_218 = arith.constant dense<0.000000e+00> : vector<8x32xf32>
    %284 = tpu.matmul %275, %283, %cst_218 {dimension_numbers = #tpu.dot_dimension_numbers<[1], [0], [0], [1], [0, 0, 1, 1], [], []>} : vector<8x32xbf16>, vector<32x32xbf16>, vector<8x32xf32> -> vector<8x32xf32>
    %c1_219 = arith.constant 1 : index
    %c0_220 = arith.constant 0 : index
    %c0_221 = arith.constant 0 : index
    %285 = vector.load %arg21[%c1_219, %c0_220, %c0_221] : memref<4x8x32xf32, #tpu.memory_space<vmem>>, vector<1x8x32xf32>
    %286 = vector.shape_cast %285 : vector<1x8x32xf32> to vector<8x32xf32>
    %287 = arith.addf %284, %286 : vector<8x32xf32>
    %c2_222 = arith.constant 2 : index
    %c0_223 = arith.constant 0 : index
    %c0_224 = arith.constant 0 : index
    %288 = vector.load %arg19[%c2_222, %c0_223, %c0_224] : memref<3x32x32xbf16, #tpu.memory_space<vmem>>, vector<1x32x32xbf16>
    %289 = vector.shape_cast %288 : vector<1x32x32xbf16> to vector<32x32xbf16>
    %cst_225 = arith.constant dense<0.000000e+00> : vector<8x32xf32>
    %290 = tpu.matmul %275, %289, %cst_225 {dimension_numbers = #tpu.dot_dimension_numbers<[1], [0], [0], [1], [0, 0, 1, 1], [], []>} : vector<8x32xbf16>, vector<32x32xbf16>, vector<8x32xf32> -> vector<8x32xf32>
    %c2_226 = arith.constant 2 : index
    %c0_227 = arith.constant 0 : index
    %c0_228 = arith.constant 0 : index
    %291 = vector.load %arg21[%c2_226, %c0_227, %c0_228] : memref<4x8x32xf32, #tpu.memory_space<vmem>>, vector<1x8x32xf32>
    %292 = vector.shape_cast %291 : vector<1x8x32xf32> to vector<8x32xf32>
    %293 = arith.addf %290, %292 : vector<8x32xf32>
    %c0_229 = arith.constant 0 : index
    %c0_230 = arith.constant 0 : index
    %294 = vector.load %arg26[%c0_229, %c0_230] : memref<32x128xbf16, #tpu.memory_space<vmem>>, vector<32x128xbf16>
    %cst_231 = arith.constant dense<0.000000e+00> : vector<8x128xf32>
    %295 = tpu.matmul %269, %294, %cst_231 {dimension_numbers = #tpu.dot_dimension_numbers<[1], [0], [0], [1], [0, 0, 1, 1], [], []>} : vector<8x32xbf16>, vector<32x128xbf16>, vector<8x128xf32> -> vector<8x128xf32>
    %c0_232 = arith.constant 0 : index
    %c0_233 = arith.constant 0 : index
    %296 = vector.load %arg27[%c0_232, %c0_233] : memref<32x128xbf16, #tpu.memory_space<vmem>>, vector<32x128xbf16>
    %cst_234 = arith.constant dense<0.000000e+00> : vector<8x128xf32>
    %297 = tpu.matmul %275, %296, %cst_234 {dimension_numbers = #tpu.dot_dimension_numbers<[1], [0], [0], [1], [0, 0, 1, 1], [], []>} : vector<8x32xbf16>, vector<32x128xbf16>, vector<8x128xf32> -> vector<8x128xf32>
    %298 = arith.addf %295, %297 : vector<8x128xf32>
    %c3_235 = arith.constant 3 : index
    %c0_236 = arith.constant 0 : index
    %c0_237 = arith.constant 0 : index
    %299 = vector.load %arg21[%c3_235, %c0_236, %c0_237] : memref<4x8x32xf32, #tpu.memory_space<vmem>>, vector<1x8x32xf32>
    %300 = vector.shape_cast %299 : vector<1x8x32xf32> to vector<8x32xf32>
    %c0_238 = arith.constant 0 : index
    %c0_239 = arith.constant 0 : index
    %c0_240 = arith.constant 0 : index
    %301 = vector.load %arg20[%c0_238, %c0_239, %c0_240] : memref<3x32x32xbf16, #tpu.memory_space<vmem>>, vector<1x32x32xbf16>
    %302 = vector.shape_cast %301 : vector<1x32x32xbf16> to vector<32x32xbf16>
    %cst_241 = arith.constant dense<0.000000e+00> : vector<8x32xf32>
    %303 = tpu.matmul %204, %302, %cst_241 {dimension_numbers = #tpu.dot_dimension_numbers<[1], [0], [0], [1], [0, 0, 1, 1], [], []>} : vector<8x32xbf16>, vector<32x32xbf16>, vector<8x32xf32> -> vector<8x32xf32>
    %304 = arith.addf %154, %303 : vector<8x32xf32>
    %305 = arith.negf %304 : vector<8x32xf32>
    %306 = math.exp %305 : vector<8x32xf32>
    %cst_242 = arith.constant 1.000000e+00 : f32
    %307 = vector.broadcast %cst_242 : f32 to vector<8x32xf32>
    %308 = arith.addf %307, %306 : vector<8x32xf32>
    %309 = arith.divf %307, %308 : vector<8x32xf32>
    %c1_243 = arith.constant 1 : index
    %c0_244 = arith.constant 0 : index
    %c0_245 = arith.constant 0 : index
    %310 = vector.load %arg20[%c1_243, %c0_244, %c0_245] : memref<3x32x32xbf16, #tpu.memory_space<vmem>>, vector<1x32x32xbf16>
    %311 = vector.shape_cast %310 : vector<1x32x32xbf16> to vector<32x32xbf16>
    %cst_246 = arith.constant dense<0.000000e+00> : vector<8x32xf32>
    %312 = tpu.matmul %204, %311, %cst_246 {dimension_numbers = #tpu.dot_dimension_numbers<[1], [0], [0], [1], [0, 0, 1, 1], [], []>} : vector<8x32xbf16>, vector<32x32xbf16>, vector<8x32xf32> -> vector<8x32xf32>
    %313 = arith.addf %160, %312 : vector<8x32xf32>
    %314 = arith.negf %313 : vector<8x32xf32>
    %315 = math.exp %314 : vector<8x32xf32>
    %cst_247 = arith.constant 1.000000e+00 : f32
    %316 = vector.broadcast %cst_247 : f32 to vector<8x32xf32>
    %317 = arith.addf %316, %315 : vector<8x32xf32>
    %318 = arith.divf %316, %317 : vector<8x32xf32>
    %c2_248 = arith.constant 2 : index
    %c0_249 = arith.constant 0 : index
    %c0_250 = arith.constant 0 : index
    %319 = vector.load %arg20[%c2_248, %c0_249, %c0_250] : memref<3x32x32xbf16, #tpu.memory_space<vmem>>, vector<1x32x32xbf16>
    %320 = vector.shape_cast %319 : vector<1x32x32xbf16> to vector<32x32xbf16>
    %cst_251 = arith.constant dense<0.000000e+00> : vector<8x32xf32>
    %321 = tpu.matmul %204, %320, %cst_251 {dimension_numbers = #tpu.dot_dimension_numbers<[1], [0], [0], [1], [0, 0, 1, 1], [], []>} : vector<8x32xbf16>, vector<32x32xbf16>, vector<8x32xf32> -> vector<8x32xf32>
    %322 = arith.addf %321, %300 : vector<8x32xf32>
    %323 = arith.mulf %309, %322 : vector<8x32xf32>
    %324 = arith.addf %166, %323 : vector<8x32xf32>
    %325 = math.tanh %324 : vector<8x32xf32>
    %cst_252 = arith.constant 1.000000e+00 : f32
    %326 = vector.broadcast %cst_252 : f32 to vector<8x32xf32>
    %327 = arith.subf %326, %318 : vector<8x32xf32>
    %328 = arith.mulf %327, %325 : vector<8x32xf32>
    %329 = arith.mulf %318, %203 : vector<8x32xf32>
    %330 = arith.addf %328, %329 : vector<8x32xf32>
    %331 = arith.truncf %330 : vector<8x32xf32> to vector<8x32xbf16>
    %c0_253 = arith.constant 0 : index
    %c0_254 = arith.constant 0 : index
    %332 = vector.load %arg9[%c0_253, %c0_254] : memref<32x32xbf16, #tpu.memory_space<vmem>>, vector<32x32xbf16>
    %cst_255 = arith.constant dense<0.000000e+00> : vector<8x32xf32>
    %333 = tpu.matmul %331, %332, %cst_255 {dimension_numbers = #tpu.dot_dimension_numbers<[1], [0], [0], [1], [0, 0, 1, 1], [], []>} : vector<8x32xbf16>, vector<32x32xbf16>, vector<8x32xf32> -> vector<8x32xf32>
    %c0_256 = arith.constant 0 : index
    %c0_257 = arith.constant 0 : index
    %334 = vector.load %arg10[%c0_256, %c0_257] : memref<8x32xf32, #tpu.memory_space<vmem>>, vector<8x32xf32>
    %335 = arith.addf %333, %334 : vector<8x32xf32>
    %336 = math.tanh %335 : vector<8x32xf32>
    %337 = arith.truncf %336 : vector<8x32xf32> to vector<8x32xbf16>
    %c0_258 = arith.constant 0 : index
    %c0_259 = arith.constant 0 : index
    %c0_260 = arith.constant 0 : index
    %338 = vector.load %arg22[%c0_258, %c0_259, %c0_260] : memref<3x32x32xbf16, #tpu.memory_space<vmem>>, vector<1x32x32xbf16>
    %339 = vector.shape_cast %338 : vector<1x32x32xbf16> to vector<32x32xbf16>
    %cst_261 = arith.constant dense<0.000000e+00> : vector<8x32xf32>
    %340 = tpu.matmul %337, %339, %cst_261 {dimension_numbers = #tpu.dot_dimension_numbers<[1], [0], [0], [1], [0, 0, 1, 1], [], []>} : vector<8x32xbf16>, vector<32x32xbf16>, vector<8x32xf32> -> vector<8x32xf32>
    %c0_262 = arith.constant 0 : index
    %c0_263 = arith.constant 0 : index
    %c0_264 = arith.constant 0 : index
    %341 = vector.load %arg24[%c0_262, %c0_263, %c0_264] : memref<4x8x32xf32, #tpu.memory_space<vmem>>, vector<1x8x32xf32>
    %342 = vector.shape_cast %341 : vector<1x8x32xf32> to vector<8x32xf32>
    %343 = arith.addf %340, %342 : vector<8x32xf32>
    %c1_265 = arith.constant 1 : index
    %c0_266 = arith.constant 0 : index
    %c0_267 = arith.constant 0 : index
    %344 = vector.load %arg22[%c1_265, %c0_266, %c0_267] : memref<3x32x32xbf16, #tpu.memory_space<vmem>>, vector<1x32x32xbf16>
    %345 = vector.shape_cast %344 : vector<1x32x32xbf16> to vector<32x32xbf16>
    %cst_268 = arith.constant dense<0.000000e+00> : vector<8x32xf32>
    %346 = tpu.matmul %337, %345, %cst_268 {dimension_numbers = #tpu.dot_dimension_numbers<[1], [0], [0], [1], [0, 0, 1, 1], [], []>} : vector<8x32xbf16>, vector<32x32xbf16>, vector<8x32xf32> -> vector<8x32xf32>
    %c1_269 = arith.constant 1 : index
    %c0_270 = arith.constant 0 : index
    %c0_271 = arith.constant 0 : index
    %347 = vector.load %arg24[%c1_269, %c0_270, %c0_271] : memref<4x8x32xf32, #tpu.memory_space<vmem>>, vector<1x8x32xf32>
    %348 = vector.shape_cast %347 : vector<1x8x32xf32> to vector<8x32xf32>
    %349 = arith.addf %346, %348 : vector<8x32xf32>
    %c2_272 = arith.constant 2 : index
    %c0_273 = arith.constant 0 : index
    %c0_274 = arith.constant 0 : index
    %350 = vector.load %arg22[%c2_272, %c0_273, %c0_274] : memref<3x32x32xbf16, #tpu.memory_space<vmem>>, vector<1x32x32xbf16>
    %351 = vector.shape_cast %350 : vector<1x32x32xbf16> to vector<32x32xbf16>
    %cst_275 = arith.constant dense<0.000000e+00> : vector<8x32xf32>
    %352 = tpu.matmul %337, %351, %cst_275 {dimension_numbers = #tpu.dot_dimension_numbers<[1], [0], [0], [1], [0, 0, 1, 1], [], []>} : vector<8x32xbf16>, vector<32x32xbf16>, vector<8x32xf32> -> vector<8x32xf32>
    %c2_276 = arith.constant 2 : index
    %c0_277 = arith.constant 0 : index
    %c0_278 = arith.constant 0 : index
    %353 = vector.load %arg24[%c2_276, %c0_277, %c0_278] : memref<4x8x32xf32, #tpu.memory_space<vmem>>, vector<1x8x32xf32>
    %354 = vector.shape_cast %353 : vector<1x8x32xf32> to vector<8x32xf32>
    %355 = arith.addf %352, %354 : vector<8x32xf32>
    %c0_279 = arith.constant 0 : index
    %c0_280 = arith.constant 0 : index
    %356 = vector.load %arg28[%c0_279, %c0_280] : memref<32x128xbf16, #tpu.memory_space<vmem>>, vector<32x128xbf16>
    %cst_281 = arith.constant dense<0.000000e+00> : vector<8x128xf32>
    %357 = tpu.matmul %331, %356, %cst_281 {dimension_numbers = #tpu.dot_dimension_numbers<[1], [0], [0], [1], [0, 0, 1, 1], [], []>} : vector<8x32xbf16>, vector<32x128xbf16>, vector<8x128xf32> -> vector<8x128xf32>
    %358 = arith.addf %171, %357 : vector<8x128xf32>
    %c0_282 = arith.constant 0 : index
    %c0_283 = arith.constant 0 : index
    %359 = vector.load %arg29[%c0_282, %c0_283] : memref<32x128xbf16, #tpu.memory_space<vmem>>, vector<32x128xbf16>
    %cst_284 = arith.constant dense<0.000000e+00> : vector<8x128xf32>
    %360 = tpu.matmul %337, %359, %cst_284 {dimension_numbers = #tpu.dot_dimension_numbers<[1], [0], [0], [1], [0, 0, 1, 1], [], []>} : vector<8x32xbf16>, vector<32x128xbf16>, vector<8x128xf32> -> vector<8x128xf32>
    %361 = arith.addf %358, %360 : vector<8x128xf32>
    %c3_285 = arith.constant 3 : index
    %c0_286 = arith.constant 0 : index
    %c0_287 = arith.constant 0 : index
    %362 = vector.load %arg24[%c3_285, %c0_286, %c0_287] : memref<4x8x32xf32, #tpu.memory_space<vmem>>, vector<1x8x32xf32>
    %363 = vector.shape_cast %362 : vector<1x8x32xf32> to vector<8x32xf32>
    %c0_288 = arith.constant 0 : index
    %c0_289 = arith.constant 0 : index
    %c0_290 = arith.constant 0 : index
    %364 = vector.load %arg23[%c0_288, %c0_289, %c0_290] : memref<3x32x32xbf16, #tpu.memory_space<vmem>>, vector<1x32x32xbf16>
    %365 = vector.shape_cast %364 : vector<1x32x32xbf16> to vector<32x32xbf16>
    %cst_291 = arith.constant dense<0.000000e+00> : vector<8x32xf32>
    %366 = tpu.matmul %43, %365, %cst_291 {dimension_numbers = #tpu.dot_dimension_numbers<[1], [0], [0], [1], [0, 0, 1, 1], [], []>} : vector<8x32xbf16>, vector<32x32xbf16>, vector<8x32xf32> -> vector<8x32xf32>
    %367 = arith.addf %216, %366 : vector<8x32xf32>
    %368 = arith.negf %367 : vector<8x32xf32>
    %369 = math.exp %368 : vector<8x32xf32>
    %cst_292 = arith.constant 1.000000e+00 : f32
    %370 = vector.broadcast %cst_292 : f32 to vector<8x32xf32>
    %371 = arith.addf %370, %369 : vector<8x32xf32>
    %372 = arith.divf %370, %371 : vector<8x32xf32>
    %c1_293 = arith.constant 1 : index
    %c0_294 = arith.constant 0 : index
    %c0_295 = arith.constant 0 : index
    %373 = vector.load %arg23[%c1_293, %c0_294, %c0_295] : memref<3x32x32xbf16, #tpu.memory_space<vmem>>, vector<1x32x32xbf16>
    %374 = vector.shape_cast %373 : vector<1x32x32xbf16> to vector<32x32xbf16>
    %cst_296 = arith.constant dense<0.000000e+00> : vector<8x32xf32>
    %375 = tpu.matmul %43, %374, %cst_296 {dimension_numbers = #tpu.dot_dimension_numbers<[1], [0], [0], [1], [0, 0, 1, 1], [], []>} : vector<8x32xbf16>, vector<32x32xbf16>, vector<8x32xf32> -> vector<8x32xf32>
    %376 = arith.addf %222, %375 : vector<8x32xf32>
    %377 = arith.negf %376 : vector<8x32xf32>
    %378 = math.exp %377 : vector<8x32xf32>
    %cst_297 = arith.constant 1.000000e+00 : f32
    %379 = vector.broadcast %cst_297 : f32 to vector<8x32xf32>
    %380 = arith.addf %379, %378 : vector<8x32xf32>
    %381 = arith.divf %379, %380 : vector<8x32xf32>
    %c2_298 = arith.constant 2 : index
    %c0_299 = arith.constant 0 : index
    %c0_300 = arith.constant 0 : index
    %382 = vector.load %arg23[%c2_298, %c0_299, %c0_300] : memref<3x32x32xbf16, #tpu.memory_space<vmem>>, vector<1x32x32xbf16>
    %383 = vector.shape_cast %382 : vector<1x32x32xbf16> to vector<32x32xbf16>
    %cst_301 = arith.constant dense<0.000000e+00> : vector<8x32xf32>
    %384 = tpu.matmul %43, %383, %cst_301 {dimension_numbers = #tpu.dot_dimension_numbers<[1], [0], [0], [1], [0, 0, 1, 1], [], []>} : vector<8x32xbf16>, vector<32x32xbf16>, vector<8x32xf32> -> vector<8x32xf32>
    %385 = arith.addf %384, %363 : vector<8x32xf32>
    %386 = arith.mulf %372, %385 : vector<8x32xf32>
    %387 = arith.addf %228, %386 : vector<8x32xf32>
    %388 = math.tanh %387 : vector<8x32xf32>
    %cst_302 = arith.constant 1.000000e+00 : f32
    %389 = vector.broadcast %cst_302 : f32 to vector<8x32xf32>
    %390 = arith.subf %389, %381 : vector<8x32xf32>
    %391 = arith.mulf %390, %388 : vector<8x32xf32>
    %392 = arith.mulf %381, %42 : vector<8x32xf32>
    %393 = arith.addf %391, %392 : vector<8x32xf32>
    %394 = arith.truncf %393 : vector<8x32xf32> to vector<8x32xbf16>
    %c0_303 = arith.constant 0 : index
    %c0_304 = arith.constant 0 : index
    %395 = vector.load %arg11[%c0_303, %c0_304] : memref<32x32xbf16, #tpu.memory_space<vmem>>, vector<32x32xbf16>
    %cst_305 = arith.constant dense<0.000000e+00> : vector<8x32xf32>
    %396 = tpu.matmul %394, %395, %cst_305 {dimension_numbers = #tpu.dot_dimension_numbers<[1], [0], [0], [1], [0, 0, 1, 1], [], []>} : vector<8x32xbf16>, vector<32x32xbf16>, vector<8x32xf32> -> vector<8x32xf32>
    %c0_306 = arith.constant 0 : index
    %c0_307 = arith.constant 0 : index
    %397 = vector.load %arg12[%c0_306, %c0_307] : memref<8x32xf32, #tpu.memory_space<vmem>>, vector<8x32xf32>
    %398 = arith.addf %396, %397 : vector<8x32xf32>
    %399 = math.tanh %398 : vector<8x32xf32>
    %400 = arith.truncf %399 : vector<8x32xf32> to vector<8x32xbf16>
    %c0_308 = arith.constant 0 : index
    %c0_309 = arith.constant 0 : index
    %401 = vector.load %arg13[%c0_308, %c0_309] : memref<32x32xbf16, #tpu.memory_space<vmem>>, vector<32x32xbf16>
    %cst_310 = arith.constant dense<0.000000e+00> : vector<8x32xf32>
    %402 = tpu.matmul %400, %401, %cst_310 {dimension_numbers = #tpu.dot_dimension_numbers<[1], [0], [0], [1], [0, 0, 1, 1], [], []>} : vector<8x32xbf16>, vector<32x32xbf16>, vector<8x32xf32> -> vector<8x32xf32>
    %c0_311 = arith.constant 0 : index
    %c0_312 = arith.constant 0 : index
    %403 = vector.load %arg14[%c0_311, %c0_312] : memref<8x32xf32, #tpu.memory_space<vmem>>, vector<8x32xf32>
    %404 = arith.addf %402, %403 : vector<8x32xf32>
    %405 = math.tanh %404 : vector<8x32xf32>
    %c0_313 = arith.constant 0 : index
    %c0_314 = arith.constant 0 : index
    %406 = vector.load %arg30[%c0_313, %c0_314] : memref<32x128xbf16, #tpu.memory_space<vmem>>, vector<32x128xbf16>
    %cst_315 = arith.constant dense<0.000000e+00> : vector<8x128xf32>
    %407 = tpu.matmul %394, %406, %cst_315 {dimension_numbers = #tpu.dot_dimension_numbers<[1], [0], [0], [1], [0, 0, 1, 1], [], []>} : vector<8x32xbf16>, vector<32x128xbf16>, vector<8x128xf32> -> vector<8x128xf32>
    %c0_316 = arith.constant 0 : index
    %c0_317 = arith.constant 0 : index
    %408 = vector.load %arg31[%c0_316, %c0_317] : memref<32x128xbf16, #tpu.memory_space<vmem>>, vector<32x128xbf16>
    %cst_318 = arith.constant dense<0.000000e+00> : vector<8x128xf32>
    %409 = tpu.matmul %400, %408, %cst_318 {dimension_numbers = #tpu.dot_dimension_numbers<[1], [0], [0], [1], [0, 0, 1, 1], [], []>} : vector<8x32xbf16>, vector<32x128xbf16>, vector<8x128xf32> -> vector<8x128xf32>
    %410 = arith.addf %407, %409 : vector<8x128xf32>
    %411 = arith.truncf %405 : vector<8x32xf32> to vector<8x32xbf16>
    %c0_319 = arith.constant 0 : index
    %c0_320 = arith.constant 0 : index
    %412 = vector.load %arg32[%c0_319, %c0_320] : memref<32x128xbf16, #tpu.memory_space<vmem>>, vector<32x128xbf16>
    %cst_321 = arith.constant dense<0.000000e+00> : vector<8x128xf32>
    %413 = tpu.matmul %411, %412, %cst_321 {dimension_numbers = #tpu.dot_dimension_numbers<[1], [0], [0], [1], [0, 0, 1, 1], [], []>} : vector<8x32xbf16>, vector<32x128xbf16>, vector<8x128xf32> -> vector<8x128xf32>
    %414 = arith.addf %410, %413 : vector<8x128xf32>
    %415 = vector.extract_strided_slice %34 {offsets = [0, 0], sizes = [8, 128], strides = [1, 1]} : vector<64x128xf32> to vector<8x128xf32>
    %416 = arith.addf %415, %234 : vector<8x128xf32>
    %417 = arith.addf %416, %414 : vector<8x128xf32>
    %c0_322 = arith.constant 0 : index
    %c0_323 = arith.constant 0 : index
    %c0_324 = arith.constant 0 : index
    %418 = vector.load %arg34[%c0_322, %c0_323, %c0_324] : memref<1x64x128xf32, #tpu.memory_space<vmem>>, vector<1x8x128xf32>
    %419 = vector.shape_cast %418 : vector<1x8x128xf32> to vector<8x128xf32>
    %420 = vector.shape_cast %417 : vector<8x128xf32> to vector<1x8x128xf32>
    tpu.vector_store %arg34[%c0_322, %c0_323, %c0_324], %420 {strides = array<i32>} : memref<1x64x128xf32, #tpu.memory_space<vmem>>, vector<1x8x128xf32>,
    %421 = vector.extract_strided_slice %15 {offsets = [24, 0], sizes = [8, 32], strides = [1, 1]} : vector<64x32xf32> to vector<8x32xf32>
    %422 = vector.extract_strided_slice %22 {offsets = [24, 0], sizes = [8, 32], strides = [1, 1]} : vector<64x32xf32> to vector<8x32xf32>
    %423 = vector.extract_strided_slice %29 {offsets = [24, 0], sizes = [8, 32], strides = [1, 1]} : vector<64x32xf32> to vector<8x32xf32>
    %c0_325 = arith.constant 0 : index
    %c0_326 = arith.constant 0 : index
    %424 = vector.load %arg18[%c0_325, %c0_326] : memref<8x32xf32, #tpu.memory_space<vmem>>, vector<8x32xf32>
    %c0_327 = arith.constant 0 : index
    %c0_328 = arith.constant 0 : index
    %c0_329 = arith.constant 0 : index
    %425 = vector.load %arg16[%c0_327, %c0_328, %c0_329] : memref<3x32x32xbf16, #tpu.memory_space<vmem>>, vector<1x32x32xbf16>
    %426 = vector.shape_cast %425 : vector<1x32x32xbf16> to vector<32x32xbf16>
    %cst_330 = arith.constant dense<0.000000e+00> : vector<8x32xf32>
    %427 = tpu.matmul %269, %426, %cst_330 {dimension_numbers = #tpu.dot_dimension_numbers<[1], [0], [0], [1], [0, 0, 1, 1], [], []>} : vector<8x32xbf16>, vector<32x32xbf16>, vector<8x32xf32> -> vector<8x32xf32>
    %428 = arith.addf %421, %427 : vector<8x32xf32>
    %429 = arith.negf %428 : vector<8x32xf32>
    %430 = math.exp %429 : vector<8x32xf32>
    %cst_331 = arith.constant 1.000000e+00 : f32
    %431 = vector.broadcast %cst_331 : f32 to vector<8x32xf32>
    %432 = arith.addf %431, %430 : vector<8x32xf32>
    %433 = arith.divf %431, %432 : vector<8x32xf32>
    %c1_332 = arith.constant 1 : index
    %c0_333 = arith.constant 0 : index
    %c0_334 = arith.constant 0 : index
    %434 = vector.load %arg16[%c1_332, %c0_333, %c0_334] : memref<3x32x32xbf16, #tpu.memory_space<vmem>>, vector<1x32x32xbf16>
    %435 = vector.shape_cast %434 : vector<1x32x32xbf16> to vector<32x32xbf16>
    %cst_335 = arith.constant dense<0.000000e+00> : vector<8x32xf32>
    %436 = tpu.matmul %269, %435, %cst_335 {dimension_numbers = #tpu.dot_dimension_numbers<[1], [0], [0], [1], [0, 0, 1, 1], [], []>} : vector<8x32xbf16>, vector<32x32xbf16>, vector<8x32xf32> -> vector<8x32xf32>
    %437 = arith.addf %422, %436 : vector<8x32xf32>
    %438 = arith.negf %437 : vector<8x32xf32>
    %439 = math.exp %438 : vector<8x32xf32>
    %cst_336 = arith.constant 1.000000e+00 : f32
    %440 = vector.broadcast %cst_336 : f32 to vector<8x32xf32>
    %441 = arith.addf %440, %439 : vector<8x32xf32>
    %442 = arith.divf %440, %441 : vector<8x32xf32>
    %c2_337 = arith.constant 2 : index
    %c0_338 = arith.constant 0 : index
    %c0_339 = arith.constant 0 : index
    %443 = vector.load %arg16[%c2_337, %c0_338, %c0_339] : memref<3x32x32xbf16, #tpu.memory_space<vmem>>, vector<1x32x32xbf16>
    %444 = vector.shape_cast %443 : vector<1x32x32xbf16> to vector<32x32xbf16>
    %cst_340 = arith.constant dense<0.000000e+00> : vector<8x32xf32>
    %445 = tpu.matmul %269, %444, %cst_340 {dimension_numbers = #tpu.dot_dimension_numbers<[1], [0], [0], [1], [0, 0, 1, 1], [], []>} : vector<8x32xbf16>, vector<32x32xbf16>, vector<8x32xf32> -> vector<8x32xf32>
    %446 = arith.addf %445, %424 : vector<8x32xf32>
    %447 = arith.mulf %433, %446 : vector<8x32xf32>
    %448 = arith.addf %423, %447 : vector<8x32xf32>
    %449 = math.tanh %448 : vector<8x32xf32>
    %cst_341 = arith.constant 1.000000e+00 : f32
    %450 = vector.broadcast %cst_341 : f32 to vector<8x32xf32>
    %451 = arith.subf %450, %442 : vector<8x32xf32>
    %452 = arith.mulf %451, %449 : vector<8x32xf32>
    %453 = arith.mulf %442, %268 : vector<8x32xf32>
    %454 = arith.addf %452, %453 : vector<8x32xf32>
    %455 = arith.truncf %454 : vector<8x32xf32> to vector<8x32xbf16>
    %c0_342 = arith.constant 0 : index
    %c0_343 = arith.constant 0 : index
    %456 = vector.load %arg7[%c0_342, %c0_343] : memref<32x32xbf16, #tpu.memory_space<vmem>>, vector<32x32xbf16>
    %cst_344 = arith.constant dense<0.000000e+00> : vector<8x32xf32>
    %457 = tpu.matmul %455, %456, %cst_344 {dimension_numbers = #tpu.dot_dimension_numbers<[1], [0], [0], [1], [0, 0, 1, 1], [], []>} : vector<8x32xbf16>, vector<32x32xbf16>, vector<8x32xf32> -> vector<8x32xf32>
    %c0_345 = arith.constant 0 : index
    %c0_346 = arith.constant 0 : index
    %458 = vector.load %arg8[%c0_345, %c0_346] : memref<8x32xf32, #tpu.memory_space<vmem>>, vector<8x32xf32>
    %459 = arith.addf %457, %458 : vector<8x32xf32>
    %460 = math.tanh %459 : vector<8x32xf32>
    %461 = arith.truncf %460 : vector<8x32xf32> to vector<8x32xbf16>
    %c0_347 = arith.constant 0 : index
    %c0_348 = arith.constant 0 : index
    %c0_349 = arith.constant 0 : index
    %462 = vector.load %arg19[%c0_347, %c0_348, %c0_349] : memref<3x32x32xbf16, #tpu.memory_space<vmem>>, vector<1x32x32xbf16>
    %463 = vector.shape_cast %462 : vector<1x32x32xbf16> to vector<32x32xbf16>
    %cst_350 = arith.constant dense<0.000000e+00> : vector<8x32xf32>
    %464 = tpu.matmul %461, %463, %cst_350 {dimension_numbers = #tpu.dot_dimension_numbers<[1], [0], [0], [1], [0, 0, 1, 1], [], []>} : vector<8x32xbf16>, vector<32x32xbf16>, vector<8x32xf32> -> vector<8x32xf32>
    %c0_351 = arith.constant 0 : index
    %c0_352 = arith.constant 0 : index
    %c0_353 = arith.constant 0 : index
    %465 = vector.load %arg21[%c0_351, %c0_352, %c0_353] : memref<4x8x32xf32, #tpu.memory_space<vmem>>, vector<1x8x32xf32>
    %466 = vector.shape_cast %465 : vector<1x8x32xf32> to vector<8x32xf32>
    %467 = arith.addf %464, %466 : vector<8x32xf32>
    %c1_354 = arith.constant 1 : index
    %c0_355 = arith.constant 0 : index
    %c0_356 = arith.constant 0 : index
    %468 = vector.load %arg19[%c1_354, %c0_355, %c0_356] : memref<3x32x32xbf16, #tpu.memory_space<vmem>>, vector<1x32x32xbf16>
    %469 = vector.shape_cast %468 : vector<1x32x32xbf16> to vector<32x32xbf16>
    %cst_357 = arith.constant dense<0.000000e+00> : vector<8x32xf32>
    %470 = tpu.matmul %461, %469, %cst_357 {dimension_numbers = #tpu.dot_dimension_numbers<[1], [0], [0], [1], [0, 0, 1, 1], [], []>} : vector<8x32xbf16>, vector<32x32xbf16>, vector<8x32xf32> -> vector<8x32xf32>
    %c1_358 = arith.constant 1 : index
    %c0_359 = arith.constant 0 : index
    %c0_360 = arith.constant 0 : index
    %471 = vector.load %arg21[%c1_358, %c0_359, %c0_360] : memref<4x8x32xf32, #tpu.memory_space<vmem>>, vector<1x8x32xf32>
    %472 = vector.shape_cast %471 : vector<1x8x32xf32> to vector<8x32xf32>
    %473 = arith.addf %470, %472 : vector<8x32xf32>
    %c2_361 = arith.constant 2 : index
    %c0_362 = arith.constant 0 : index
    %c0_363 = arith.constant 0 : index
    %474 = vector.load %arg19[%c2_361, %c0_362, %c0_363] : memref<3x32x32xbf16, #tpu.memory_space<vmem>>, vector<1x32x32xbf16>
    %475 = vector.shape_cast %474 : vector<1x32x32xbf16> to vector<32x32xbf16>
    %cst_364 = arith.constant dense<0.000000e+00> : vector<8x32xf32>
    %476 = tpu.matmul %461, %475, %cst_364 {dimension_numbers = #tpu.dot_dimension_numbers<[1], [0], [0], [1], [0, 0, 1, 1], [], []>} : vector<8x32xbf16>, vector<32x32xbf16>, vector<8x32xf32> -> vector<8x32xf32>
    %c2_365 = arith.constant 2 : index
    %c0_366 = arith.constant 0 : index
    %c0_367 = arith.constant 0 : index
    %477 = vector.load %arg21[%c2_365, %c0_366, %c0_367] : memref<4x8x32xf32, #tpu.memory_space<vmem>>, vector<1x8x32xf32>
    %478 = vector.shape_cast %477 : vector<1x8x32xf32> to vector<8x32xf32>
    %479 = arith.addf %476, %478 : vector<8x32xf32>
    %c0_368 = arith.constant 0 : index
    %c0_369 = arith.constant 0 : index
    %480 = vector.load %arg26[%c0_368, %c0_369] : memref<32x128xbf16, #tpu.memory_space<vmem>>, vector<32x128xbf16>
    %cst_370 = arith.constant dense<0.000000e+00> : vector<8x128xf32>
    %481 = tpu.matmul %455, %480, %cst_370 {dimension_numbers = #tpu.dot_dimension_numbers<[1], [0], [0], [1], [0, 0, 1, 1], [], []>} : vector<8x32xbf16>, vector<32x128xbf16>, vector<8x128xf32> -> vector<8x128xf32>
    %c0_371 = arith.constant 0 : index
    %c0_372 = arith.constant 0 : index
    %482 = vector.load %arg27[%c0_371, %c0_372] : memref<32x128xbf16, #tpu.memory_space<vmem>>, vector<32x128xbf16>
    %cst_373 = arith.constant dense<0.000000e+00> : vector<8x128xf32>
    %483 = tpu.matmul %461, %482, %cst_373 {dimension_numbers = #tpu.dot_dimension_numbers<[1], [0], [0], [1], [0, 0, 1, 1], [], []>} : vector<8x32xbf16>, vector<32x128xbf16>, vector<8x128xf32> -> vector<8x128xf32>
    %484 = arith.addf %481, %483 : vector<8x128xf32>
    %c3_374 = arith.constant 3 : index
    %c0_375 = arith.constant 0 : index
    %c0_376 = arith.constant 0 : index
    %485 = vector.load %arg21[%c3_374, %c0_375, %c0_376] : memref<4x8x32xf32, #tpu.memory_space<vmem>>, vector<1x8x32xf32>
    %486 = vector.shape_cast %485 : vector<1x8x32xf32> to vector<8x32xf32>
    %c0_377 = arith.constant 0 : index
    %c0_378 = arith.constant 0 : index
    %c0_379 = arith.constant 0 : index
    %487 = vector.load %arg20[%c0_377, %c0_378, %c0_379] : memref<3x32x32xbf16, #tpu.memory_space<vmem>>, vector<1x32x32xbf16>
    %488 = vector.shape_cast %487 : vector<1x32x32xbf16> to vector<32x32xbf16>
    %cst_380 = arith.constant dense<0.000000e+00> : vector<8x32xf32>
    %489 = tpu.matmul %331, %488, %cst_380 {dimension_numbers = #tpu.dot_dimension_numbers<[1], [0], [0], [1], [0, 0, 1, 1], [], []>} : vector<8x32xbf16>, vector<32x32xbf16>, vector<8x32xf32> -> vector<8x32xf32>
    %490 = arith.addf %281, %489 : vector<8x32xf32>
    %491 = arith.negf %490 : vector<8x32xf32>
    %492 = math.exp %491 : vector<8x32xf32>
    %cst_381 = arith.constant 1.000000e+00 : f32
    %493 = vector.broadcast %cst_381 : f32 to vector<8x32xf32>
    %494 = arith.addf %493, %492 : vector<8x32xf32>
    %495 = arith.divf %493, %494 : vector<8x32xf32>
    %c1_382 = arith.constant 1 : index
    %c0_383 = arith.constant 0 : index
    %c0_384 = arith.constant 0 : index
    %496 = vector.load %arg20[%c1_382, %c0_383, %c0_384] : memref<3x32x32xbf16, #tpu.memory_space<vmem>>, vector<1x32x32xbf16>
    %497 = vector.shape_cast %496 : vector<1x32x32xbf16> to vector<32x32xbf16>
    %cst_385 = arith.constant dense<0.000000e+00> : vector<8x32xf32>
    %498 = tpu.matmul %331, %497, %cst_385 {dimension_numbers = #tpu.dot_dimension_numbers<[1], [0], [0], [1], [0, 0, 1, 1], [], []>} : vector<8x32xbf16>, vector<32x32xbf16>, vector<8x32xf32> -> vector<8x32xf32>
    %499 = arith.addf %287, %498 : vector<8x32xf32>
    %500 = arith.negf %499 : vector<8x32xf32>
    %501 = math.exp %500 : vector<8x32xf32>
    %cst_386 = arith.constant 1.000000e+00 : f32
    %502 = vector.broadcast %cst_386 : f32 to vector<8x32xf32>
    %503 = arith.addf %502, %501 : vector<8x32xf32>
    %504 = arith.divf %502, %503 : vector<8x32xf32>
    %c2_387 = arith.constant 2 : index
    %c0_388 = arith.constant 0 : index
    %c0_389 = arith.constant 0 : index
    %505 = vector.load %arg20[%c2_387, %c0_388, %c0_389] : memref<3x32x32xbf16, #tpu.memory_space<vmem>>, vector<1x32x32xbf16>
    %506 = vector.shape_cast %505 : vector<1x32x32xbf16> to vector<32x32xbf16>
    %cst_390 = arith.constant dense<0.000000e+00> : vector<8x32xf32>
    %507 = tpu.matmul %331, %506, %cst_390 {dimension_numbers = #tpu.dot_dimension_numbers<[1], [0], [0], [1], [0, 0, 1, 1], [], []>} : vector<8x32xbf16>, vector<32x32xbf16>, vector<8x32xf32> -> vector<8x32xf32>
    %508 = arith.addf %507, %486 : vector<8x32xf32>
    %509 = arith.mulf %495, %508 : vector<8x32xf32>
    %510 = arith.addf %293, %509 : vector<8x32xf32>
    %511 = math.tanh %510 : vector<8x32xf32>
    %cst_391 = arith.constant 1.000000e+00 : f32
    %512 = vector.broadcast %cst_391 : f32 to vector<8x32xf32>
    %513 = arith.subf %512, %504 : vector<8x32xf32>
    %514 = arith.mulf %513, %511 : vector<8x32xf32>
    %515 = arith.mulf %504, %330 : vector<8x32xf32>
    %516 = arith.addf %514, %515 : vector<8x32xf32>
    %517 = arith.truncf %516 : vector<8x32xf32> to vector<8x32xbf16>
    %c0_392 = arith.constant 0 : index
    %c0_393 = arith.constant 0 : index
    %518 = vector.load %arg9[%c0_392, %c0_393] : memref<32x32xbf16, #tpu.memory_space<vmem>>, vector<32x32xbf16>
    %cst_394 = arith.constant dense<0.000000e+00> : vector<8x32xf32>
    %519 = tpu.matmul %517, %518, %cst_394 {dimension_numbers = #tpu.dot_dimension_numbers<[1], [0], [0], [1], [0, 0, 1, 1], [], []>} : vector<8x32xbf16>, vector<32x32xbf16>, vector<8x32xf32> -> vector<8x32xf32>
    %c0_395 = arith.constant 0 : index
    %c0_396 = arith.constant 0 : index
    %520 = vector.load %arg10[%c0_395, %c0_396] : memref<8x32xf32, #tpu.memory_space<vmem>>, vector<8x32xf32>
    %521 = arith.addf %519, %520 : vector<8x32xf32>
    %522 = math.tanh %521 : vector<8x32xf32>
    %523 = arith.truncf %522 : vector<8x32xf32> to vector<8x32xbf16>
    %c0_397 = arith.constant 0 : index
    %c0_398 = arith.constant 0 : index
    %c0_399 = arith.constant 0 : index
    %524 = vector.load %arg22[%c0_397, %c0_398, %c0_399] : memref<3x32x32xbf16, #tpu.memory_space<vmem>>, vector<1x32x32xbf16>
    %525 = vector.shape_cast %524 : vector<1x32x32xbf16> to vector<32x32xbf16>
    %cst_400 = arith.constant dense<0.000000e+00> : vector<8x32xf32>
    %526 = tpu.matmul %523, %525, %cst_400 {dimension_numbers = #tpu.dot_dimension_numbers<[1], [0], [0], [1], [0, 0, 1, 1], [], []>} : vector<8x32xbf16>, vector<32x32xbf16>, vector<8x32xf32> -> vector<8x32xf32>
    %c0_401 = arith.constant 0 : index
    %c0_402 = arith.constant 0 : index
    %c0_403 = arith.constant 0 : index
    %527 = vector.load %arg24[%c0_401, %c0_402, %c0_403] : memref<4x8x32xf32, #tpu.memory_space<vmem>>, vector<1x8x32xf32>
    %528 = vector.shape_cast %527 : vector<1x8x32xf32> to vector<8x32xf32>
    %529 = arith.addf %526, %528 : vector<8x32xf32>
    %c1_404 = arith.constant 1 : index
    %c0_405 = arith.constant 0 : index
    %c0_406 = arith.constant 0 : index
    %530 = vector.load %arg22[%c1_404, %c0_405, %c0_406] : memref<3x32x32xbf16, #tpu.memory_space<vmem>>, vector<1x32x32xbf16>
    %531 = vector.shape_cast %530 : vector<1x32x32xbf16> to vector<32x32xbf16>
    %cst_407 = arith.constant dense<0.000000e+00> : vector<8x32xf32>
    %532 = tpu.matmul %523, %531, %cst_407 {dimension_numbers = #tpu.dot_dimension_numbers<[1], [0], [0], [1], [0, 0, 1, 1], [], []>} : vector<8x32xbf16>, vector<32x32xbf16>, vector<8x32xf32> -> vector<8x32xf32>
    %c1_408 = arith.constant 1 : index
    %c0_409 = arith.constant 0 : index
    %c0_410 = arith.constant 0 : index
    %533 = vector.load %arg24[%c1_408, %c0_409, %c0_410] : memref<4x8x32xf32, #tpu.memory_space<vmem>>, vector<1x8x32xf32>
    %534 = vector.shape_cast %533 : vector<1x8x32xf32> to vector<8x32xf32>
    %535 = arith.addf %532, %534 : vector<8x32xf32>
    %c2_411 = arith.constant 2 : index
    %c0_412 = arith.constant 0 : index
    %c0_413 = arith.constant 0 : index
    %536 = vector.load %arg22[%c2_411, %c0_412, %c0_413] : memref<3x32x32xbf16, #tpu.memory_space<vmem>>, vector<1x32x32xbf16>
    %537 = vector.shape_cast %536 : vector<1x32x32xbf16> to vector<32x32xbf16>
    %cst_414 = arith.constant dense<0.000000e+00> : vector<8x32xf32>
    %538 = tpu.matmul %523, %537, %cst_414 {dimension_numbers = #tpu.dot_dimension_numbers<[1], [0], [0], [1], [0, 0, 1, 1], [], []>} : vector<8x32xbf16>, vector<32x32xbf16>, vector<8x32xf32> -> vector<8x32xf32>
    %c2_415 = arith.constant 2 : index
    %c0_416 = arith.constant 0 : index
    %c0_417 = arith.constant 0 : index
    %539 = vector.load %arg24[%c2_415, %c0_416, %c0_417] : memref<4x8x32xf32, #tpu.memory_space<vmem>>, vector<1x8x32xf32>
    %540 = vector.shape_cast %539 : vector<1x8x32xf32> to vector<8x32xf32>
    %541 = arith.addf %538, %540 : vector<8x32xf32>
    %c0_418 = arith.constant 0 : index
    %c0_419 = arith.constant 0 : index
    %542 = vector.load %arg28[%c0_418, %c0_419] : memref<32x128xbf16, #tpu.memory_space<vmem>>, vector<32x128xbf16>
    %cst_420 = arith.constant dense<0.000000e+00> : vector<8x128xf32>
    %543 = tpu.matmul %517, %542, %cst_420 {dimension_numbers = #tpu.dot_dimension_numbers<[1], [0], [0], [1], [0, 0, 1, 1], [], []>} : vector<8x32xbf16>, vector<32x128xbf16>, vector<8x128xf32> -> vector<8x128xf32>
    %544 = arith.addf %298, %543 : vector<8x128xf32>
    %c0_421 = arith.constant 0 : index
    %c0_422 = arith.constant 0 : index
    %545 = vector.load %arg29[%c0_421, %c0_422] : memref<32x128xbf16, #tpu.memory_space<vmem>>, vector<32x128xbf16>
    %cst_423 = arith.constant dense<0.000000e+00> : vector<8x128xf32>
    %546 = tpu.matmul %523, %545, %cst_423 {dimension_numbers = #tpu.dot_dimension_numbers<[1], [0], [0], [1], [0, 0, 1, 1], [], []>} : vector<8x32xbf16>, vector<32x128xbf16>, vector<8x128xf32> -> vector<8x128xf32>
    %547 = arith.addf %544, %546 : vector<8x128xf32>
    %c3_424 = arith.constant 3 : index
    %c0_425 = arith.constant 0 : index
    %c0_426 = arith.constant 0 : index
    %548 = vector.load %arg24[%c3_424, %c0_425, %c0_426] : memref<4x8x32xf32, #tpu.memory_space<vmem>>, vector<1x8x32xf32>
    %549 = vector.shape_cast %548 : vector<1x8x32xf32> to vector<8x32xf32>
    %c0_427 = arith.constant 0 : index
    %c0_428 = arith.constant 0 : index
    %c0_429 = arith.constant 0 : index
    %550 = vector.load %arg23[%c0_427, %c0_428, %c0_429] : memref<3x32x32xbf16, #tpu.memory_space<vmem>>, vector<1x32x32xbf16>
    %551 = vector.shape_cast %550 : vector<1x32x32xbf16> to vector<32x32xbf16>
    %cst_430 = arith.constant dense<0.000000e+00> : vector<8x32xf32>
    %552 = tpu.matmul %394, %551, %cst_430 {dimension_numbers = #tpu.dot_dimension_numbers<[1], [0], [0], [1], [0, 0, 1, 1], [], []>} : vector<8x32xbf16>, vector<32x32xbf16>, vector<8x32xf32> -> vector<8x32xf32>
    %553 = arith.addf %343, %552 : vector<8x32xf32>
    %554 = arith.negf %553 : vector<8x32xf32>
    %555 = math.exp %554 : vector<8x32xf32>
    %cst_431 = arith.constant 1.000000e+00 : f32
    %556 = vector.broadcast %cst_431 : f32 to vector<8x32xf32>
    %557 = arith.addf %556, %555 : vector<8x32xf32>
    %558 = arith.divf %556, %557 : vector<8x32xf32>
    %c1_432 = arith.constant 1 : index
    %c0_433 = arith.constant 0 : index
    %c0_434 = arith.constant 0 : index
    %559 = vector.load %arg23[%c1_432, %c0_433, %c0_434] : memref<3x32x32xbf16, #tpu.memory_space<vmem>>, vector<1x32x32xbf16>
    %560 = vector.shape_cast %559 : vector<1x32x32xbf16> to vector<32x32xbf16>
    %cst_435 = arith.constant dense<0.000000e+00> : vector<8x32xf32>
    %561 = tpu.matmul %394, %560, %cst_435 {dimension_numbers = #tpu.dot_dimension_numbers<[1], [0], [0], [1], [0, 0, 1, 1], [], []>} : vector<8x32xbf16>, vector<32x32xbf16>, vector<8x32xf32> -> vector<8x32xf32>
    %562 = arith.addf %349, %561 : vector<8x32xf32>
    %563 = arith.negf %562 : vector<8x32xf32>
    %564 = math.exp %563 : vector<8x32xf32>
    %cst_436 = arith.constant 1.000000e+00 : f32
    %565 = vector.broadcast %cst_436 : f32 to vector<8x32xf32>
    %566 = arith.addf %565, %564 : vector<8x32xf32>
    %567 = arith.divf %565, %566 : vector<8x32xf32>
    %c2_437 = arith.constant 2 : index
    %c0_438 = arith.constant 0 : index
    %c0_439 = arith.constant 0 : index
    %568 = vector.load %arg23[%c2_437, %c0_438, %c0_439] : memref<3x32x32xbf16, #tpu.memory_space<vmem>>, vector<1x32x32xbf16>
    %569 = vector.shape_cast %568 : vector<1x32x32xbf16> to vector<32x32xbf16>
    %cst_440 = arith.constant dense<0.000000e+00> : vector<8x32xf32>
    %570 = tpu.matmul %394, %569, %cst_440 {dimension_numbers = #tpu.dot_dimension_numbers<[1], [0], [0], [1], [0, 0, 1, 1], [], []>} : vector<8x32xbf16>, vector<32x32xbf16>, vector<8x32xf32> -> vector<8x32xf32>
    %571 = arith.addf %570, %549 : vector<8x32xf32>
    %572 = arith.mulf %558, %571 : vector<8x32xf32>
    %573 = arith.addf %355, %572 : vector<8x32xf32>
    %574 = math.tanh %573 : vector<8x32xf32>
    %cst_441 = arith.constant 1.000000e+00 : f32
    %575 = vector.broadcast %cst_441 : f32 to vector<8x32xf32>
    %576 = arith.subf %575, %567 : vector<8x32xf32>
    %577 = arith.mulf %576, %574 : vector<8x32xf32>
    %578 = arith.mulf %567, %393 : vector<8x32xf32>
    %579 = arith.addf %577, %578 : vector<8x32xf32>
    %580 = arith.truncf %579 : vector<8x32xf32> to vector<8x32xbf16>
    %c0_442 = arith.constant 0 : index
    %c0_443 = arith.constant 0 : index
    %581 = vector.load %arg11[%c0_442, %c0_443] : memref<32x32xbf16, #tpu.memory_space<vmem>>, vector<32x32xbf16>
    %cst_444 = arith.constant dense<0.000000e+00> : vector<8x32xf32>
    %582 = tpu.matmul %580, %581, %cst_444 {dimension_numbers = #tpu.dot_dimension_numbers<[1], [0], [0], [1], [0, 0, 1, 1], [], []>} : vector<8x32xbf16>, vector<32x32xbf16>, vector<8x32xf32> -> vector<8x32xf32>
    %c0_445 = arith.constant 0 : index
    %c0_446 = arith.constant 0 : index
    %583 = vector.load %arg12[%c0_445, %c0_446] : memref<8x32xf32, #tpu.memory_space<vmem>>, vector<8x32xf32>
    %584 = arith.addf %582, %583 : vector<8x32xf32>
    %585 = math.tanh %584 : vector<8x32xf32>
    %586 = arith.truncf %585 : vector<8x32xf32> to vector<8x32xbf16>
    %c0_447 = arith.constant 0 : index
    %c0_448 = arith.constant 0 : index
    %587 = vector.load %arg13[%c0_447, %c0_448] : memref<32x32xbf16, #tpu.memory_space<vmem>>, vector<32x32xbf16>
    %cst_449 = arith.constant dense<0.000000e+00> : vector<8x32xf32>
    %588 = tpu.matmul %586, %587, %cst_449 {dimension_numbers = #tpu.dot_dimension_numbers<[1], [0], [0], [1], [0, 0, 1, 1], [], []>} : vector<8x32xbf16>, vector<32x32xbf16>, vector<8x32xf32> -> vector<8x32xf32>
    %c0_450 = arith.constant 0 : index
    %c0_451 = arith.constant 0 : index
    %589 = vector.load %arg14[%c0_450, %c0_451] : memref<8x32xf32, #tpu.memory_space<vmem>>, vector<8x32xf32>
    %590 = arith.addf %588, %589 : vector<8x32xf32>
    %591 = math.tanh %590 : vector<8x32xf32>
    %c0_452 = arith.constant 0 : index
    %c0_453 = arith.constant 0 : index
    %592 = vector.load %arg30[%c0_452, %c0_453] : memref<32x128xbf16, #tpu.memory_space<vmem>>, vector<32x128xbf16>
    %cst_454 = arith.constant dense<0.000000e+00> : vector<8x128xf32>
    %593 = tpu.matmul %580, %592, %cst_454 {dimension_numbers = #tpu.dot_dimension_numbers<[1], [0], [0], [1], [0, 0, 1, 1], [], []>} : vector<8x32xbf16>, vector<32x128xbf16>, vector<8x128xf32> -> vector<8x128xf32>
    %c0_455 = arith.constant 0 : index
    %c0_456 = arith.constant 0 : index
    %594 = vector.load %arg31[%c0_455, %c0_456] : memref<32x128xbf16, #tpu.memory_space<vmem>>, vector<32x128xbf16>
    %cst_457 = arith.constant dense<0.000000e+00> : vector<8x128xf32>
    %595 = tpu.matmul %586, %594, %cst_457 {dimension_numbers = #tpu.dot_dimension_numbers<[1], [0], [0], [1], [0, 0, 1, 1], [], []>} : vector<8x32xbf16>, vector<32x128xbf16>, vector<8x128xf32> -> vector<8x128xf32>
    %596 = arith.addf %593, %595 : vector<8x128xf32>
    %597 = arith.truncf %591 : vector<8x32xf32> to vector<8x32xbf16>
    %c0_458 = arith.constant 0 : index
    %c0_459 = arith.constant 0 : index
    %598 = vector.load %arg32[%c0_458, %c0_459] : memref<32x128xbf16, #tpu.memory_space<vmem>>, vector<32x128xbf16>
    %cst_460 = arith.constant dense<0.000000e+00> : vector<8x128xf32>
    %599 = tpu.matmul %597, %598, %cst_460 {dimension_numbers = #tpu.dot_dimension_numbers<[1], [0], [0], [1], [0, 0, 1, 1], [], []>} : vector<8x32xbf16>, vector<32x128xbf16>, vector<8x128xf32> -> vector<8x128xf32>
    %600 = arith.addf %596, %599 : vector<8x128xf32>
    %601 = vector.extract_strided_slice %34 {offsets = [8, 0], sizes = [8, 128], strides = [1, 1]} : vector<64x128xf32> to vector<8x128xf32>
    %602 = arith.addf %601, %361 : vector<8x128xf32>
    %603 = arith.addf %602, %600 : vector<8x128xf32>
    %c0_461 = arith.constant 0 : index
    %c8 = arith.constant 8 : index
    %c0_462 = arith.constant 0 : index
    %604 = vector.load %arg34[%c0_461, %c8, %c0_462] : memref<1x64x128xf32, #tpu.memory_space<vmem>>, vector<1x8x128xf32>
    %605 = vector.shape_cast %604 : vector<1x8x128xf32> to vector<8x128xf32>
    %606 = vector.shape_cast %603 : vector<8x128xf32> to vector<1x8x128xf32>
    tpu.vector_store %arg34[%c0_461, %c8, %c0_462], %606 {strides = array<i32>} : memref<1x64x128xf32, #tpu.memory_space<vmem>>, vector<1x8x128xf32>,
    %607 = vector.extract_strided_slice %15 {offsets = [32, 0], sizes = [8, 32], strides = [1, 1]} : vector<64x32xf32> to vector<8x32xf32>
    %608 = vector.extract_strided_slice %22 {offsets = [32, 0], sizes = [8, 32], strides = [1, 1]} : vector<64x32xf32> to vector<8x32xf32>
    %609 = vector.extract_strided_slice %29 {offsets = [32, 0], sizes = [8, 32], strides = [1, 1]} : vector<64x32xf32> to vector<8x32xf32>
    %c0_463 = arith.constant 0 : index
    %c0_464 = arith.constant 0 : index
    %610 = vector.load %arg18[%c0_463, %c0_464] : memref<8x32xf32, #tpu.memory_space<vmem>>, vector<8x32xf32>
    %c0_465 = arith.constant 0 : index
    %c0_466 = arith.constant 0 : index
    %c0_467 = arith.constant 0 : index
    %611 = vector.load %arg16[%c0_465, %c0_466, %c0_467] : memref<3x32x32xbf16, #tpu.memory_space<vmem>>, vector<1x32x32xbf16>
    %612 = vector.shape_cast %611 : vector<1x32x32xbf16> to vector<32x32xbf16>
    %cst_468 = arith.constant dense<0.000000e+00> : vector<8x32xf32>
    %613 = tpu.matmul %455, %612, %cst_468 {dimension_numbers = #tpu.dot_dimension_numbers<[1], [0], [0], [1], [0, 0, 1, 1], [], []>} : vector<8x32xbf16>, vector<32x32xbf16>, vector<8x32xf32> -> vector<8x32xf32>
    %614 = arith.addf %607, %613 : vector<8x32xf32>
    %615 = arith.negf %614 : vector<8x32xf32>
    %616 = math.exp %615 : vector<8x32xf32>
    %cst_469 = arith.constant 1.000000e+00 : f32
    %617 = vector.broadcast %cst_469 : f32 to vector<8x32xf32>
    %618 = arith.addf %617, %616 : vector<8x32xf32>
    %619 = arith.divf %617, %618 : vector<8x32xf32>
    %c1_470 = arith.constant 1 : index
    %c0_471 = arith.constant 0 : index
    %c0_472 = arith.constant 0 : index
    %620 = vector.load %arg16[%c1_470, %c0_471, %c0_472] : memref<3x32x32xbf16, #tpu.memory_space<vmem>>, vector<1x32x32xbf16>
    %621 = vector.shape_cast %620 : vector<1x32x32xbf16> to vector<32x32xbf16>
    %cst_473 = arith.constant dense<0.000000e+00> : vector<8x32xf32>
    %622 = tpu.matmul %455, %621, %cst_473 {dimension_numbers = #tpu.dot_dimension_numbers<[1], [0], [0], [1], [0, 0, 1, 1], [], []>} : vector<8x32xbf16>, vector<32x32xbf16>, vector<8x32xf32> -> vector<8x32xf32>
    %623 = arith.addf %608, %622 : vector<8x32xf32>
    %624 = arith.negf %623 : vector<8x32xf32>
    %625 = math.exp %624 : vector<8x32xf32>
    %cst_474 = arith.constant 1.000000e+00 : f32
    %626 = vector.broadcast %cst_474 : f32 to vector<8x32xf32>
    %627 = arith.addf %626, %625 : vector<8x32xf32>
    %628 = arith.divf %626, %627 : vector<8x32xf32>
    %c2_475 = arith.constant 2 : index
    %c0_476 = arith.constant 0 : index
    %c0_477 = arith.constant 0 : index
    %629 = vector.load %arg16[%c2_475, %c0_476, %c0_477] : memref<3x32x32xbf16, #tpu.memory_space<vmem>>, vector<1x32x32xbf16>
    %630 = vector.shape_cast %629 : vector<1x32x32xbf16> to vector<32x32xbf16>
    %cst_478 = arith.constant dense<0.000000e+00> : vector<8x32xf32>
    %631 = tpu.matmul %455, %630, %cst_478 {dimension_numbers = #tpu.dot_dimension_numbers<[1], [0], [0], [1], [0, 0, 1, 1], [], []>} : vector<8x32xbf16>, vector<32x32xbf16>, vector<8x32xf32> -> vector<8x32xf32>
    %632 = arith.addf %631, %610 : vector<8x32xf32>
    %633 = arith.mulf %619, %632 : vector<8x32xf32>
    %634 = arith.addf %609, %633 : vector<8x32xf32>
    %635 = math.tanh %634 : vector<8x32xf32>
    %cst_479 = arith.constant 1.000000e+00 : f32
    %636 = vector.broadcast %cst_479 : f32 to vector<8x32xf32>
    %637 = arith.subf %636, %628 : vector<8x32xf32>
    %638 = arith.mulf %637, %635 : vector<8x32xf32>
    %639 = arith.mulf %628, %454 : vector<8x32xf32>
    %640 = arith.addf %638, %639 : vector<8x32xf32>
    %641 = arith.truncf %640 : vector<8x32xf32> to vector<8x32xbf16>
    %c0_480 = arith.constant 0 : index
    %c0_481 = arith.constant 0 : index
    %642 = vector.load %arg7[%c0_480, %c0_481] : memref<32x32xbf16, #tpu.memory_space<vmem>>, vector<32x32xbf16>
    %cst_482 = arith.constant dense<0.000000e+00> : vector<8x32xf32>
    %643 = tpu.matmul %641, %642, %cst_482 {dimension_numbers = #tpu.dot_dimension_numbers<[1], [0], [0], [1], [0, 0, 1, 1], [], []>} : vector<8x32xbf16>, vector<32x32xbf16>, vector<8x32xf32> -> vector<8x32xf32>
    %c0_483 = arith.constant 0 : index
    %c0_484 = arith.constant 0 : index
    %644 = vector.load %arg8[%c0_483, %c0_484] : memref<8x32xf32, #tpu.memory_space<vmem>>, vector<8x32xf32>
    %645 = arith.addf %643, %644 : vector<8x32xf32>
    %646 = math.tanh %645 : vector<8x32xf32>
    %647 = arith.truncf %646 : vector<8x32xf32> to vector<8x32xbf16>
    %c0_485 = arith.constant 0 : index
    %c0_486 = arith.constant 0 : index
    %c0_487 = arith.constant 0 : index
    %648 = vector.load %arg19[%c0_485, %c0_486, %c0_487] : memref<3x32x32xbf16, #tpu.memory_space<vmem>>, vector<1x32x32xbf16>
    %649 = vector.shape_cast %648 : vector<1x32x32xbf16> to vector<32x32xbf16>
    %cst_488 = arith.constant dense<0.000000e+00> : vector<8x32xf32>
    %650 = tpu.matmul %647, %649, %cst_488 {dimension_numbers = #tpu.dot_dimension_numbers<[1], [0], [0], [1], [0, 0, 1, 1], [], []>} : vector<8x32xbf16>, vector<32x32xbf16>, vector<8x32xf32> -> vector<8x32xf32>
    %c0_489 = arith.constant 0 : index
    %c0_490 = arith.constant 0 : index
    %c0_491 = arith.constant 0 : index
    %651 = vector.load %arg21[%c0_489, %c0_490, %c0_491] : memref<4x8x32xf32, #tpu.memory_space<vmem>>, vector<1x8x32xf32>
    %652 = vector.shape_cast %651 : vector<1x8x32xf32> to vector<8x32xf32>
    %653 = arith.addf %650, %652 : vector<8x32xf32>
    %c1_492 = arith.constant 1 : index
    %c0_493 = arith.constant 0 : index
    %c0_494 = arith.constant 0 : index
    %654 = vector.load %arg19[%c1_492, %c0_493, %c0_494] : memref<3x32x32xbf16, #tpu.memory_space<vmem>>, vector<1x32x32xbf16>
    %655 = vector.shape_cast %654 : vector<1x32x32xbf16> to vector<32x32xbf16>
    %cst_495 = arith.constant dense<0.000000e+00> : vector<8x32xf32>
    %656 = tpu.matmul %647, %655, %cst_495 {dimension_numbers = #tpu.dot_dimension_numbers<[1], [0], [0], [1], [0, 0, 1, 1], [], []>} : vector<8x32xbf16>, vector<32x32xbf16>, vector<8x32xf32> -> vector<8x32xf32>
    %c1_496 = arith.constant 1 : index
    %c0_497 = arith.constant 0 : index
    %c0_498 = arith.constant 0 : index
    %657 = vector.load %arg21[%c1_496, %c0_497, %c0_498] : memref<4x8x32xf32, #tpu.memory_space<vmem>>, vector<1x8x32xf32>
    %658 = vector.shape_cast %657 : vector<1x8x32xf32> to vector<8x32xf32>
    %659 = arith.addf %656, %658 : vector<8x32xf32>
    %c2_499 = arith.constant 2 : index
    %c0_500 = arith.constant 0 : index
    %c0_501 = arith.constant 0 : index
    %660 = vector.load %arg19[%c2_499, %c0_500, %c0_501] : memref<3x32x32xbf16, #tpu.memory_space<vmem>>, vector<1x32x32xbf16>
    %661 = vector.shape_cast %660 : vector<1x32x32xbf16> to vector<32x32xbf16>
    %cst_502 = arith.constant dense<0.000000e+00> : vector<8x32xf32>
    %662 = tpu.matmul %647, %661, %cst_502 {dimension_numbers = #tpu.dot_dimension_numbers<[1], [0], [0], [1], [0, 0, 1, 1], [], []>} : vector<8x32xbf16>, vector<32x32xbf16>, vector<8x32xf32> -> vector<8x32xf32>
    %c2_503 = arith.constant 2 : index
    %c0_504 = arith.constant 0 : index
    %c0_505 = arith.constant 0 : index
    %663 = vector.load %arg21[%c2_503, %c0_504, %c0_505] : memref<4x8x32xf32, #tpu.memory_space<vmem>>, vector<1x8x32xf32>
    %664 = vector.shape_cast %663 : vector<1x8x32xf32> to vector<8x32xf32>
    %665 = arith.addf %662, %664 : vector<8x32xf32>
    %c0_506 = arith.constant 0 : index
    %c0_507 = arith.constant 0 : index
    %666 = vector.load %arg26[%c0_506, %c0_507] : memref<32x128xbf16, #tpu.memory_space<vmem>>, vector<32x128xbf16>
    %cst_508 = arith.constant dense<0.000000e+00> : vector<8x128xf32>
    %667 = tpu.matmul %641, %666, %cst_508 {dimension_numbers = #tpu.dot_dimension_numbers<[1], [0], [0], [1], [0, 0, 1, 1], [], []>} : vector<8x32xbf16>, vector<32x128xbf16>, vector<8x128xf32> -> vector<8x128xf32>
    %c0_509 = arith.constant 0 : index
    %c0_510 = arith.constant 0 : index
    %668 = vector.load %arg27[%c0_509, %c0_510] : memref<32x128xbf16, #tpu.memory_space<vmem>>, vector<32x128xbf16>
    %cst_511 = arith.constant dense<0.000000e+00> : vector<8x128xf32>
    %669 = tpu.matmul %647, %668, %cst_511 {dimension_numbers = #tpu.dot_dimension_numbers<[1], [0], [0], [1], [0, 0, 1, 1], [], []>} : vector<8x32xbf16>, vector<32x128xbf16>, vector<8x128xf32> -> vector<8x128xf32>
    %670 = arith.addf %667, %669 : vector<8x128xf32>
    %c3_512 = arith.constant 3 : index
    %c0_513 = arith.constant 0 : index
    %c0_514 = arith.constant 0 : index
    %671 = vector.load %arg21[%c3_512, %c0_513, %c0_514] : memref<4x8x32xf32, #tpu.memory_space<vmem>>, vector<1x8x32xf32>
    %672 = vector.shape_cast %671 : vector<1x8x32xf32> to vector<8x32xf32>
    %c0_515 = arith.constant 0 : index
    %c0_516 = arith.constant 0 : index
    %c0_517 = arith.constant 0 : index
    %673 = vector.load %arg20[%c0_515, %c0_516, %c0_517] : memref<3x32x32xbf16, #tpu.memory_space<vmem>>, vector<1x32x32xbf16>
    %674 = vector.shape_cast %673 : vector<1x32x32xbf16> to vector<32x32xbf16>
    %cst_518 = arith.constant dense<0.000000e+00> : vector<8x32xf32>
    %675 = tpu.matmul %517, %674, %cst_518 {dimension_numbers = #tpu.dot_dimension_numbers<[1], [0], [0], [1], [0, 0, 1, 1], [], []>} : vector<8x32xbf16>, vector<32x32xbf16>, vector<8x32xf32> -> vector<8x32xf32>
    %676 = arith.addf %467, %675 : vector<8x32xf32>
    %677 = arith.negf %676 : vector<8x32xf32>
    %678 = math.exp %677 : vector<8x32xf32>
    %cst_519 = arith.constant 1.000000e+00 : f32
    %679 = vector.broadcast %cst_519 : f32 to vector<8x32xf32>
    %680 = arith.addf %679, %678 : vector<8x32xf32>
    %681 = arith.divf %679, %680 : vector<8x32xf32>
    %c1_520 = arith.constant 1 : index
    %c0_521 = arith.constant 0 : index
    %c0_522 = arith.constant 0 : index
    %682 = vector.load %arg20[%c1_520, %c0_521, %c0_522] : memref<3x32x32xbf16, #tpu.memory_space<vmem>>, vector<1x32x32xbf16>
    %683 = vector.shape_cast %682 : vector<1x32x32xbf16> to vector<32x32xbf16>
    %cst_523 = arith.constant dense<0.000000e+00> : vector<8x32xf32>
    %684 = tpu.matmul %517, %683, %cst_523 {dimension_numbers = #tpu.dot_dimension_numbers<[1], [0], [0], [1], [0, 0, 1, 1], [], []>} : vector<8x32xbf16>, vector<32x32xbf16>, vector<8x32xf32> -> vector<8x32xf32>
    %685 = arith.addf %473, %684 : vector<8x32xf32>
    %686 = arith.negf %685 : vector<8x32xf32>
    %687 = math.exp %686 : vector<8x32xf32>
    %cst_524 = arith.constant 1.000000e+00 : f32
    %688 = vector.broadcast %cst_524 : f32 to vector<8x32xf32>
    %689 = arith.addf %688, %687 : vector<8x32xf32>
    %690 = arith.divf %688, %689 : vector<8x32xf32>
    %c2_525 = arith.constant 2 : index
    %c0_526 = arith.constant 0 : index
    %c0_527 = arith.constant 0 : index
    %691 = vector.load %arg20[%c2_525, %c0_526, %c0_527] : memref<3x32x32xbf16, #tpu.memory_space<vmem>>, vector<1x32x32xbf16>
    %692 = vector.shape_cast %691 : vector<1x32x32xbf16> to vector<32x32xbf16>
    %cst_528 = arith.constant dense<0.000000e+00> : vector<8x32xf32>
    %693 = tpu.matmul %517, %692, %cst_528 {dimension_numbers = #tpu.dot_dimension_numbers<[1], [0], [0], [1], [0, 0, 1, 1], [], []>} : vector<8x32xbf16>, vector<32x32xbf16>, vector<8x32xf32> -> vector<8x32xf32>
    %694 = arith.addf %693, %672 : vector<8x32xf32>
    %695 = arith.mulf %681, %694 : vector<8x32xf32>
    %696 = arith.addf %479, %695 : vector<8x32xf32>
    %697 = math.tanh %696 : vector<8x32xf32>
    %cst_529 = arith.constant 1.000000e+00 : f32
    %698 = vector.broadcast %cst_529 : f32 to vector<8x32xf32>
    %699 = arith.subf %698, %690 : vector<8x32xf32>
    %700 = arith.mulf %699, %697 : vector<8x32xf32>
    %701 = arith.mulf %690, %516 : vector<8x32xf32>
    %702 = arith.addf %700, %701 : vector<8x32xf32>
    %703 = arith.truncf %702 : vector<8x32xf32> to vector<8x32xbf16>
    %c0_530 = arith.constant 0 : index
    %c0_531 = arith.constant 0 : index
    %704 = vector.load %arg9[%c0_530, %c0_531] : memref<32x32xbf16, #tpu.memory_space<vmem>>, vector<32x32xbf16>
    %cst_532 = arith.constant dense<0.000000e+00> : vector<8x32xf32>
    %705 = tpu.matmul %703, %704, %cst_532 {dimension_numbers = #tpu.dot_dimension_numbers<[1], [0], [0], [1], [0, 0, 1, 1], [], []>} : vector<8x32xbf16>, vector<32x32xbf16>, vector<8x32xf32> -> vector<8x32xf32>
    %c0_533 = arith.constant 0 : index
    %c0_534 = arith.constant 0 : index
    %706 = vector.load %arg10[%c0_533, %c0_534] : memref<8x32xf32, #tpu.memory_space<vmem>>, vector<8x32xf32>
    %707 = arith.addf %705, %706 : vector<8x32xf32>
    %708 = math.tanh %707 : vector<8x32xf32>
    %709 = arith.truncf %708 : vector<8x32xf32> to vector<8x32xbf16>
    %c0_535 = arith.constant 0 : index
    %c0_536 = arith.constant 0 : index
    %c0_537 = arith.constant 0 : index
    %710 = vector.load %arg22[%c0_535, %c0_536, %c0_537] : memref<3x32x32xbf16, #tpu.memory_space<vmem>>, vector<1x32x32xbf16>
    %711 = vector.shape_cast %710 : vector<1x32x32xbf16> to vector<32x32xbf16>
    %cst_538 = arith.constant dense<0.000000e+00> : vector<8x32xf32>
    %712 = tpu.matmul %709, %711, %cst_538 {dimension_numbers = #tpu.dot_dimension_numbers<[1], [0], [0], [1], [0, 0, 1, 1], [], []>} : vector<8x32xbf16>, vector<32x32xbf16>, vector<8x32xf32> -> vector<8x32xf32>
    %c0_539 = arith.constant 0 : index
    %c0_540 = arith.constant 0 : index
    %c0_541 = arith.constant 0 : index
    %713 = vector.load %arg24[%c0_539, %c0_540, %c0_541] : memref<4x8x32xf32, #tpu.memory_space<vmem>>, vector<1x8x32xf32>
    %714 = vector.shape_cast %713 : vector<1x8x32xf32> to vector<8x32xf32>
    %715 = arith.addf %712, %714 : vector<8x32xf32>
    %c1_542 = arith.constant 1 : index
    %c0_543 = arith.constant 0 : index
    %c0_544 = arith.constant 0 : index
    %716 = vector.load %arg22[%c1_542, %c0_543, %c0_544] : memref<3x32x32xbf16, #tpu.memory_space<vmem>>, vector<1x32x32xbf16>
    %717 = vector.shape_cast %716 : vector<1x32x32xbf16> to vector<32x32xbf16>
    %cst_545 = arith.constant dense<0.000000e+00> : vector<8x32xf32>
    %718 = tpu.matmul %709, %717, %cst_545 {dimension_numbers = #tpu.dot_dimension_numbers<[1], [0], [0], [1], [0, 0, 1, 1], [], []>} : vector<8x32xbf16>, vector<32x32xbf16>, vector<8x32xf32> -> vector<8x32xf32>
    %c1_546 = arith.constant 1 : index
    %c0_547 = arith.constant 0 : index
    %c0_548 = arith.constant 0 : index
    %719 = vector.load %arg24[%c1_546, %c0_547, %c0_548] : memref<4x8x32xf32, #tpu.memory_space<vmem>>, vector<1x8x32xf32>
    %720 = vector.shape_cast %719 : vector<1x8x32xf32> to vector<8x32xf32>
    %721 = arith.addf %718, %720 : vector<8x32xf32>
    %c2_549 = arith.constant 2 : index
    %c0_550 = arith.constant 0 : index
    %c0_551 = arith.constant 0 : index
    %722 = vector.load %arg22[%c2_549, %c0_550, %c0_551] : memref<3x32x32xbf16, #tpu.memory_space<vmem>>, vector<1x32x32xbf16>
    %723 = vector.shape_cast %722 : vector<1x32x32xbf16> to vector<32x32xbf16>
    %cst_552 = arith.constant dense<0.000000e+00> : vector<8x32xf32>
    %724 = tpu.matmul %709, %723, %cst_552 {dimension_numbers = #tpu.dot_dimension_numbers<[1], [0], [0], [1], [0, 0, 1, 1], [], []>} : vector<8x32xbf16>, vector<32x32xbf16>, vector<8x32xf32> -> vector<8x32xf32>
    %c2_553 = arith.constant 2 : index
    %c0_554 = arith.constant 0 : index
    %c0_555 = arith.constant 0 : index
    %725 = vector.load %arg24[%c2_553, %c0_554, %c0_555] : memref<4x8x32xf32, #tpu.memory_space<vmem>>, vector<1x8x32xf32>
    %726 = vector.shape_cast %725 : vector<1x8x32xf32> to vector<8x32xf32>
    %727 = arith.addf %724, %726 : vector<8x32xf32>
    %c0_556 = arith.constant 0 : index
    %c0_557 = arith.constant 0 : index
    %728 = vector.load %arg28[%c0_556, %c0_557] : memref<32x128xbf16, #tpu.memory_space<vmem>>, vector<32x128xbf16>
    %cst_558 = arith.constant dense<0.000000e+00> : vector<8x128xf32>
    %729 = tpu.matmul %703, %728, %cst_558 {dimension_numbers = #tpu.dot_dimension_numbers<[1], [0], [0], [1], [0, 0, 1, 1], [], []>} : vector<8x32xbf16>, vector<32x128xbf16>, vector<8x128xf32> -> vector<8x128xf32>
    %730 = arith.addf %484, %729 : vector<8x128xf32>
    %c0_559 = arith.constant 0 : index
    %c0_560 = arith.constant 0 : index
    %731 = vector.load %arg29[%c0_559, %c0_560] : memref<32x128xbf16, #tpu.memory_space<vmem>>, vector<32x128xbf16>
    %cst_561 = arith.constant dense<0.000000e+00> : vector<8x128xf32>
    %732 = tpu.matmul %709, %731, %cst_561 {dimension_numbers = #tpu.dot_dimension_numbers<[1], [0], [0], [1], [0, 0, 1, 1], [], []>} : vector<8x32xbf16>, vector<32x128xbf16>, vector<8x128xf32> -> vector<8x128xf32>
    %733 = arith.addf %730, %732 : vector<8x128xf32>
    %c3_562 = arith.constant 3 : index
    %c0_563 = arith.constant 0 : index
    %c0_564 = arith.constant 0 : index
    %734 = vector.load %arg24[%c3_562, %c0_563, %c0_564] : memref<4x8x32xf32, #tpu.memory_space<vmem>>, vector<1x8x32xf32>
    %735 = vector.shape_cast %734 : vector<1x8x32xf32> to vector<8x32xf32>
    %c0_565 = arith.constant 0 : index
    %c0_566 = arith.constant 0 : index
    %c0_567 = arith.constant 0 : index
    %736 = vector.load %arg23[%c0_565, %c0_566, %c0_567] : memref<3x32x32xbf16, #tpu.memory_space<vmem>>, vector<1x32x32xbf16>
    %737 = vector.shape_cast %736 : vector<1x32x32xbf16> to vector<32x32xbf16>
    %cst_568 = arith.constant dense<0.000000e+00> : vector<8x32xf32>
    %738 = tpu.matmul %580, %737, %cst_568 {dimension_numbers = #tpu.dot_dimension_numbers<[1], [0], [0], [1], [0, 0, 1, 1], [], []>} : vector<8x32xbf16>, vector<32x32xbf16>, vector<8x32xf32> -> vector<8x32xf32>
    %739 = arith.addf %529, %738 : vector<8x32xf32>
    %740 = arith.negf %739 : vector<8x32xf32>
    %741 = math.exp %740 : vector<8x32xf32>
    %cst_569 = arith.constant 1.000000e+00 : f32
    %742 = vector.broadcast %cst_569 : f32 to vector<8x32xf32>
    %743 = arith.addf %742, %741 : vector<8x32xf32>
    %744 = arith.divf %742, %743 : vector<8x32xf32>
    %c1_570 = arith.constant 1 : index
    %c0_571 = arith.constant 0 : index
    %c0_572 = arith.constant 0 : index
    %745 = vector.load %arg23[%c1_570, %c0_571, %c0_572] : memref<3x32x32xbf16, #tpu.memory_space<vmem>>, vector<1x32x32xbf16>
    %746 = vector.shape_cast %745 : vector<1x32x32xbf16> to vector<32x32xbf16>
    %cst_573 = arith.constant dense<0.000000e+00> : vector<8x32xf32>
    %747 = tpu.matmul %580, %746, %cst_573 {dimension_numbers = #tpu.dot_dimension_numbers<[1], [0], [0], [1], [0, 0, 1, 1], [], []>} : vector<8x32xbf16>, vector<32x32xbf16>, vector<8x32xf32> -> vector<8x32xf32>
    %748 = arith.addf %535, %747 : vector<8x32xf32>
    %749 = arith.negf %748 : vector<8x32xf32>
    %750 = math.exp %749 : vector<8x32xf32>
    %cst_574 = arith.constant 1.000000e+00 : f32
    %751 = vector.broadcast %cst_574 : f32 to vector<8x32xf32>
    %752 = arith.addf %751, %750 : vector<8x32xf32>
    %753 = arith.divf %751, %752 : vector<8x32xf32>
    %c2_575 = arith.constant 2 : index
    %c0_576 = arith.constant 0 : index
    %c0_577 = arith.constant 0 : index
    %754 = vector.load %arg23[%c2_575, %c0_576, %c0_577] : memref<3x32x32xbf16, #tpu.memory_space<vmem>>, vector<1x32x32xbf16>
    %755 = vector.shape_cast %754 : vector<1x32x32xbf16> to vector<32x32xbf16>
    %cst_578 = arith.constant dense<0.000000e+00> : vector<8x32xf32>
    %756 = tpu.matmul %580, %755, %cst_578 {dimension_numbers = #tpu.dot_dimension_numbers<[1], [0], [0], [1], [0, 0, 1, 1], [], []>} : vector<8x32xbf16>, vector<32x32xbf16>, vector<8x32xf32> -> vector<8x32xf32>
    %757 = arith.addf %756, %735 : vector<8x32xf32>
    %758 = arith.mulf %744, %757 : vector<8x32xf32>
    %759 = arith.addf %541, %758 : vector<8x32xf32>
    %760 = math.tanh %759 : vector<8x32xf32>
    %cst_579 = arith.constant 1.000000e+00 : f32
    %761 = vector.broadcast %cst_579 : f32 to vector<8x32xf32>
    %762 = arith.subf %761, %753 : vector<8x32xf32>
    %763 = arith.mulf %762, %760 : vector<8x32xf32>
    %764 = arith.mulf %753, %579 : vector<8x32xf32>
    %765 = arith.addf %763, %764 : vector<8x32xf32>
    %766 = arith.truncf %765 : vector<8x32xf32> to vector<8x32xbf16>
    %c0_580 = arith.constant 0 : index
    %c0_581 = arith.constant 0 : index
    %767 = vector.load %arg11[%c0_580, %c0_581] : memref<32x32xbf16, #tpu.memory_space<vmem>>, vector<32x32xbf16>
    %cst_582 = arith.constant dense<0.000000e+00> : vector<8x32xf32>
    %768 = tpu.matmul %766, %767, %cst_582 {dimension_numbers = #tpu.dot_dimension_numbers<[1], [0], [0], [1], [0, 0, 1, 1], [], []>} : vector<8x32xbf16>, vector<32x32xbf16>, vector<8x32xf32> -> vector<8x32xf32>
    %c0_583 = arith.constant 0 : index
    %c0_584 = arith.constant 0 : index
    %769 = vector.load %arg12[%c0_583, %c0_584] : memref<8x32xf32, #tpu.memory_space<vmem>>, vector<8x32xf32>
    %770 = arith.addf %768, %769 : vector<8x32xf32>
    %771 = math.tanh %770 : vector<8x32xf32>
    %772 = arith.truncf %771 : vector<8x32xf32> to vector<8x32xbf16>
    %c0_585 = arith.constant 0 : index
    %c0_586 = arith.constant 0 : index
    %773 = vector.load %arg13[%c0_585, %c0_586] : memref<32x32xbf16, #tpu.memory_space<vmem>>, vector<32x32xbf16>
    %cst_587 = arith.constant dense<0.000000e+00> : vector<8x32xf32>
    %774 = tpu.matmul %772, %773, %cst_587 {dimension_numbers = #tpu.dot_dimension_numbers<[1], [0], [0], [1], [0, 0, 1, 1], [], []>} : vector<8x32xbf16>, vector<32x32xbf16>, vector<8x32xf32> -> vector<8x32xf32>
    %c0_588 = arith.constant 0 : index
    %c0_589 = arith.constant 0 : index
    %775 = vector.load %arg14[%c0_588, %c0_589] : memref<8x32xf32, #tpu.memory_space<vmem>>, vector<8x32xf32>
    %776 = arith.addf %774, %775 : vector<8x32xf32>
    %777 = math.tanh %776 : vector<8x32xf32>
    %c0_590 = arith.constant 0 : index
    %c0_591 = arith.constant 0 : index
    %778 = vector.load %arg30[%c0_590, %c0_591] : memref<32x128xbf16, #tpu.memory_space<vmem>>, vector<32x128xbf16>
    %cst_592 = arith.constant dense<0.000000e+00> : vector<8x128xf32>
    %779 = tpu.matmul %766, %778, %cst_592 {dimension_numbers = #tpu.dot_dimension_numbers<[1], [0], [0], [1], [0, 0, 1, 1], [], []>} : vector<8x32xbf16>, vector<32x128xbf16>, vector<8x128xf32> -> vector<8x128xf32>
    %c0_593 = arith.constant 0 : index
    %c0_594 = arith.constant 0 : index
    %780 = vector.load %arg31[%c0_593, %c0_594] : memref<32x128xbf16, #tpu.memory_space<vmem>>, vector<32x128xbf16>
    %cst_595 = arith.constant dense<0.000000e+00> : vector<8x128xf32>
    %781 = tpu.matmul %772, %780, %cst_595 {dimension_numbers = #tpu.dot_dimension_numbers<[1], [0], [0], [1], [0, 0, 1, 1], [], []>} : vector<8x32xbf16>, vector<32x128xbf16>, vector<8x128xf32> -> vector<8x128xf32>
    %782 = arith.addf %779, %781 : vector<8x128xf32>
    %783 = arith.truncf %777 : vector<8x32xf32> to vector<8x32xbf16>
    %c0_596 = arith.constant 0 : index
    %c0_597 = arith.constant 0 : index
    %784 = vector.load %arg32[%c0_596, %c0_597] : memref<32x128xbf16, #tpu.memory_space<vmem>>, vector<32x128xbf16>
    %cst_598 = arith.constant dense<0.000000e+00> : vector<8x128xf32>
    %785 = tpu.matmul %783, %784, %cst_598 {dimension_numbers = #tpu.dot_dimension_numbers<[1], [0], [0], [1], [0, 0, 1, 1], [], []>} : vector<8x32xbf16>, vector<32x128xbf16>, vector<8x128xf32> -> vector<8x128xf32>
    %786 = arith.addf %782, %785 : vector<8x128xf32>
    %787 = vector.extract_strided_slice %34 {offsets = [16, 0], sizes = [8, 128], strides = [1, 1]} : vector<64x128xf32> to vector<8x128xf32>
    %788 = arith.addf %787, %547 : vector<8x128xf32>
    %789 = arith.addf %788, %786 : vector<8x128xf32>
    %c0_599 = arith.constant 0 : index
    %c16 = arith.constant 16 : index
    %c0_600 = arith.constant 0 : index
    %790 = vector.load %arg34[%c0_599, %c16, %c0_600] : memref<1x64x128xf32, #tpu.memory_space<vmem>>, vector<1x8x128xf32>
    %791 = vector.shape_cast %790 : vector<1x8x128xf32> to vector<8x128xf32>
    %792 = vector.shape_cast %789 : vector<8x128xf32> to vector<1x8x128xf32>
    tpu.vector_store %arg34[%c0_599, %c16, %c0_600], %792 {strides = array<i32>} : memref<1x64x128xf32, #tpu.memory_space<vmem>>, vector<1x8x128xf32>,
    %793 = vector.extract_strided_slice %15 {offsets = [40, 0], sizes = [8, 32], strides = [1, 1]} : vector<64x32xf32> to vector<8x32xf32>
    %794 = vector.extract_strided_slice %22 {offsets = [40, 0], sizes = [8, 32], strides = [1, 1]} : vector<64x32xf32> to vector<8x32xf32>
    %795 = vector.extract_strided_slice %29 {offsets = [40, 0], sizes = [8, 32], strides = [1, 1]} : vector<64x32xf32> to vector<8x32xf32>
    %c0_601 = arith.constant 0 : index
    %c0_602 = arith.constant 0 : index
    %796 = vector.load %arg18[%c0_601, %c0_602] : memref<8x32xf32, #tpu.memory_space<vmem>>, vector<8x32xf32>
    %c0_603 = arith.constant 0 : index
    %c0_604 = arith.constant 0 : index
    %c0_605 = arith.constant 0 : index
    %797 = vector.load %arg16[%c0_603, %c0_604, %c0_605] : memref<3x32x32xbf16, #tpu.memory_space<vmem>>, vector<1x32x32xbf16>
    %798 = vector.shape_cast %797 : vector<1x32x32xbf16> to vector<32x32xbf16>
    %cst_606 = arith.constant dense<0.000000e+00> : vector<8x32xf32>
    %799 = tpu.matmul %641, %798, %cst_606 {dimension_numbers = #tpu.dot_dimension_numbers<[1], [0], [0], [1], [0, 0, 1, 1], [], []>} : vector<8x32xbf16>, vector<32x32xbf16>, vector<8x32xf32> -> vector<8x32xf32>
    %800 = arith.addf %793, %799 : vector<8x32xf32>
    %801 = arith.negf %800 : vector<8x32xf32>
    %802 = math.exp %801 : vector<8x32xf32>
    %cst_607 = arith.constant 1.000000e+00 : f32
    %803 = vector.broadcast %cst_607 : f32 to vector<8x32xf32>
    %804 = arith.addf %803, %802 : vector<8x32xf32>
    %805 = arith.divf %803, %804 : vector<8x32xf32>
    %c1_608 = arith.constant 1 : index
    %c0_609 = arith.constant 0 : index
    %c0_610 = arith.constant 0 : index
    %806 = vector.load %arg16[%c1_608, %c0_609, %c0_610] : memref<3x32x32xbf16, #tpu.memory_space<vmem>>, vector<1x32x32xbf16>
    %807 = vector.shape_cast %806 : vector<1x32x32xbf16> to vector<32x32xbf16>
    %cst_611 = arith.constant dense<0.000000e+00> : vector<8x32xf32>
    %808 = tpu.matmul %641, %807, %cst_611 {dimension_numbers = #tpu.dot_dimension_numbers<[1], [0], [0], [1], [0, 0, 1, 1], [], []>} : vector<8x32xbf16>, vector<32x32xbf16>, vector<8x32xf32> -> vector<8x32xf32>
    %809 = arith.addf %794, %808 : vector<8x32xf32>
    %810 = arith.negf %809 : vector<8x32xf32>
    %811 = math.exp %810 : vector<8x32xf32>
    %cst_612 = arith.constant 1.000000e+00 : f32
    %812 = vector.broadcast %cst_612 : f32 to vector<8x32xf32>
    %813 = arith.addf %812, %811 : vector<8x32xf32>
    %814 = arith.divf %812, %813 : vector<8x32xf32>
    %c2_613 = arith.constant 2 : index
    %c0_614 = arith.constant 0 : index
    %c0_615 = arith.constant 0 : index
    %815 = vector.load %arg16[%c2_613, %c0_614, %c0_615] : memref<3x32x32xbf16, #tpu.memory_space<vmem>>, vector<1x32x32xbf16>
    %816 = vector.shape_cast %815 : vector<1x32x32xbf16> to vector<32x32xbf16>
    %cst_616 = arith.constant dense<0.000000e+00> : vector<8x32xf32>
    %817 = tpu.matmul %641, %816, %cst_616 {dimension_numbers = #tpu.dot_dimension_numbers<[1], [0], [0], [1], [0, 0, 1, 1], [], []>} : vector<8x32xbf16>, vector<32x32xbf16>, vector<8x32xf32> -> vector<8x32xf32>
    %818 = arith.addf %817, %796 : vector<8x32xf32>
    %819 = arith.mulf %805, %818 : vector<8x32xf32>
    %820 = arith.addf %795, %819 : vector<8x32xf32>
    %821 = math.tanh %820 : vector<8x32xf32>
    %cst_617 = arith.constant 1.000000e+00 : f32
    %822 = vector.broadcast %cst_617 : f32 to vector<8x32xf32>
    %823 = arith.subf %822, %814 : vector<8x32xf32>
    %824 = arith.mulf %823, %821 : vector<8x32xf32>
    %825 = arith.mulf %814, %640 : vector<8x32xf32>
    %826 = arith.addf %824, %825 : vector<8x32xf32>
    %827 = arith.truncf %826 : vector<8x32xf32> to vector<8x32xbf16>
    %c0_618 = arith.constant 0 : index
    %c0_619 = arith.constant 0 : index
    %828 = vector.load %arg7[%c0_618, %c0_619] : memref<32x32xbf16, #tpu.memory_space<vmem>>, vector<32x32xbf16>
    %cst_620 = arith.constant dense<0.000000e+00> : vector<8x32xf32>
    %829 = tpu.matmul %827, %828, %cst_620 {dimension_numbers = #tpu.dot_dimension_numbers<[1], [0], [0], [1], [0, 0, 1, 1], [], []>} : vector<8x32xbf16>, vector<32x32xbf16>, vector<8x32xf32> -> vector<8x32xf32>
    %c0_621 = arith.constant 0 : index
    %c0_622 = arith.constant 0 : index
    %830 = vector.load %arg8[%c0_621, %c0_622] : memref<8x32xf32, #tpu.memory_space<vmem>>, vector<8x32xf32>
    %831 = arith.addf %829, %830 : vector<8x32xf32>
    %832 = math.tanh %831 : vector<8x32xf32>
    %833 = arith.truncf %832 : vector<8x32xf32> to vector<8x32xbf16>
    %c0_623 = arith.constant 0 : index
    %c0_624 = arith.constant 0 : index
    %c0_625 = arith.constant 0 : index
    %834 = vector.load %arg19[%c0_623, %c0_624, %c0_625] : memref<3x32x32xbf16, #tpu.memory_space<vmem>>, vector<1x32x32xbf16>
    %835 = vector.shape_cast %834 : vector<1x32x32xbf16> to vector<32x32xbf16>
    %cst_626 = arith.constant dense<0.000000e+00> : vector<8x32xf32>
    %836 = tpu.matmul %833, %835, %cst_626 {dimension_numbers = #tpu.dot_dimension_numbers<[1], [0], [0], [1], [0, 0, 1, 1], [], []>} : vector<8x32xbf16>, vector<32x32xbf16>, vector<8x32xf32> -> vector<8x32xf32>
    %c0_627 = arith.constant 0 : index
    %c0_628 = arith.constant 0 : index
    %c0_629 = arith.constant 0 : index
    %837 = vector.load %arg21[%c0_627, %c0_628, %c0_629] : memref<4x8x32xf32, #tpu.memory_space<vmem>>, vector<1x8x32xf32>
    %838 = vector.shape_cast %837 : vector<1x8x32xf32> to vector<8x32xf32>
    %839 = arith.addf %836, %838 : vector<8x32xf32>
    %c1_630 = arith.constant 1 : index
    %c0_631 = arith.constant 0 : index
    %c0_632 = arith.constant 0 : index
    %840 = vector.load %arg19[%c1_630, %c0_631, %c0_632] : memref<3x32x32xbf16, #tpu.memory_space<vmem>>, vector<1x32x32xbf16>
    %841 = vector.shape_cast %840 : vector<1x32x32xbf16> to vector<32x32xbf16>
    %cst_633 = arith.constant dense<0.000000e+00> : vector<8x32xf32>
    %842 = tpu.matmul %833, %841, %cst_633 {dimension_numbers = #tpu.dot_dimension_numbers<[1], [0], [0], [1], [0, 0, 1, 1], [], []>} : vector<8x32xbf16>, vector<32x32xbf16>, vector<8x32xf32> -> vector<8x32xf32>
    %c1_634 = arith.constant 1 : index
    %c0_635 = arith.constant 0 : index
    %c0_636 = arith.constant 0 : index
    %843 = vector.load %arg21[%c1_634, %c0_635, %c0_636] : memref<4x8x32xf32, #tpu.memory_space<vmem>>, vector<1x8x32xf32>
    %844 = vector.shape_cast %843 : vector<1x8x32xf32> to vector<8x32xf32>
    %845 = arith.addf %842, %844 : vector<8x32xf32>
    %c2_637 = arith.constant 2 : index
    %c0_638 = arith.constant 0 : index
    %c0_639 = arith.constant 0 : index
    %846 = vector.load %arg19[%c2_637, %c0_638, %c0_639] : memref<3x32x32xbf16, #tpu.memory_space<vmem>>, vector<1x32x32xbf16>
    %847 = vector.shape_cast %846 : vector<1x32x32xbf16> to vector<32x32xbf16>
    %cst_640 = arith.constant dense<0.000000e+00> : vector<8x32xf32>
    %848 = tpu.matmul %833, %847, %cst_640 {dimension_numbers = #tpu.dot_dimension_numbers<[1], [0], [0], [1], [0, 0, 1, 1], [], []>} : vector<8x32xbf16>, vector<32x32xbf16>, vector<8x32xf32> -> vector<8x32xf32>
    %c2_641 = arith.constant 2 : index
    %c0_642 = arith.constant 0 : index
    %c0_643 = arith.constant 0 : index
    %849 = vector.load %arg21[%c2_641, %c0_642, %c0_643] : memref<4x8x32xf32, #tpu.memory_space<vmem>>, vector<1x8x32xf32>
    %850 = vector.shape_cast %849 : vector<1x8x32xf32> to vector<8x32xf32>
    %851 = arith.addf %848, %850 : vector<8x32xf32>
    %c0_644 = arith.constant 0 : index
    %c0_645 = arith.constant 0 : index
    %852 = vector.load %arg26[%c0_644, %c0_645] : memref<32x128xbf16, #tpu.memory_space<vmem>>, vector<32x128xbf16>
    %cst_646 = arith.constant dense<0.000000e+00> : vector<8x128xf32>
    %853 = tpu.matmul %827, %852, %cst_646 {dimension_numbers = #tpu.dot_dimension_numbers<[1], [0], [0], [1], [0, 0, 1, 1], [], []>} : vector<8x32xbf16>, vector<32x128xbf16>, vector<8x128xf32> -> vector<8x128xf32>
    %c0_647 = arith.constant 0 : index
    %c0_648 = arith.constant 0 : index
    %854 = vector.load %arg27[%c0_647, %c0_648] : memref<32x128xbf16, #tpu.memory_space<vmem>>, vector<32x128xbf16>
    %cst_649 = arith.constant dense<0.000000e+00> : vector<8x128xf32>
    %855 = tpu.matmul %833, %854, %cst_649 {dimension_numbers = #tpu.dot_dimension_numbers<[1], [0], [0], [1], [0, 0, 1, 1], [], []>} : vector<8x32xbf16>, vector<32x128xbf16>, vector<8x128xf32> -> vector<8x128xf32>
    %856 = arith.addf %853, %855 : vector<8x128xf32>
    %c3_650 = arith.constant 3 : index
    %c0_651 = arith.constant 0 : index
    %c0_652 = arith.constant 0 : index
    %857 = vector.load %arg21[%c3_650, %c0_651, %c0_652] : memref<4x8x32xf32, #tpu.memory_space<vmem>>, vector<1x8x32xf32>
    %858 = vector.shape_cast %857 : vector<1x8x32xf32> to vector<8x32xf32>
    %c0_653 = arith.constant 0 : index
    %c0_654 = arith.constant 0 : index
    %c0_655 = arith.constant 0 : index
    %859 = vector.load %arg20[%c0_653, %c0_654, %c0_655] : memref<3x32x32xbf16, #tpu.memory_space<vmem>>, vector<1x32x32xbf16>
    %860 = vector.shape_cast %859 : vector<1x32x32xbf16> to vector<32x32xbf16>
    %cst_656 = arith.constant dense<0.000000e+00> : vector<8x32xf32>
    %861 = tpu.matmul %703, %860, %cst_656 {dimension_numbers = #tpu.dot_dimension_numbers<[1], [0], [0], [1], [0, 0, 1, 1], [], []>} : vector<8x32xbf16>, vector<32x32xbf16>, vector<8x32xf32> -> vector<8x32xf32>
    %862 = arith.addf %653, %861 : vector<8x32xf32>
    %863 = arith.negf %862 : vector<8x32xf32>
    %864 = math.exp %863 : vector<8x32xf32>
    %cst_657 = arith.constant 1.000000e+00 : f32
    %865 = vector.broadcast %cst_657 : f32 to vector<8x32xf32>
    %866 = arith.addf %865, %864 : vector<8x32xf32>
    %867 = arith.divf %865, %866 : vector<8x32xf32>
    %c1_658 = arith.constant 1 : index
    %c0_659 = arith.constant 0 : index
    %c0_660 = arith.constant 0 : index
    %868 = vector.load %arg20[%c1_658, %c0_659, %c0_660] : memref<3x32x32xbf16, #tpu.memory_space<vmem>>, vector<1x32x32xbf16>
    %869 = vector.shape_cast %868 : vector<1x32x32xbf16> to vector<32x32xbf16>
    %cst_661 = arith.constant dense<0.000000e+00> : vector<8x32xf32>
    %870 = tpu.matmul %703, %869, %cst_661 {dimension_numbers = #tpu.dot_dimension_numbers<[1], [0], [0], [1], [0, 0, 1, 1], [], []>} : vector<8x32xbf16>, vector<32x32xbf16>, vector<8x32xf32> -> vector<8x32xf32>
    %871 = arith.addf %659, %870 : vector<8x32xf32>
    %872 = arith.negf %871 : vector<8x32xf32>
    %873 = math.exp %872 : vector<8x32xf32>
    %cst_662 = arith.constant 1.000000e+00 : f32
    %874 = vector.broadcast %cst_662 : f32 to vector<8x32xf32>
    %875 = arith.addf %874, %873 : vector<8x32xf32>
    %876 = arith.divf %874, %875 : vector<8x32xf32>
    %c2_663 = arith.constant 2 : index
    %c0_664 = arith.constant 0 : index
    %c0_665 = arith.constant 0 : index
    %877 = vector.load %arg20[%c2_663, %c0_664, %c0_665] : memref<3x32x32xbf16, #tpu.memory_space<vmem>>, vector<1x32x32xbf16>
    %878 = vector.shape_cast %877 : vector<1x32x32xbf16> to vector<32x32xbf16>
    %cst_666 = arith.constant dense<0.000000e+00> : vector<8x32xf32>
    %879 = tpu.matmul %703, %878, %cst_666 {dimension_numbers = #tpu.dot_dimension_numbers<[1], [0], [0], [1], [0, 0, 1, 1], [], []>} : vector<8x32xbf16>, vector<32x32xbf16>, vector<8x32xf32> -> vector<8x32xf32>
    %880 = arith.addf %879, %858 : vector<8x32xf32>
    %881 = arith.mulf %867, %880 : vector<8x32xf32>
    %882 = arith.addf %665, %881 : vector<8x32xf32>
    %883 = math.tanh %882 : vector<8x32xf32>
    %cst_667 = arith.constant 1.000000e+00 : f32
    %884 = vector.broadcast %cst_667 : f32 to vector<8x32xf32>
    %885 = arith.subf %884, %876 : vector<8x32xf32>
    %886 = arith.mulf %885, %883 : vector<8x32xf32>
    %887 = arith.mulf %876, %702 : vector<8x32xf32>
    %888 = arith.addf %886, %887 : vector<8x32xf32>
    %889 = arith.truncf %888 : vector<8x32xf32> to vector<8x32xbf16>
    %c0_668 = arith.constant 0 : index
    %c0_669 = arith.constant 0 : index
    %890 = vector.load %arg9[%c0_668, %c0_669] : memref<32x32xbf16, #tpu.memory_space<vmem>>, vector<32x32xbf16>
    %cst_670 = arith.constant dense<0.000000e+00> : vector<8x32xf32>
    %891 = tpu.matmul %889, %890, %cst_670 {dimension_numbers = #tpu.dot_dimension_numbers<[1], [0], [0], [1], [0, 0, 1, 1], [], []>} : vector<8x32xbf16>, vector<32x32xbf16>, vector<8x32xf32> -> vector<8x32xf32>
    %c0_671 = arith.constant 0 : index
    %c0_672 = arith.constant 0 : index
    %892 = vector.load %arg10[%c0_671, %c0_672] : memref<8x32xf32, #tpu.memory_space<vmem>>, vector<8x32xf32>
    %893 = arith.addf %891, %892 : vector<8x32xf32>
    %894 = math.tanh %893 : vector<8x32xf32>
    %895 = arith.truncf %894 : vector<8x32xf32> to vector<8x32xbf16>
    %c0_673 = arith.constant 0 : index
    %c0_674 = arith.constant 0 : index
    %c0_675 = arith.constant 0 : index
    %896 = vector.load %arg22[%c0_673, %c0_674, %c0_675] : memref<3x32x32xbf16, #tpu.memory_space<vmem>>, vector<1x32x32xbf16>
    %897 = vector.shape_cast %896 : vector<1x32x32xbf16> to vector<32x32xbf16>
    %cst_676 = arith.constant dense<0.000000e+00> : vector<8x32xf32>
    %898 = tpu.matmul %895, %897, %cst_676 {dimension_numbers = #tpu.dot_dimension_numbers<[1], [0], [0], [1], [0, 0, 1, 1], [], []>} : vector<8x32xbf16>, vector<32x32xbf16>, vector<8x32xf32> -> vector<8x32xf32>
    %c0_677 = arith.constant 0 : index
    %c0_678 = arith.constant 0 : index
    %c0_679 = arith.constant 0 : index
    %899 = vector.load %arg24[%c0_677, %c0_678, %c0_679] : memref<4x8x32xf32, #tpu.memory_space<vmem>>, vector<1x8x32xf32>
    %900 = vector.shape_cast %899 : vector<1x8x32xf32> to vector<8x32xf32>
    %901 = arith.addf %898, %900 : vector<8x32xf32>
    %c1_680 = arith.constant 1 : index
    %c0_681 = arith.constant 0 : index
    %c0_682 = arith.constant 0 : index
    %902 = vector.load %arg22[%c1_680, %c0_681, %c0_682] : memref<3x32x32xbf16, #tpu.memory_space<vmem>>, vector<1x32x32xbf16>
    %903 = vector.shape_cast %902 : vector<1x32x32xbf16> to vector<32x32xbf16>
    %cst_683 = arith.constant dense<0.000000e+00> : vector<8x32xf32>
    %904 = tpu.matmul %895, %903, %cst_683 {dimension_numbers = #tpu.dot_dimension_numbers<[1], [0], [0], [1], [0, 0, 1, 1], [], []>} : vector<8x32xbf16>, vector<32x32xbf16>, vector<8x32xf32> -> vector<8x32xf32>
    %c1_684 = arith.constant 1 : index
    %c0_685 = arith.constant 0 : index
    %c0_686 = arith.constant 0 : index
    %905 = vector.load %arg24[%c1_684, %c0_685, %c0_686] : memref<4x8x32xf32, #tpu.memory_space<vmem>>, vector<1x8x32xf32>
    %906 = vector.shape_cast %905 : vector<1x8x32xf32> to vector<8x32xf32>
    %907 = arith.addf %904, %906 : vector<8x32xf32>
    %c2_687 = arith.constant 2 : index
    %c0_688 = arith.constant 0 : index
    %c0_689 = arith.constant 0 : index
    %908 = vector.load %arg22[%c2_687, %c0_688, %c0_689] : memref<3x32x32xbf16, #tpu.memory_space<vmem>>, vector<1x32x32xbf16>
    %909 = vector.shape_cast %908 : vector<1x32x32xbf16> to vector<32x32xbf16>
    %cst_690 = arith.constant dense<0.000000e+00> : vector<8x32xf32>
    %910 = tpu.matmul %895, %909, %cst_690 {dimension_numbers = #tpu.dot_dimension_numbers<[1], [0], [0], [1], [0, 0, 1, 1], [], []>} : vector<8x32xbf16>, vector<32x32xbf16>, vector<8x32xf32> -> vector<8x32xf32>
    %c2_691 = arith.constant 2 : index
    %c0_692 = arith.constant 0 : index
    %c0_693 = arith.constant 0 : index
    %911 = vector.load %arg24[%c2_691, %c0_692, %c0_693] : memref<4x8x32xf32, #tpu.memory_space<vmem>>, vector<1x8x32xf32>
    %912 = vector.shape_cast %911 : vector<1x8x32xf32> to vector<8x32xf32>
    %913 = arith.addf %910, %912 : vector<8x32xf32>
    %c0_694 = arith.constant 0 : index
    %c0_695 = arith.constant 0 : index
    %914 = vector.load %arg28[%c0_694, %c0_695] : memref<32x128xbf16, #tpu.memory_space<vmem>>, vector<32x128xbf16>
    %cst_696 = arith.constant dense<0.000000e+00> : vector<8x128xf32>
    %915 = tpu.matmul %889, %914, %cst_696 {dimension_numbers = #tpu.dot_dimension_numbers<[1], [0], [0], [1], [0, 0, 1, 1], [], []>} : vector<8x32xbf16>, vector<32x128xbf16>, vector<8x128xf32> -> vector<8x128xf32>
    %916 = arith.addf %670, %915 : vector<8x128xf32>
    %c0_697 = arith.constant 0 : index
    %c0_698 = arith.constant 0 : index
    %917 = vector.load %arg29[%c0_697, %c0_698] : memref<32x128xbf16, #tpu.memory_space<vmem>>, vector<32x128xbf16>
    %cst_699 = arith.constant dense<0.000000e+00> : vector<8x128xf32>
    %918 = tpu.matmul %895, %917, %cst_699 {dimension_numbers = #tpu.dot_dimension_numbers<[1], [0], [0], [1], [0, 0, 1, 1], [], []>} : vector<8x32xbf16>, vector<32x128xbf16>, vector<8x128xf32> -> vector<8x128xf32>
    %919 = arith.addf %916, %918 : vector<8x128xf32>
    %c3_700 = arith.constant 3 : index
    %c0_701 = arith.constant 0 : index
    %c0_702 = arith.constant 0 : index
    %920 = vector.load %arg24[%c3_700, %c0_701, %c0_702] : memref<4x8x32xf32, #tpu.memory_space<vmem>>, vector<1x8x32xf32>
    %921 = vector.shape_cast %920 : vector<1x8x32xf32> to vector<8x32xf32>
    %c0_703 = arith.constant 0 : index
    %c0_704 = arith.constant 0 : index
    %c0_705 = arith.constant 0 : index
    %922 = vector.load %arg23[%c0_703, %c0_704, %c0_705] : memref<3x32x32xbf16, #tpu.memory_space<vmem>>, vector<1x32x32xbf16>
    %923 = vector.shape_cast %922 : vector<1x32x32xbf16> to vector<32x32xbf16>
    %cst_706 = arith.constant dense<0.000000e+00> : vector<8x32xf32>
    %924 = tpu.matmul %766, %923, %cst_706 {dimension_numbers = #tpu.dot_dimension_numbers<[1], [0], [0], [1], [0, 0, 1, 1], [], []>} : vector<8x32xbf16>, vector<32x32xbf16>, vector<8x32xf32> -> vector<8x32xf32>
    %925 = arith.addf %715, %924 : vector<8x32xf32>
    %926 = arith.negf %925 : vector<8x32xf32>
    %927 = math.exp %926 : vector<8x32xf32>
    %cst_707 = arith.constant 1.000000e+00 : f32
    %928 = vector.broadcast %cst_707 : f32 to vector<8x32xf32>
    %929 = arith.addf %928, %927 : vector<8x32xf32>
    %930 = arith.divf %928, %929 : vector<8x32xf32>
    %c1_708 = arith.constant 1 : index
    %c0_709 = arith.constant 0 : index
    %c0_710 = arith.constant 0 : index
    %931 = vector.load %arg23[%c1_708, %c0_709, %c0_710] : memref<3x32x32xbf16, #tpu.memory_space<vmem>>, vector<1x32x32xbf16>
    %932 = vector.shape_cast %931 : vector<1x32x32xbf16> to vector<32x32xbf16>
    %cst_711 = arith.constant dense<0.000000e+00> : vector<8x32xf32>
    %933 = tpu.matmul %766, %932, %cst_711 {dimension_numbers = #tpu.dot_dimension_numbers<[1], [0], [0], [1], [0, 0, 1, 1], [], []>} : vector<8x32xbf16>, vector<32x32xbf16>, vector<8x32xf32> -> vector<8x32xf32>
    %934 = arith.addf %721, %933 : vector<8x32xf32>
    %935 = arith.negf %934 : vector<8x32xf32>
    %936 = math.exp %935 : vector<8x32xf32>
    %cst_712 = arith.constant 1.000000e+00 : f32
    %937 = vector.broadcast %cst_712 : f32 to vector<8x32xf32>
    %938 = arith.addf %937, %936 : vector<8x32xf32>
    %939 = arith.divf %937, %938 : vector<8x32xf32>
    %c2_713 = arith.constant 2 : index
    %c0_714 = arith.constant 0 : index
    %c0_715 = arith.constant 0 : index
    %940 = vector.load %arg23[%c2_713, %c0_714, %c0_715] : memref<3x32x32xbf16, #tpu.memory_space<vmem>>, vector<1x32x32xbf16>
    %941 = vector.shape_cast %940 : vector<1x32x32xbf16> to vector<32x32xbf16>
    %cst_716 = arith.constant dense<0.000000e+00> : vector<8x32xf32>
    %942 = tpu.matmul %766, %941, %cst_716 {dimension_numbers = #tpu.dot_dimension_numbers<[1], [0], [0], [1], [0, 0, 1, 1], [], []>} : vector<8x32xbf16>, vector<32x32xbf16>, vector<8x32xf32> -> vector<8x32xf32>
    %943 = arith.addf %942, %921 : vector<8x32xf32>
    %944 = arith.mulf %930, %943 : vector<8x32xf32>
    %945 = arith.addf %727, %944 : vector<8x32xf32>
    %946 = math.tanh %945 : vector<8x32xf32>
    %cst_717 = arith.constant 1.000000e+00 : f32
    %947 = vector.broadcast %cst_717 : f32 to vector<8x32xf32>
    %948 = arith.subf %947, %939 : vector<8x32xf32>
    %949 = arith.mulf %948, %946 : vector<8x32xf32>
    %950 = arith.mulf %939, %765 : vector<8x32xf32>
    %951 = arith.addf %949, %950 : vector<8x32xf32>
    %952 = arith.truncf %951 : vector<8x32xf32> to vector<8x32xbf16>
    %c0_718 = arith.constant 0 : index
    %c0_719 = arith.constant 0 : index
    %953 = vector.load %arg11[%c0_718, %c0_719] : memref<32x32xbf16, #tpu.memory_space<vmem>>, vector<32x32xbf16>
    %cst_720 = arith.constant dense<0.000000e+00> : vector<8x32xf32>
    %954 = tpu.matmul %952, %953, %cst_720 {dimension_numbers = #tpu.dot_dimension_numbers<[1], [0], [0], [1], [0, 0, 1, 1], [], []>} : vector<8x32xbf16>, vector<32x32xbf16>, vector<8x32xf32> -> vector<8x32xf32>
    %c0_721 = arith.constant 0 : index
    %c0_722 = arith.constant 0 : index
    %955 = vector.load %arg12[%c0_721, %c0_722] : memref<8x32xf32, #tpu.memory_space<vmem>>, vector<8x32xf32>
    %956 = arith.addf %954, %955 : vector<8x32xf32>
    %957 = math.tanh %956 : vector<8x32xf32>
    %958 = arith.truncf %957 : vector<8x32xf32> to vector<8x32xbf16>
    %c0_723 = arith.constant 0 : index
    %c0_724 = arith.constant 0 : index
    %959 = vector.load %arg13[%c0_723, %c0_724] : memref<32x32xbf16, #tpu.memory_space<vmem>>, vector<32x32xbf16>
    %cst_725 = arith.constant dense<0.000000e+00> : vector<8x32xf32>
    %960 = tpu.matmul %958, %959, %cst_725 {dimension_numbers = #tpu.dot_dimension_numbers<[1], [0], [0], [1], [0, 0, 1, 1], [], []>} : vector<8x32xbf16>, vector<32x32xbf16>, vector<8x32xf32> -> vector<8x32xf32>
    %c0_726 = arith.constant 0 : index
    %c0_727 = arith.constant 0 : index
    %961 = vector.load %arg14[%c0_726, %c0_727] : memref<8x32xf32, #tpu.memory_space<vmem>>, vector<8x32xf32>
    %962 = arith.addf %960, %961 : vector<8x32xf32>
    %963 = math.tanh %962 : vector<8x32xf32>
    %c0_728 = arith.constant 0 : index
    %c0_729 = arith.constant 0 : index
    %964 = vector.load %arg30[%c0_728, %c0_729] : memref<32x128xbf16, #tpu.memory_space<vmem>>, vector<32x128xbf16>
    %cst_730 = arith.constant dense<0.000000e+00> : vector<8x128xf32>
    %965 = tpu.matmul %952, %964, %cst_730 {dimension_numbers = #tpu.dot_dimension_numbers<[1], [0], [0], [1], [0, 0, 1, 1], [], []>} : vector<8x32xbf16>, vector<32x128xbf16>, vector<8x128xf32> -> vector<8x128xf32>
    %c0_731 = arith.constant 0 : index
    %c0_732 = arith.constant 0 : index
    %966 = vector.load %arg31[%c0_731, %c0_732] : memref<32x128xbf16, #tpu.memory_space<vmem>>, vector<32x128xbf16>
    %cst_733 = arith.constant dense<0.000000e+00> : vector<8x128xf32>
    %967 = tpu.matmul %958, %966, %cst_733 {dimension_numbers = #tpu.dot_dimension_numbers<[1], [0], [0], [1], [0, 0, 1, 1], [], []>} : vector<8x32xbf16>, vector<32x128xbf16>, vector<8x128xf32> -> vector<8x128xf32>
    %968 = arith.addf %965, %967 : vector<8x128xf32>
    %969 = arith.truncf %963 : vector<8x32xf32> to vector<8x32xbf16>
    %c0_734 = arith.constant 0 : index
    %c0_735 = arith.constant 0 : index
    %970 = vector.load %arg32[%c0_734, %c0_735] : memref<32x128xbf16, #tpu.memory_space<vmem>>, vector<32x128xbf16>
    %cst_736 = arith.constant dense<0.000000e+00> : vector<8x128xf32>
    %971 = tpu.matmul %969, %970, %cst_736 {dimension_numbers = #tpu.dot_dimension_numbers<[1], [0], [0], [1], [0, 0, 1, 1], [], []>} : vector<8x32xbf16>, vector<32x128xbf16>, vector<8x128xf32> -> vector<8x128xf32>
    %972 = arith.addf %968, %971 : vector<8x128xf32>
    %973 = vector.extract_strided_slice %34 {offsets = [24, 0], sizes = [8, 128], strides = [1, 1]} : vector<64x128xf32> to vector<8x128xf32>
    %974 = arith.addf %973, %733 : vector<8x128xf32>
    %975 = arith.addf %974, %972 : vector<8x128xf32>
    %c0_737 = arith.constant 0 : index
    %c24 = arith.constant 24 : index
    %c0_738 = arith.constant 0 : index
    %976 = vector.load %arg34[%c0_737, %c24, %c0_738] : memref<1x64x128xf32, #tpu.memory_space<vmem>>, vector<1x8x128xf32>
    %977 = vector.shape_cast %976 : vector<1x8x128xf32> to vector<8x128xf32>
    %978 = vector.shape_cast %975 : vector<8x128xf32> to vector<1x8x128xf32>
    tpu.vector_store %arg34[%c0_737, %c24, %c0_738], %978 {strides = array<i32>} : memref<1x64x128xf32, #tpu.memory_space<vmem>>, vector<1x8x128xf32>,
    %979 = vector.extract_strided_slice %15 {offsets = [48, 0], sizes = [8, 32], strides = [1, 1]} : vector<64x32xf32> to vector<8x32xf32>
    %980 = vector.extract_strided_slice %22 {offsets = [48, 0], sizes = [8, 32], strides = [1, 1]} : vector<64x32xf32> to vector<8x32xf32>
    %981 = vector.extract_strided_slice %29 {offsets = [48, 0], sizes = [8, 32], strides = [1, 1]} : vector<64x32xf32> to vector<8x32xf32>
    %c0_739 = arith.constant 0 : index
    %c0_740 = arith.constant 0 : index
    %982 = vector.load %arg18[%c0_739, %c0_740] : memref<8x32xf32, #tpu.memory_space<vmem>>, vector<8x32xf32>
    %c0_741 = arith.constant 0 : index
    %c0_742 = arith.constant 0 : index
    %c0_743 = arith.constant 0 : index
    %983 = vector.load %arg16[%c0_741, %c0_742, %c0_743] : memref<3x32x32xbf16, #tpu.memory_space<vmem>>, vector<1x32x32xbf16>
    %984 = vector.shape_cast %983 : vector<1x32x32xbf16> to vector<32x32xbf16>
    %cst_744 = arith.constant dense<0.000000e+00> : vector<8x32xf32>
    %985 = tpu.matmul %827, %984, %cst_744 {dimension_numbers = #tpu.dot_dimension_numbers<[1], [0], [0], [1], [0, 0, 1, 1], [], []>} : vector<8x32xbf16>, vector<32x32xbf16>, vector<8x32xf32> -> vector<8x32xf32>
    %986 = arith.addf %979, %985 : vector<8x32xf32>
    %987 = arith.negf %986 : vector<8x32xf32>
    %988 = math.exp %987 : vector<8x32xf32>
    %cst_745 = arith.constant 1.000000e+00 : f32
    %989 = vector.broadcast %cst_745 : f32 to vector<8x32xf32>
    %990 = arith.addf %989, %988 : vector<8x32xf32>
    %991 = arith.divf %989, %990 : vector<8x32xf32>
    %c1_746 = arith.constant 1 : index
    %c0_747 = arith.constant 0 : index
    %c0_748 = arith.constant 0 : index
    %992 = vector.load %arg16[%c1_746, %c0_747, %c0_748] : memref<3x32x32xbf16, #tpu.memory_space<vmem>>, vector<1x32x32xbf16>
    %993 = vector.shape_cast %992 : vector<1x32x32xbf16> to vector<32x32xbf16>
    %cst_749 = arith.constant dense<0.000000e+00> : vector<8x32xf32>
    %994 = tpu.matmul %827, %993, %cst_749 {dimension_numbers = #tpu.dot_dimension_numbers<[1], [0], [0], [1], [0, 0, 1, 1], [], []>} : vector<8x32xbf16>, vector<32x32xbf16>, vector<8x32xf32> -> vector<8x32xf32>
    %995 = arith.addf %980, %994 : vector<8x32xf32>
    %996 = arith.negf %995 : vector<8x32xf32>
    %997 = math.exp %996 : vector<8x32xf32>
    %cst_750 = arith.constant 1.000000e+00 : f32
    %998 = vector.broadcast %cst_750 : f32 to vector<8x32xf32>
    %999 = arith.addf %998, %997 : vector<8x32xf32>
    %1000 = arith.divf %998, %999 : vector<8x32xf32>
    %c2_751 = arith.constant 2 : index
    %c0_752 = arith.constant 0 : index
    %c0_753 = arith.constant 0 : index
    %1001 = vector.load %arg16[%c2_751, %c0_752, %c0_753] : memref<3x32x32xbf16, #tpu.memory_space<vmem>>, vector<1x32x32xbf16>
    %1002 = vector.shape_cast %1001 : vector<1x32x32xbf16> to vector<32x32xbf16>
    %cst_754 = arith.constant dense<0.000000e+00> : vector<8x32xf32>
    %1003 = tpu.matmul %827, %1002, %cst_754 {dimension_numbers = #tpu.dot_dimension_numbers<[1], [0], [0], [1], [0, 0, 1, 1], [], []>} : vector<8x32xbf16>, vector<32x32xbf16>, vector<8x32xf32> -> vector<8x32xf32>
    %1004 = arith.addf %1003, %982 : vector<8x32xf32>
    %1005 = arith.mulf %991, %1004 : vector<8x32xf32>
    %1006 = arith.addf %981, %1005 : vector<8x32xf32>
    %1007 = math.tanh %1006 : vector<8x32xf32>
    %cst_755 = arith.constant 1.000000e+00 : f32
    %1008 = vector.broadcast %cst_755 : f32 to vector<8x32xf32>
    %1009 = arith.subf %1008, %1000 : vector<8x32xf32>
    %1010 = arith.mulf %1009, %1007 : vector<8x32xf32>
    %1011 = arith.mulf %1000, %826 : vector<8x32xf32>
    %1012 = arith.addf %1010, %1011 : vector<8x32xf32>
    %1013 = arith.truncf %1012 : vector<8x32xf32> to vector<8x32xbf16>
    %c0_756 = arith.constant 0 : index
    %c0_757 = arith.constant 0 : index
    %1014 = vector.load %arg7[%c0_756, %c0_757] : memref<32x32xbf16, #tpu.memory_space<vmem>>, vector<32x32xbf16>
    %cst_758 = arith.constant dense<0.000000e+00> : vector<8x32xf32>
    %1015 = tpu.matmul %1013, %1014, %cst_758 {dimension_numbers = #tpu.dot_dimension_numbers<[1], [0], [0], [1], [0, 0, 1, 1], [], []>} : vector<8x32xbf16>, vector<32x32xbf16>, vector<8x32xf32> -> vector<8x32xf32>
    %c0_759 = arith.constant 0 : index
    %c0_760 = arith.constant 0 : index
    %1016 = vector.load %arg8[%c0_759, %c0_760] : memref<8x32xf32, #tpu.memory_space<vmem>>, vector<8x32xf32>
    %1017 = arith.addf %1015, %1016 : vector<8x32xf32>
    %1018 = math.tanh %1017 : vector<8x32xf32>
    %1019 = arith.truncf %1018 : vector<8x32xf32> to vector<8x32xbf16>
    %c0_761 = arith.constant 0 : index
    %c0_762 = arith.constant 0 : index
    %c0_763 = arith.constant 0 : index
    %1020 = vector.load %arg19[%c0_761, %c0_762, %c0_763] : memref<3x32x32xbf16, #tpu.memory_space<vmem>>, vector<1x32x32xbf16>
    %1021 = vector.shape_cast %1020 : vector<1x32x32xbf16> to vector<32x32xbf16>
    %cst_764 = arith.constant dense<0.000000e+00> : vector<8x32xf32>
    %1022 = tpu.matmul %1019, %1021, %cst_764 {dimension_numbers = #tpu.dot_dimension_numbers<[1], [0], [0], [1], [0, 0, 1, 1], [], []>} : vector<8x32xbf16>, vector<32x32xbf16>, vector<8x32xf32> -> vector<8x32xf32>
    %c0_765 = arith.constant 0 : index
    %c0_766 = arith.constant 0 : index
    %c0_767 = arith.constant 0 : index
    %1023 = vector.load %arg21[%c0_765, %c0_766, %c0_767] : memref<4x8x32xf32, #tpu.memory_space<vmem>>, vector<1x8x32xf32>
    %1024 = vector.shape_cast %1023 : vector<1x8x32xf32> to vector<8x32xf32>
    %1025 = arith.addf %1022, %1024 : vector<8x32xf32>
    %c1_768 = arith.constant 1 : index
    %c0_769 = arith.constant 0 : index
    %c0_770 = arith.constant 0 : index
    %1026 = vector.load %arg19[%c1_768, %c0_769, %c0_770] : memref<3x32x32xbf16, #tpu.memory_space<vmem>>, vector<1x32x32xbf16>
    %1027 = vector.shape_cast %1026 : vector<1x32x32xbf16> to vector<32x32xbf16>
    %cst_771 = arith.constant dense<0.000000e+00> : vector<8x32xf32>
    %1028 = tpu.matmul %1019, %1027, %cst_771 {dimension_numbers = #tpu.dot_dimension_numbers<[1], [0], [0], [1], [0, 0, 1, 1], [], []>} : vector<8x32xbf16>, vector<32x32xbf16>, vector<8x32xf32> -> vector<8x32xf32>
    %c1_772 = arith.constant 1 : index
    %c0_773 = arith.constant 0 : index
    %c0_774 = arith.constant 0 : index
    %1029 = vector.load %arg21[%c1_772, %c0_773, %c0_774] : memref<4x8x32xf32, #tpu.memory_space<vmem>>, vector<1x8x32xf32>
    %1030 = vector.shape_cast %1029 : vector<1x8x32xf32> to vector<8x32xf32>
    %1031 = arith.addf %1028, %1030 : vector<8x32xf32>
    %c2_775 = arith.constant 2 : index
    %c0_776 = arith.constant 0 : index
    %c0_777 = arith.constant 0 : index
    %1032 = vector.load %arg19[%c2_775, %c0_776, %c0_777] : memref<3x32x32xbf16, #tpu.memory_space<vmem>>, vector<1x32x32xbf16>
    %1033 = vector.shape_cast %1032 : vector<1x32x32xbf16> to vector<32x32xbf16>
    %cst_778 = arith.constant dense<0.000000e+00> : vector<8x32xf32>
    %1034 = tpu.matmul %1019, %1033, %cst_778 {dimension_numbers = #tpu.dot_dimension_numbers<[1], [0], [0], [1], [0, 0, 1, 1], [], []>} : vector<8x32xbf16>, vector<32x32xbf16>, vector<8x32xf32> -> vector<8x32xf32>
    %c2_779 = arith.constant 2 : index
    %c0_780 = arith.constant 0 : index
    %c0_781 = arith.constant 0 : index
    %1035 = vector.load %arg21[%c2_779, %c0_780, %c0_781] : memref<4x8x32xf32, #tpu.memory_space<vmem>>, vector<1x8x32xf32>
    %1036 = vector.shape_cast %1035 : vector<1x8x32xf32> to vector<8x32xf32>
    %1037 = arith.addf %1034, %1036 : vector<8x32xf32>
    %c0_782 = arith.constant 0 : index
    %c0_783 = arith.constant 0 : index
    %1038 = vector.load %arg26[%c0_782, %c0_783] : memref<32x128xbf16, #tpu.memory_space<vmem>>, vector<32x128xbf16>
    %cst_784 = arith.constant dense<0.000000e+00> : vector<8x128xf32>
    %1039 = tpu.matmul %1013, %1038, %cst_784 {dimension_numbers = #tpu.dot_dimension_numbers<[1], [0], [0], [1], [0, 0, 1, 1], [], []>} : vector<8x32xbf16>, vector<32x128xbf16>, vector<8x128xf32> -> vector<8x128xf32>
    %c0_785 = arith.constant 0 : index
    %c0_786 = arith.constant 0 : index
    %1040 = vector.load %arg27[%c0_785, %c0_786] : memref<32x128xbf16, #tpu.memory_space<vmem>>, vector<32x128xbf16>
    %cst_787 = arith.constant dense<0.000000e+00> : vector<8x128xf32>
    %1041 = tpu.matmul %1019, %1040, %cst_787 {dimension_numbers = #tpu.dot_dimension_numbers<[1], [0], [0], [1], [0, 0, 1, 1], [], []>} : vector<8x32xbf16>, vector<32x128xbf16>, vector<8x128xf32> -> vector<8x128xf32>
    %1042 = arith.addf %1039, %1041 : vector<8x128xf32>
    %c3_788 = arith.constant 3 : index
    %c0_789 = arith.constant 0 : index
    %c0_790 = arith.constant 0 : index
    %1043 = vector.load %arg21[%c3_788, %c0_789, %c0_790] : memref<4x8x32xf32, #tpu.memory_space<vmem>>, vector<1x8x32xf32>
    %1044 = vector.shape_cast %1043 : vector<1x8x32xf32> to vector<8x32xf32>
    %c0_791 = arith.constant 0 : index
    %c0_792 = arith.constant 0 : index
    %c0_793 = arith.constant 0 : index
    %1045 = vector.load %arg20[%c0_791, %c0_792, %c0_793] : memref<3x32x32xbf16, #tpu.memory_space<vmem>>, vector<1x32x32xbf16>
    %1046 = vector.shape_cast %1045 : vector<1x32x32xbf16> to vector<32x32xbf16>
    %cst_794 = arith.constant dense<0.000000e+00> : vector<8x32xf32>
    %1047 = tpu.matmul %889, %1046, %cst_794 {dimension_numbers = #tpu.dot_dimension_numbers<[1], [0], [0], [1], [0, 0, 1, 1], [], []>} : vector<8x32xbf16>, vector<32x32xbf16>, vector<8x32xf32> -> vector<8x32xf32>
    %1048 = arith.addf %839, %1047 : vector<8x32xf32>
    %1049 = arith.negf %1048 : vector<8x32xf32>
    %1050 = math.exp %1049 : vector<8x32xf32>
    %cst_795 = arith.constant 1.000000e+00 : f32
    %1051 = vector.broadcast %cst_795 : f32 to vector<8x32xf32>
    %1052 = arith.addf %1051, %1050 : vector<8x32xf32>
    %1053 = arith.divf %1051, %1052 : vector<8x32xf32>
    %c1_796 = arith.constant 1 : index
    %c0_797 = arith.constant 0 : index
    %c0_798 = arith.constant 0 : index
    %1054 = vector.load %arg20[%c1_796, %c0_797, %c0_798] : memref<3x32x32xbf16, #tpu.memory_space<vmem>>, vector<1x32x32xbf16>
    %1055 = vector.shape_cast %1054 : vector<1x32x32xbf16> to vector<32x32xbf16>
    %cst_799 = arith.constant dense<0.000000e+00> : vector<8x32xf32>
    %1056 = tpu.matmul %889, %1055, %cst_799 {dimension_numbers = #tpu.dot_dimension_numbers<[1], [0], [0], [1], [0, 0, 1, 1], [], []>} : vector<8x32xbf16>, vector<32x32xbf16>, vector<8x32xf32> -> vector<8x32xf32>
    %1057 = arith.addf %845, %1056 : vector<8x32xf32>
    %1058 = arith.negf %1057 : vector<8x32xf32>
    %1059 = math.exp %1058 : vector<8x32xf32>
    %cst_800 = arith.constant 1.000000e+00 : f32
    %1060 = vector.broadcast %cst_800 : f32 to vector<8x32xf32>
    %1061 = arith.addf %1060, %1059 : vector<8x32xf32>
    %1062 = arith.divf %1060, %1061 : vector<8x32xf32>
    %c2_801 = arith.constant 2 : index
    %c0_802 = arith.constant 0 : index
    %c0_803 = arith.constant 0 : index
    %1063 = vector.load %arg20[%c2_801, %c0_802, %c0_803] : memref<3x32x32xbf16, #tpu.memory_space<vmem>>, vector<1x32x32xbf16>
    %1064 = vector.shape_cast %1063 : vector<1x32x32xbf16> to vector<32x32xbf16>
    %cst_804 = arith.constant dense<0.000000e+00> : vector<8x32xf32>
    %1065 = tpu.matmul %889, %1064, %cst_804 {dimension_numbers = #tpu.dot_dimension_numbers<[1], [0], [0], [1], [0, 0, 1, 1], [], []>} : vector<8x32xbf16>, vector<32x32xbf16>, vector<8x32xf32> -> vector<8x32xf32>
    %1066 = arith.addf %1065, %1044 : vector<8x32xf32>
    %1067 = arith.mulf %1053, %1066 : vector<8x32xf32>
    %1068 = arith.addf %851, %1067 : vector<8x32xf32>
    %1069 = math.tanh %1068 : vector<8x32xf32>
    %cst_805 = arith.constant 1.000000e+00 : f32
    %1070 = vector.broadcast %cst_805 : f32 to vector<8x32xf32>
    %1071 = arith.subf %1070, %1062 : vector<8x32xf32>
    %1072 = arith.mulf %1071, %1069 : vector<8x32xf32>
    %1073 = arith.mulf %1062, %888 : vector<8x32xf32>
    %1074 = arith.addf %1072, %1073 : vector<8x32xf32>
    %1075 = arith.truncf %1074 : vector<8x32xf32> to vector<8x32xbf16>
    %c0_806 = arith.constant 0 : index
    %c0_807 = arith.constant 0 : index
    %1076 = vector.load %arg9[%c0_806, %c0_807] : memref<32x32xbf16, #tpu.memory_space<vmem>>, vector<32x32xbf16>
    %cst_808 = arith.constant dense<0.000000e+00> : vector<8x32xf32>
    %1077 = tpu.matmul %1075, %1076, %cst_808 {dimension_numbers = #tpu.dot_dimension_numbers<[1], [0], [0], [1], [0, 0, 1, 1], [], []>} : vector<8x32xbf16>, vector<32x32xbf16>, vector<8x32xf32> -> vector<8x32xf32>
    %c0_809 = arith.constant 0 : index
    %c0_810 = arith.constant 0 : index
    %1078 = vector.load %arg10[%c0_809, %c0_810] : memref<8x32xf32, #tpu.memory_space<vmem>>, vector<8x32xf32>
    %1079 = arith.addf %1077, %1078 : vector<8x32xf32>
    %1080 = math.tanh %1079 : vector<8x32xf32>
    %1081 = arith.truncf %1080 : vector<8x32xf32> to vector<8x32xbf16>
    %c0_811 = arith.constant 0 : index
    %c0_812 = arith.constant 0 : index
    %c0_813 = arith.constant 0 : index
    %1082 = vector.load %arg22[%c0_811, %c0_812, %c0_813] : memref<3x32x32xbf16, #tpu.memory_space<vmem>>, vector<1x32x32xbf16>
    %1083 = vector.shape_cast %1082 : vector<1x32x32xbf16> to vector<32x32xbf16>
    %cst_814 = arith.constant dense<0.000000e+00> : vector<8x32xf32>
    %1084 = tpu.matmul %1081, %1083, %cst_814 {dimension_numbers = #tpu.dot_dimension_numbers<[1], [0], [0], [1], [0, 0, 1, 1], [], []>} : vector<8x32xbf16>, vector<32x32xbf16>, vector<8x32xf32> -> vector<8x32xf32>
    %c0_815 = arith.constant 0 : index
    %c0_816 = arith.constant 0 : index
    %c0_817 = arith.constant 0 : index
    %1085 = vector.load %arg24[%c0_815, %c0_816, %c0_817] : memref<4x8x32xf32, #tpu.memory_space<vmem>>, vector<1x8x32xf32>
    %1086 = vector.shape_cast %1085 : vector<1x8x32xf32> to vector<8x32xf32>
    %1087 = arith.addf %1084, %1086 : vector<8x32xf32>
    %c1_818 = arith.constant 1 : index
    %c0_819 = arith.constant 0 : index
    %c0_820 = arith.constant 0 : index
    %1088 = vector.load %arg22[%c1_818, %c0_819, %c0_820] : memref<3x32x32xbf16, #tpu.memory_space<vmem>>, vector<1x32x32xbf16>
    %1089 = vector.shape_cast %1088 : vector<1x32x32xbf16> to vector<32x32xbf16>
    %cst_821 = arith.constant dense<0.000000e+00> : vector<8x32xf32>
    %1090 = tpu.matmul %1081, %1089, %cst_821 {dimension_numbers = #tpu.dot_dimension_numbers<[1], [0], [0], [1], [0, 0, 1, 1], [], []>} : vector<8x32xbf16>, vector<32x32xbf16>, vector<8x32xf32> -> vector<8x32xf32>
    %c1_822 = arith.constant 1 : index
    %c0_823 = arith.constant 0 : index
    %c0_824 = arith.constant 0 : index
    %1091 = vector.load %arg24[%c1_822, %c0_823, %c0_824] : memref<4x8x32xf32, #tpu.memory_space<vmem>>, vector<1x8x32xf32>
    %1092 = vector.shape_cast %1091 : vector<1x8x32xf32> to vector<8x32xf32>
    %1093 = arith.addf %1090, %1092 : vector<8x32xf32>
    %c2_825 = arith.constant 2 : index
    %c0_826 = arith.constant 0 : index
    %c0_827 = arith.constant 0 : index
    %1094 = vector.load %arg22[%c2_825, %c0_826, %c0_827] : memref<3x32x32xbf16, #tpu.memory_space<vmem>>, vector<1x32x32xbf16>
    %1095 = vector.shape_cast %1094 : vector<1x32x32xbf16> to vector<32x32xbf16>
    %cst_828 = arith.constant dense<0.000000e+00> : vector<8x32xf32>
    %1096 = tpu.matmul %1081, %1095, %cst_828 {dimension_numbers = #tpu.dot_dimension_numbers<[1], [0], [0], [1], [0, 0, 1, 1], [], []>} : vector<8x32xbf16>, vector<32x32xbf16>, vector<8x32xf32> -> vector<8x32xf32>
    %c2_829 = arith.constant 2 : index
    %c0_830 = arith.constant 0 : index
    %c0_831 = arith.constant 0 : index
    %1097 = vector.load %arg24[%c2_829, %c0_830, %c0_831] : memref<4x8x32xf32, #tpu.memory_space<vmem>>, vector<1x8x32xf32>
    %1098 = vector.shape_cast %1097 : vector<1x8x32xf32> to vector<8x32xf32>
    %1099 = arith.addf %1096, %1098 : vector<8x32xf32>
    %c0_832 = arith.constant 0 : index
    %c0_833 = arith.constant 0 : index
    %1100 = vector.load %arg28[%c0_832, %c0_833] : memref<32x128xbf16, #tpu.memory_space<vmem>>, vector<32x128xbf16>
    %cst_834 = arith.constant dense<0.000000e+00> : vector<8x128xf32>
    %1101 = tpu.matmul %1075, %1100, %cst_834 {dimension_numbers = #tpu.dot_dimension_numbers<[1], [0], [0], [1], [0, 0, 1, 1], [], []>} : vector<8x32xbf16>, vector<32x128xbf16>, vector<8x128xf32> -> vector<8x128xf32>
    %1102 = arith.addf %856, %1101 : vector<8x128xf32>
    %c0_835 = arith.constant 0 : index
    %c0_836 = arith.constant 0 : index
    %1103 = vector.load %arg29[%c0_835, %c0_836] : memref<32x128xbf16, #tpu.memory_space<vmem>>, vector<32x128xbf16>
    %cst_837 = arith.constant dense<0.000000e+00> : vector<8x128xf32>
    %1104 = tpu.matmul %1081, %1103, %cst_837 {dimension_numbers = #tpu.dot_dimension_numbers<[1], [0], [0], [1], [0, 0, 1, 1], [], []>} : vector<8x32xbf16>, vector<32x128xbf16>, vector<8x128xf32> -> vector<8x128xf32>
    %1105 = arith.addf %1102, %1104 : vector<8x128xf32>
    %c3_838 = arith.constant 3 : index
    %c0_839 = arith.constant 0 : index
    %c0_840 = arith.constant 0 : index
    %1106 = vector.load %arg24[%c3_838, %c0_839, %c0_840] : memref<4x8x32xf32, #tpu.memory_space<vmem>>, vector<1x8x32xf32>
    %1107 = vector.shape_cast %1106 : vector<1x8x32xf32> to vector<8x32xf32>
    %c0_841 = arith.constant 0 : index
    %c0_842 = arith.constant 0 : index
    %c0_843 = arith.constant 0 : index
    %1108 = vector.load %arg23[%c0_841, %c0_842, %c0_843] : memref<3x32x32xbf16, #tpu.memory_space<vmem>>, vector<1x32x32xbf16>
    %1109 = vector.shape_cast %1108 : vector<1x32x32xbf16> to vector<32x32xbf16>
    %cst_844 = arith.constant dense<0.000000e+00> : vector<8x32xf32>
    %1110 = tpu.matmul %952, %1109, %cst_844 {dimension_numbers = #tpu.dot_dimension_numbers<[1], [0], [0], [1], [0, 0, 1, 1], [], []>} : vector<8x32xbf16>, vector<32x32xbf16>, vector<8x32xf32> -> vector<8x32xf32>
    %1111 = arith.addf %901, %1110 : vector<8x32xf32>
    %1112 = arith.negf %1111 : vector<8x32xf32>
    %1113 = math.exp %1112 : vector<8x32xf32>
    %cst_845 = arith.constant 1.000000e+00 : f32
    %1114 = vector.broadcast %cst_845 : f32 to vector<8x32xf32>
    %1115 = arith.addf %1114, %1113 : vector<8x32xf32>
    %1116 = arith.divf %1114, %1115 : vector<8x32xf32>
    %c1_846 = arith.constant 1 : index
    %c0_847 = arith.constant 0 : index
    %c0_848 = arith.constant 0 : index
    %1117 = vector.load %arg23[%c1_846, %c0_847, %c0_848] : memref<3x32x32xbf16, #tpu.memory_space<vmem>>, vector<1x32x32xbf16>
    %1118 = vector.shape_cast %1117 : vector<1x32x32xbf16> to vector<32x32xbf16>
    %cst_849 = arith.constant dense<0.000000e+00> : vector<8x32xf32>
    %1119 = tpu.matmul %952, %1118, %cst_849 {dimension_numbers = #tpu.dot_dimension_numbers<[1], [0], [0], [1], [0, 0, 1, 1], [], []>} : vector<8x32xbf16>, vector<32x32xbf16>, vector<8x32xf32> -> vector<8x32xf32>
    %1120 = arith.addf %907, %1119 : vector<8x32xf32>
    %1121 = arith.negf %1120 : vector<8x32xf32>
    %1122 = math.exp %1121 : vector<8x32xf32>
    %cst_850 = arith.constant 1.000000e+00 : f32
    %1123 = vector.broadcast %cst_850 : f32 to vector<8x32xf32>
    %1124 = arith.addf %1123, %1122 : vector<8x32xf32>
    %1125 = arith.divf %1123, %1124 : vector<8x32xf32>
    %c2_851 = arith.constant 2 : index
    %c0_852 = arith.constant 0 : index
    %c0_853 = arith.constant 0 : index
    %1126 = vector.load %arg23[%c2_851, %c0_852, %c0_853] : memref<3x32x32xbf16, #tpu.memory_space<vmem>>, vector<1x32x32xbf16>
    %1127 = vector.shape_cast %1126 : vector<1x32x32xbf16> to vector<32x32xbf16>
    %cst_854 = arith.constant dense<0.000000e+00> : vector<8x32xf32>
    %1128 = tpu.matmul %952, %1127, %cst_854 {dimension_numbers = #tpu.dot_dimension_numbers<[1], [0], [0], [1], [0, 0, 1, 1], [], []>} : vector<8x32xbf16>, vector<32x32xbf16>, vector<8x32xf32> -> vector<8x32xf32>
    %1129 = arith.addf %1128, %1107 : vector<8x32xf32>
    %1130 = arith.mulf %1116, %1129 : vector<8x32xf32>
    %1131 = arith.addf %913, %1130 : vector<8x32xf32>
    %1132 = math.tanh %1131 : vector<8x32xf32>
    %cst_855 = arith.constant 1.000000e+00 : f32
    %1133 = vector.broadcast %cst_855 : f32 to vector<8x32xf32>
    %1134 = arith.subf %1133, %1125 : vector<8x32xf32>
    %1135 = arith.mulf %1134, %1132 : vector<8x32xf32>
    %1136 = arith.mulf %1125, %951 : vector<8x32xf32>
    %1137 = arith.addf %1135, %1136 : vector<8x32xf32>
    %1138 = arith.truncf %1137 : vector<8x32xf32> to vector<8x32xbf16>
    %c0_856 = arith.constant 0 : index
    %c0_857 = arith.constant 0 : index
    %1139 = vector.load %arg11[%c0_856, %c0_857] : memref<32x32xbf16, #tpu.memory_space<vmem>>, vector<32x32xbf16>
    %cst_858 = arith.constant dense<0.000000e+00> : vector<8x32xf32>
    %1140 = tpu.matmul %1138, %1139, %cst_858 {dimension_numbers = #tpu.dot_dimension_numbers<[1], [0], [0], [1], [0, 0, 1, 1], [], []>} : vector<8x32xbf16>, vector<32x32xbf16>, vector<8x32xf32> -> vector<8x32xf32>
    %c0_859 = arith.constant 0 : index
    %c0_860 = arith.constant 0 : index
    %1141 = vector.load %arg12[%c0_859, %c0_860] : memref<8x32xf32, #tpu.memory_space<vmem>>, vector<8x32xf32>
    %1142 = arith.addf %1140, %1141 : vector<8x32xf32>
    %1143 = math.tanh %1142 : vector<8x32xf32>
    %1144 = arith.truncf %1143 : vector<8x32xf32> to vector<8x32xbf16>
    %c0_861 = arith.constant 0 : index
    %c0_862 = arith.constant 0 : index
    %1145 = vector.load %arg13[%c0_861, %c0_862] : memref<32x32xbf16, #tpu.memory_space<vmem>>, vector<32x32xbf16>
    %cst_863 = arith.constant dense<0.000000e+00> : vector<8x32xf32>
    %1146 = tpu.matmul %1144, %1145, %cst_863 {dimension_numbers = #tpu.dot_dimension_numbers<[1], [0], [0], [1], [0, 0, 1, 1], [], []>} : vector<8x32xbf16>, vector<32x32xbf16>, vector<8x32xf32> -> vector<8x32xf32>
    %c0_864 = arith.constant 0 : index
    %c0_865 = arith.constant 0 : index
    %1147 = vector.load %arg14[%c0_864, %c0_865] : memref<8x32xf32, #tpu.memory_space<vmem>>, vector<8x32xf32>
    %1148 = arith.addf %1146, %1147 : vector<8x32xf32>
    %1149 = math.tanh %1148 : vector<8x32xf32>
    %c0_866 = arith.constant 0 : index
    %c0_867 = arith.constant 0 : index
    %1150 = vector.load %arg30[%c0_866, %c0_867] : memref<32x128xbf16, #tpu.memory_space<vmem>>, vector<32x128xbf16>
    %cst_868 = arith.constant dense<0.000000e+00> : vector<8x128xf32>
    %1151 = tpu.matmul %1138, %1150, %cst_868 {dimension_numbers = #tpu.dot_dimension_numbers<[1], [0], [0], [1], [0, 0, 1, 1], [], []>} : vector<8x32xbf16>, vector<32x128xbf16>, vector<8x128xf32> -> vector<8x128xf32>
    %c0_869 = arith.constant 0 : index
    %c0_870 = arith.constant 0 : index
    %1152 = vector.load %arg31[%c0_869, %c0_870] : memref<32x128xbf16, #tpu.memory_space<vmem>>, vector<32x128xbf16>
    %cst_871 = arith.constant dense<0.000000e+00> : vector<8x128xf32>
    %1153 = tpu.matmul %1144, %1152, %cst_871 {dimension_numbers = #tpu.dot_dimension_numbers<[1], [0], [0], [1], [0, 0, 1, 1], [], []>} : vector<8x32xbf16>, vector<32x128xbf16>, vector<8x128xf32> -> vector<8x128xf32>
    %1154 = arith.addf %1151, %1153 : vector<8x128xf32>
    %1155 = arith.truncf %1149 : vector<8x32xf32> to vector<8x32xbf16>
    %c0_872 = arith.constant 0 : index
    %c0_873 = arith.constant 0 : index
    %1156 = vector.load %arg32[%c0_872, %c0_873] : memref<32x128xbf16, #tpu.memory_space<vmem>>, vector<32x128xbf16>
    %cst_874 = arith.constant dense<0.000000e+00> : vector<8x128xf32>
    %1157 = tpu.matmul %1155, %1156, %cst_874 {dimension_numbers = #tpu.dot_dimension_numbers<[1], [0], [0], [1], [0, 0, 1, 1], [], []>} : vector<8x32xbf16>, vector<32x128xbf16>, vector<8x128xf32> -> vector<8x128xf32>
    %1158 = arith.addf %1154, %1157 : vector<8x128xf32>
    %1159 = vector.extract_strided_slice %34 {offsets = [32, 0], sizes = [8, 128], strides = [1, 1]} : vector<64x128xf32> to vector<8x128xf32>
    %1160 = arith.addf %1159, %919 : vector<8x128xf32>
    %1161 = arith.addf %1160, %1158 : vector<8x128xf32>
    %c0_875 = arith.constant 0 : index
    %c32 = arith.constant 32 : index
    %c0_876 = arith.constant 0 : index
    %1162 = vector.load %arg34[%c0_875, %c32, %c0_876] : memref<1x64x128xf32, #tpu.memory_space<vmem>>, vector<1x8x128xf32>
    %1163 = vector.shape_cast %1162 : vector<1x8x128xf32> to vector<8x128xf32>
    %1164 = vector.shape_cast %1161 : vector<8x128xf32> to vector<1x8x128xf32>
    tpu.vector_store %arg34[%c0_875, %c32, %c0_876], %1164 {strides = array<i32>} : memref<1x64x128xf32, #tpu.memory_space<vmem>>, vector<1x8x128xf32>,
    %1165 = vector.extract_strided_slice %15 {offsets = [56, 0], sizes = [8, 32], strides = [1, 1]} : vector<64x32xf32> to vector<8x32xf32>
    %1166 = vector.extract_strided_slice %22 {offsets = [56, 0], sizes = [8, 32], strides = [1, 1]} : vector<64x32xf32> to vector<8x32xf32>
    %1167 = vector.extract_strided_slice %29 {offsets = [56, 0], sizes = [8, 32], strides = [1, 1]} : vector<64x32xf32> to vector<8x32xf32>
    %c0_877 = arith.constant 0 : index
    %c0_878 = arith.constant 0 : index
    %1168 = vector.load %arg18[%c0_877, %c0_878] : memref<8x32xf32, #tpu.memory_space<vmem>>, vector<8x32xf32>
    %c0_879 = arith.constant 0 : index
    %c0_880 = arith.constant 0 : index
    %c0_881 = arith.constant 0 : index
    %1169 = vector.load %arg16[%c0_879, %c0_880, %c0_881] : memref<3x32x32xbf16, #tpu.memory_space<vmem>>, vector<1x32x32xbf16>
    %1170 = vector.shape_cast %1169 : vector<1x32x32xbf16> to vector<32x32xbf16>
    %cst_882 = arith.constant dense<0.000000e+00> : vector<8x32xf32>
    %1171 = tpu.matmul %1013, %1170, %cst_882 {dimension_numbers = #tpu.dot_dimension_numbers<[1], [0], [0], [1], [0, 0, 1, 1], [], []>} : vector<8x32xbf16>, vector<32x32xbf16>, vector<8x32xf32> -> vector<8x32xf32>
    %1172 = arith.addf %1165, %1171 : vector<8x32xf32>
    %1173 = arith.negf %1172 : vector<8x32xf32>
    %1174 = math.exp %1173 : vector<8x32xf32>
    %cst_883 = arith.constant 1.000000e+00 : f32
    %1175 = vector.broadcast %cst_883 : f32 to vector<8x32xf32>
    %1176 = arith.addf %1175, %1174 : vector<8x32xf32>
    %1177 = arith.divf %1175, %1176 : vector<8x32xf32>
    %c1_884 = arith.constant 1 : index
    %c0_885 = arith.constant 0 : index
    %c0_886 = arith.constant 0 : index
    %1178 = vector.load %arg16[%c1_884, %c0_885, %c0_886] : memref<3x32x32xbf16, #tpu.memory_space<vmem>>, vector<1x32x32xbf16>
    %1179 = vector.shape_cast %1178 : vector<1x32x32xbf16> to vector<32x32xbf16>
    %cst_887 = arith.constant dense<0.000000e+00> : vector<8x32xf32>
    %1180 = tpu.matmul %1013, %1179, %cst_887 {dimension_numbers = #tpu.dot_dimension_numbers<[1], [0], [0], [1], [0, 0, 1, 1], [], []>} : vector<8x32xbf16>, vector<32x32xbf16>, vector<8x32xf32> -> vector<8x32xf32>
    %1181 = arith.addf %1166, %1180 : vector<8x32xf32>
    %1182 = arith.negf %1181 : vector<8x32xf32>
    %1183 = math.exp %1182 : vector<8x32xf32>
    %cst_888 = arith.constant 1.000000e+00 : f32
    %1184 = vector.broadcast %cst_888 : f32 to vector<8x32xf32>
    %1185 = arith.addf %1184, %1183 : vector<8x32xf32>
    %1186 = arith.divf %1184, %1185 : vector<8x32xf32>
    %c2_889 = arith.constant 2 : index
    %c0_890 = arith.constant 0 : index
    %c0_891 = arith.constant 0 : index
    %1187 = vector.load %arg16[%c2_889, %c0_890, %c0_891] : memref<3x32x32xbf16, #tpu.memory_space<vmem>>, vector<1x32x32xbf16>
    %1188 = vector.shape_cast %1187 : vector<1x32x32xbf16> to vector<32x32xbf16>
    %cst_892 = arith.constant dense<0.000000e+00> : vector<8x32xf32>
    %1189 = tpu.matmul %1013, %1188, %cst_892 {dimension_numbers = #tpu.dot_dimension_numbers<[1], [0], [0], [1], [0, 0, 1, 1], [], []>} : vector<8x32xbf16>, vector<32x32xbf16>, vector<8x32xf32> -> vector<8x32xf32>
    %1190 = arith.addf %1189, %1168 : vector<8x32xf32>
    %1191 = arith.mulf %1177, %1190 : vector<8x32xf32>
    %1192 = arith.addf %1167, %1191 : vector<8x32xf32>
    %1193 = math.tanh %1192 : vector<8x32xf32>
    %cst_893 = arith.constant 1.000000e+00 : f32
    %1194 = vector.broadcast %cst_893 : f32 to vector<8x32xf32>
    %1195 = arith.subf %1194, %1186 : vector<8x32xf32>
    %1196 = arith.mulf %1195, %1193 : vector<8x32xf32>
    %1197 = arith.mulf %1186, %1012 : vector<8x32xf32>
    %1198 = arith.addf %1196, %1197 : vector<8x32xf32>
    %1199 = arith.truncf %1198 : vector<8x32xf32> to vector<8x32xbf16>
    %c0_894 = arith.constant 0 : index
    %c0_895 = arith.constant 0 : index
    %1200 = vector.load %arg7[%c0_894, %c0_895] : memref<32x32xbf16, #tpu.memory_space<vmem>>, vector<32x32xbf16>
    %cst_896 = arith.constant dense<0.000000e+00> : vector<8x32xf32>
    %1201 = tpu.matmul %1199, %1200, %cst_896 {dimension_numbers = #tpu.dot_dimension_numbers<[1], [0], [0], [1], [0, 0, 1, 1], [], []>} : vector<8x32xbf16>, vector<32x32xbf16>, vector<8x32xf32> -> vector<8x32xf32>
    %c0_897 = arith.constant 0 : index
    %c0_898 = arith.constant 0 : index
    %1202 = vector.load %arg8[%c0_897, %c0_898] : memref<8x32xf32, #tpu.memory_space<vmem>>, vector<8x32xf32>
    %1203 = arith.addf %1201, %1202 : vector<8x32xf32>
    %1204 = math.tanh %1203 : vector<8x32xf32>
    %1205 = arith.truncf %1204 : vector<8x32xf32> to vector<8x32xbf16>
    %c0_899 = arith.constant 0 : index
    %c0_900 = arith.constant 0 : index
    %c0_901 = arith.constant 0 : index
    %1206 = vector.load %arg19[%c0_899, %c0_900, %c0_901] : memref<3x32x32xbf16, #tpu.memory_space<vmem>>, vector<1x32x32xbf16>
    %1207 = vector.shape_cast %1206 : vector<1x32x32xbf16> to vector<32x32xbf16>
    %cst_902 = arith.constant dense<0.000000e+00> : vector<8x32xf32>
    %1208 = tpu.matmul %1205, %1207, %cst_902 {dimension_numbers = #tpu.dot_dimension_numbers<[1], [0], [0], [1], [0, 0, 1, 1], [], []>} : vector<8x32xbf16>, vector<32x32xbf16>, vector<8x32xf32> -> vector<8x32xf32>
    %c0_903 = arith.constant 0 : index
    %c0_904 = arith.constant 0 : index
    %c0_905 = arith.constant 0 : index
    %1209 = vector.load %arg21[%c0_903, %c0_904, %c0_905] : memref<4x8x32xf32, #tpu.memory_space<vmem>>, vector<1x8x32xf32>
    %1210 = vector.shape_cast %1209 : vector<1x8x32xf32> to vector<8x32xf32>
    %1211 = arith.addf %1208, %1210 : vector<8x32xf32>
    %c1_906 = arith.constant 1 : index
    %c0_907 = arith.constant 0 : index
    %c0_908 = arith.constant 0 : index
    %1212 = vector.load %arg19[%c1_906, %c0_907, %c0_908] : memref<3x32x32xbf16, #tpu.memory_space<vmem>>, vector<1x32x32xbf16>
    %1213 = vector.shape_cast %1212 : vector<1x32x32xbf16> to vector<32x32xbf16>
    %cst_909 = arith.constant dense<0.000000e+00> : vector<8x32xf32>
    %1214 = tpu.matmul %1205, %1213, %cst_909 {dimension_numbers = #tpu.dot_dimension_numbers<[1], [0], [0], [1], [0, 0, 1, 1], [], []>} : vector<8x32xbf16>, vector<32x32xbf16>, vector<8x32xf32> -> vector<8x32xf32>
    %c1_910 = arith.constant 1 : index
    %c0_911 = arith.constant 0 : index
    %c0_912 = arith.constant 0 : index
    %1215 = vector.load %arg21[%c1_910, %c0_911, %c0_912] : memref<4x8x32xf32, #tpu.memory_space<vmem>>, vector<1x8x32xf32>
    %1216 = vector.shape_cast %1215 : vector<1x8x32xf32> to vector<8x32xf32>
    %1217 = arith.addf %1214, %1216 : vector<8x32xf32>
    %c2_913 = arith.constant 2 : index
    %c0_914 = arith.constant 0 : index
    %c0_915 = arith.constant 0 : index
    %1218 = vector.load %arg19[%c2_913, %c0_914, %c0_915] : memref<3x32x32xbf16, #tpu.memory_space<vmem>>, vector<1x32x32xbf16>
    %1219 = vector.shape_cast %1218 : vector<1x32x32xbf16> to vector<32x32xbf16>
    %cst_916 = arith.constant dense<0.000000e+00> : vector<8x32xf32>
    %1220 = tpu.matmul %1205, %1219, %cst_916 {dimension_numbers = #tpu.dot_dimension_numbers<[1], [0], [0], [1], [0, 0, 1, 1], [], []>} : vector<8x32xbf16>, vector<32x32xbf16>, vector<8x32xf32> -> vector<8x32xf32>
    %c2_917 = arith.constant 2 : index
    %c0_918 = arith.constant 0 : index
    %c0_919 = arith.constant 0 : index
    %1221 = vector.load %arg21[%c2_917, %c0_918, %c0_919] : memref<4x8x32xf32, #tpu.memory_space<vmem>>, vector<1x8x32xf32>
    %1222 = vector.shape_cast %1221 : vector<1x8x32xf32> to vector<8x32xf32>
    %1223 = arith.addf %1220, %1222 : vector<8x32xf32>
    %c0_920 = arith.constant 0 : index
    %c0_921 = arith.constant 0 : index
    %1224 = vector.load %arg26[%c0_920, %c0_921] : memref<32x128xbf16, #tpu.memory_space<vmem>>, vector<32x128xbf16>
    %cst_922 = arith.constant dense<0.000000e+00> : vector<8x128xf32>
    %1225 = tpu.matmul %1199, %1224, %cst_922 {dimension_numbers = #tpu.dot_dimension_numbers<[1], [0], [0], [1], [0, 0, 1, 1], [], []>} : vector<8x32xbf16>, vector<32x128xbf16>, vector<8x128xf32> -> vector<8x128xf32>
    %c0_923 = arith.constant 0 : index
    %c0_924 = arith.constant 0 : index
    %1226 = vector.load %arg27[%c0_923, %c0_924] : memref<32x128xbf16, #tpu.memory_space<vmem>>, vector<32x128xbf16>
    %cst_925 = arith.constant dense<0.000000e+00> : vector<8x128xf32>
    %1227 = tpu.matmul %1205, %1226, %cst_925 {dimension_numbers = #tpu.dot_dimension_numbers<[1], [0], [0], [1], [0, 0, 1, 1], [], []>} : vector<8x32xbf16>, vector<32x128xbf16>, vector<8x128xf32> -> vector<8x128xf32>
    %1228 = arith.addf %1225, %1227 : vector<8x128xf32>
    %c3_926 = arith.constant 3 : index
    %c0_927 = arith.constant 0 : index
    %c0_928 = arith.constant 0 : index
    %1229 = vector.load %arg21[%c3_926, %c0_927, %c0_928] : memref<4x8x32xf32, #tpu.memory_space<vmem>>, vector<1x8x32xf32>
    %1230 = vector.shape_cast %1229 : vector<1x8x32xf32> to vector<8x32xf32>
    %c0_929 = arith.constant 0 : index
    %c0_930 = arith.constant 0 : index
    %c0_931 = arith.constant 0 : index
    %1231 = vector.load %arg20[%c0_929, %c0_930, %c0_931] : memref<3x32x32xbf16, #tpu.memory_space<vmem>>, vector<1x32x32xbf16>
    %1232 = vector.shape_cast %1231 : vector<1x32x32xbf16> to vector<32x32xbf16>
    %cst_932 = arith.constant dense<0.000000e+00> : vector<8x32xf32>
    %1233 = tpu.matmul %1075, %1232, %cst_932 {dimension_numbers = #tpu.dot_dimension_numbers<[1], [0], [0], [1], [0, 0, 1, 1], [], []>} : vector<8x32xbf16>, vector<32x32xbf16>, vector<8x32xf32> -> vector<8x32xf32>
    %1234 = arith.addf %1025, %1233 : vector<8x32xf32>
    %1235 = arith.negf %1234 : vector<8x32xf32>
    %1236 = math.exp %1235 : vector<8x32xf32>
    %cst_933 = arith.constant 1.000000e+00 : f32
    %1237 = vector.broadcast %cst_933 : f32 to vector<8x32xf32>
    %1238 = arith.addf %1237, %1236 : vector<8x32xf32>
    %1239 = arith.divf %1237, %1238 : vector<8x32xf32>
    %c1_934 = arith.constant 1 : index
    %c0_935 = arith.constant 0 : index
    %c0_936 = arith.constant 0 : index
    %1240 = vector.load %arg20[%c1_934, %c0_935, %c0_936] : memref<3x32x32xbf16, #tpu.memory_space<vmem>>, vector<1x32x32xbf16>
    %1241 = vector.shape_cast %1240 : vector<1x32x32xbf16> to vector<32x32xbf16>
    %cst_937 = arith.constant dense<0.000000e+00> : vector<8x32xf32>
    %1242 = tpu.matmul %1075, %1241, %cst_937 {dimension_numbers = #tpu.dot_dimension_numbers<[1], [0], [0], [1], [0, 0, 1, 1], [], []>} : vector<8x32xbf16>, vector<32x32xbf16>, vector<8x32xf32> -> vector<8x32xf32>
    %1243 = arith.addf %1031, %1242 : vector<8x32xf32>
    %1244 = arith.negf %1243 : vector<8x32xf32>
    %1245 = math.exp %1244 : vector<8x32xf32>
    %cst_938 = arith.constant 1.000000e+00 : f32
    %1246 = vector.broadcast %cst_938 : f32 to vector<8x32xf32>
    %1247 = arith.addf %1246, %1245 : vector<8x32xf32>
    %1248 = arith.divf %1246, %1247 : vector<8x32xf32>
    %c2_939 = arith.constant 2 : index
    %c0_940 = arith.constant 0 : index
    %c0_941 = arith.constant 0 : index
    %1249 = vector.load %arg20[%c2_939, %c0_940, %c0_941] : memref<3x32x32xbf16, #tpu.memory_space<vmem>>, vector<1x32x32xbf16>
    %1250 = vector.shape_cast %1249 : vector<1x32x32xbf16> to vector<32x32xbf16>
    %cst_942 = arith.constant dense<0.000000e+00> : vector<8x32xf32>
    %1251 = tpu.matmul %1075, %1250, %cst_942 {dimension_numbers = #tpu.dot_dimension_numbers<[1], [0], [0], [1], [0, 0, 1, 1], [], []>} : vector<8x32xbf16>, vector<32x32xbf16>, vector<8x32xf32> -> vector<8x32xf32>
    %1252 = arith.addf %1251, %1230 : vector<8x32xf32>
    %1253 = arith.mulf %1239, %1252 : vector<8x32xf32>
    %1254 = arith.addf %1037, %1253 : vector<8x32xf32>
    %1255 = math.tanh %1254 : vector<8x32xf32>
    %cst_943 = arith.constant 1.000000e+00 : f32
    %1256 = vector.broadcast %cst_943 : f32 to vector<8x32xf32>
    %1257 = arith.subf %1256, %1248 : vector<8x32xf32>
    %1258 = arith.mulf %1257, %1255 : vector<8x32xf32>
    %1259 = arith.mulf %1248, %1074 : vector<8x32xf32>
    %1260 = arith.addf %1258, %1259 : vector<8x32xf32>
    %1261 = arith.truncf %1260 : vector<8x32xf32> to vector<8x32xbf16>
    %c0_944 = arith.constant 0 : index
    %c0_945 = arith.constant 0 : index
    %1262 = vector.load %arg9[%c0_944, %c0_945] : memref<32x32xbf16, #tpu.memory_space<vmem>>, vector<32x32xbf16>
    %cst_946 = arith.constant dense<0.000000e+00> : vector<8x32xf32>
    %1263 = tpu.matmul %1261, %1262, %cst_946 {dimension_numbers = #tpu.dot_dimension_numbers<[1], [0], [0], [1], [0, 0, 1, 1], [], []>} : vector<8x32xbf16>, vector<32x32xbf16>, vector<8x32xf32> -> vector<8x32xf32>
    %c0_947 = arith.constant 0 : index
    %c0_948 = arith.constant 0 : index
    %1264 = vector.load %arg10[%c0_947, %c0_948] : memref<8x32xf32, #tpu.memory_space<vmem>>, vector<8x32xf32>
    %1265 = arith.addf %1263, %1264 : vector<8x32xf32>
    %1266 = math.tanh %1265 : vector<8x32xf32>
    %1267 = arith.truncf %1266 : vector<8x32xf32> to vector<8x32xbf16>
    %c0_949 = arith.constant 0 : index
    %c0_950 = arith.constant 0 : index
    %c0_951 = arith.constant 0 : index
    %1268 = vector.load %arg22[%c0_949, %c0_950, %c0_951] : memref<3x32x32xbf16, #tpu.memory_space<vmem>>, vector<1x32x32xbf16>
    %1269 = vector.shape_cast %1268 : vector<1x32x32xbf16> to vector<32x32xbf16>
    %cst_952 = arith.constant dense<0.000000e+00> : vector<8x32xf32>
    %1270 = tpu.matmul %1267, %1269, %cst_952 {dimension_numbers = #tpu.dot_dimension_numbers<[1], [0], [0], [1], [0, 0, 1, 1], [], []>} : vector<8x32xbf16>, vector<32x32xbf16>, vector<8x32xf32> -> vector<8x32xf32>
    %c0_953 = arith.constant 0 : index
    %c0_954 = arith.constant 0 : index
    %c0_955 = arith.constant 0 : index
    %1271 = vector.load %arg24[%c0_953, %c0_954, %c0_955] : memref<4x8x32xf32, #tpu.memory_space<vmem>>, vector<1x8x32xf32>
    %1272 = vector.shape_cast %1271 : vector<1x8x32xf32> to vector<8x32xf32>
    %1273 = arith.addf %1270, %1272 : vector<8x32xf32>
    %c1_956 = arith.constant 1 : index
    %c0_957 = arith.constant 0 : index
    %c0_958 = arith.constant 0 : index
    %1274 = vector.load %arg22[%c1_956, %c0_957, %c0_958] : memref<3x32x32xbf16, #tpu.memory_space<vmem>>, vector<1x32x32xbf16>
    %1275 = vector.shape_cast %1274 : vector<1x32x32xbf16> to vector<32x32xbf16>
    %cst_959 = arith.constant dense<0.000000e+00> : vector<8x32xf32>
    %1276 = tpu.matmul %1267, %1275, %cst_959 {dimension_numbers = #tpu.dot_dimension_numbers<[1], [0], [0], [1], [0, 0, 1, 1], [], []>} : vector<8x32xbf16>, vector<32x32xbf16>, vector<8x32xf32> -> vector<8x32xf32>
    %c1_960 = arith.constant 1 : index
    %c0_961 = arith.constant 0 : index
    %c0_962 = arith.constant 0 : index
    %1277 = vector.load %arg24[%c1_960, %c0_961, %c0_962] : memref<4x8x32xf32, #tpu.memory_space<vmem>>, vector<1x8x32xf32>
    %1278 = vector.shape_cast %1277 : vector<1x8x32xf32> to vector<8x32xf32>
    %1279 = arith.addf %1276, %1278 : vector<8x32xf32>
    %c2_963 = arith.constant 2 : index
    %c0_964 = arith.constant 0 : index
    %c0_965 = arith.constant 0 : index
    %1280 = vector.load %arg22[%c2_963, %c0_964, %c0_965] : memref<3x32x32xbf16, #tpu.memory_space<vmem>>, vector<1x32x32xbf16>
    %1281 = vector.shape_cast %1280 : vector<1x32x32xbf16> to vector<32x32xbf16>
    %cst_966 = arith.constant dense<0.000000e+00> : vector<8x32xf32>
    %1282 = tpu.matmul %1267, %1281, %cst_966 {dimension_numbers = #tpu.dot_dimension_numbers<[1], [0], [0], [1], [0, 0, 1, 1], [], []>} : vector<8x32xbf16>, vector<32x32xbf16>, vector<8x32xf32> -> vector<8x32xf32>
    %c2_967 = arith.constant 2 : index
    %c0_968 = arith.constant 0 : index
    %c0_969 = arith.constant 0 : index
    %1283 = vector.load %arg24[%c2_967, %c0_968, %c0_969] : memref<4x8x32xf32, #tpu.memory_space<vmem>>, vector<1x8x32xf32>
    %1284 = vector.shape_cast %1283 : vector<1x8x32xf32> to vector<8x32xf32>
    %1285 = arith.addf %1282, %1284 : vector<8x32xf32>
    %c0_970 = arith.constant 0 : index
    %c0_971 = arith.constant 0 : index
    %1286 = vector.load %arg28[%c0_970, %c0_971] : memref<32x128xbf16, #tpu.memory_space<vmem>>, vector<32x128xbf16>
    %cst_972 = arith.constant dense<0.000000e+00> : vector<8x128xf32>
    %1287 = tpu.matmul %1261, %1286, %cst_972 {dimension_numbers = #tpu.dot_dimension_numbers<[1], [0], [0], [1], [0, 0, 1, 1], [], []>} : vector<8x32xbf16>, vector<32x128xbf16>, vector<8x128xf32> -> vector<8x128xf32>
    %1288 = arith.addf %1042, %1287 : vector<8x128xf32>
    %c0_973 = arith.constant 0 : index
    %c0_974 = arith.constant 0 : index
    %1289 = vector.load %arg29[%c0_973, %c0_974] : memref<32x128xbf16, #tpu.memory_space<vmem>>, vector<32x128xbf16>
    %cst_975 = arith.constant dense<0.000000e+00> : vector<8x128xf32>
    %1290 = tpu.matmul %1267, %1289, %cst_975 {dimension_numbers = #tpu.dot_dimension_numbers<[1], [0], [0], [1], [0, 0, 1, 1], [], []>} : vector<8x32xbf16>, vector<32x128xbf16>, vector<8x128xf32> -> vector<8x128xf32>
    %1291 = arith.addf %1288, %1290 : vector<8x128xf32>
    %c3_976 = arith.constant 3 : index
    %c0_977 = arith.constant 0 : index
    %c0_978 = arith.constant 0 : index
    %1292 = vector.load %arg24[%c3_976, %c0_977, %c0_978] : memref<4x8x32xf32, #tpu.memory_space<vmem>>, vector<1x8x32xf32>
    %1293 = vector.shape_cast %1292 : vector<1x8x32xf32> to vector<8x32xf32>
    %c0_979 = arith.constant 0 : index
    %c0_980 = arith.constant 0 : index
    %c0_981 = arith.constant 0 : index
    %1294 = vector.load %arg23[%c0_979, %c0_980, %c0_981] : memref<3x32x32xbf16, #tpu.memory_space<vmem>>, vector<1x32x32xbf16>
    %1295 = vector.shape_cast %1294 : vector<1x32x32xbf16> to vector<32x32xbf16>
    %cst_982 = arith.constant dense<0.000000e+00> : vector<8x32xf32>
    %1296 = tpu.matmul %1138, %1295, %cst_982 {dimension_numbers = #tpu.dot_dimension_numbers<[1], [0], [0], [1], [0, 0, 1, 1], [], []>} : vector<8x32xbf16>, vector<32x32xbf16>, vector<8x32xf32> -> vector<8x32xf32>
    %1297 = arith.addf %1087, %1296 : vector<8x32xf32>
    %1298 = arith.negf %1297 : vector<8x32xf32>
    %1299 = math.exp %1298 : vector<8x32xf32>
    %cst_983 = arith.constant 1.000000e+00 : f32
    %1300 = vector.broadcast %cst_983 : f32 to vector<8x32xf32>
    %1301 = arith.addf %1300, %1299 : vector<8x32xf32>
    %1302 = arith.divf %1300, %1301 : vector<8x32xf32>
    %c1_984 = arith.constant 1 : index
    %c0_985 = arith.constant 0 : index
    %c0_986 = arith.constant 0 : index
    %1303 = vector.load %arg23[%c1_984, %c0_985, %c0_986] : memref<3x32x32xbf16, #tpu.memory_space<vmem>>, vector<1x32x32xbf16>
    %1304 = vector.shape_cast %1303 : vector<1x32x32xbf16> to vector<32x32xbf16>
    %cst_987 = arith.constant dense<0.000000e+00> : vector<8x32xf32>
    %1305 = tpu.matmul %1138, %1304, %cst_987 {dimension_numbers = #tpu.dot_dimension_numbers<[1], [0], [0], [1], [0, 0, 1, 1], [], []>} : vector<8x32xbf16>, vector<32x32xbf16>, vector<8x32xf32> -> vector<8x32xf32>
    %1306 = arith.addf %1093, %1305 : vector<8x32xf32>
    %1307 = arith.negf %1306 : vector<8x32xf32>
    %1308 = math.exp %1307 : vector<8x32xf32>
    %cst_988 = arith.constant 1.000000e+00 : f32
    %1309 = vector.broadcast %cst_988 : f32 to vector<8x32xf32>
    %1310 = arith.addf %1309, %1308 : vector<8x32xf32>
    %1311 = arith.divf %1309, %1310 : vector<8x32xf32>
    %c2_989 = arith.constant 2 : index
    %c0_990 = arith.constant 0 : index
    %c0_991 = arith.constant 0 : index
    %1312 = vector.load %arg23[%c2_989, %c0_990, %c0_991] : memref<3x32x32xbf16, #tpu.memory_space<vmem>>, vector<1x32x32xbf16>
    %1313 = vector.shape_cast %1312 : vector<1x32x32xbf16> to vector<32x32xbf16>
    %cst_992 = arith.constant dense<0.000000e+00> : vector<8x32xf32>
    %1314 = tpu.matmul %1138, %1313, %cst_992 {dimension_numbers = #tpu.dot_dimension_numbers<[1], [0], [0], [1], [0, 0, 1, 1], [], []>} : vector<8x32xbf16>, vector<32x32xbf16>, vector<8x32xf32> -> vector<8x32xf32>
    %1315 = arith.addf %1314, %1293 : vector<8x32xf32>
    %1316 = arith.mulf %1302, %1315 : vector<8x32xf32>
    %1317 = arith.addf %1099, %1316 : vector<8x32xf32>
    %1318 = math.tanh %1317 : vector<8x32xf32>
    %cst_993 = arith.constant 1.000000e+00 : f32
    %1319 = vector.broadcast %cst_993 : f32 to vector<8x32xf32>
    %1320 = arith.subf %1319, %1311 : vector<8x32xf32>
    %1321 = arith.mulf %1320, %1318 : vector<8x32xf32>
    %1322 = arith.mulf %1311, %1137 : vector<8x32xf32>
    %1323 = arith.addf %1321, %1322 : vector<8x32xf32>
    %1324 = arith.truncf %1323 : vector<8x32xf32> to vector<8x32xbf16>
    %c0_994 = arith.constant 0 : index
    %c0_995 = arith.constant 0 : index
    %1325 = vector.load %arg11[%c0_994, %c0_995] : memref<32x32xbf16, #tpu.memory_space<vmem>>, vector<32x32xbf16>
    %cst_996 = arith.constant dense<0.000000e+00> : vector<8x32xf32>
    %1326 = tpu.matmul %1324, %1325, %cst_996 {dimension_numbers = #tpu.dot_dimension_numbers<[1], [0], [0], [1], [0, 0, 1, 1], [], []>} : vector<8x32xbf16>, vector<32x32xbf16>, vector<8x32xf32> -> vector<8x32xf32>
    %c0_997 = arith.constant 0 : index
    %c0_998 = arith.constant 0 : index
    %1327 = vector.load %arg12[%c0_997, %c0_998] : memref<8x32xf32, #tpu.memory_space<vmem>>, vector<8x32xf32>
    %1328 = arith.addf %1326, %1327 : vector<8x32xf32>
    %1329 = math.tanh %1328 : vector<8x32xf32>
    %1330 = arith.truncf %1329 : vector<8x32xf32> to vector<8x32xbf16>
    %c0_999 = arith.constant 0 : index
    %c0_1000 = arith.constant 0 : index
    %1331 = vector.load %arg13[%c0_999, %c0_1000] : memref<32x32xbf16, #tpu.memory_space<vmem>>, vector<32x32xbf16>
    %cst_1001 = arith.constant dense<0.000000e+00> : vector<8x32xf32>
    %1332 = tpu.matmul %1330, %1331, %cst_1001 {dimension_numbers = #tpu.dot_dimension_numbers<[1], [0], [0], [1], [0, 0, 1, 1], [], []>} : vector<8x32xbf16>, vector<32x32xbf16>, vector<8x32xf32> -> vector<8x32xf32>
    %c0_1002 = arith.constant 0 : index
    %c0_1003 = arith.constant 0 : index
    %1333 = vector.load %arg14[%c0_1002, %c0_1003] : memref<8x32xf32, #tpu.memory_space<vmem>>, vector<8x32xf32>
    %1334 = arith.addf %1332, %1333 : vector<8x32xf32>
    %1335 = math.tanh %1334 : vector<8x32xf32>
    %c0_1004 = arith.constant 0 : index
    %c0_1005 = arith.constant 0 : index
    %1336 = vector.load %arg30[%c0_1004, %c0_1005] : memref<32x128xbf16, #tpu.memory_space<vmem>>, vector<32x128xbf16>
    %cst_1006 = arith.constant dense<0.000000e+00> : vector<8x128xf32>
    %1337 = tpu.matmul %1324, %1336, %cst_1006 {dimension_numbers = #tpu.dot_dimension_numbers<[1], [0], [0], [1], [0, 0, 1, 1], [], []>} : vector<8x32xbf16>, vector<32x128xbf16>, vector<8x128xf32> -> vector<8x128xf32>
    %c0_1007 = arith.constant 0 : index
    %c0_1008 = arith.constant 0 : index
    %1338 = vector.load %arg31[%c0_1007, %c0_1008] : memref<32x128xbf16, #tpu.memory_space<vmem>>, vector<32x128xbf16>
    %cst_1009 = arith.constant dense<0.000000e+00> : vector<8x128xf32>
    %1339 = tpu.matmul %1330, %1338, %cst_1009 {dimension_numbers = #tpu.dot_dimension_numbers<[1], [0], [0], [1], [0, 0, 1, 1], [], []>} : vector<8x32xbf16>, vector<32x128xbf16>, vector<8x128xf32> -> vector<8x128xf32>
    %1340 = arith.addf %1337, %1339 : vector<8x128xf32>
    %1341 = arith.truncf %1335 : vector<8x32xf32> to vector<8x32xbf16>
    %c0_1010 = arith.constant 0 : index
    %c0_1011 = arith.constant 0 : index
    %1342 = vector.load %arg32[%c0_1010, %c0_1011] : memref<32x128xbf16, #tpu.memory_space<vmem>>, vector<32x128xbf16>
    %cst_1012 = arith.constant dense<0.000000e+00> : vector<8x128xf32>
    %1343 = tpu.matmul %1341, %1342, %cst_1012 {dimension_numbers = #tpu.dot_dimension_numbers<[1], [0], [0], [1], [0, 0, 1, 1], [], []>} : vector<8x32xbf16>, vector<32x128xbf16>, vector<8x128xf32> -> vector<8x128xf32>
    %1344 = arith.addf %1340, %1343 : vector<8x128xf32>
    %1345 = vector.extract_strided_slice %34 {offsets = [40, 0], sizes = [8, 128], strides = [1, 1]} : vector<64x128xf32> to vector<8x128xf32>
    %1346 = arith.addf %1345, %1105 : vector<8x128xf32>
    %1347 = arith.addf %1346, %1344 : vector<8x128xf32>
    %c0_1013 = arith.constant 0 : index
    %c40 = arith.constant 40 : index
    %c0_1014 = arith.constant 0 : index
    %1348 = vector.load %arg34[%c0_1013, %c40, %c0_1014] : memref<1x64x128xf32, #tpu.memory_space<vmem>>, vector<1x8x128xf32>
    %1349 = vector.shape_cast %1348 : vector<1x8x128xf32> to vector<8x128xf32>
    %1350 = vector.shape_cast %1347 : vector<8x128xf32> to vector<1x8x128xf32>
    tpu.vector_store %arg34[%c0_1013, %c40, %c0_1014], %1350 {strides = array<i32>} : memref<1x64x128xf32, #tpu.memory_space<vmem>>, vector<1x8x128xf32>,
    %c3_1015 = arith.constant 3 : index
    %c0_1016 = arith.constant 0 : index
    %c0_1017 = arith.constant 0 : index
    %1351 = vector.load %arg21[%c3_1015, %c0_1016, %c0_1017] : memref<4x8x32xf32, #tpu.memory_space<vmem>>, vector<1x8x32xf32>
    %1352 = vector.shape_cast %1351 : vector<1x8x32xf32> to vector<8x32xf32>
    %c0_1018 = arith.constant 0 : index
    %c0_1019 = arith.constant 0 : index
    %c0_1020 = arith.constant 0 : index
    %1353 = vector.load %arg20[%c0_1018, %c0_1019, %c0_1020] : memref<3x32x32xbf16, #tpu.memory_space<vmem>>, vector<1x32x32xbf16>
    %1354 = vector.shape_cast %1353 : vector<1x32x32xbf16> to vector<32x32xbf16>
    %cst_1021 = arith.constant dense<0.000000e+00> : vector<8x32xf32>
    %1355 = tpu.matmul %1261, %1354, %cst_1021 {dimension_numbers = #tpu.dot_dimension_numbers<[1], [0], [0], [1], [0, 0, 1, 1], [], []>} : vector<8x32xbf16>, vector<32x32xbf16>, vector<8x32xf32> -> vector<8x32xf32>
    %1356 = arith.addf %1211, %1355 : vector<8x32xf32>
    %1357 = arith.negf %1356 : vector<8x32xf32>
    %1358 = math.exp %1357 : vector<8x32xf32>
    %cst_1022 = arith.constant 1.000000e+00 : f32
    %1359 = vector.broadcast %cst_1022 : f32 to vector<8x32xf32>
    %1360 = arith.addf %1359, %1358 : vector<8x32xf32>
    %1361 = arith.divf %1359, %1360 : vector<8x32xf32>
    %c1_1023 = arith.constant 1 : index
    %c0_1024 = arith.constant 0 : index
    %c0_1025 = arith.constant 0 : index
    %1362 = vector.load %arg20[%c1_1023, %c0_1024, %c0_1025] : memref<3x32x32xbf16, #tpu.memory_space<vmem>>, vector<1x32x32xbf16>
    %1363 = vector.shape_cast %1362 : vector<1x32x32xbf16> to vector<32x32xbf16>
    %cst_1026 = arith.constant dense<0.000000e+00> : vector<8x32xf32>
    %1364 = tpu.matmul %1261, %1363, %cst_1026 {dimension_numbers = #tpu.dot_dimension_numbers<[1], [0], [0], [1], [0, 0, 1, 1], [], []>} : vector<8x32xbf16>, vector<32x32xbf16>, vector<8x32xf32> -> vector<8x32xf32>
    %1365 = arith.addf %1217, %1364 : vector<8x32xf32>
    %1366 = arith.negf %1365 : vector<8x32xf32>
    %1367 = math.exp %1366 : vector<8x32xf32>
    %cst_1027 = arith.constant 1.000000e+00 : f32
    %1368 = vector.broadcast %cst_1027 : f32 to vector<8x32xf32>
    %1369 = arith.addf %1368, %1367 : vector<8x32xf32>
    %1370 = arith.divf %1368, %1369 : vector<8x32xf32>
    %c2_1028 = arith.constant 2 : index
    %c0_1029 = arith.constant 0 : index
    %c0_1030 = arith.constant 0 : index
    %1371 = vector.load %arg20[%c2_1028, %c0_1029, %c0_1030] : memref<3x32x32xbf16, #tpu.memory_space<vmem>>, vector<1x32x32xbf16>
    %1372 = vector.shape_cast %1371 : vector<1x32x32xbf16> to vector<32x32xbf16>
    %cst_1031 = arith.constant dense<0.000000e+00> : vector<8x32xf32>
    %1373 = tpu.matmul %1261, %1372, %cst_1031 {dimension_numbers = #tpu.dot_dimension_numbers<[1], [0], [0], [1], [0, 0, 1, 1], [], []>} : vector<8x32xbf16>, vector<32x32xbf16>, vector<8x32xf32> -> vector<8x32xf32>
    %1374 = arith.addf %1373, %1352 : vector<8x32xf32>
    %1375 = arith.mulf %1361, %1374 : vector<8x32xf32>
    %1376 = arith.addf %1223, %1375 : vector<8x32xf32>
    %1377 = math.tanh %1376 : vector<8x32xf32>
    %cst_1032 = arith.constant 1.000000e+00 : f32
    %1378 = vector.broadcast %cst_1032 : f32 to vector<8x32xf32>
    %1379 = arith.subf %1378, %1370 : vector<8x32xf32>
    %1380 = arith.mulf %1379, %1377 : vector<8x32xf32>
    %1381 = arith.mulf %1370, %1260 : vector<8x32xf32>
    %1382 = arith.addf %1380, %1381 : vector<8x32xf32>
    %1383 = arith.truncf %1382 : vector<8x32xf32> to vector<8x32xbf16>
    %c0_1033 = arith.constant 0 : index
    %c0_1034 = arith.constant 0 : index
    %1384 = vector.load %arg9[%c0_1033, %c0_1034] : memref<32x32xbf16, #tpu.memory_space<vmem>>, vector<32x32xbf16>
    %cst_1035 = arith.constant dense<0.000000e+00> : vector<8x32xf32>
    %1385 = tpu.matmul %1383, %1384, %cst_1035 {dimension_numbers = #tpu.dot_dimension_numbers<[1], [0], [0], [1], [0, 0, 1, 1], [], []>} : vector<8x32xbf16>, vector<32x32xbf16>, vector<8x32xf32> -> vector<8x32xf32>
    %c0_1036 = arith.constant 0 : index
    %c0_1037 = arith.constant 0 : index
    %1386 = vector.load %arg10[%c0_1036, %c0_1037] : memref<8x32xf32, #tpu.memory_space<vmem>>, vector<8x32xf32>
    %1387 = arith.addf %1385, %1386 : vector<8x32xf32>
    %1388 = math.tanh %1387 : vector<8x32xf32>
    %1389 = arith.truncf %1388 : vector<8x32xf32> to vector<8x32xbf16>
    %c0_1038 = arith.constant 0 : index
    %c0_1039 = arith.constant 0 : index
    %c0_1040 = arith.constant 0 : index
    %1390 = vector.load %arg22[%c0_1038, %c0_1039, %c0_1040] : memref<3x32x32xbf16, #tpu.memory_space<vmem>>, vector<1x32x32xbf16>
    %1391 = vector.shape_cast %1390 : vector<1x32x32xbf16> to vector<32x32xbf16>
    %cst_1041 = arith.constant dense<0.000000e+00> : vector<8x32xf32>
    %1392 = tpu.matmul %1389, %1391, %cst_1041 {dimension_numbers = #tpu.dot_dimension_numbers<[1], [0], [0], [1], [0, 0, 1, 1], [], []>} : vector<8x32xbf16>, vector<32x32xbf16>, vector<8x32xf32> -> vector<8x32xf32>
    %c0_1042 = arith.constant 0 : index
    %c0_1043 = arith.constant 0 : index
    %c0_1044 = arith.constant 0 : index
    %1393 = vector.load %arg24[%c0_1042, %c0_1043, %c0_1044] : memref<4x8x32xf32, #tpu.memory_space<vmem>>, vector<1x8x32xf32>
    %1394 = vector.shape_cast %1393 : vector<1x8x32xf32> to vector<8x32xf32>
    %1395 = arith.addf %1392, %1394 : vector<8x32xf32>
    %c1_1045 = arith.constant 1 : index
    %c0_1046 = arith.constant 0 : index
    %c0_1047 = arith.constant 0 : index
    %1396 = vector.load %arg22[%c1_1045, %c0_1046, %c0_1047] : memref<3x32x32xbf16, #tpu.memory_space<vmem>>, vector<1x32x32xbf16>
    %1397 = vector.shape_cast %1396 : vector<1x32x32xbf16> to vector<32x32xbf16>
    %cst_1048 = arith.constant dense<0.000000e+00> : vector<8x32xf32>
    %1398 = tpu.matmul %1389, %1397, %cst_1048 {dimension_numbers = #tpu.dot_dimension_numbers<[1], [0], [0], [1], [0, 0, 1, 1], [], []>} : vector<8x32xbf16>, vector<32x32xbf16>, vector<8x32xf32> -> vector<8x32xf32>
    %c1_1049 = arith.constant 1 : index
    %c0_1050 = arith.constant 0 : index
    %c0_1051 = arith.constant 0 : index
    %1399 = vector.load %arg24[%c1_1049, %c0_1050, %c0_1051] : memref<4x8x32xf32, #tpu.memory_space<vmem>>, vector<1x8x32xf32>
    %1400 = vector.shape_cast %1399 : vector<1x8x32xf32> to vector<8x32xf32>
    %1401 = arith.addf %1398, %1400 : vector<8x32xf32>
    %c2_1052 = arith.constant 2 : index
    %c0_1053 = arith.constant 0 : index
    %c0_1054 = arith.constant 0 : index
    %1402 = vector.load %arg22[%c2_1052, %c0_1053, %c0_1054] : memref<3x32x32xbf16, #tpu.memory_space<vmem>>, vector<1x32x32xbf16>
    %1403 = vector.shape_cast %1402 : vector<1x32x32xbf16> to vector<32x32xbf16>
    %cst_1055 = arith.constant dense<0.000000e+00> : vector<8x32xf32>
    %1404 = tpu.matmul %1389, %1403, %cst_1055 {dimension_numbers = #tpu.dot_dimension_numbers<[1], [0], [0], [1], [0, 0, 1, 1], [], []>} : vector<8x32xbf16>, vector<32x32xbf16>, vector<8x32xf32> -> vector<8x32xf32>
    %c2_1056 = arith.constant 2 : index
    %c0_1057 = arith.constant 0 : index
    %c0_1058 = arith.constant 0 : index
    %1405 = vector.load %arg24[%c2_1056, %c0_1057, %c0_1058] : memref<4x8x32xf32, #tpu.memory_space<vmem>>, vector<1x8x32xf32>
    %1406 = vector.shape_cast %1405 : vector<1x8x32xf32> to vector<8x32xf32>
    %1407 = arith.addf %1404, %1406 : vector<8x32xf32>
    %c0_1059 = arith.constant 0 : index
    %c0_1060 = arith.constant 0 : index
    %1408 = vector.load %arg28[%c0_1059, %c0_1060] : memref<32x128xbf16, #tpu.memory_space<vmem>>, vector<32x128xbf16>
    %cst_1061 = arith.constant dense<0.000000e+00> : vector<8x128xf32>
    %1409 = tpu.matmul %1383, %1408, %cst_1061 {dimension_numbers = #tpu.dot_dimension_numbers<[1], [0], [0], [1], [0, 0, 1, 1], [], []>} : vector<8x32xbf16>, vector<32x128xbf16>, vector<8x128xf32> -> vector<8x128xf32>
    %1410 = arith.addf %1228, %1409 : vector<8x128xf32>
    %c0_1062 = arith.constant 0 : index
    %c0_1063 = arith.constant 0 : index
    %1411 = vector.load %arg29[%c0_1062, %c0_1063] : memref<32x128xbf16, #tpu.memory_space<vmem>>, vector<32x128xbf16>
    %cst_1064 = arith.constant dense<0.000000e+00> : vector<8x128xf32>
    %1412 = tpu.matmul %1389, %1411, %cst_1064 {dimension_numbers = #tpu.dot_dimension_numbers<[1], [0], [0], [1], [0, 0, 1, 1], [], []>} : vector<8x32xbf16>, vector<32x128xbf16>, vector<8x128xf32> -> vector<8x128xf32>
    %1413 = arith.addf %1410, %1412 : vector<8x128xf32>
    %c3_1065 = arith.constant 3 : index
    %c0_1066 = arith.constant 0 : index
    %c0_1067 = arith.constant 0 : index
    %1414 = vector.load %arg24[%c3_1065, %c0_1066, %c0_1067] : memref<4x8x32xf32, #tpu.memory_space<vmem>>, vector<1x8x32xf32>
    %1415 = vector.shape_cast %1414 : vector<1x8x32xf32> to vector<8x32xf32>
    %c0_1068 = arith.constant 0 : index
    %c0_1069 = arith.constant 0 : index
    %c0_1070 = arith.constant 0 : index
    %1416 = vector.load %arg23[%c0_1068, %c0_1069, %c0_1070] : memref<3x32x32xbf16, #tpu.memory_space<vmem>>, vector<1x32x32xbf16>
    %1417 = vector.shape_cast %1416 : vector<1x32x32xbf16> to vector<32x32xbf16>
    %cst_1071 = arith.constant dense<0.000000e+00> : vector<8x32xf32>
    %1418 = tpu.matmul %1324, %1417, %cst_1071 {dimension_numbers = #tpu.dot_dimension_numbers<[1], [0], [0], [1], [0, 0, 1, 1], [], []>} : vector<8x32xbf16>, vector<32x32xbf16>, vector<8x32xf32> -> vector<8x32xf32>
    %1419 = arith.addf %1273, %1418 : vector<8x32xf32>
    %1420 = arith.negf %1419 : vector<8x32xf32>
    %1421 = math.exp %1420 : vector<8x32xf32>
    %cst_1072 = arith.constant 1.000000e+00 : f32
    %1422 = vector.broadcast %cst_1072 : f32 to vector<8x32xf32>
    %1423 = arith.addf %1422, %1421 : vector<8x32xf32>
    %1424 = arith.divf %1422, %1423 : vector<8x32xf32>
    %c1_1073 = arith.constant 1 : index
    %c0_1074 = arith.constant 0 : index
    %c0_1075 = arith.constant 0 : index
    %1425 = vector.load %arg23[%c1_1073, %c0_1074, %c0_1075] : memref<3x32x32xbf16, #tpu.memory_space<vmem>>, vector<1x32x32xbf16>
    %1426 = vector.shape_cast %1425 : vector<1x32x32xbf16> to vector<32x32xbf16>
    %cst_1076 = arith.constant dense<0.000000e+00> : vector<8x32xf32>
    %1427 = tpu.matmul %1324, %1426, %cst_1076 {dimension_numbers = #tpu.dot_dimension_numbers<[1], [0], [0], [1], [0, 0, 1, 1], [], []>} : vector<8x32xbf16>, vector<32x32xbf16>, vector<8x32xf32> -> vector<8x32xf32>
    %1428 = arith.addf %1279, %1427 : vector<8x32xf32>
    %1429 = arith.negf %1428 : vector<8x32xf32>
    %1430 = math.exp %1429 : vector<8x32xf32>
    %cst_1077 = arith.constant 1.000000e+00 : f32
    %1431 = vector.broadcast %cst_1077 : f32 to vector<8x32xf32>
    %1432 = arith.addf %1431, %1430 : vector<8x32xf32>
    %1433 = arith.divf %1431, %1432 : vector<8x32xf32>
    %c2_1078 = arith.constant 2 : index
    %c0_1079 = arith.constant 0 : index
    %c0_1080 = arith.constant 0 : index
    %1434 = vector.load %arg23[%c2_1078, %c0_1079, %c0_1080] : memref<3x32x32xbf16, #tpu.memory_space<vmem>>, vector<1x32x32xbf16>
    %1435 = vector.shape_cast %1434 : vector<1x32x32xbf16> to vector<32x32xbf16>
    %cst_1081 = arith.constant dense<0.000000e+00> : vector<8x32xf32>
    %1436 = tpu.matmul %1324, %1435, %cst_1081 {dimension_numbers = #tpu.dot_dimension_numbers<[1], [0], [0], [1], [0, 0, 1, 1], [], []>} : vector<8x32xbf16>, vector<32x32xbf16>, vector<8x32xf32> -> vector<8x32xf32>
    %1437 = arith.addf %1436, %1415 : vector<8x32xf32>
    %1438 = arith.mulf %1424, %1437 : vector<8x32xf32>
    %1439 = arith.addf %1285, %1438 : vector<8x32xf32>
    %1440 = math.tanh %1439 : vector<8x32xf32>
    %cst_1082 = arith.constant 1.000000e+00 : f32
    %1441 = vector.broadcast %cst_1082 : f32 to vector<8x32xf32>
    %1442 = arith.subf %1441, %1433 : vector<8x32xf32>
    %1443 = arith.mulf %1442, %1440 : vector<8x32xf32>
    %1444 = arith.mulf %1433, %1323 : vector<8x32xf32>
    %1445 = arith.addf %1443, %1444 : vector<8x32xf32>
    %1446 = arith.truncf %1445 : vector<8x32xf32> to vector<8x32xbf16>
    %c0_1083 = arith.constant 0 : index
    %c0_1084 = arith.constant 0 : index
    %1447 = vector.load %arg11[%c0_1083, %c0_1084] : memref<32x32xbf16, #tpu.memory_space<vmem>>, vector<32x32xbf16>
    %cst_1085 = arith.constant dense<0.000000e+00> : vector<8x32xf32>
    %1448 = tpu.matmul %1446, %1447, %cst_1085 {dimension_numbers = #tpu.dot_dimension_numbers<[1], [0], [0], [1], [0, 0, 1, 1], [], []>} : vector<8x32xbf16>, vector<32x32xbf16>, vector<8x32xf32> -> vector<8x32xf32>
    %c0_1086 = arith.constant 0 : index
    %c0_1087 = arith.constant 0 : index
    %1449 = vector.load %arg12[%c0_1086, %c0_1087] : memref<8x32xf32, #tpu.memory_space<vmem>>, vector<8x32xf32>
    %1450 = arith.addf %1448, %1449 : vector<8x32xf32>
    %1451 = math.tanh %1450 : vector<8x32xf32>
    %1452 = arith.truncf %1451 : vector<8x32xf32> to vector<8x32xbf16>
    %c0_1088 = arith.constant 0 : index
    %c0_1089 = arith.constant 0 : index
    %1453 = vector.load %arg13[%c0_1088, %c0_1089] : memref<32x32xbf16, #tpu.memory_space<vmem>>, vector<32x32xbf16>
    %cst_1090 = arith.constant dense<0.000000e+00> : vector<8x32xf32>
    %1454 = tpu.matmul %1452, %1453, %cst_1090 {dimension_numbers = #tpu.dot_dimension_numbers<[1], [0], [0], [1], [0, 0, 1, 1], [], []>} : vector<8x32xbf16>, vector<32x32xbf16>, vector<8x32xf32> -> vector<8x32xf32>
    %c0_1091 = arith.constant 0 : index
    %c0_1092 = arith.constant 0 : index
    %1455 = vector.load %arg14[%c0_1091, %c0_1092] : memref<8x32xf32, #tpu.memory_space<vmem>>, vector<8x32xf32>
    %1456 = arith.addf %1454, %1455 : vector<8x32xf32>
    %1457 = math.tanh %1456 : vector<8x32xf32>
    %c0_1093 = arith.constant 0 : index
    %c0_1094 = arith.constant 0 : index
    %1458 = vector.load %arg30[%c0_1093, %c0_1094] : memref<32x128xbf16, #tpu.memory_space<vmem>>, vector<32x128xbf16>
    %cst_1095 = arith.constant dense<0.000000e+00> : vector<8x128xf32>
    %1459 = tpu.matmul %1446, %1458, %cst_1095 {dimension_numbers = #tpu.dot_dimension_numbers<[1], [0], [0], [1], [0, 0, 1, 1], [], []>} : vector<8x32xbf16>, vector<32x128xbf16>, vector<8x128xf32> -> vector<8x128xf32>
    %c0_1096 = arith.constant 0 : index
    %c0_1097 = arith.constant 0 : index
    %1460 = vector.load %arg31[%c0_1096, %c0_1097] : memref<32x128xbf16, #tpu.memory_space<vmem>>, vector<32x128xbf16>
    %cst_1098 = arith.constant dense<0.000000e+00> : vector<8x128xf32>
    %1461 = tpu.matmul %1452, %1460, %cst_1098 {dimension_numbers = #tpu.dot_dimension_numbers<[1], [0], [0], [1], [0, 0, 1, 1], [], []>} : vector<8x32xbf16>, vector<32x128xbf16>, vector<8x128xf32> -> vector<8x128xf32>
    %1462 = arith.addf %1459, %1461 : vector<8x128xf32>
    %1463 = arith.truncf %1457 : vector<8x32xf32> to vector<8x32xbf16>
    %c0_1099 = arith.constant 0 : index
    %c0_1100 = arith.constant 0 : index
    %1464 = vector.load %arg32[%c0_1099, %c0_1100] : memref<32x128xbf16, #tpu.memory_space<vmem>>, vector<32x128xbf16>
    %cst_1101 = arith.constant dense<0.000000e+00> : vector<8x128xf32>
    %1465 = tpu.matmul %1463, %1464, %cst_1101 {dimension_numbers = #tpu.dot_dimension_numbers<[1], [0], [0], [1], [0, 0, 1, 1], [], []>} : vector<8x32xbf16>, vector<32x128xbf16>, vector<8x128xf32> -> vector<8x128xf32>
    %1466 = arith.addf %1462, %1465 : vector<8x128xf32>
    %1467 = vector.extract_strided_slice %34 {offsets = [48, 0], sizes = [8, 128], strides = [1, 1]} : vector<64x128xf32> to vector<8x128xf32>
    %1468 = arith.addf %1467, %1291 : vector<8x128xf32>
    %1469 = arith.addf %1468, %1466 : vector<8x128xf32>
    %c0_1102 = arith.constant 0 : index
    %c48 = arith.constant 48 : index
    %c0_1103 = arith.constant 0 : index
    %1470 = vector.load %arg34[%c0_1102, %c48, %c0_1103] : memref<1x64x128xf32, #tpu.memory_space<vmem>>, vector<1x8x128xf32>
    %1471 = vector.shape_cast %1470 : vector<1x8x128xf32> to vector<8x128xf32>
    %1472 = vector.shape_cast %1469 : vector<8x128xf32> to vector<1x8x128xf32>
    tpu.vector_store %arg34[%c0_1102, %c48, %c0_1103], %1472 {strides = array<i32>} : memref<1x64x128xf32, #tpu.memory_space<vmem>>, vector<1x8x128xf32>,
    %c3_1104 = arith.constant 3 : index
    %c0_1105 = arith.constant 0 : index
    %c0_1106 = arith.constant 0 : index
    %1473 = vector.load %arg24[%c3_1104, %c0_1105, %c0_1106] : memref<4x8x32xf32, #tpu.memory_space<vmem>>, vector<1x8x32xf32>
    %1474 = vector.shape_cast %1473 : vector<1x8x32xf32> to vector<8x32xf32>
    %c0_1107 = arith.constant 0 : index
    %c0_1108 = arith.constant 0 : index
    %c0_1109 = arith.constant 0 : index
    %1475 = vector.load %arg23[%c0_1107, %c0_1108, %c0_1109] : memref<3x32x32xbf16, #tpu.memory_space<vmem>>, vector<1x32x32xbf16>
    %1476 = vector.shape_cast %1475 : vector<1x32x32xbf16> to vector<32x32xbf16>
    %cst_1110 = arith.constant dense<0.000000e+00> : vector<8x32xf32>
    %1477 = tpu.matmul %1446, %1476, %cst_1110 {dimension_numbers = #tpu.dot_dimension_numbers<[1], [0], [0], [1], [0, 0, 1, 1], [], []>} : vector<8x32xbf16>, vector<32x32xbf16>, vector<8x32xf32> -> vector<8x32xf32>
    %1478 = arith.addf %1395, %1477 : vector<8x32xf32>
    %1479 = arith.negf %1478 : vector<8x32xf32>
    %1480 = math.exp %1479 : vector<8x32xf32>
    %cst_1111 = arith.constant 1.000000e+00 : f32
    %1481 = vector.broadcast %cst_1111 : f32 to vector<8x32xf32>
    %1482 = arith.addf %1481, %1480 : vector<8x32xf32>
    %1483 = arith.divf %1481, %1482 : vector<8x32xf32>
    %c1_1112 = arith.constant 1 : index
    %c0_1113 = arith.constant 0 : index
    %c0_1114 = arith.constant 0 : index
    %1484 = vector.load %arg23[%c1_1112, %c0_1113, %c0_1114] : memref<3x32x32xbf16, #tpu.memory_space<vmem>>, vector<1x32x32xbf16>
    %1485 = vector.shape_cast %1484 : vector<1x32x32xbf16> to vector<32x32xbf16>
    %cst_1115 = arith.constant dense<0.000000e+00> : vector<8x32xf32>
    %1486 = tpu.matmul %1446, %1485, %cst_1115 {dimension_numbers = #tpu.dot_dimension_numbers<[1], [0], [0], [1], [0, 0, 1, 1], [], []>} : vector<8x32xbf16>, vector<32x32xbf16>, vector<8x32xf32> -> vector<8x32xf32>
    %1487 = arith.addf %1401, %1486 : vector<8x32xf32>
    %1488 = arith.negf %1487 : vector<8x32xf32>
    %1489 = math.exp %1488 : vector<8x32xf32>
    %cst_1116 = arith.constant 1.000000e+00 : f32
    %1490 = vector.broadcast %cst_1116 : f32 to vector<8x32xf32>
    %1491 = arith.addf %1490, %1489 : vector<8x32xf32>
    %1492 = arith.divf %1490, %1491 : vector<8x32xf32>
    %c2_1117 = arith.constant 2 : index
    %c0_1118 = arith.constant 0 : index
    %c0_1119 = arith.constant 0 : index
    %1493 = vector.load %arg23[%c2_1117, %c0_1118, %c0_1119] : memref<3x32x32xbf16, #tpu.memory_space<vmem>>, vector<1x32x32xbf16>
    %1494 = vector.shape_cast %1493 : vector<1x32x32xbf16> to vector<32x32xbf16>
    %cst_1120 = arith.constant dense<0.000000e+00> : vector<8x32xf32>
    %1495 = tpu.matmul %1446, %1494, %cst_1120 {dimension_numbers = #tpu.dot_dimension_numbers<[1], [0], [0], [1], [0, 0, 1, 1], [], []>} : vector<8x32xbf16>, vector<32x32xbf16>, vector<8x32xf32> -> vector<8x32xf32>
    %1496 = arith.addf %1495, %1474 : vector<8x32xf32>
    %1497 = arith.mulf %1483, %1496 : vector<8x32xf32>
    %1498 = arith.addf %1407, %1497 : vector<8x32xf32>
    %1499 = math.tanh %1498 : vector<8x32xf32>
    %cst_1121 = arith.constant 1.000000e+00 : f32
    %1500 = vector.broadcast %cst_1121 : f32 to vector<8x32xf32>
    %1501 = arith.subf %1500, %1492 : vector<8x32xf32>
    %1502 = arith.mulf %1501, %1499 : vector<8x32xf32>
    %1503 = arith.mulf %1492, %1445 : vector<8x32xf32>
    %1504 = arith.addf %1502, %1503 : vector<8x32xf32>
    %1505 = arith.truncf %1504 : vector<8x32xf32> to vector<8x32xbf16>
    %c0_1122 = arith.constant 0 : index
    %c0_1123 = arith.constant 0 : index
    %1506 = vector.load %arg11[%c0_1122, %c0_1123] : memref<32x32xbf16, #tpu.memory_space<vmem>>, vector<32x32xbf16>
    %cst_1124 = arith.constant dense<0.000000e+00> : vector<8x32xf32>
    %1507 = tpu.matmul %1505, %1506, %cst_1124 {dimension_numbers = #tpu.dot_dimension_numbers<[1], [0], [0], [1], [0, 0, 1, 1], [], []>} : vector<8x32xbf16>, vector<32x32xbf16>, vector<8x32xf32> -> vector<8x32xf32>
    %c0_1125 = arith.constant 0 : index
    %c0_1126 = arith.constant 0 : index
    %1508 = vector.load %arg12[%c0_1125, %c0_1126] : memref<8x32xf32, #tpu.memory_space<vmem>>, vector<8x32xf32>
    %1509 = arith.addf %1507, %1508 : vector<8x32xf32>
    %1510 = math.tanh %1509 : vector<8x32xf32>
    %1511 = arith.truncf %1510 : vector<8x32xf32> to vector<8x32xbf16>
    %c0_1127 = arith.constant 0 : index
    %c0_1128 = arith.constant 0 : index
    %1512 = vector.load %arg13[%c0_1127, %c0_1128] : memref<32x32xbf16, #tpu.memory_space<vmem>>, vector<32x32xbf16>
    %cst_1129 = arith.constant dense<0.000000e+00> : vector<8x32xf32>
    %1513 = tpu.matmul %1511, %1512, %cst_1129 {dimension_numbers = #tpu.dot_dimension_numbers<[1], [0], [0], [1], [0, 0, 1, 1], [], []>} : vector<8x32xbf16>, vector<32x32xbf16>, vector<8x32xf32> -> vector<8x32xf32>
    %c0_1130 = arith.constant 0 : index
    %c0_1131 = arith.constant 0 : index
    %1514 = vector.load %arg14[%c0_1130, %c0_1131] : memref<8x32xf32, #tpu.memory_space<vmem>>, vector<8x32xf32>
    %1515 = arith.addf %1513, %1514 : vector<8x32xf32>
    %1516 = math.tanh %1515 : vector<8x32xf32>
    %c0_1132 = arith.constant 0 : index
    %c0_1133 = arith.constant 0 : index
    %1517 = vector.load %arg30[%c0_1132, %c0_1133] : memref<32x128xbf16, #tpu.memory_space<vmem>>, vector<32x128xbf16>
    %cst_1134 = arith.constant dense<0.000000e+00> : vector<8x128xf32>
    %1518 = tpu.matmul %1505, %1517, %cst_1134 {dimension_numbers = #tpu.dot_dimension_numbers<[1], [0], [0], [1], [0, 0, 1, 1], [], []>} : vector<8x32xbf16>, vector<32x128xbf16>, vector<8x128xf32> -> vector<8x128xf32>
    %c0_1135 = arith.constant 0 : index
    %c0_1136 = arith.constant 0 : index
    %1519 = vector.load %arg31[%c0_1135, %c0_1136] : memref<32x128xbf16, #tpu.memory_space<vmem>>, vector<32x128xbf16>
    %cst_1137 = arith.constant dense<0.000000e+00> : vector<8x128xf32>
    %1520 = tpu.matmul %1511, %1519, %cst_1137 {dimension_numbers = #tpu.dot_dimension_numbers<[1], [0], [0], [1], [0, 0, 1, 1], [], []>} : vector<8x32xbf16>, vector<32x128xbf16>, vector<8x128xf32> -> vector<8x128xf32>
    %1521 = arith.addf %1518, %1520 : vector<8x128xf32>
    %1522 = arith.truncf %1516 : vector<8x32xf32> to vector<8x32xbf16>
    %c0_1138 = arith.constant 0 : index
    %c0_1139 = arith.constant 0 : index
    %1523 = vector.load %arg32[%c0_1138, %c0_1139] : memref<32x128xbf16, #tpu.memory_space<vmem>>, vector<32x128xbf16>
    %cst_1140 = arith.constant dense<0.000000e+00> : vector<8x128xf32>
    %1524 = tpu.matmul %1522, %1523, %cst_1140 {dimension_numbers = #tpu.dot_dimension_numbers<[1], [0], [0], [1], [0, 0, 1, 1], [], []>} : vector<8x32xbf16>, vector<32x128xbf16>, vector<8x128xf32> -> vector<8x128xf32>
    %1525 = arith.addf %1521, %1524 : vector<8x128xf32>
    %1526 = vector.extract_strided_slice %34 {offsets = [56, 0], sizes = [8, 128], strides = [1, 1]} : vector<64x128xf32> to vector<8x128xf32>
    %1527 = arith.addf %1526, %1413 : vector<8x128xf32>
    %1528 = arith.addf %1527, %1525 : vector<8x128xf32>
    %c0_1141 = arith.constant 0 : index
    %c56 = arith.constant 56 : index
    %c0_1142 = arith.constant 0 : index
    %1529 = vector.load %arg34[%c0_1141, %c56, %c0_1142] : memref<1x64x128xf32, #tpu.memory_space<vmem>>, vector<1x8x128xf32>
    %1530 = vector.shape_cast %1529 : vector<1x8x128xf32> to vector<8x128xf32>
    %1531 = vector.shape_cast %1528 : vector<8x128xf32> to vector<1x8x128xf32>
    tpu.vector_store %arg34[%c0_1141, %c56, %c0_1142], %1531 {strides = array<i32>} : memref<1x64x128xf32, #tpu.memory_space<vmem>>, vector<1x8x128xf32>,
    return
  }
  func.func @transform_0(%arg0: i32) -> (i32, i32, i32) {
    %c0_i32 = arith.constant 0 : i32
    %c0_i32_0 = arith.constant 0 : i32
    %c0_i32_1 = arith.constant 0 : i32
    return %arg0, %c0_i32, %c0_i32_0 : i32, i32, i32
  }
  func.func @transform_1(%arg0: i32) -> (i32, i32, i32) {
    %c0_i32 = arith.constant 0 : i32
    %c0_i32_0 = arith.constant 0 : i32
    %c0_i32_1 = arith.constant 0 : i32
    return %arg0, %c0_i32, %c0_i32_0 : i32, i32, i32
  }
  func.func @transform_2(%arg0: i32) -> (i32, i32, i32) {
    %c0_i32 = arith.constant 0 : i32
    %c0_i32_0 = arith.constant 0 : i32
    %c0_i32_1 = arith.constant 0 : i32
    return %arg0, %c0_i32, %c0_i32_0 : i32, i32, i32
  }
  func.func @transform_3(%arg0: i32) -> (i32, i32, i32) {
    %c0_i32 = arith.constant 0 : i32
    %c0_i32_0 = arith.constant 0 : i32
    %c0_i32_1 = arith.constant 0 : i32
    return %arg0, %c0_i32, %c0_i32_0 : i32, i32, i32
  }
  func.func @transform_4(%arg0: i32) -> (i32, i32) {
    %c0_i32 = arith.constant 0 : i32
    %c0_i32_0 = arith.constant 0 : i32
    %c0_i32_1 = arith.constant 0 : i32
    return %c0_i32, %c0_i32_0 : i32, i32
  }
  func.func @transform_5(%arg0: i32) -> (i32, i32) {
    %c0_i32 = arith.constant 0 : i32
    %c0_i32_0 = arith.constant 0 : i32
    %c0_i32_1 = arith.constant 0 : i32
    return %c0_i32, %c0_i32_0 : i32, i32
  }
  func.func @transform_6(%arg0: i32) -> (i32, i32) {
    %c0_i32 = arith.constant 0 : i32
    %c0_i32_0 = arith.constant 0 : i32
    %c0_i32_1 = arith.constant 0 : i32
    return %c0_i32, %c0_i32_0 : i32, i32
  }
  func.func @transform_7(%arg0: i32) -> (i32, i32) {
    %c0_i32 = arith.constant 0 : i32
    %c0_i32_0 = arith.constant 0 : i32
    %c0_i32_1 = arith.constant 0 : i32
    return %c0_i32, %c0_i32_0 : i32, i32
  }
  func.func @transform_8(%arg0: i32) -> (i32, i32) {
    %c0_i32 = arith.constant 0 : i32
    %c0_i32_0 = arith.constant 0 : i32
    %c0_i32_1 = arith.constant 0 : i32
    return %c0_i32, %c0_i32_0 : i32, i32
  }
  func.func @transform_9(%arg0: i32) -> (i32, i32) {
    %c0_i32 = arith.constant 0 : i32
    %c0_i32_0 = arith.constant 0 : i32
    %c0_i32_1 = arith.constant 0 : i32
    return %c0_i32, %c0_i32_0 : i32, i32
  }
  func.func @transform_10(%arg0: i32) -> (i32, i32) {
    %c0_i32 = arith.constant 0 : i32
    %c0_i32_0 = arith.constant 0 : i32
    %c0_i32_1 = arith.constant 0 : i32
    return %c0_i32, %c0_i32_0 : i32, i32
  }
  func.func @transform_11(%arg0: i32) -> (i32, i32) {
    %c0_i32 = arith.constant 0 : i32
    %c0_i32_0 = arith.constant 0 : i32
    %c0_i32_1 = arith.constant 0 : i32
    return %c0_i32, %c0_i32_0 : i32, i32
  }
  func.func @transform_12(%arg0: i32) -> (i32, i32) {
    %c0_i32 = arith.constant 0 : i32
    %c0_i32_0 = arith.constant 0 : i32
    %c0_i32_1 = arith.constant 0 : i32
    return %c0_i32, %c0_i32_0 : i32, i32
  }
  func.func @transform_13(%arg0: i32) -> (i32, i32) {
    %c0_i32 = arith.constant 0 : i32
    %c0_i32_0 = arith.constant 0 : i32
    %c0_i32_1 = arith.constant 0 : i32
    return %c0_i32, %c0_i32_0 : i32, i32
  }
  func.func @transform_14(%arg0: i32) -> (i32, i32, i32) {
    %c0_i32 = arith.constant 0 : i32
    %c0_i32_0 = arith.constant 0 : i32
    %c0_i32_1 = arith.constant 0 : i32
    %c0_i32_2 = arith.constant 0 : i32
    return %c0_i32, %c0_i32_0, %c0_i32_1 : i32, i32, i32
  }
  func.func @transform_15(%arg0: i32) -> (i32, i32, i32) {
    %c0_i32 = arith.constant 0 : i32
    %c0_i32_0 = arith.constant 0 : i32
    %c0_i32_1 = arith.constant 0 : i32
    %c0_i32_2 = arith.constant 0 : i32
    return %c0_i32, %c0_i32_0, %c0_i32_1 : i32, i32, i32
  }
  func.func @transform_16(%arg0: i32) -> (i32, i32, i32) {
    %c0_i32 = arith.constant 0 : i32
    %c0_i32_0 = arith.constant 0 : i32
    %c0_i32_1 = arith.constant 0 : i32
    %c0_i32_2 = arith.constant 0 : i32
    return %c0_i32, %c0_i32_0, %c0_i32_1 : i32, i32, i32
  }
  func.func @transform_17(%arg0: i32) -> (i32, i32) {
    %c0_i32 = arith.constant 0 : i32
    %c0_i32_0 = arith.constant 0 : i32
    %c0_i32_1 = arith.constant 0 : i32
    return %c0_i32, %c0_i32_0 : i32, i32
  }
  func.func @transform_18(%arg0: i32) -> (i32, i32, i32) {
    %c0_i32 = arith.constant 0 : i32
    %c0_i32_0 = arith.constant 0 : i32
    %c0_i32_1 = arith.constant 0 : i32
    %c0_i32_2 = arith.constant 0 : i32
    return %c0_i32, %c0_i32_0, %c0_i32_1 : i32, i32, i32
  }
  func.func @transform_19(%arg0: i32) -> (i32, i32, i32) {
    %c0_i32 = arith.constant 0 : i32
    %c0_i32_0 = arith.constant 0 : i32
    %c0_i32_1 = arith.constant 0 : i32
    %c0_i32_2 = arith.constant 0 : i32
    return %c0_i32, %c0_i32_0, %c0_i32_1 : i32, i32, i32
  }
  func.func @transform_20(%arg0: i32) -> (i32, i32, i32) {
    %c0_i32 = arith.constant 0 : i32
    %c0_i32_0 = arith.constant 0 : i32
    %c0_i32_1 = arith.constant 0 : i32
    %c0_i32_2 = arith.constant 0 : i32
    return %c0_i32, %c0_i32_0, %c0_i32_1 : i32, i32, i32
  }
  func.func @transform_21(%arg0: i32) -> (i32, i32, i32) {
    %c0_i32 = arith.constant 0 : i32
    %c0_i32_0 = arith.constant 0 : i32
    %c0_i32_1 = arith.constant 0 : i32
    %c0_i32_2 = arith.constant 0 : i32
    return %c0_i32, %c0_i32_0, %c0_i32_1 : i32, i32, i32
  }
  func.func @transform_22(%arg0: i32) -> (i32, i32, i32) {
    %c0_i32 = arith.constant 0 : i32
    %c0_i32_0 = arith.constant 0 : i32
    %c0_i32_1 = arith.constant 0 : i32
    %c0_i32_2 = arith.constant 0 : i32
    return %c0_i32, %c0_i32_0, %c0_i32_1 : i32, i32, i32
  }
  func.func @transform_23(%arg0: i32) -> (i32, i32, i32) {
    %c0_i32 = arith.constant 0 : i32
    %c0_i32_0 = arith.constant 0 : i32
    %c0_i32_1 = arith.constant 0 : i32
    %c0_i32_2 = arith.constant 0 : i32
    return %c0_i32, %c0_i32_0, %c0_i32_1 : i32, i32, i32
  }
  func.func @transform_24(%arg0: i32) -> (i32, i32) {
    %c0_i32 = arith.constant 0 : i32
    %c0_i32_0 = arith.constant 0 : i32
    %c0_i32_1 = arith.constant 0 : i32
    return %c0_i32, %c0_i32_0 : i32, i32
  }
  func.func @transform_25(%arg0: i32) -> (i32, i32) {
    %c0_i32 = arith.constant 0 : i32
    %c0_i32_0 = arith.constant 0 : i32
    %c0_i32_1 = arith.constant 0 : i32
    return %c0_i32, %c0_i32_0 : i32, i32
  }
  func.func @transform_26(%arg0: i32) -> (i32, i32) {
    %c0_i32 = arith.constant 0 : i32
    %c0_i32_0 = arith.constant 0 : i32
    %c0_i32_1 = arith.constant 0 : i32
    return %c0_i32, %c0_i32_0 : i32, i32
  }
  func.func @transform_27(%arg0: i32) -> (i32, i32) {
    %c0_i32 = arith.constant 0 : i32
    %c0_i32_0 = arith.constant 0 : i32
    %c0_i32_1 = arith.constant 0 : i32
    return %c0_i32, %c0_i32_0 : i32, i32
  }
  func.func @transform_28(%arg0: i32) -> (i32, i32) {
    %c0_i32 = arith.constant 0 : i32
    %c0_i32_0 = arith.constant 0 : i32
    %c0_i32_1 = arith.constant 0 : i32
    return %c0_i32, %c0_i32_0 : i32, i32
  }
  func.func @transform_29(%arg0: i32) -> (i32, i32) {
    %c0_i32 = arith.constant 0 : i32
    %c0_i32_0 = arith.constant 0 : i32
    %c0_i32_1 = arith.constant 0 : i32
    return %c0_i32, %c0_i32_0 : i32, i32
  }
  func.func @transform_30(%arg0: i32) -> (i32, i32) {
    %c0_i32 = arith.constant 0 : i32
    %c0_i32_0 = arith.constant 0 : i32
    %c0_i32_1 = arith.constant 0 : i32
    return %c0_i32, %c0_i32_0 : i32, i32
  }
  func.func @transform_31(%arg0: i32) -> (i32, i32) {
    %c0_i32 = arith.constant 0 : i32
    %c0_i32_0 = arith.constant 0 : i32
    %c0_i32_1 = arith.constant 0 : i32
    return %c0_i32, %c0_i32_0 : i32, i32
  }
  func.func @transform_32(%arg0: i32) -> (i32, i32) {
    %c0_i32 = arith.constant 0 : i32
    %c0_i32_0 = arith.constant 0 : i32
    %c0_i32_1 = arith.constant 0 : i32
    return %c0_i32, %c0_i32_0 : i32, i32
  }
  func.func @transform_33(%arg0: i32) -> (i32, i32, i32) {
    %c0_i32 = arith.constant 0 : i32
    %c0_i32_0 = arith.constant 0 : i32
    %c0_i32_1 = arith.constant 0 : i32
    return %arg0, %c0_i32, %c0_i32_0 : i32, i32, i32
  }
}

</mosaic_0001>

<bundles_post_ra>
// kernel: core_decoder_forward.1
= control target key start
LH: loop header
LB: loop body
LE: loop exit
PB: predicated region body
PF: predicated region fallthrough
CT: control target
= control target key end

     0   :  { %s17226_s3 = smov 4   ;;  %vm190_vm0 = vcmask 261120   ;;  %s17227_s10 = smov 14   ;;  %v19716_v43 = vmov 0.0   ;;  %vm17233_vm1 = vmmov 0   ;;  %s19715_s0 = inlined_call_operand.smem [shape: u32[34], index: -1, kind: input, shape index: {}] }
   0x1   :  { %s12807_s6 = sld [smem:[%s19715_s0 + %s17226_s3]]   ;;  %s17228_s14 = smov 24  }
   0x2   :  { %s1_s9 = sld [smem:[%s19715_s0]]   ;;  %s17229_s18 = smov 15  }
   0x3   :  { %s17279_s13 = sld [smem:[%s19715_s0 + %s17227_s10]]   ;;  %s17230_s22 = smov 5  }
   0x4   :  { %s17289_s17 = sld [smem:[%s19715_s0 + %s17228_s14]]   ;;  %s17232_s26 = smov 1  }
   0x5   :  { %s17295_s21 = sld [smem:[%s19715_s0 + %s17229_s18]]   ;;  %s17234_s30 = smov 6  }
   0x6   :  { %s12808_s25 = sld [smem:[%s19715_s0 + %s17230_s22]]   ;;  %s17235_s4 = smov 16  }
   0x7   :  { %v16502_v0 = vld [vmem:[%s12807_s6] sm:$0xff]   ;;  %v16503_v1 = vld [vmem:[%s12807_s6 + $0x8] sm:$0xff]   ;;  %s12804_s29 = sld [smem:[%s19715_s0 + %s17232_s26]]   ;;  %s17236_s8 = smov 32  }
   0x8   :  { %14471 = vmatprep.subr.bf16.mxu0 %v16502_v0  ;;  %v16504_v2 = vld [vmem:[%s1_s9] sm:$0xff]   ;;  %v16505_v3 = vld [vmem:[%s1_s9 + $0x8] sm:$0xff]   ;;  %v16506_v4 = vld [vmem:[%s1_s9 + $0x10] sm:$0xff]   ;;  %s17373_s3 = sld [smem:[%s19715_s0 + %s17234_s30]]   ;;  %s17237_s12 = smov 17  }
   0x9   :  { %14472 = vmatpush3.bf16.msra.mxu0 %v16502_v0  ;;  %14475 = vmatprep.mubr.msk.bf16.mxu0 %vm190_vm0, %v16504_v2  ;;  %v16507_v5 = vld [vmem:[%s1_s9 + $0x18] sm:$0xff]   ;;  %v16508_v6 = vld [vmem:[%s17279_s13] sm:$0xff]   ;;  %v16509_v7 = vld [vmem:[%s17279_s13 + $0x10] sm:$0xff]   ;;  %s17388_s7 = sld [smem:[%s19715_s0 + %s17235_s4]]   ;;  %s17238_s16 = smov 18  }
   0xa   :  { %14473 = vmatprep.subr.bf16.mxu0 %v16503_v1  ;;  %14483 = vmatprep.subr.bf16.mxu1 %v16508_v6  ;;  %v16510_v8 = vld [vmem:[%s17279_s13 + $0x8] sm:$0xff]   ;;  %v16511_v9 = vld [vmem:[%s17279_s13 + $0x18] sm:$0xff]   ;;  %v16512_v10 = vld [vmem:[%s17279_s13 + $0x20] sm:$0xff]   ;;  %s17419_s11 = sld [smem:[%s19715_s0 + %s17236_s8]]   ;;  %s17239_s20 = smov 26  }
   0xb   :  { %14484 = vmatpush3.bf16.msra.mxu1 %v16508_v6  ;;  %v16514_v11 = vld [vmem:[%s17289_s17] sm:$0xff]   ;;  %v16513_v35 = vld [vmem:[%s17279_s13 + $0x28] sm:$0xff]   ;;  %v17352_v50 = vld [vmem:[%s17295_s21 + $0x10] sm:$0xff]   ;;  %s17483_s15 = sld [smem:[%s19715_s0 + %s17237_s12]]   ;;  %s17242_s4 = smov 19  }
   0xc   :  { %14485 = vmatprep.subr.bf16.mxu1 %v16510_v8  ;;  %v12837_v12 = vld [vmem:[%s12808_s25] ss:$0 sm:$0xff]  ;;  %v16515_v36 = vld [vmem:[%s17289_s17 + $0x8] sm:$0xff]   ;;  %v17358_v51 = vld [vmem:[%s17295_s21 + $0x18] sm:$0xff]   ;;  %s17503_s19 = sld [smem:[%s19715_s0 + %s17238_s16]]   ;;  %s17240_s25 = smov 25  }
   0xd   :  { %14474 = vmatpush3.bf16.msra.mxu0 %v16503_v1  ;;  %v17315_v44 = vld [vmem:[%s17295_s21] sm:$0xff]   ;;  %v17325_v46 = vld [vmem:[%s17295_s21 + $0x8] sm:$0xff]   ;;  %s17515_s24 = sld [smem:[%s19715_s0 + %s17239_s20]]   ;;  %s17243_s8 = smov 2  }
   0xe   :  { %14495 = vmatprep.subr.bf16.mxu0 %v16509_v7  ;;  %v17318_v45 = vld [vmem:[%s17295_s21 + $0x20] sm:$0xff]   ;;  %v17334_v47 = vld [vmem:[%s17295_s21 + $0x28] sm:$0xff]   ;;  %s17533_s28 = sld [smem:[%s19715_s0 + %s17240_s25]]   ;;  %s17244_s13 = smov 8  }
   0xf   :  { %14486 = vmatpush3.bf16.msra.mxu1 %v16510_v8  ;;  %v17344_v48 = vld [vmem:[%s12804_s29] sm:$0xff]  ;;  %v17379_v53 = vld [vmem:[%s17373_s3 + $0x8] sm:$0xff]   ;;  %s17241_s29 = smov 7   ;;  %s12805_s12 = sld [smem:[%s19715_s0 + %s17243_s8]]  }
  0x10   :  { %14476 = vmatmul.mubr.msk.bf16.vlgmr.msra.gmra.mrb[0].mxu0 %vm190_vm0, %v16505_v3  ;;  %14507 = vmatprep.subr.bf16.mxu1 %v16512_v10  ;;  %v657_v49 = vpack.c.bf16 %v17344_v48, %v17344_v48  ;;  %v17376_v52 = vld [vmem:[%s17373_s3] sm:$0xff]   ;;  %s17538_s2 = sld [smem:[%s19715_s0 + %s17241_s29]]   ;;  %s17245_s18 = smov 20  }
  0x11   :  { %14479 = vmatprep.mubr.msk.bf16.mxu0 %vm190_vm0, %v16506_v4  ;;  %14496 = vmatpush3.bf16.msra.mxu0 %v16509_v7  ;;  %v17391_v54 = vld [vmem:[%s17388_s7 + $0x1] ss:$0 sm:$0xff]  ;;  %v17394_v55 = vld [vmem:[%s17388_s7] ss:$0 sm:$0xff]  ;;  %s17726_s17 = sld [smem:[%s19715_s0 + %s17244_s13]]   ;;  %s17246_s25 = smov 21  }
  0x12   :  { %14497 = vmatprep.subr.bf16.mxu0 %v16511_v9  ;;  %s17743_s23 = sld [smem:[%s19715_s0 + %s17245_s18]]   ;;  %s17247_s30 = smov 27  }
  0x13   :  { %s17776_s29 = sld [smem:[%s19715_s0 + %s17246_s25]]   ;;  %s17248_s6 = smov 28  }
  0x14   :  { %s17788_s5 = sld [smem:[%s19715_s0 + %s17247_s30]]   ;;  %s17251_s25 = smov 3  }
  0x15   :  { %14498 = vmatpush3.bf16.msra.mxu0 %v16511_v9  ;;  %s17806_s10 = sld [smem:[%s19715_s0 + %s17248_s6]]   ;;  %s17252_s1 = smov 10  }
  0x16   :  { %14519 = vmatprep.subr.bf16.mxu0 %v16514_v11  ;;  %s12806_s30 = sld [smem:[%s19715_s0 + %s17251_s25]]   ;;  %s17253_s9 = smov 23  }
  0x17   :  { %s18068_s8 = sld [smem:[%s19715_s0 + %s17252_s1]]   ;;  %s17255_s26 = smov 30  }
  0x18   :  { %14480 = vmatmul.mubr.msk.bf16.gmra.mrb[4].mxu0 %vm190_vm0, %v16507_v5  ;;  %s18079_s14 = sld [smem:[%s19715_s0 + %s17253_s9]]   ;;  %s17257_s13 = smov 11  }
  0x19   :  { %s18108_s1 = sld [smem:[%s19715_s0 + %s17255_s26]]   ;;  %s17258_s26 = smov 31  }
  0x1a   :  { %s18126_s20 = sld [smem:[%s19715_s0 + %s17257_s13]]   ;;  %s17259_s6 = smov 13  }
  0x1b   :  { %s17260_s18 = smov 33  }
  0xe3   :  { %v14477_v13 = vpop.f32.mrb[0].mxu0 }
  0xe4   :  { %v246_v14 = vadd.f32 %v14477_v13, %v12837_v12  ;;  %v237_v15 = vpop.f32.mrb[1].mxu0 }
  0xe5   :  { %v238_v16 = vadd.f32 %v12837_v12, %v237_v15  ;;  %v14478_v17 = vpop.f32.mrb[2].mxu0 }
  0xe6   :  { %16878 = vtanh.f32 %v246_v14  ;;  %v249_v18 = vadd.f32 %v14478_v17, %v12837_v12  ;;  %v240_v19 = vpop.f32.mrb[3].mxu0 }
  0xe7   :  { %16880 = vtanh.f32 %v238_v16  ;;  %v241_v20 = vadd.f32 %v12837_v12, %v240_v19 }
  0xe8   :  { %16882 = vtanh.f32 %v249_v18 }
  0xe9   :  { %16884 = vtanh.f32 %v241_v20 }
  0xeb   :  { %v14481_v21 = vpop.f32.mrb[4].mxu0 }
  0xec   :  { %v262_v22 = vadd.f32 %v14481_v21, %v12837_v12  ;;  %v253_v23 = vpop.f32.mrb[5].mxu0 }
  0xed   :  { %v254_v24 = vadd.f32 %v12837_v12, %v253_v23  ;;  %v14482_v25 = vpop.f32.mrb[6].mxu0  ;;  %v12885_v23 = vld [vmem:[%s17419_s11] ss:$0 sm:$0xff] }
  0xee   :  { %16886 = vtanh.f32 %v262_v22  ;;  %v265_v26 = vadd.f32 %v14482_v25, %v12837_v12  ;;  %v256_v27 = vpop.f32.mrb[7].mxu0  ;;  %v12872_v22 = vld [vmem:[%s17388_s7 + $0x2] ss:$0 sm:$0xff]  ;;  %s17646_s7 = sld [smem:[%s19715_s0 + %s17242_s4]]   ;;  %s17256_s4 = smov 29  }
  0xef   :  { %16888 = vtanh.f32 %v254_v24  ;;  %v257_v28 = vadd.f32 %v12837_v12, %v256_v27 }
  0xf0   :  { %v16879_v29 = vpop.eup %16878  ;;  %16890 = vtanh.f32 %v265_v26 }
  0xf1   :  { %v16881_v30 = vpop.eup %16880  ;;  %16892 = vtanh.f32 %v257_v28 }
  0xf2   :  { %v16883_v31 = vpop.eup %16882 }
  0xf3   :  { %v16885_v32 = vpop.eup %16884  ;;  %v277_v33 = vpack.c.bf16 %v16883_v31, %v16879_v29 }
  0xf4   :  { %v276_v34 = vpack.c.bf16 %v16885_v32, %v16881_v30 }
  0xf6   :  { %14487 = vmatprep.mubr.msk.bf16.mxu1 %vm190_vm0, %v276_v34  ;;  %14499 = vmatprep.mubr.msk.bf16.mxu0 %vm190_vm0, %v276_v34 }
  0xf7   :  { %14488 = vmatmul.mubr.msk.bf16.vlgmr.msra.gmra.mrb[0].mxu1 %vm190_vm0, %v277_v33  ;;  %14500 = vmatmul.mubr.msk.bf16.vlgmr.msra.gmra.mrb[8].mxu0 %vm190_vm0, %v277_v33 }
  0xf8   :  { %v16887_v37 = vpop.eup %16886  ;;  %14508 = vmatpush3.bf16.msra.mxu1 %v16512_v10  ;;  %14520 = vmatpush3.bf16.msra.mxu0 %v16514_v11 }
  0xf9   :  { %v16889_v38 = vpop.eup %16888  ;;  %14509 = vmatprep.subr.bf16.mxu1 %v16513_v35  ;;  %14521 = vmatprep.subr.bf16.mxu0 %v16515_v36 }
  0xfa   :  { %v16891_v39 = vpop.eup %16890 }
  0xfb   :  { %v16893_v40 = vpop.eup %16892  ;;  %v279_v41 = vpack.c.bf16 %v16891_v39, %v16887_v37 }
  0xfc   :  { %v278_v42 = vpack.c.bf16 %v16893_v40, %v16889_v38  ;;  %14510 = vmatpush3.bf16.msra.mxu1 %v16513_v35  ;;  %14522 = vmatpush3.bf16.msra.mxu0 %v16515_v36 }
  0xfd   :  { %14531 = vmatprep.subr.bf16.mxu1 %v19716_v43  ;;  %14547 = vmatprep.subr.bf16.mxu0 %v19716_v43 }
  0xfe   :  { %14491 = vmatprep.mubr.msk.bf16.mxu1 %vm190_vm0, %v278_v42  ;;  %14503 = vmatprep.mubr.msk.bf16.mxu0 %vm190_vm0, %v278_v42 }
  0xff   :  { %14492 = vmatmul.mubr.msk.bf16.gmra.mrb[4].mxu1 %vm190_vm0, %v279_v41  ;;  %14504 = vmatmul.mubr.msk.bf16.gmra.mrb[12].mxu0 %vm190_vm0, %v279_v41 }
 0x100   :  { %14511 = vmatprep.mubr.msk.bf16.mxu1 %vm190_vm0, %v276_v34  ;;  %14523 = vmatprep.mubr.msk.bf16.mxu0 %vm190_vm0, %v276_v34 }
 0x107   :  { %14512 = vmatmul.mubr.msk.bf16.vlgmr.msra.gmra.mrb[8].mxu1 %vm190_vm0, %v277_v33  ;;  %14524 = vmatmul.mubr.msk.bf16.vlgmr.msra.gmra.mrb[16].mxu0 %vm190_vm0, %v277_v33 }
 0x108   :  { %14532 = vmatpush3.bf16.msra.mxu1 %v17315_v44  ;;  %14515 = vmatprep.mubr.msk.bf16.mxu1 %vm190_vm0, %v278_v42 }
 0x109   :  { %14527 = vmatprep.mubr.msk.bf16.mxu0 %vm190_vm0, %v278_v42  ;;  %14533 = vmatprep.subr.bf16.mxu1 %v19716_v43 }
 0x10a   :  { %14548 = vmatpush3.bf16.msra.mxu0 %v17318_v45 }
 0x10b   :  { %14549 = vmatprep.subr.bf16.mxu0 %v19716_v43 }
 0x10c   :  { %14534 = vmatpush3.bf16.msra.mxu1 %v17325_v46 }
 0x10d   :  { %14539 = vmatprep.subr.bf16.mxu1 %v19716_v43 }
 0x10e   :  { %14550 = vmatpush3.bf16.msra.mxu0 %v17334_v47 }
 0x10f   :  { %14516 = vmatmul.mubr.msk.bf16.gmra.mrb[12].mxu1 %vm190_vm0, %v279_v41  ;;  %14528 = vmatmul.mubr.msk.bf16.gmra.mrb[20].mxu0 %vm190_vm0, %v279_v41 }
 0x110   :  { %14535 = vmatprep.mubr.msk.bf16.mxu1 %vm17233_vm1, %v19716_v43  ;;  %14551 = vmatprep.mubr.msk.bf16.mxu0 %vm17233_vm1, %v19716_v43 }
 0x111   :  { %14563 = vmatprep.subr.bf16.mxu0 %v19716_v43 }
 0x117   :  { %14536 = vmatmul.mubr.msk.bf16.vlgmr.msra.gmra.mrb[16].mxu1 %vm190_vm0, %v657_v49  ;;  %14552 = vmatmul.mubr.msk.bf16.vlgmr.msra.gmra.mrb[24].mxu0 %vm190_vm0, %v657_v49 }
 0x118   :  { %14540 = vmatpush3.bf16.msra.mxu1 %v17352_v50  ;;  %14543 = vmatprep.mubr.msk.bf16.mxu1 %vm17233_vm1, %v19716_v43 }
 0x119   :  { %14541 = vmatprep.subr.bf16.mxu1 %v19716_v43  ;;  %14567 = vmatprep.mubr.msk.bf16.mxu0 %vm17233_vm1, %v19716_v43 }
 0x11c   :  { %14542 = vmatpush3.bf16.msra.mxu1 %v17358_v51 }
 0x11d   :  { %14555 = vmatprep.subr.bf16.mxu1 %v19716_v43 }
 0x11f   :  { %14544 = vmatmul.mubr.msk.bf16.vlgmr.msra.gmra.mrb[20].mxu1 %vm190_vm0, %v657_v49 }
 0x120   :  { %14559 = vmatprep.mubr.msk.bf16.mxu1 %vm17233_vm1, %v19716_v43  ;;  %14556 = vmatpush3.bf16.msra.mxu1 %v17376_v52 }
 0x121   :  { %14557 = vmatprep.subr.bf16.mxu1 %v19716_v43 }
 0x124   :  { %14558 = vmatpush3.bf16.msra.mxu1 %v17379_v53 }
 0x125   :  { %14571 = vmatprep.subr.bf16.mxu1 %v19716_v43 }
 0x1ca   :  { %v14489_v56 = vpop.f32.mrb[0].mxu1  ;;  %v14501_v57 = vpop.f32.mrb[8].mxu0 }
 0x1cb   :  { %v349_v58 = vpop.f32.mrb[1].mxu1  ;;  %v17396_v59 = vpop.f32.mrb[9].mxu0  ;;  %v17399_v60 = vadd.f32 %v14489_v56, %v17394_v55  ;;  %v17402_v61 = vadd.f32 %v14501_v57, %v17391_v54 }
 0x1cc   :  { %v14490_v62 = vpop.f32.mrb[2].mxu1  ;;  %v14502_v63 = vpop.f32.mrb[10].mxu0 }
 0x1cd   :  { %v352_v0 = vpop.f32.mrb[3].mxu1  ;;  %v442_v1 = vpop.f32.mrb[11].mxu0  ;;  %v17405_v2 = vadd.f32 %v14490_v62, %v17394_v55  ;;  %v17408_v3 = vadd.f32 %v14502_v63, %v17391_v54 }
 0x1ce   :  { %v17411_v4 = vadd.f32 %v17394_v55, %v352_v0  ;;  %v17414_v5 = vadd.f32 %v17391_v54, %v442_v1 }
 0x1d2   :  { %v14493_v6 = vpop.f32.mrb[4].mxu1  ;;  %v14505_v7 = vpop.f32.mrb[12].mxu0 }
 0x1d3   :  { %v365_v8 = vpop.f32.mrb[5].mxu1  ;;  %v455_v9 = vpop.f32.mrb[13].mxu0  ;;  %v17422_v10 = vadd.f32 %v14493_v6, %v17394_v55  ;;  %v17425_v11 = vadd.f32 %v14505_v7, %v17391_v54 }
 0x1d4   :  { %v14494_v12 = vpop.f32.mrb[6].mxu1  ;;  %v14506_v13 = vpop.f32.mrb[14].mxu0  ;;  %v17428_v14 = vadd.f32 %v17394_v55, %v365_v8  ;;  %v17431_v15 = vadd.f32 %v17391_v54, %v455_v9 }
 0x1d5   :  { %v368_v16 = vpop.f32.mrb[7].mxu1  ;;  %v458_v17 = vpop.f32.mrb[15].mxu0  ;;  %v17434_v18 = vadd.f32 %v14494_v12, %v17394_v55  ;;  %v17437_v19 = vadd.f32 %v14506_v13, %v17391_v54  ;;  %v350_v12 = vadd.f32 %v17394_v55, %v349_v58 }
 0x1d6   :  { %v17440_v20 = vadd.f32 %v17394_v55, %v368_v16  ;;  %v17443_v21 = vadd.f32 %v17391_v54, %v458_v17 }
 0x1d7   :  { %19718 = vst [vmem:[#allocation2_spill] sm:$0xff] %v17434_v18  ;;  %19719 = vst [vmem:[#allocation3_spill] sm:$0xff] %v17437_v19 }
 0x1da   :  { %v14513_v24 = vpop.f32.mrb[8].mxu1  ;;  %v14525_v25 = vpop.f32.mrb[16].mxu0 }
 0x1db   :  { %v17447_v26 = vadd.f32 %v14513_v24, %v12872_v22  ;;  %v529_v27 = vpop.f32.mrb[9].mxu1  ;;  %v17449_v28 = vpop.f32.mrb[17].mxu0  ;;  %v17451_v29 = vadd.f32 %v14525_v25, %v12885_v23 }
 0x1dc   :  { %v14514_v30 = vpop.f32.mrb[10].mxu1  ;;  %v14526_v31 = vpop.f32.mrb[18].mxu0 }
 0x1dd   :  { %v17453_v32 = vadd.f32 %v14514_v30, %v12872_v22  ;;  %v532_v33 = vpop.f32.mrb[11].mxu1  ;;  %v614_v34 = vpop.f32.mrb[19].mxu0  ;;  %v17455_v35 = vadd.f32 %v14526_v31, %v12885_v23 }
 0x1de   :  { %v17457_v36 = vadd.f32 %v12872_v22, %v532_v33  ;;  %v17459_v37 = vadd.f32 %v12885_v23, %v614_v34 }
 0x1e2   :  { %v14517_v38 = vpop.f32.mrb[12].mxu1  ;;  %v14529_v39 = vpop.f32.mrb[20].mxu0 }
 0x1e3   :  { %v17461_v40 = vadd.f32 %v14517_v38, %v12872_v22  ;;  %v545_v41 = vpop.f32.mrb[13].mxu1  ;;  %v627_v42 = vpop.f32.mrb[21].mxu0  ;;  %v17463_v49 = vadd.f32 %v14529_v39, %v12885_v23  ;;  %v440_v39 = vadd.f32 %v17391_v54, %v17396_v59 }
 0x1e4   :  { %v17465_v56 = vadd.f32 %v12872_v22, %v545_v41  ;;  %v14518_v57 = vpop.f32.mrb[14].mxu1  ;;  %v14530_v62 = vpop.f32.mrb[22].mxu0  ;;  %v17467_v63 = vadd.f32 %v12885_v23, %v627_v42 }
 0x1e5   :  { %19720 = vst [vmem:[#allocation4_spill] sm:$0xff] %v17463_v49  ;;  %v17469_v0 = vadd.f32 %v14518_v57, %v12872_v22  ;;  %v548_v1 = vpop.f32.mrb[15].mxu1  ;;  %v630_v6 = vpop.f32.mrb[23].mxu0  ;;  %v17471_v7 = vadd.f32 %v14530_v62, %v12885_v23 }
 0x1e6   :  { %v17473_v8 = vadd.f32 %v12872_v22, %v548_v1  ;;  %v17475_v9 = vadd.f32 %v12885_v23, %v630_v6  ;;  %v17486_v6 = vld [vmem:[%s17483_s15] sm:$0xff] }
 0x1e7   :  { %19721 = vst [vmem:[#allocation5_spill] sm:$0xff] %v17469_v0  ;;  %19722 = vst [vmem:[#allocation6_spill] sm:$0xff] %v17471_v7 }
 0x1e8   :  { %19723 = vst [vmem:[#allocation7_spill] sm:$0xff] %v17475_v9 }
 0x1ea   :  { %v716_v13 = vpop.f32.mrb[16].mxu1  ;;  %v844_v16 = vpop.f32.mrb[24].mxu0 }
 0x1eb   :  { %v722_v17 = vadd.f32 %v716_v13, %v350_v12  ;;  %v14537_v24 = vpop.f32.mrb[17].mxu1  ;;  %v14553_v25 = vpop.f32.mrb[25].mxu0  ;;  %v845_v12 = vadd.f32 %v844_v16, %v17486_v6  ;;  %v17524_v16 = vld [vmem:[%s17503_s19 + $0x18] sm:$0xff]  }
 0x1ec   :  { %v719_v30 = vpop.f32.mrb[18].mxu1  ;;  %v847_v31 = vpop.f32.mrb[26].mxu0 }
 0x1ed   :  { %v12889_v33 = vmul.f32 -1.442695, %v722_v17  ;;  %v14538_v34 = vpop.f32.mrb[19].mxu1  ;;  %v14554_v38 = vpop.f32.mrb[27].mxu0  ;;  %v530_v17 = vadd.f32 %v12872_v22, %v529_v27  ;;  %v17509_v22 = vld [vmem:[%s17503_s19 + $0x10] sm:$0xff]   ;;  %v17520_v27 = vld [vmem:[%s17503_s19 + $0x8] sm:$0xff]  }
 0x1ef   :  { %16894 = vpow2.f32 %v12889_v33 }
 0x1f2   :  { %v780_v41 = vpop.f32.mrb[20].mxu1 }
 0x1f3   :  { %v786_v42 = vadd.f32 %v780_v41, %v440_v39  ;;  %v14545_v23 = vpop.f32.mrb[21].mxu1 }
 0x1f4   :  { %v783_v57 = vpop.f32.mrb[22].mxu1 }
 0x1f5   :  { %v12897_v62 = vmul.f32 -1.442695, %v786_v42  ;;  %v14546_v55 = vpop.f32.mrb[23].mxu1  ;;  %v17541_v42 = vld [vmem:[%s17538_s2] sm:$0xff] }
 0x1f7   :  { %16896 = vpow2.f32 %v12897_v62 }
 0x1f9   :  { %v16895_v58 = vpop.eup %16894 }
 0x1fa   :  { %v726_v1 = vadd.f32 1.0, %v16895_v58 }
 0x1fc   :  { %16898 = vrcp.f32 %v726_v1 }
 0x201   :  { %v16897_v54 = vpop.eup %16896 }
 0x202   :  { %v790_v59 = vadd.f32 1.0, %v16897_v54  ;;  %v17545_v54 = vld [vmem:[%s17503_s19 + $0x20] sm:$0xff]  }
 0x204   :  { %16900 = vrcp.f32 %v790_v59  ;;  %v17548_v59 = vld [vmem:[%s17515_s24] sm:$0xff]  }
 0x206   :  { %v16899_v13 = vpop.eup %16898 }
 0x207   :  { %v850_v24 = vmul.f32 %v16899_v13, %v845_v12  ;;  %v17555_v13 = vld [vmem:[%s17503_s19 + $0x28] sm:$0xff]  }
 0x209   :  { %v851_v25 = vadd.f32 %v850_v24, %v530_v17  ;;  %v17558_v17 = vld [vmem:[%s17515_s24 + $0x8] sm:$0xff]   ;;  %v17569_v24 = vld [vmem:[%s17533_s28] sm:$0xff]  }
 0x20b   :  { %16902 = vtanh.f32 %v851_v25  ;;  %v17578_v25 = vld [vmem:[%s17533_s28 + $0x8] sm:$0xff]  }
 0x20e   :  { %v16901_v30 = vpop.eup %16900 }
 0x20f   :  { %v853_v31 = vsub.f32 1.0, %v16901_v30  ;;  %v855_v38 = vmul.f32 %v16901_v30, %v17344_v48  ;;  %v17506_v48 = vld [vmem:[%s17503_s19] sm:$0xff]  }
 0x210   :  { %14564 = vmatpush3.bf16.msra.mxu0 %v17506_v48 }
 0x211   :  { %14565 = vmatprep.subr.bf16.mxu0 %v19716_v43 }
 0x214   :  { %14566 = vmatpush3.bf16.msra.mxu0 %v17520_v27 }
 0x215   :  { %v16903_v33 = vpop.eup %16902  ;;  %14579 = vmatprep.subr.bf16.mxu0 %v19716_v43 }
 0x216   :  { %v854_v34 = vmul.f32 %v16903_v33, %v853_v31 }
 0x218   :  { %v17490_v39 = vadd.f32 %v855_v38, %v854_v34 }
 0x21a   :  { %v17494_v41 = vpack.c.bf16 %v17490_v39, %v17490_v39 }
 0x21c   :  { %14560 = vmatmul.mubr.msk.bf16.vlgmr.msra.gmra.mrb[24].mxu1 %vm190_vm0, %v17494_v41 }
 0x21d   :  { %14575 = vmatprep.mubr.msk.bf16.mxu1 %vm17233_vm1, %v19716_v43  ;;  %14572 = vmatpush3.bf16.msra.mxu1 %v17509_v22 }
 0x21e   :  { %14573 = vmatprep.subr.bf16.mxu1 %v19716_v43 }
 0x221   :  { %14574 = vmatpush3.bf16.msra.mxu1 %v17524_v16 }
 0x222   :  { %14587 = vmatprep.subr.bf16.mxu1 %v19716_v43 }
 0x2ef   :  { %v912_v23 = vpop.f32.mrb[24].mxu1 }
 0x2f0   :  { %v913_v57 = vadd.f32 %v912_v23, %v17541_v42  ;;  %v14561_v62 = vpop.f32.mrb[25].mxu1 }
 0x2f1   :  { %v915_v55 = vpop.f32.mrb[26].mxu1 }
 0x2f2   :  { %16904 = vtanh.f32 %v913_v57  ;;  %v14562_v58 = vpop.f32.mrb[27].mxu1 }
 0x2fc   :  { %v16905_v1 = vpop.eup %16904 }
 0x2fd   :  { %v919_v12 = vpack.c.bf16 %v16905_v1, %v16905_v1 }
 0x2ff   :  { %14568 = vmatmul.mubr.msk.bf16.vlgmr.msra.gmra.mrb[28].mxu0 %vm190_vm0, %v919_v12  ;;  %14576 = vmatmul.mubr.msk.bf16.vlgmr.msra.gmra.mrb[28].mxu1 %vm190_vm0, %v919_v12 }
 0x300   :  { %14580 = vmatpush3.bf16.msra.mxu0 %v17545_v54  ;;  %14588 = vmatpush3.bf16.msra.mxu1 %v17548_v59 }
 0x301   :  { %14581 = vmatprep.subr.bf16.mxu0 %v19716_v43  ;;  %14589 = vmatprep.subr.bf16.mxu1 %v19716_v43 }
 0x302   :  { %14583 = vmatprep.mubr.msk.bf16.mxu0 %vm17233_vm1, %v19716_v43  ;;  %14591 = vmatprep.mubr.msk.bf16.mxu1 %vm17233_vm1, %v19716_v43 }
 0x304   :  { %14582 = vmatpush3.bf16.msra.mxu0 %v17555_v13  ;;  %14590 = vmatpush3.bf16.msra.mxu1 %v17558_v17 }
 0x305   :  { %14603 = vmatprep.subr.bf16.mxu0 %v19716_v43  ;;  %14595 = vmatprep.subr.bf16.mxu1 %v19716_v43 }
 0x307   :  { %14584 = vmatmul.mubr.msk.bf16.vlgmr.msra.gmra.mrb[32].mxu0 %vm190_vm0, %v919_v12  ;;  %14592 = vmatmul.mubr.msk.bf16.vlgmr.msra.gmra.mrb[32].mxu1 %vm190_vm0, %v919_v12 }
 0x308   :  { %14604 = vmatpush3.bf16.msra.mxu0 %v17315_v44  ;;  %14596 = vmatpush3.bf16.msra.mxu1 %v17569_v24 }
 0x309   :  { %14605 = vmatprep.subr.bf16.mxu0 %v19716_v43  ;;  %14607 = vmatprep.mubr.msk.bf16.mxu0 %vm17233_vm1, %v19716_v43 }
 0x30a   :  { %14597 = vmatprep.subr.bf16.mxu1 %v19716_v43  ;;  %14599 = vmatprep.mubr.msk.bf16.mxu1 %vm17233_vm1, %v19716_v43 }
 0x30c   :  { %14606 = vmatpush3.bf16.msra.mxu0 %v17325_v46  ;;  %14598 = vmatpush3.bf16.msra.mxu1 %v17578_v25 }
 0x30d   :  { %14611 = vmatprep.subr.bf16.mxu0 %v19716_v43  ;;  %14619 = vmatprep.subr.bf16.mxu1 %v19716_v43 }
 0x30f   :  { %14608 = vmatmul.mubr.msk.bf16.vlgmr.msra.gmra.mrb[36].mxu0 %vm190_vm0, %v17494_v41 }
 0x310   :  { %14612 = vmatpush3.bf16.msra.mxu0 %v17352_v50  ;;  %14615 = vmatprep.mubr.msk.bf16.mxu0 %vm17233_vm1, %v19716_v43 }
 0x311   :  { %14613 = vmatprep.subr.bf16.mxu0 %v19716_v43 }
 0x313   :  { %14600 = vmatmul.mubr.msk.bf16.vlgmr.msra.gmra.mrb[32].mxu1 %vm190_vm0, %v17494_v41 }
 0x314   :  { %14614 = vmatpush3.bf16.msra.mxu0 %v17358_v51  ;;  %14620 = vmatpush3.bf16.msra.mxu1 %v17318_v45 }
 0x315   :  { %14621 = vmatprep.subr.bf16.mxu1 %v19716_v43  ;;  %14623 = vmatprep.mubr.msk.bf16.mxu1 %vm17233_vm1, %v19716_v43 }
 0x316   :  { %14627 = vmatprep.subr.bf16.mxu0 %v19716_v43 }
 0x317   :  { %14616 = vmatmul.mubr.msk.bf16.vlgmr.msra.gmra.mrb[40].mxu0 %vm190_vm0, %v17494_v41 }
 0x318   :  { %14622 = vmatpush3.bf16.msra.mxu1 %v17334_v47  ;;  %14628 = vmatpush3.bf16.msra.mxu0 %v17376_v52 }
 0x319   :  { %14629 = vmatprep.subr.bf16.mxu0 %v19716_v43  ;;  %14631 = vmatprep.mubr.msk.bf16.mxu0 %vm17233_vm1, %v19716_v43 }
 0x31a   :  { %14635 = vmatprep.subr.bf16.mxu1 %v19716_v43 }
 0x31b   :  { %14624 = vmatmul.mubr.msk.bf16.vlgmr.msra.gmra.mrb[36].mxu1 %vm190_vm0, %v17494_v41 }
 0x31c   :  { %14630 = vmatpush3.bf16.msra.mxu0 %v17379_v53  ;;  %14636 = vmatpush3.bf16.msra.mxu1 %v17506_v48 }
 0x31d   :  { %14643 = vmatprep.subr.bf16.mxu0 %v19716_v43  ;;  %14637 = vmatprep.subr.bf16.mxu1 %v19716_v43 }
 0x31e   :  { %14639 = vmatprep.mubr.msk.bf16.mxu1 %vm17233_vm1, %v19716_v43 }
 0x320   :  { %14638 = vmatpush3.bf16.msra.mxu1 %v17520_v27 }
 0x321   :  { %14651 = vmatprep.subr.bf16.mxu1 %v19716_v43 }
 0x3da   :  { %v17622_v44 = vpop.f32.mrb[32].mxu0 }
 0x3db   :  { %v14585_v45 = vpop.f32.mrb[33].mxu0 }
 0x3dc   :  { %v1095_v46 = vpop.f32.mrb[34].mxu0 }
 0x3dd   :  { %v14586_v47 = vpop.f32.mrb[35].mxu0 }
 0x3e2   :  { %v1244_v50 = vpop.f32.mrb[36].mxu0 }
 0x3e3   :  { %v1250_v51 = vadd.f32 %v1244_v50, %v17411_v4  ;;  %v14609_v52 = vpop.f32.mrb[37].mxu0 }
 0x3e4   :  { %v1247_v53 = vpop.f32.mrb[38].mxu0 }
 0x3e5   :  { %v12934_v30 = vmul.f32 -1.442695, %v1250_v51  ;;  %v14610_v31 = vpop.f32.mrb[39].mxu0 }
 0x3e7   :  { %16906 = vpow2.f32 %v12934_v30 }
 0x3ea   :  { %v1291_v33 = vpop.f32.mrb[40].mxu0 }
 0x3eb   :  { %v1297_v34 = vadd.f32 %v1291_v33, %v17414_v5  ;;  %v14617_v38 = vpop.f32.mrb[41].mxu0 }
 0x3ec   :  { %v1294_v41 = vpop.f32.mrb[42].mxu0 }
 0x3ed   :  { %v12936_v48 = vmul.f32 -1.442695, %v1297_v34  ;;  %v14618_v27 = vpop.f32.mrb[43].mxu0 }
 0x3ee   :  { %v1338_v23 = vpop.f32.mrb[36].mxu1  ;;  %v17732_v27 = vld [vmem:[%s17726_s17 + $0x8] sm:$0xff]  }
 0x3ef   :  { %16908 = vpow2.f32 %v12936_v48  ;;  %v14625_v57 = vpop.f32.mrb[37].mxu1  ;;  %v1339_v45 = vadd.f32 %v1338_v23, %v17486_v6  ;;  %v17729_v48 = vld [vmem:[%s17726_s17] sm:$0xff]  }
 0x3f0   :  { %v1341_v62 = vpop.f32.mrb[38].mxu1 }
 0x3f1   :  { %v16907_v55 = vpop.eup %16906  ;;  %v14626_v58 = vpop.f32.mrb[39].mxu1 }
 0x3f2   :  { %v1254_v1 = vadd.f32 1.0, %v16907_v55 }
 0x3f4   :  { %16910 = vrcp.f32 %v1254_v1 }
 0x3f9   :  { %v16909_v4 = vpop.eup %16908 }
 0x3fa   :  { %v1301_v12 = vadd.f32 1.0, %v16909_v4 }
 0x3fc   :  { %16912 = vrcp.f32 %v1301_v12 }
 0x3fe   :  { %v16911_v46 = vpop.eup %16910 }
 0x3ff   :  { %v1344_v47 = vmul.f32 %v16911_v46, %v1339_v45  ;;  %v17746_v46 = vld [vmem:[%s17743_s23] sm:$0xff] }
 0x401   :  { %v1345_v5 = vadd.f32 %v1344_v47, %v17457_v36 }
 0x403   :  { %16914 = vtanh.f32 %v1345_v5 }
 0x406   :  { %v16913_v50 = vpop.eup %16912 }
 0x407   :  { %v1347_v51 = vsub.f32 1.0, %v16913_v50  ;;  %v1349_v53 = vmul.f32 %v16913_v50, %v17490_v39 }
 0x40d   :  { %v16915_v52 = vpop.eup %16914 }
 0x40e   :  { %v1348_v30 = vmul.f32 %v16915_v52, %v1347_v51  ;;  %v17749_v52 = vld [vmem:[%s17743_s23 + $0x8] sm:$0xff] }
 0x410   :  { %v17629_v31 = vadd.f32 %v1349_v53, %v1348_v30 }
 0x412   :  { %v17633_v33 = vpack.c.bf16 %v17629_v31, %v17629_v31 }
 0x414   :  { %14632 = vmatmul.mubr.msk.bf16.vlgmr.msra.gmra.mrb[44].mxu0 %vm190_vm0, %v17633_v33 }
 0x415   :  { %14644 = vmatpush3.bf16.msra.mxu0 %v17509_v22  ;;  %14647 = vmatprep.mubr.msk.bf16.mxu0 %vm17233_vm1, %v19716_v43 }
 0x416   :  { %14645 = vmatprep.subr.bf16.mxu0 %v19716_v43 }
 0x419   :  { %14646 = vmatpush3.bf16.msra.mxu0 %v17524_v16  ;;  %v17665_v16 = vld [vmem:[%s17646_s7 + $0x10] sm:$0xff]  }
 0x41a   :  { %14659 = vmatprep.subr.bf16.mxu0 %v19716_v43 }
 0x4e7   :  { %v1389_v36 = vpop.f32.mrb[44].mxu0 }
 0x4e8   :  { %v1390_v6 = vadd.f32 %v1389_v36, %v17541_v42  ;;  %v14633_v39 = vpop.f32.mrb[45].mxu0  ;;  %v17674_v42 = vld [vmem:[%s17646_s7 + $0x18] sm:$0xff]  }
 0x4e9   :  { %v1392_v22 = vpop.f32.mrb[46].mxu0 }
 0x4ea   :  { %16916 = vtanh.f32 %v1390_v6  ;;  %v14634_v34 = vpop.f32.mrb[47].mxu0 }
 0x4f4   :  { %v16917_v38 = vpop.eup %16916 }
 0x4f5   :  { %v1396_v41 = vpack.c.bf16 %v16917_v38, %v16917_v38 }
 0x4f7   :  { %14640 = vmatmul.mubr.msk.bf16.vlgmr.msra.gmra.mrb[40].mxu1 %vm190_vm0, %v1396_v41  ;;  %14648 = vmatmul.mubr.msk.bf16.vlgmr.msra.gmra.mrb[48].mxu0 %vm190_vm0, %v1396_v41 }
 0x4f8   :  { %14660 = vmatpush3.bf16.msra.mxu0 %v17548_v59  ;;  %14652 = vmatpush3.bf16.msra.mxu1 %v17545_v54  ;;  %v17676_v54 = vld [vmem:[%s12805_s12] sm:$0xff]  ;;  %s17249_s12 = smov 9  }
 0x4f9   :  { %14661 = vmatprep.subr.bf16.mxu0 %v19716_v43  ;;  %14653 = vmatprep.subr.bf16.mxu1 %v19716_v43  ;;  %v659_v59 = vpack.c.bf16 %v17676_v54, %v17676_v54  ;;  %s17811_s16 = sld [smem:[%s19715_s0 + %s17249_s12]]  }
 0x4fa   :  { %14655 = vmatprep.mubr.msk.bf16.mxu1 %vm17233_vm1, %v19716_v43  ;;  %14663 = vmatprep.mubr.msk.bf16.mxu0 %vm17233_vm1, %v19716_v43  ;;  %s18115_s12 = sld [smem:[%s19715_s0 + %s17256_s4]]  }
 0x4fb   :  { %s18165_s4 = sld [smem:[%s19715_s0 + %s17258_s26]]  }
 0x4fc   :  { %14662 = vmatpush3.bf16.msra.mxu0 %v17558_v17  ;;  %14654 = vmatpush3.bf16.msra.mxu1 %v17555_v13  ;;  %v17689_v13 = vld [vmem:[%s17646_s7 + $0x20] sm:$0xff]  }
 0x4fd   :  { %14667 = vmatprep.subr.bf16.mxu0 %v19716_v43  ;;  %14683 = vmatprep.subr.bf16.mxu1 %v19716_v43  ;;  %v17695_v17 = vld [vmem:[%s17646_s7] sm:$0xff]  }
 0x4ff   :  { %14656 = vmatmul.mubr.msk.bf16.vlgmr.msra.gmra.mrb[44].mxu1 %vm190_vm0, %v1396_v41  ;;  %14664 = vmatmul.mubr.msk.bf16.vlgmr.msra.gmra.mrb[52].mxu0 %vm190_vm0, %v1396_v41 }
 0x500   :  { %14668 = vmatpush3.bf16.msra.mxu0 %v17569_v24  ;;  %14684 = vmatpush3.bf16.msra.mxu1 %v17665_v16  ;;  %v17702_v24 = vld [vmem:[%s17646_s7 + $0x28] sm:$0xff]  }
 0x501   :  { %14685 = vmatprep.subr.bf16.mxu1 %v19716_v43  ;;  %14669 = vmatprep.subr.bf16.mxu0 %v19716_v43 }
 0x502   :  { %14687 = vmatprep.mubr.msk.bf16.mxu1 %vm17233_vm1, %v19716_v43  ;;  %14671 = vmatprep.mubr.msk.bf16.mxu0 %vm17233_vm1, %v19716_v43 }
 0x504   :  { %14686 = vmatpush3.bf16.msra.mxu1 %v17674_v42  ;;  %14670 = vmatpush3.bf16.msra.mxu0 %v17578_v25  ;;  %v17708_v25 = vld [vmem:[%s17646_s7 + $0x8] sm:$0xff]  }
 0x505   :  { %14675 = vmatprep.subr.bf16.mxu0 %v19716_v43  ;;  %14691 = vmatprep.subr.bf16.mxu1 %v19716_v43 }
 0x507   :  { %14688 = vmatmul.mubr.msk.bf16.vlgmr.msra.gmra.mrb[28].mxu1 %vm190_vm0, %v659_v59 }
 0x508   :  { %14692 = vmatpush3.bf16.msra.mxu1 %v17689_v13  ;;  %14695 = vmatprep.mubr.msk.bf16.mxu1 %vm17233_vm1, %v19716_v43 }
 0x509   :  { %14693 = vmatprep.subr.bf16.mxu1 %v19716_v43 }
 0x50b   :  { %14672 = vmatmul.mubr.msk.bf16.vlgmr.msra.gmra.mrb[52].mxu0 %vm190_vm0, %v17633_v33 }
 0x50c   :  { %14676 = vmatpush3.bf16.msra.mxu0 %v17695_v17  ;;  %14679 = vmatprep.mubr.msk.bf16.mxu0 %vm17233_vm1, %v19716_v43 }
 0x50d   :  { %14677 = vmatprep.subr.bf16.mxu0 %v19716_v43  ;;  %14694 = vmatpush3.bf16.msra.mxu1 %v17702_v24 }
 0x50e   :  { %14699 = vmatprep.subr.bf16.mxu1 %v19716_v43 }
 0x510   :  { %14678 = vmatpush3.bf16.msra.mxu0 %v17708_v25  ;;  %14696 = vmatmul.mubr.msk.bf16.vlgmr.msra.gmra.mrb[48].mxu1 %vm190_vm0, %v659_v59 }
 0x511   :  { %14703 = vmatprep.mubr.msk.bf16.mxu1 %vm17233_vm1, %v19716_v43  ;;  %14707 = vmatprep.subr.bf16.mxu0 %v19716_v43 }
 0x512   :  { %14700 = vmatpush3.bf16.msra.mxu1 %v17729_v48 }
 0x513   :  { %14680 = vmatmul.mubr.msk.bf16.vlgmr.msra.gmra.mrb[28].mxu0 %vm190_vm0, %v659_v59  ;;  %14701 = vmatprep.subr.bf16.mxu1 %v19716_v43 }
 0x514   :  { %14711 = vmatprep.mubr.msk.bf16.mxu0 %vm17233_vm1, %v19716_v43 }
 0x516   :  { %14702 = vmatpush3.bf16.msra.mxu1 %v17732_v27 }
 0x517   :  { %14715 = vmatprep.subr.bf16.mxu1 %v19716_v43 }
 0x5d2   :  { %v17738_v23 = vpop.f32.mrb[44].mxu1 }
 0x5d3   :  { %v14657_v57 = vpop.f32.mrb[45].mxu1 }
 0x5d4   :  { %v1517_v62 = vpop.f32.mrb[46].mxu1  ;;  %v17754_v57 = vld [vmem:[%s17743_s23 + $0x18] sm:$0xff] }
 0x5d5   :  { %v14658_v55 = vpop.f32.mrb[47].mxu1 }
 0x5da   :  { %v1719_v58 = vpop.f32.mrb[28].mxu1 }
 0x5db   :  { %v14689_v1 = vpop.f32.mrb[29].mxu1  ;;  %v16196_v22 = vadd.f32 %v17749_v52, %v1719_v58 }
 0x5dc   :  { %v1722_v4 = vpop.f32.mrb[30].mxu1  ;;  %v17758_v1 = vld [vmem:[%s17743_s23 + $0x10] sm:$0xff] }
 0x5dd   :  { %v14690_v12 = vpop.f32.mrb[31].mxu1  ;;  %v12956_v34 = vmul.f32 -1.442695, %v16196_v22  ;;  %v17814_v22 = vld [vmem:[%s17811_s16] sm:$0xff] }
 0x5de   :  { %v1093_v12 = vadd.f32 %v17758_v1, %v17622_v44  ;;  %v17779_v44 = vld [vmem:[%s17776_s29] sm:$0xff]  }
 0x5df   :  { %14708 = vmatpush3.bf16.msra.mxu0 %v17779_v44 }
 0x5e0   :  { %14709 = vmatprep.subr.bf16.mxu0 %v19716_v43 }
 0x5e3   :  { %v1783_v45 = vpop.f32.mrb[48].mxu1 }
 0x5e4   :  { %v14697_v47 = vpop.f32.mrb[49].mxu1  ;;  %v1784_v55 = vadd.f32 %v17754_v57, %v1783_v45 }
 0x5e5   :  { %v1786_v5 = vpop.f32.mrb[50].mxu1 }
 0x5e6   :  { %v1655_v50 = vpop.f32.mrb[28].mxu0  ;;  %v14698_v51 = vpop.f32.mrb[51].mxu1 }
 0x5e7   :  { %v16195_v53 = vadd.f32 %v1655_v50, %v17746_v46  ;;  %v14681_v30 = vpop.f32.mrb[29].mxu0 }
 0x5e8   :  { %v1658_v36 = vpop.f32.mrb[30].mxu0 }
 0x5e9   :  { %v12948_v6 = vmul.f32 -1.442695, %v16195_v53  ;;  %v14682_v39 = vpop.f32.mrb[31].mxu0 }
 0x5ea   :  { %v17797_v39 = vld [vmem:[%s17776_s29 + $0x18] sm:$0xff]  }
 0x5eb   :  { %16918 = vpow2.f32 %v12948_v6  ;;  %v17793_v6 = vld [vmem:[%s17776_s29 + $0x8] sm:$0xff]  }
 0x5ec   :  { %16920 = vpow2.f32 %v12956_v34  ;;  %14710 = vmatpush3.bf16.msra.mxu0 %v17793_v6 }
 0x5ed   :  { %14723 = vmatprep.subr.bf16.mxu0 %v19716_v43 }
 0x5f5   :  { %v16919_v38 = vpop.eup %16918 }
 0x5f6   :  { %v1665_v41 = vadd.f32 1.0, %v16919_v38  ;;  %v16921_v59 = vpop.eup %16920 }
 0x5f7   :  { %v1729_v62 = vadd.f32 1.0, %v16921_v59 }
 0x5f8   :  { %16922 = vrcp.f32 %v1665_v41 }
 0x5f9   :  { %16924 = vrcp.f32 %v1729_v62 }
 0x602   :  { %v16923_v4 = vpop.eup %16922 }
 0x603   :  { %v1789_v58 = vmul.f32 %v16923_v4, %v1784_v55  ;;  %v16925_v5 = vpop.eup %16924  ;;  %v17818_v4 = vld [vmem:[%s17776_s29 + $0x20] sm:$0xff]  }
 0x604   :  { %v1792_v50 = vsub.f32 1.0, %v16925_v5  ;;  %v1794_v30 = vmul.f32 %v16925_v5, %v17676_v54  ;;  %v17782_v54 = vld [vmem:[%s17776_s29 + $0x10] sm:$0xff]   ;;  %v17831_v5 = vld [vmem:[%s17788_s5 + $0x8] sm:$0xff]  }
 0x605   :  { %v1790_v47 = vadd.f32 %v1789_v58, %v1093_v12  ;;  %v17821_v12 = vld [vmem:[%s17788_s5] sm:$0xff]  }
 0x607   :  { %16926 = vtanh.f32 %v1790_v47  ;;  %v17828_v47 = vld [vmem:[%s17776_s29 + $0x28] sm:$0xff]  }
 0x611   :  { %v16927_v51 = vpop.eup %16926 }
 0x612   :  { %v1793_v53 = vmul.f32 %v16927_v51, %v1792_v50  ;;  %v17842_v50 = vld [vmem:[%s17806_s10] sm:$0xff]  }
 0x613   :  { %v17198_v51 = vld [vmem:[%s17295_s21] sm:$0xff]  }
 0x614   :  { %v17763_v36 = vadd.f32 %v1794_v30, %v1793_v53  ;;  %v17852_v53 = vld [vmem:[%s17806_s10 + $0x8] sm:$0xff]  }
 0x615   :  { %v17199_v30 = vld [vmem:[%s17295_s21 + $0x8] sm:$0xff]  }
 0x616   :  { %v17767_v45 = vpack.c.bf16 %v17763_v36, %v17763_v36 }
 0x618   :  { %14704 = vmatmul.mubr.msk.bf16.vlgmr.msra.gmra.mrb[52].mxu1 %vm190_vm0, %v17767_v45 }
 0x619   :  { %14719 = vmatprep.mubr.msk.bf16.mxu1 %vm17233_vm1, %v19716_v43  ;;  %14716 = vmatpush3.bf16.msra.mxu1 %v17782_v54 }
 0x61a   :  { %14717 = vmatprep.subr.bf16.mxu1 %v19716_v43 }
 0x61d   :  { %14718 = vmatpush3.bf16.msra.mxu1 %v17797_v39 }
 0x61e   :  { %14731 = vmatprep.subr.bf16.mxu1 %v19716_v43 }
 0x6eb   :  { %v1851_v34 = vpop.f32.mrb[52].mxu1 }
 0x6ec   :  { %v1852_v38 = vadd.f32 %v1851_v34, %v17814_v22  ;;  %v14705_v41 = vpop.f32.mrb[53].mxu1  ;;  %v17200_v34 = vld [vmem:[%s17295_s21 + $0x10] sm:$0xff]  }
 0x6ed   :  { %v1854_v59 = vpop.f32.mrb[54].mxu1  ;;  %v17202_v41 = vld [vmem:[%s17295_s21 + $0x20] sm:$0xff]  }
 0x6ee   :  { %16928 = vtanh.f32 %v1852_v38  ;;  %v14706_v62 = vpop.f32.mrb[55].mxu1  ;;  %v17201_v38 = vld [vmem:[%s17295_s21 + $0x18] sm:$0xff]   ;;  %v17203_v59 = vld [vmem:[%s17295_s21 + $0x28] sm:$0xff]  }
 0x6ef   :  { %v17204_v62 = vld [vmem:[%s17373_s3] sm:$0xff]  }
 0x6f8   :  { %v16929_v55 = vpop.eup %16928 }
 0x6f9   :  { %v1858_v58 = vpack.c.bf16 %v16929_v55, %v16929_v55  ;;  %v17205_v55 = vld [vmem:[%s17373_s3 + $0x8] sm:$0xff]  }
 0x6fb   :  { %14712 = vmatmul.mubr.msk.bf16.vlgmr.msra.gmra.mrb[56].mxu0 %vm190_vm0, %v1858_v58  ;;  %14720 = vmatmul.mubr.msk.bf16.vlgmr.msra.gmra.mrb[56].mxu1 %vm190_vm0, %v1858_v58 }
 0x6fc   :  { %14724 = vmatpush3.bf16.msra.mxu0 %v17818_v4  ;;  %14732 = vmatpush3.bf16.msra.mxu1 %v17821_v12 }
 0x6fd   :  { %14725 = vmatprep.subr.bf16.mxu0 %v19716_v43  ;;  %14733 = vmatprep.subr.bf16.mxu1 %v19716_v43 }
 0x6fe   :  { %14727 = vmatprep.mubr.msk.bf16.mxu0 %vm17233_vm1, %v19716_v43  ;;  %14735 = vmatprep.mubr.msk.bf16.mxu1 %vm17233_vm1, %v19716_v43 }
 0x700   :  { %14726 = vmatpush3.bf16.msra.mxu0 %v17828_v47  ;;  %14734 = vmatpush3.bf16.msra.mxu1 %v17831_v5 }
 0x701   :  { %14747 = vmatprep.subr.bf16.mxu0 %v19716_v43  ;;  %14739 = vmatprep.subr.bf16.mxu1 %v19716_v43 }
 0x703   :  { %14728 = vmatmul.mubr.msk.bf16.vlgmr.msra.gmra.mrb[60].mxu0 %vm190_vm0, %v1858_v58  ;;  %14736 = vmatmul.mubr.msk.bf16.vlgmr.msra.gmra.mrb[32].mxu1 %vm190_vm0, %v17767_v45 }
 0x704   :  { %14748 = vmatpush3.bf16.msra.mxu0 %v17198_v51  ;;  %14740 = vmatpush3.bf16.msra.mxu1 %v17842_v50  ;;  %v17207_v51 = vld [vmem:[%s17503_s19 + $0x8] sm:$0xff]  }
 0x705   :  { %14749 = vmatprep.subr.bf16.mxu0 %v19716_v43  ;;  %14751 = vmatprep.mubr.msk.bf16.mxu0 %vm17233_vm1, %v19716_v43 }
 0x706   :  { %14741 = vmatprep.subr.bf16.mxu1 %v19716_v43  ;;  %14743 = vmatprep.mubr.msk.bf16.mxu1 %vm17233_vm1, %v19716_v43 }
 0x708   :  { %14750 = vmatpush3.bf16.msra.mxu0 %v17199_v30  ;;  %14742 = vmatpush3.bf16.msra.mxu1 %v17852_v53 }
 0x709   :  { %14755 = vmatprep.subr.bf16.mxu0 %v19716_v43  ;;  %14763 = vmatprep.subr.bf16.mxu1 %v19716_v43 }
 0x70b   :  { %14752 = vmatmul.mubr.msk.bf16.vlgmr.msra.gmra.mrb[64].mxu0 %vm190_vm0, %v17633_v33 }
 0x70c   :  { %14756 = vmatpush3.bf16.msra.mxu0 %v17200_v34  ;;  %14759 = vmatprep.mubr.msk.bf16.mxu0 %vm17233_vm1, %v19716_v43 }
 0x70d   :  { %14757 = vmatprep.subr.bf16.mxu0 %v19716_v43 }
 0x70f   :  { %14744 = vmatmul.mubr.msk.bf16.vlgmr.msra.gmra.mrb[32].mxu1 %vm190_vm0, %v1858_v58  ;;  %v17206_v58 = vld [vmem:[%s17503_s19] sm:$0xff]  }
 0x710   :  { %14758 = vmatpush3.bf16.msra.mxu0 %v17201_v38  ;;  %14764 = vmatpush3.bf16.msra.mxu1 %v17202_v41 }
 0x711   :  { %14765 = vmatprep.subr.bf16.mxu1 %v19716_v43  ;;  %14767 = vmatprep.mubr.msk.bf16.mxu1 %vm17233_vm1, %v19716_v43 }
 0x712   :  { %14771 = vmatprep.subr.bf16.mxu0 %v19716_v43 }
 0x713   :  { %14760 = vmatmul.mubr.msk.bf16.vlgmr.msra.gmra.mrb[68].mxu0 %vm190_vm0, %v17633_v33 }
 0x714   :  { %14766 = vmatpush3.bf16.msra.mxu1 %v17203_v59  ;;  %14772 = vmatpush3.bf16.msra.mxu0 %v17204_v62 }
 0x715   :  { %14773 = vmatprep.subr.bf16.mxu0 %v19716_v43  ;;  %14775 = vmatprep.mubr.msk.bf16.mxu0 %vm17233_vm1, %v19716_v43 }
 0x716   :  { %14779 = vmatprep.subr.bf16.mxu1 %v19716_v43 }
 0x717   :  { %14768 = vmatmul.mubr.msk.bf16.vlgmr.msra.gmra.mrb[60].mxu1 %vm190_vm0, %v17633_v33 }
 0x718   :  { %14774 = vmatpush3.bf16.msra.mxu0 %v17205_v55  ;;  %14780 = vmatpush3.bf16.msra.mxu1 %v17206_v58  ;;  %v17208_v58 = vld [vmem:[%s17419_s11] ss:$0 sm:$0xff]  ;;  %s17250_s11 = smov 22  }
 0x719   :  { %14787 = vmatprep.subr.bf16.mxu0 %v19716_v43  ;;  %14781 = vmatprep.subr.bf16.mxu1 %v19716_v43  ;;  %v648_v7 = vadd.f32 %v17208_v58, %v17449_v28  ;;  %s18006_s22 = sld [smem:[%s19715_s0 + %s17250_s11]]   ;;  %s17254_s11 = smov 12  }
 0x71a   :  { %14783 = vmatprep.mubr.msk.bf16.mxu1 %vm17233_vm1, %v19716_v43  ;;  %s18103_s25 = sld [smem:[%s19715_s0 + %s17254_s11]]  }
 0x71b   :  { %s18174_s11 = sld [smem:[%s19715_s0 + %s17259_s6]]  }
 0x71c   :  { %14782 = vmatpush3.bf16.msra.mxu1 %v17207_v51 }
 0x71d   :  { %14795 = vmatprep.subr.bf16.mxu1 %v19716_v43 }
 0x7d6   :  { %v17895_v30 = vpop.f32.mrb[60].mxu0 }
 0x7d7   :  { %v14729_v34 = vpop.f32.mrb[61].mxu0 }
 0x7d8   :  { %v2034_v33 = vpop.f32.mrb[62].mxu0 }
 0x7d9   :  { %v14730_v38 = vpop.f32.mrb[63].mxu0 }
 0x7de   :  { %v2185_v41 = vpop.f32.mrb[64].mxu0 }
 0x7df   :  { %v2191_v59 = vadd.f32 %v2185_v41, %v17399_v60  ;;  %v14753_v62 = vpop.f32.mrb[65].mxu0 }
 0x7e0   :  { %v2188_v55 = vpop.f32.mrb[66].mxu0 }
 0x7e1   :  { %v12993_v49 = vmul.f32 -1.442695, %v2191_v59  ;;  %v14754_v19 = vpop.f32.mrb[67].mxu0 }
 0x7e2   :  { %v2144_v0 = vpop.f32.mrb[32].mxu1 }
 0x7e3   :  { %16930 = vpow2.f32 %v12993_v49  ;;  %v17900_v51 = vadd.f32 %v2144_v0, %v648_v7  ;;  %v14745_v43 = vpop.f32.mrb[33].mxu1 }
 0x7e4   :  { %v2147_v18 = vpop.f32.mrb[34].mxu1 }
 0x7e5   :  { %v14746_v9 = vpop.f32.mrb[35].mxu1  ;;  %v17209_v18 = vld [vmem:[%s17483_s15] sm:$0xff] }
 0x7e6   :  { %v2232_v34 = vpop.f32.mrb[68].mxu0 }
 0x7e7   :  { %v2238_v33 = vadd.f32 %v2232_v34, %v17402_v61  ;;  %v14761_v38 = vpop.f32.mrb[69].mxu0 }
 0x7e8   :  { %v2235_v60 = vpop.f32.mrb[70].mxu0 }
 0x7e9   :  { %v12995_v41 = vmul.f32 -1.442695, %v2238_v33  ;;  %v14762_v62 = vpop.f32.mrb[71].mxu0 }
 0x7ea   :  { %v2279_v55 = vpop.f32.mrb[60].mxu1 }
 0x7eb   :  { %16932 = vpow2.f32 %v12995_v41  ;;  %v14769_v28 = vpop.f32.mrb[61].mxu1  ;;  %v2280_v7 = vadd.f32 %v17209_v18, %v2279_v55  ;;  %v17210_v55 = vld [vmem:[%s17503_s19 + $0x10] sm:$0xff]  }
 0x7ec   :  { %v2282_v59 = vpop.f32.mrb[62].mxu1 }
 0x7ed   :  { %v16931_v19 = vpop.eup %16930  ;;  %v14770_v58 = vpop.f32.mrb[63].mxu1 }
 0x7ee   :  { %v2195_v49 = vadd.f32 1.0, %v16931_v19  ;;  %v17211_v19 = vld [vmem:[%s17503_s19 + $0x18] sm:$0xff]   ;;  %v17212_v58 = vld [vmem:[%s17538_s2] sm:$0xff] }
 0x7f0   :  { %16934 = vrcp.f32 %v2195_v49 }
 0x7f5   :  { %v16933_v0 = vpop.eup %16932 }
 0x7f6   :  { %v2242_v43 = vadd.f32 1.0, %v16933_v0 }
 0x7f8   :  { %16936 = vrcp.f32 %v2242_v43 }
 0x7fa   :  { %v16935_v9 = vpop.eup %16934 }
 0x7fb   :  { %v2285_v61 = vmul.f32 %v16935_v9, %v2280_v7 }
 0x7fd   :  { %v2286_v34 = vadd.f32 %v2285_v61, %v17447_v26  ;;  %v19724_v26 = vmov 0.0   ;;  %v17213_v61 = vld [vmem:[%s17503_s19 + $0x20] sm:$0xff]  }
 0x7ff   :  { %16938 = vtanh.f32 %v2286_v34  ;;  %v17214_v34 = vld [vmem:[%s17515_s24] sm:$0xff]  }
 0x802   :  { %v16937_v33 = vpop.eup %16936 }
 0x803   :  { %v2288_v38 = vsub.f32 1.0, %v16937_v33  ;;  %v2290_v41 = vmul.f32 %v16937_v33, %v17629_v31  ;;  %v17215_v33 = vld [vmem:[%s17503_s19 + $0x28] sm:$0xff]  }
 0x809   :  { %v16939_v60 = vpop.eup %16938 }
 0x80a   :  { %v2289_v62 = vmul.f32 %v16939_v60, %v2288_v38  ;;  %v17216_v38 = vld [vmem:[%s17515_s24 + $0x8] sm:$0xff]   ;;  %v17217_v60 = vld [vmem:[%s17533_s28] sm:$0xff]  }
 0x80c   :  { %v17906_v28 = vadd.f32 %v2290_v41, %v2289_v62  ;;  %v17218_v41 = vld [vmem:[%s17533_s28 + $0x8] sm:$0xff]  }
 0x80e   :  { %v17910_v59 = vpack.c.bf16 %v17906_v28, %v17906_v28 }
 0x810   :  { %14776 = vmatmul.mubr.msk.bf16.vlgmr.msra.gmra.mrb[72].mxu0 %vm190_vm0, %v17910_v59 }
 0x811   :  { %14788 = vmatpush3.bf16.msra.mxu0 %v17210_v55  ;;  %14791 = vmatprep.mubr.msk.bf16.mxu0 %vm17233_vm1, %v19724_v26 }
 0x812   :  { %14789 = vmatprep.subr.bf16.mxu0 %v19724_v26 }
 0x815   :  { %14790 = vmatpush3.bf16.msra.mxu0 %v17211_v19 }
 0x816   :  { %14803 = vmatprep.subr.bf16.mxu0 %v19724_v26 }
 0x8e3   :  { %v2330_v31 = vpop.f32.mrb[72].mxu0 }
 0x8e4   :  { %v2331_v49 = vadd.f32 %v17212_v58, %v2330_v31  ;;  %v14777_v0 = vpop.f32.mrb[73].mxu0 }
 0x8e5   :  { %v2333_v43 = vpop.f32.mrb[74].mxu0 }
 0x8e6   :  { %16940 = vtanh.f32 %v2331_v49  ;;  %v14778_v18 = vpop.f32.mrb[75].mxu0 }
 0x8f0   :  { %v16941_v7 = vpop.eup %16940 }
 0x8f1   :  { %v2337_v9 = vpack.c.bf16 %v16941_v7, %v16941_v7 }
 0x8f3   :  { %14784 = vmatmul.mubr.msk.bf16.vlgmr.msra.gmra.mrb[64].mxu1 %vm190_vm0, %v2337_v9  ;;  %14792 = vmatmul.mubr.msk.bf16.vlgmr.msra.gmra.mrb[76].mxu0 %vm190_vm0, %v2337_v9 }
 0x8f4   :  { %14796 = vmatpush3.bf16.msra.mxu1 %v17213_v61  ;;  %14804 = vmatpush3.bf16.msra.mxu0 %v17214_v34 }
 0x8f5   :  { %14797 = vmatprep.subr.bf16.mxu1 %v19724_v26  ;;  %14805 = vmatprep.subr.bf16.mxu0 %v19724_v26 }
 0x8f6   :  { %14799 = vmatprep.mubr.msk.bf16.mxu1 %vm17233_vm1, %v19724_v26  ;;  %14807 = vmatprep.mubr.msk.bf16.mxu0 %vm17233_vm1, %v19724_v26 }
 0x8f8   :  { %14798 = vmatpush3.bf16.msra.mxu1 %v17215_v33  ;;  %14806 = vmatpush3.bf16.msra.mxu0 %v17216_v38  ;;  %v1515_v38 = vadd.f32 %v17758_v1, %v17738_v23 }
 0x8f9   :  { %14819 = vmatprep.subr.bf16.mxu1 %v19724_v26  ;;  %14811 = vmatprep.subr.bf16.mxu0 %v19724_v26 }
 0x8fb   :  { %14800 = vmatmul.mubr.msk.bf16.vlgmr.msra.gmra.mrb[68].mxu1 %vm190_vm0, %v2337_v9  ;;  %14808 = vmatmul.mubr.msk.bf16.vlgmr.msra.gmra.mrb[80].mxu0 %vm190_vm0, %v2337_v9 }
 0x8fc   :  { %14820 = vmatpush3.bf16.msra.mxu1 %v17695_v17  ;;  %14812 = vmatpush3.bf16.msra.mxu0 %v17217_v60 }
 0x8fd   :  { %14821 = vmatprep.subr.bf16.mxu1 %v19724_v26  ;;  %14813 = vmatprep.subr.bf16.mxu0 %v19724_v26 }
 0x8fe   :  { %14823 = vmatprep.mubr.msk.bf16.mxu1 %vm17233_vm1, %v19724_v26  ;;  %14815 = vmatprep.mubr.msk.bf16.mxu0 %vm17233_vm1, %v19724_v26 }
 0x900   :  { %14822 = vmatpush3.bf16.msra.mxu1 %v17708_v25  ;;  %14814 = vmatpush3.bf16.msra.mxu0 %v17218_v41 }
 0x901   :  { %14835 = vmatprep.subr.bf16.mxu1 %v19724_v26  ;;  %14827 = vmatprep.subr.bf16.mxu0 %v19724_v26 }
 0x903   :  { %14824 = vmatmul.mubr.msk.bf16.vlgmr.msra.gmra.mrb[40].mxu1 %vm190_vm0, %v17767_v45 }
 0x904   :  { %14836 = vmatpush3.bf16.msra.mxu1 %v17689_v13  ;;  %14839 = vmatprep.mubr.msk.bf16.mxu1 %vm17233_vm1, %v19724_v26 }
 0x905   :  { %14837 = vmatprep.subr.bf16.mxu1 %v19724_v26 }
 0x907   :  { %14816 = vmatmul.mubr.msk.bf16.vlgmr.msra.gmra.mrb[80].mxu0 %vm190_vm0, %v17910_v59 }
 0x908   :  { %14828 = vmatpush3.bf16.msra.mxu0 %v17665_v16  ;;  %14838 = vmatpush3.bf16.msra.mxu1 %v17702_v24 }
 0x909   :  { %14829 = vmatprep.subr.bf16.mxu0 %v19724_v26  ;;  %14831 = vmatprep.mubr.msk.bf16.mxu0 %vm17233_vm1, %v19724_v26 }
 0x90a   :  { %14843 = vmatprep.subr.bf16.mxu1 %v19724_v26 }
 0x90b   :  { %14840 = vmatmul.mubr.msk.bf16.vlgmr.msra.gmra.mrb[72].mxu1 %vm190_vm0, %v17767_v45 }
 0x90c   :  { %14830 = vmatpush3.bf16.msra.mxu0 %v17674_v42  ;;  %14844 = vmatpush3.bf16.msra.mxu1 %v17729_v48 }
 0x90d   :  { %14845 = vmatprep.subr.bf16.mxu1 %v19724_v26  ;;  %14847 = vmatprep.mubr.msk.bf16.mxu1 %vm17233_vm1, %v19724_v26 }
 0x90e   :  { %14851 = vmatprep.subr.bf16.mxu0 %v19724_v26 }
 0x90f   :  { %14832 = vmatmul.mubr.msk.bf16.vlgmr.msra.gmra.mrb[48].mxu0 %vm190_vm0, %v17767_v45 }
 0x910   :  { %14846 = vmatpush3.bf16.msra.mxu1 %v17732_v27  ;;  %14852 = vmatpush3.bf16.msra.mxu0 %v17779_v44 }
 0x911   :  { %14859 = vmatprep.subr.bf16.mxu1 %v19724_v26  ;;  %14853 = vmatprep.subr.bf16.mxu0 %v19724_v26 }
 0x912   :  { %14855 = vmatprep.mubr.msk.bf16.mxu0 %vm17233_vm1, %v19724_v26 }
 0x914   :  { %14854 = vmatpush3.bf16.msra.mxu0 %v17793_v6 }
 0x915   :  { %14867 = vmatprep.subr.bf16.mxu0 %v19724_v26 }
 0x9ce   :  { %v17981_v16 = vpop.f32.mrb[68].mxu1 }
 0x9cf   :  { %v14801_v42 = vpop.f32.mrb[69].mxu1 }
 0x9d0   :  { %v2458_v13 = vpop.f32.mrb[70].mxu1 }
 0x9d1   :  { %v14802_v17 = vpop.f32.mrb[71].mxu1 }
 0x9d6   :  { %v2575_v24 = vpop.f32.mrb[40].mxu1 }
 0x9d7   :  { %v16197_v25 = vadd.f32 %v2575_v24, %v17746_v46  ;;  %v14825_v48 = vpop.f32.mrb[41].mxu1 }
 0x9d8   :  { %v2578_v27 = vpop.f32.mrb[42].mxu1 }
 0x9d9   :  { %v13004_v45 = vmul.f32 -1.442695, %v16197_v25  ;;  %v14826_v44 = vpop.f32.mrb[43].mxu1  ;;  %v16552_v27 = vld [vmem:[%s18006_s22 + $0x10] sm:$0xff]  }
 0x9da   :  { %v18017_v44 = vld [vmem:[%s12806_s30] sm:$0xff]  ;;  %s18204_s30 = sld [smem:[%s19715_s0 + %s17260_s18]]  }
 0x9db   :  { %16942 = vpow2.f32 %v13004_v45 }
 0x9de   :  { %v2669_v62 = vpop.f32.mrb[72].mxu1 }
 0x9df   :  { %v14841_v55 = vpop.f32.mrb[73].mxu1  ;;  %v2670_v61 = vadd.f32 %v17754_v57, %v2669_v62  ;;  %v661_v62 = vpack.c.bf16 %v18017_v44, %v18017_v44 }
 0x9e0   :  { %v2672_v19 = vpop.f32.mrb[74].mxu1 }
 0x9e1   :  { %v14842_v31 = vpop.f32.mrb[75].mxu1 }
 0x9e2   :  { %v2622_v6 = vpop.f32.mrb[48].mxu0 }
 0x9e3   :  { %v16198_v58 = vadd.f32 %v17749_v52, %v2622_v6  ;;  %v14833_v49 = vpop.f32.mrb[49].mxu0 }
 0x9e4   :  { %v2625_v0 = vpop.f32.mrb[50].mxu0 }
 0x9e5   :  { %v16943_v43 = vpop.eup %16942  ;;  %v13006_v18 = vmul.f32 -1.442695, %v16198_v58  ;;  %v14834_v7 = vpop.f32.mrb[51].mxu0 }
 0x9e6   :  { %v2585_v9 = vadd.f32 1.0, %v16943_v43 }
 0x9e7   :  { %16944 = vpow2.f32 %v13006_v18 }
 0x9e8   :  { %16946 = vrcp.f32 %v2585_v9 }
 0x9f1   :  { %v16945_v46 = vpop.eup %16944 }
 0x9f2   :  { %v16947_v34 = vpop.eup %16946  ;;  %v2632_v33 = vadd.f32 1.0, %v16945_v46 }
 0x9f3   :  { %v2675_v60 = vmul.f32 %v16947_v34, %v2670_v61 }
 0x9f4   :  { %16948 = vrcp.f32 %v2632_v33 }
 0x9f5   :  { %v2676_v41 = vadd.f32 %v2675_v60, %v1515_v38 }
 0x9f7   :  { %16950 = vtanh.f32 %v2676_v41  ;;  %v1863_v41 = vld [vmem:[%s18079_s14] sm:$0xff] }
 0x9fe   :  { %v16949_v52 = vpop.eup %16948 }
 0x9ff   :  { %v2678_v42 = vsub.f32 1.0, %v16949_v52  ;;  %v2680_v17 = vmul.f32 %v16949_v52, %v17763_v36 }
 0xa01   :  { %v16951_v13 = vpop.eup %16950 }
 0xa02   :  { %v2679_v24 = vmul.f32 %v16951_v13, %v2678_v42  ;;  %v12974_v42 = vld [vmem:[%s18079_s14 + $0x8] sm:$0xff] }
 0xa04   :  { %v17989_v25 = vadd.f32 %v2680_v17, %v2679_v24 }
 0xa06   :  { %v17993_v57 = vpack.c.bf16 %v17989_v25, %v17989_v25 }
 0xa08   :  { %14848 = vmatmul.mubr.msk.bf16.vlgmr.msra.gmra.mrb[76].mxu1 %vm190_vm0, %v17993_v57 }
 0xa09   :  { %14860 = vmatpush3.bf16.msra.mxu1 %v17782_v54  ;;  %14863 = vmatprep.mubr.msk.bf16.mxu1 %vm17233_vm1, %v19724_v26 }
 0xa0a   :  { %14861 = vmatprep.subr.bf16.mxu1 %v19724_v26 }
 0xa0d   :  { %14862 = vmatpush3.bf16.msra.mxu1 %v17797_v39 }
 0xa0e   :  { %14899 = vmatprep.subr.bf16.mxu1 %v19724_v26 }
 0xadb   :  { %v2720_v23 = vpop.f32.mrb[76].mxu1 }
 0xadc   :  { %v2721_v1 = vadd.f32 %v2720_v23, %v17814_v22  ;;  %v14849_v36 = vpop.f32.mrb[77].mxu1  ;;  %v16553_v22 = vld [vmem:[%s18006_s22 + $0x18] sm:$0xff]  }
 0xadd   :  { %v2723_v54 = vpop.f32.mrb[78].mxu1 }
 0xade   :  { %16952 = vtanh.f32 %v2721_v1  ;;  %v14850_v48 = vpop.f32.mrb[79].mxu1 }
 0xae8   :  { %v16953_v39 = vpop.eup %16952 }
 0xae9   :  { %v2727_v45 = vpack.c.bf16 %v16953_v39, %v16953_v39 }
 0xaeb   :  { %14856 = vmatmul.mubr.msk.bf16.vlgmr.msra.gmra.mrb[84].mxu0 %vm190_vm0, %v2727_v45  ;;  %14864 = vmatmul.mubr.msk.bf16.vlgmr.msra.gmra.mrb[80].mxu1 %vm190_vm0, %v2727_v45 }
 0xaec   :  { %14868 = vmatpush3.bf16.msra.mxu0 %v17818_v4  ;;  %14900 = vmatpush3.bf16.msra.mxu1 %v16552_v27  ;;  %v16556_v4 = vld [vmem:[%s18006_s22 + $0x20] sm:$0xff]   ;;  %v13014_v27 = vld [vmem:[%s18079_s14 + $0x18] sm:$0xff] }
 0xaed   :  { %14869 = vmatprep.subr.bf16.mxu0 %v19724_v26  ;;  %14901 = vmatprep.subr.bf16.mxu1 %v19724_v26 }
 0xaee   :  { %14871 = vmatprep.mubr.msk.bf16.mxu0 %vm17233_vm1, %v19724_v26  ;;  %14903 = vmatprep.mubr.msk.bf16.mxu1 %vm17233_vm1, %v19724_v26 }
 0xaf0   :  { %14870 = vmatpush3.bf16.msra.mxu0 %v17828_v47  ;;  %14902 = vmatpush3.bf16.msra.mxu1 %v16553_v22  ;;  %v16557_v47 = vld [vmem:[%s18006_s22 + $0x28] sm:$0xff]  }
 0xaf1   :  { %14875 = vmatprep.subr.bf16.mxu0 %v19724_v26  ;;  %14907 = vmatprep.subr.bf16.mxu1 %v19724_v26 }
 0xaf3   :  { %14872 = vmatmul.mubr.msk.bf16.vlgmr.msra.gmra.mrb[88].mxu0 %vm190_vm0, %v2727_v45  ;;  %14904 = vmatmul.mubr.msk.bf16.vlgmr.msra.gmra.mrb[56].mxu1 %vm190_vm0, %v661_v62 }
 0xaf4   :  { %14876 = vmatpush3.bf16.msra.mxu0 %v17821_v12  ;;  %14879 = vmatprep.mubr.msk.bf16.mxu0 %vm17233_vm1, %v19724_v26  ;;  %v16554_v12 = vld [vmem:[%s18006_s22] sm:$0xff]  }
 0xaf5   :  { %14877 = vmatprep.subr.bf16.mxu0 %v19724_v26  ;;  %14908 = vmatpush3.bf16.msra.mxu1 %v16556_v4 }
 0xaf6   :  { %14909 = vmatprep.subr.bf16.mxu1 %v19724_v26  ;;  %14911 = vmatprep.mubr.msk.bf16.mxu1 %vm17233_vm1, %v19724_v26 }
 0xaf8   :  { %14878 = vmatpush3.bf16.msra.mxu0 %v17831_v5  ;;  %v16555_v5 = vld [vmem:[%s18006_s22 + $0x8] sm:$0xff]  }
 0xaf9   :  { %14883 = vmatprep.subr.bf16.mxu0 %v19724_v26  ;;  %14910 = vmatpush3.bf16.msra.mxu1 %v16557_v47 }
 0xafa   :  { %14915 = vmatprep.subr.bf16.mxu1 %v19724_v26 }
 0xafb   :  { %14880 = vmatmul.mubr.msk.bf16.vlgmr.msra.gmra.mrb[52].mxu0 %vm190_vm0, %v17993_v57 }
 0xafc   :  { %14884 = vmatpush3.bf16.msra.mxu0 %v17842_v50  ;;  %14887 = vmatprep.mubr.msk.bf16.mxu0 %vm17233_vm1, %v19724_v26  ;;  %v16558_v50 = vld [vmem:[%s18068_s8] sm:$0xff]  }
 0xafd   :  { %14885 = vmatprep.subr.bf16.mxu0 %v19724_v26  ;;  %14912 = vmatmul.mubr.msk.bf16.vlgmr.msra.gmra.mrb[84].mxu1 %vm190_vm0, %v661_v62 }
 0xafe   :  { %14919 = vmatprep.mubr.msk.bf16.mxu1 %vm17233_vm1, %v19724_v26  ;;  %14916 = vmatpush3.bf16.msra.mxu1 %v16558_v50 }
 0xaff   :  { %14917 = vmatprep.subr.bf16.mxu1 %v19724_v26 }
 0xb00   :  { %14886 = vmatpush3.bf16.msra.mxu0 %v17852_v53  ;;  %v16559_v53 = vld [vmem:[%s18068_s8 + $0x8] sm:$0xff]  }
 0xb01   :  { %14891 = vmatprep.subr.bf16.mxu0 %v19724_v26 }
 0xb02   :  { %14918 = vmatpush3.bf16.msra.mxu1 %v16559_v53 }
 0xb03   :  { %14923 = vmatprep.subr.bf16.mxu1 %v19724_v26 }
 0xb07   :  { %14888 = vmatmul.mubr.msk.bf16.vlgmr.msra.gmra.mrb[52].mxu0 %vm190_vm0, %v2727_v45 }
 0xb08   :  { %14892 = vmatpush3.bf16.msra.mxu0 %v16554_v12  ;;  %14895 = vmatprep.mubr.msk.bf16.mxu0 %vm17233_vm1, %v19724_v26 }
 0xb09   :  { %14893 = vmatprep.subr.bf16.mxu0 %v19724_v26 }
 0xb0c   :  { %14894 = vmatpush3.bf16.msra.mxu0 %v16555_v5 }
 0xb0d   :  { %14931 = vmatprep.subr.bf16.mxu0 %v19724_v26 }
 0xb0f   :  { %14896 = vmatmul.mubr.msk.bf16.vlgmr.msra.gmra.mrb[56].mxu0 %vm190_vm0, %v661_v62  ;;  %v12982_v62 = vld [vmem:[%s18079_s14 + $0x10] sm:$0xff] }
 0xb10   :  { %14935 = vmatprep.mubr.msk.bf16.mxu0 %vm17233_vm1, %v19724_v26  ;;  %v2032_v47 = vadd.f32 %v12982_v62, %v17895_v30  ;;  %v16560_v30 = vld [vmem:[%s18103_s25] sm:$0xff]  }
 0xbc6   :  { %v18074_v55 = vpop.f32.mrb[88].mxu0  ;;  %v3052_v19 = vpop.f32.mrb[56].mxu1 }
 0xbc7   :  { %v14873_v31 = vpop.f32.mrb[89].mxu0  ;;  %v14905_v6 = vpop.f32.mrb[57].mxu1  ;;  %v16200_v36 = vadd.f32 %v12974_v42, %v3052_v19  ;;  %v16566_v42 = vld [vmem:[%s17295_s21] sm:$0xff]  }
 0xbc8   :  { %v2848_v58 = vpop.f32.mrb[90].mxu0  ;;  %v3055_v49 = vpop.f32.mrb[58].mxu1 }
 0xbc9   :  { %v14874_v0 = vpop.f32.mrb[91].mxu0  ;;  %v14906_v43 = vpop.f32.mrb[59].mxu1  ;;  %v13026_v54 = vmul.f32 -1.442695, %v16200_v36  ;;  %v18177_v36 = vld [vmem:[%s18174_s11] sm:$0xff] }
 0xbca   :  { %v16562_v0 = vld [vmem:[%s18103_s25 + $0x8] sm:$0xff]  }
 0xbcb   :  { %v16563_v43 = vld [vmem:[%s18108_s1 + $0x8] sm:$0xff]  }
 0xbd0   :  { %v3116_v18 = vpop.f32.mrb[84].mxu1 }
 0xbd1   :  { %v14913_v7 = vpop.f32.mrb[85].mxu1  ;;  %v3117_v22 = vadd.f32 %v13014_v27, %v3116_v18  ;;  %v18129_v18 = vld [vmem:[%s18126_s20] sm:$0xff] }
 0xbd2   :  { %v3119_v9 = vpop.f32.mrb[86].mxu1 }
 0xbd3   :  { %v14914_v46 = vpop.f32.mrb[87].mxu1 }
 0xbda   :  { %v2926_v61 = vpop.f32.mrb[52].mxu0 }
 0xbdb   :  { %v18082_v34 = vadd.f32 %v2926_v61, %v17459_v37  ;;  %v14889_v33 = vpop.f32.mrb[53].mxu0 }
 0xbdc   :  { %v2929_v38 = vpop.f32.mrb[54].mxu0 }
 0xbdd   :  { %v14890_v60 = vpop.f32.mrb[55].mxu0 }
 0xbde   :  { %v16564_v60 = vld [vmem:[%s18115_s12] sm:$0xff]  }
 0xbe2   :  { %v2988_v52 = vpop.f32.mrb[56].mxu0 }
 0xbe3   :  { %v16199_v13 = vadd.f32 %v2988_v52, %v1863_v41  ;;  %v14897_v17 = vpop.f32.mrb[57].mxu0  ;;  %v16565_v52 = vld [vmem:[%s18115_s12 + $0x8] sm:$0xff]  }
 0xbe4   :  { %v2991_v24 = vpop.f32.mrb[58].mxu0  ;;  %v16568_v17 = vld [vmem:[%s17295_s21 + $0x20] sm:$0xff]  }
 0xbe5   :  { %v13018_v23 = vmul.f32 -1.442695, %v16199_v13  ;;  %v14898_v1 = vpop.f32.mrb[59].mxu0  ;;  %v16567_v13 = vld [vmem:[%s17295_s21 + $0x8] sm:$0xff]  }
 0xbe6   :  { %v16569_v24 = vld [vmem:[%s17295_s21 + $0x28] sm:$0xff]  }
 0xbe7   :  { %16954 = vpow2.f32 %v13018_v23  ;;  %v16570_v23 = vld [vmem:[%s18165_s4] sm:$0xff]   ;;  %v16571_v1 = vld [vmem:[%s18165_s4 + $0x8] sm:$0xff]  }
 0xbe8   :  { %16956 = vpow2.f32 %v13026_v54 }
 0xbf1   :  { %v16955_v48 = vpop.eup %16954 }
 0xbf2   :  { %v2998_v37 = vadd.f32 1.0, %v16955_v48  ;;  %v16957_v39 = vpop.eup %16956 }
 0xbf3   :  { %v3062_v45 = vadd.f32 1.0, %v16957_v39 }
 0xbf4   :  { %16958 = vrcp.f32 %v2998_v37 }
 0xbf5   :  { %16960 = vrcp.f32 %v3062_v45 }
 0xbfe   :  { %v16959_v4 = vpop.eup %16958 }
 0xbff   :  { %v3122_v12 = vmul.f32 %v16959_v4, %v3117_v22  ;;  %v16961_v50 = vpop.eup %16960 }
 0xc00   :  { %v3125_v53 = vsub.f32 1.0, %v16961_v50  ;;  %v3127_v6 = vmul.f32 %v16961_v50, %v18017_v44  ;;  %v16561_v44 = vld [vmem:[%s18108_s1] sm:$0xff]  }
 0xc01   :  { %v3123_v5 = vadd.f32 %v3122_v12, %v2032_v47  ;;  %14932 = vmatpush3.bf16.msra.mxu0 %v16561_v44 }
 0xc02   :  { %14933 = vmatprep.subr.bf16.mxu0 %v19724_v26 }
 0xc03   :  { %16962 = vtanh.f32 %v3123_v5 }
 0xc05   :  { %14934 = vmatpush3.bf16.msra.mxu0 %v16563_v43  ;;  %v16573_v43 = vld [vmem:[%s17295_s21 + $0x18] sm:$0xff]  }
 0xc06   :  { %14947 = vmatprep.subr.bf16.mxu0 %v19724_v26 }
 0xc0d   :  { %v16963_v19 = vpop.eup %16962 }
 0xc0e   :  { %v3126_v31 = vmul.f32 %v16963_v19, %v3125_v53 }
 0xc10   :  { %v18090_v58 = vadd.f32 %v3127_v6, %v3126_v31  ;;  %v16572_v31 = vld [vmem:[%s17295_s21 + $0x10] sm:$0xff]  }
 0xc12   :  { %v18094_v49 = vpack.c.bf16 %v18090_v58, %v18090_v58 }
 0xc14   :  { %14920 = vmatmul.mubr.msk.bf16.vlgmr.msra.gmra.mrb[88].mxu1 %vm190_vm0, %v18094_v49 }
 0xc15   :  { %14927 = vmatprep.mubr.msk.bf16.mxu1 %vm17233_vm1, %v19724_v26  ;;  %14924 = vmatpush3.bf16.msra.mxu1 %v16560_v30 }
 0xc16   :  { %14925 = vmatprep.subr.bf16.mxu1 %v19724_v26 }
 0xc19   :  { %14926 = vmatpush3.bf16.msra.mxu1 %v16562_v0 }
 0xc1a   :  { %14939 = vmatprep.subr.bf16.mxu1 %v19724_v26 }
 0xce7   :  { %v3184_v7 = vpop.f32.mrb[88].mxu1 }
 0xce8   :  { %v3185_v9 = vadd.f32 %v3184_v7, %v18129_v18  ;;  %v14921_v46 = vpop.f32.mrb[89].mxu1 }
 0xce9   :  { %v3187_v61 = vpop.f32.mrb[90].mxu1 }
 0xcea   :  { %16964 = vtanh.f32 %v3185_v9  ;;  %v14922_v33 = vpop.f32.mrb[91].mxu1 }
 0xcf4   :  { %v16965_v38 = vpop.eup %16964 }
 0xcf5   :  { %v3191_v41 = vpack.c.bf16 %v16965_v38, %v16965_v38 }
 0xcf7   :  { %14928 = vmatmul.mubr.msk.bf16.vlgmr.msra.gmra.mrb[92].mxu1 %vm190_vm0, %v3191_v41  ;;  %14936 = vmatmul.mubr.msk.bf16.vlgmr.msra.gmra.mrb[92].mxu0 %vm190_vm0, %v3191_v41 }
 0xcf8   :  { %14940 = vmatpush3.bf16.msra.mxu1 %v16564_v60  ;;  %14943 = vmatprep.mubr.msk.bf16.mxu1 %vm17233_vm1, %v19724_v26 }
 0xcf9   :  { %14941 = vmatprep.subr.bf16.mxu1 %v19724_v26  ;;  %14951 = vmatprep.mubr.msk.bf16.mxu0 %vm17233_vm1, %v19724_v26 }
 0xcfa   :  { %14948 = vmatpush3.bf16.msra.mxu0 %v16570_v23  ;;  %v16575_v23 = vld [vmem:[%s17373_s3 + $0x8] sm:$0xff]  }
 0xcfb   :  { %14949 = vmatprep.subr.bf16.mxu0 %v19724_v26 }
 0xcfc   :  { %14942 = vmatpush3.bf16.msra.mxu1 %v16565_v52  ;;  %v18193_v52 = vld [vmem:[%s17483_s15] sm:$0xff] }
 0xcfd   :  { %14955 = vmatprep.subr.bf16.mxu1 %v19724_v26 }
 0xcfe   :  { %14950 = vmatpush3.bf16.msra.mxu0 %v16571_v1 }
 0xcff   :  { %14944 = vmatmul.mubr.msk.bf16.vlgmr.msra.gmra.mrb[96].mxu1 %vm190_vm0, %v18094_v49  ;;  %14963 = vmatprep.subr.bf16.mxu0 %v19724_v26 }
 0xd00   :  { %14956 = vmatpush3.bf16.msra.mxu1 %v16566_v42  ;;  %14959 = vmatprep.mubr.msk.bf16.mxu1 %vm17233_vm1, %v19724_v26 }
 0xd01   :  { %14957 = vmatprep.subr.bf16.mxu1 %v19724_v26 }
 0xd04   :  { %14958 = vmatpush3.bf16.msra.mxu1 %v16567_v13 }
 0xd05   :  { %14971 = vmatprep.subr.bf16.mxu1 %v19724_v26 }
 0xd07   :  { %14960 = vmatmul.mubr.msk.bf16.vlgmr.msra.gmra.mrb[100].mxu1 %vm190_vm0, %v17910_v59 }
 0xd08   :  { %14972 = vmatpush3.bf16.msra.mxu1 %v16568_v17  ;;  %14975 = vmatprep.mubr.msk.bf16.mxu1 %vm17233_vm1, %v19724_v26 }
 0xd09   :  { %14973 = vmatprep.subr.bf16.mxu1 %v19724_v26 }
 0xd0c   :  { %14974 = vmatpush3.bf16.msra.mxu1 %v16569_v24 }
 0xd0d   :  { %14987 = vmatprep.subr.bf16.mxu1 %v19724_v26 }
 0xd0f   :  { %14976 = vmatmul.mubr.msk.bf16.vlgmr.msra.gmra.mrb[104].mxu1 %vm190_vm0, %v17910_v59 }
 0xd10   :  { %14991 = vmatprep.mubr.msk.bf16.mxu1 %vm17233_vm1, %v19724_v26 }
 0xdca   :  { %v3246_v54 = vpop.f32.mrb[92].mxu1  ;;  %v3307_v48 = vpop.f32.mrb[92].mxu0 }
 0xdcb   :  { %v3247_v37 = vadd.f32 %v3246_v54, %v18177_v36  ;;  %v14929_v39 = vpop.f32.mrb[93].mxu1  ;;  %v14937_v27 = vpop.f32.mrb[93].mxu0 }
 0xdcc   :  { %v3249_v45 = vpop.f32.mrb[94].mxu1  ;;  %v3310_v22 = vpop.f32.mrb[94].mxu0 }
 0xdcd   :  { %16966 = vtanh.f32 %v3247_v37  ;;  %v14930_v62 = vpop.f32.mrb[95].mxu1  ;;  %v14938_v4 = vpop.f32.mrb[95].mxu0 }
 0xdd2   :  { %v3359_v47 = vpop.f32.mrb[96].mxu1 }
 0xdd3   :  { %v14945_v12 = vpop.f32.mrb[97].mxu1  ;;  %v3360_v5 = vadd.f32 %v3359_v47, %v3307_v48 }
 0xdd4   :  { %v3362_v50 = vpop.f32.mrb[98].mxu1 }
 0xdd5   :  { %v14946_v53 = vpop.f32.mrb[99].mxu1 }
 0xdd7   :  { %v16967_v19 = vpop.eup %16966 }
 0xdd8   :  { %v3365_v6 = vpack.c.bf16 %v16967_v19, %v16967_v19 }
 0xdda   :  { %14952 = vmatmul.mubr.msk.bf16.vlgmr.msra.gmra.mrb[96].mxu0 %vm190_vm0, %v3365_v6  ;;  %v3480_v30 = vpop.f32.mrb[100].mxu1 }
 0xddb   :  { %v3486_v44 = vadd.f32 %v3480_v30, %v17405_v2  ;;  %14964 = vmatpush3.bf16.msra.mxu0 %v16572_v31  ;;  %v14961_v0 = vpop.f32.mrb[101].mxu1  ;;  %14967 = vmatprep.mubr.msk.bf16.mxu0 %vm17233_vm1, %v19724_v26  ;;  %v16576_v30 = vld [vmem:[%s17503_s19] sm:$0xff]  }
 0xddc   :  { %v3483_v7 = vpop.f32.mrb[102].mxu1  ;;  %14965 = vmatprep.subr.bf16.mxu0 %v19724_v26  ;;  %14988 = vmatpush3.bf16.msra.mxu1 %v16576_v30  ;;  %v16579_v0 = vld [vmem:[%s17503_s19 + $0x18] sm:$0xff]  }
 0xddd   :  { %v13052_v9 = vmul.f32 -1.442695, %v3486_v44  ;;  %v14962_v46 = vpop.f32.mrb[103].mxu1  ;;  %v16577_v44 = vld [vmem:[%s17503_s19 + $0x10] sm:$0xff]   ;;  %14989 = vmatprep.subr.bf16.mxu1 %v19724_v26 }
 0xddf   :  { %16968 = vpow2.f32 %v13052_v9  ;;  %14966 = vmatpush3.bf16.msra.mxu0 %v16573_v43  ;;  %v18229_v43 = vld [vmem:[%s17538_s2] sm:$0xff] }
 0xde0   :  { %14979 = vmatprep.subr.bf16.mxu0 %v19724_v26 }
 0xde2   :  { %14968 = vmatmul.mubr.msk.bf16.vlgmr.msra.gmra.mrb[100].mxu0 %vm190_vm0, %v17910_v59  ;;  %v3606_v2 = vpop.f32.mrb[104].mxu1  ;;  %v16574_v59 = vld [vmem:[%s17373_s3] sm:$0xff]  }
 0xde3   :  { %v14977_v61 = vpop.f32.mrb[105].mxu1  ;;  %14983 = vmatprep.mubr.msk.bf16.mxu0 %vm17233_vm1, %v19724_v26  ;;  %v3607_v42 = vadd.f32 %v3606_v2, %v18193_v52  ;;  %14980 = vmatpush3.bf16.msra.mxu0 %v16574_v59  ;;  %v16586_v59 = vld [vmem:[%s17646_s7 + $0x8] sm:$0xff]  }
 0xde4   :  { %v3609_v33 = vpop.f32.mrb[106].mxu1  ;;  %14981 = vmatprep.subr.bf16.mxu0 %v19724_v26 }
 0xde5   :  { %v14978_v38 = vpop.f32.mrb[107].mxu1 }
 0xde6   :  { %v16580_v38 = vld [vmem:[%s17503_s19 + $0x20] sm:$0xff]  }
 0xde7   :  { %14982 = vmatpush3.bf16.msra.mxu0 %v16575_v23  ;;  %v16587_v23 = vld [vmem:[%s17533_s28 + $0x8] sm:$0xff]  }
 0xde8   :  { %14995 = vmatprep.subr.bf16.mxu0 %v19724_v26 }
 0xde9   :  { %v16969_v60 = vpop.eup %16968 }
 0xdea   :  { %v3490_v41 = vadd.f32 1.0, %v16969_v60  ;;  %v16581_v60 = vld [vmem:[%s17515_s24] sm:$0xff]  }
 0xdec   :  { %16970 = vrcp.f32 %v3490_v41 }
 0xdf6   :  { %v16971_v13 = vpop.eup %16970 }
 0xdf7   :  { %v3612_v17 = vmul.f32 %v16971_v13, %v3607_v42  ;;  %v16582_v42 = vld [vmem:[%s17503_s19 + $0x28] sm:$0xff]  }
 0xdf8   :  { %v16583_v13 = vld [vmem:[%s17515_s24 + $0x8] sm:$0xff]  }
 0xdf9   :  { %v3613_v24 = vadd.f32 %v3612_v17, %v17453_v32  ;;  %v16584_v17 = vld [vmem:[%s17646_s7] sm:$0xff]  }
 0xead   :  { %v3419_v1 = vpop.f32.mrb[96].mxu0 }
 0xeae   :  { %v3425_v54 = vadd.f32 %v3419_v1, %v3360_v5  ;;  %v14953_v48 = vpop.f32.mrb[97].mxu0  ;;  %v16588_v1 = vld [vmem:[%s17646_s7 + $0x20] sm:$0xff]  }
 0xeaf   :  { %v3422_v37 = vpop.f32.mrb[98].mxu0  ;;  %v16590_v48 = vld [vmem:[%s17646_s7 + $0x28] sm:$0xff]  }
 0xeb0   :  { %v3427_v32 = vadd.f32 %v17900_v51, %v3425_v54  ;;  %v14954_v39 = vpop.f32.mrb[99].mxu0  ;;  %v16589_v54 = vld [vmem:[%s17646_s7 + $0x10] sm:$0xff]   ;;  %v16591_v37 = vld [vmem:[%s17646_s7 + $0x18] sm:$0xff]  }
 0xeb1   :  { %v16593_v39 = vld [vmem:[%s17726_s17 + $0x8] sm:$0xff]  }
 0xeb2   :  { %3428 = vst [vmem:[%s18204_s30] sm:$0xff] %v3427_v32  ;;  %v16592_v32 = vld [vmem:[%s17726_s17] sm:$0xff]  }
 0xeb5   :  { %v3543_v27 = vpop.f32.mrb[100].mxu0 }
 0xeb6   :  { %v3549_v45 = vadd.f32 %v3543_v27, %v17408_v3  ;;  %v14969_v22 = vpop.f32.mrb[101].mxu0 }
 0xeb7   :  { %v3546_v62 = vpop.f32.mrb[102].mxu0 }
 0xeb8   :  { %v13060_v4 = vmul.f32 -1.442695, %v3549_v45  ;;  %v14970_v47 = vpop.f32.mrb[103].mxu0 }
 0xeb9   :  { %v17219_v47 = vld [vmem:[%s17743_s23] sm:$0xff] }
 0xeba   :  { %16972 = vpow2.f32 %v13060_v4 }
 0xec4   :  { %v16973_v12 = vpop.eup %16972 }
 0xec5   :  { %v3553_v50 = vadd.f32 1.0, %v16973_v12 }
 0xec7   :  { %16974 = vrcp.f32 %v3553_v50 }
 0xec8   :  { %16976 = vtanh.f32 %v3613_v24  ;;  %v16585_v24 = vld [vmem:[%s17533_s28] sm:$0xff]  }
 0xed1   :  { %v16975_v5 = vpop.eup %16974 }
 0xed2   :  { %v3615_v51 = vsub.f32 1.0, %v16975_v5  ;;  %v16977_v53 = vpop.eup %16976  ;;  %v3617_v19 = vmul.f32 %v16975_v5, %v17906_v28  ;;  %v16578_v28 = vld [vmem:[%s17503_s19 + $0x8] sm:$0xff]  }
 0xed3   :  { %14990 = vmatpush3.bf16.msra.mxu1 %v16578_v28  ;;  %v17220_v28 = vld [vmem:[%s17743_s23 + $0x8] sm:$0xff] }
 0xed4   :  { %v3616_v31 = vmul.f32 %v16977_v53, %v3615_v51  ;;  %15003 = vmatprep.subr.bf16.mxu1 %v19724_v26 }
 0xed6   :  { %v18210_v3 = vadd.f32 %v3617_v19, %v3616_v31 }
 0xed8   :  { %v18214_v6 = vpack.c.bf16 %v18210_v3, %v18210_v3 }
 0xeda   :  { %14984 = vmatmul.mubr.msk.bf16.vlgmr.msra.gmra.mrb[104].mxu0 %vm190_vm0, %v18214_v6 }
 0xedb   :  { %14999 = vmatprep.mubr.msk.bf16.mxu0 %vm17233_vm1, %v19724_v26  ;;  %14996 = vmatpush3.bf16.msra.mxu0 %v16577_v44 }
 0xedc   :  { %14997 = vmatprep.subr.bf16.mxu0 %v19724_v26 }
 0xedf   :  { %14998 = vmatpush3.bf16.msra.mxu0 %v16579_v0 }
 0xee0   :  { %15011 = vmatprep.subr.bf16.mxu0 %v19724_v26 }
 0xfad   :  { %v3674_v7 = vpop.f32.mrb[104].mxu0 }
 0xfae   :  { %v3675_v9 = vadd.f32 %v3674_v7, %v18229_v43  ;;  %v14985_v46 = vpop.f32.mrb[105].mxu0 }
 0xfaf   :  { %v3677_v2 = vpop.f32.mrb[106].mxu0 }
 0xfb0   :  { %16978 = vtanh.f32 %v3675_v9  ;;  %v14986_v61 = vpop.f32.mrb[107].mxu0 }
 0xfba   :  { %v16979_v33 = vpop.eup %16978 }
 0xfbb   :  { %v3681_v41 = vpack.c.bf16 %v16979_v33, %v16979_v33 }
 0xfbd   :  { %14992 = vmatmul.mubr.msk.bf16.vlgmr.msra.gmra.mrb[108].mxu1 %vm190_vm0, %v3681_v41  ;;  %15000 = vmatmul.mubr.msk.bf16.vlgmr.msra.gmra.mrb[108].mxu0 %vm190_vm0, %v3681_v41 }
 0xfbe   :  { %15004 = vmatpush3.bf16.msra.mxu1 %v16580_v38  ;;  %15012 = vmatpush3.bf16.msra.mxu0 %v16581_v60  ;;  %v18293_v38 = vld [vmem:[%s17743_s23 + $0x18] sm:$0xff] }
 0xfbf   :  { %15005 = vmatprep.subr.bf16.mxu1 %v19724_v26  ;;  %15013 = vmatprep.subr.bf16.mxu0 %v19724_v26 }
 0xfc0   :  { %15007 = vmatprep.mubr.msk.bf16.mxu1 %vm17233_vm1, %v19724_v26  ;;  %15015 = vmatprep.mubr.msk.bf16.mxu0 %vm17233_vm1, %v19724_v26 }
 0xfc2   :  { %15006 = vmatpush3.bf16.msra.mxu1 %v16582_v42  ;;  %15014 = vmatpush3.bf16.msra.mxu0 %v16583_v13 }
 0xfc3   :  { %15027 = vmatprep.subr.bf16.mxu1 %v19724_v26  ;;  %15019 = vmatprep.subr.bf16.mxu0 %v19724_v26 }
 0xfc5   :  { %15008 = vmatmul.mubr.msk.bf16.vlgmr.msra.gmra.mrb[112].mxu1 %vm190_vm0, %v3681_v41  ;;  %15016 = vmatmul.mubr.msk.bf16.vlgmr.msra.gmra.mrb[112].mxu0 %vm190_vm0, %v3681_v41 }
 0xfc6   :  { %15028 = vmatpush3.bf16.msra.mxu1 %v16584_v17  ;;  %15020 = vmatpush3.bf16.msra.mxu0 %v16585_v24  ;;  %v17221_v17 = vld [vmem:[%s17743_s23 + $0x10] sm:$0xff] }
 0xfc7   :  { %15029 = vmatprep.subr.bf16.mxu1 %v19724_v26  ;;  %15021 = vmatprep.subr.bf16.mxu0 %v19724_v26  ;;  %v2456_v24 = vadd.f32 %v17221_v17, %v17981_v16  ;;  %v16594_v16 = vld [vmem:[%s17776_s29] sm:$0xff]  }
 0xfc8   :  { %15031 = vmatprep.mubr.msk.bf16.mxu1 %vm17233_vm1, %v19724_v26  ;;  %15023 = vmatprep.mubr.msk.bf16.mxu0 %vm17233_vm1, %v19724_v26 }
 0xfca   :  { %15030 = vmatpush3.bf16.msra.mxu1 %v16586_v59  ;;  %15022 = vmatpush3.bf16.msra.mxu0 %v16587_v23 }
 0xfcb   :  { %15043 = vmatprep.subr.bf16.mxu1 %v19724_v26  ;;  %15035 = vmatprep.subr.bf16.mxu0 %v19724_v26 }
 0xfcd   :  { %15032 = vmatmul.mubr.msk.bf16.vlgmr.msra.gmra.mrb[64].mxu1 %vm190_vm0, %v17993_v57 }
 0xfce   :  { %15044 = vmatpush3.bf16.msra.mxu1 %v16588_v1  ;;  %15047 = vmatprep.mubr.msk.bf16.mxu1 %vm17233_vm1, %v19724_v26 }
 0xfcf   :  { %15045 = vmatprep.subr.bf16.mxu1 %v19724_v26 }
 0xfd1   :  { %15024 = vmatmul.mubr.msk.bf16.vlgmr.msra.gmra.mrb[112].mxu0 %vm190_vm0, %v18214_v6 }
 0xfd2   :  { %15036 = vmatpush3.bf16.msra.mxu0 %v16589_v54  ;;  %15046 = vmatpush3.bf16.msra.mxu1 %v16590_v48 }
 0xfd3   :  { %15037 = vmatprep.subr.bf16.mxu0 %v19724_v26  ;;  %15039 = vmatprep.mubr.msk.bf16.mxu0 %vm17233_vm1, %v19724_v26 }
 0xfd4   :  { %15051 = vmatprep.subr.bf16.mxu1 %v19724_v26 }
 0xfd5   :  { %15048 = vmatmul.mubr.msk.bf16.vlgmr.msra.gmra.mrb[116].mxu1 %vm190_vm0, %v17993_v57 }
 0xfd6   :  { %15038 = vmatpush3.bf16.msra.mxu0 %v16591_v37  ;;  %15055 = vmatprep.mubr.msk.bf16.mxu1 %vm17233_vm1, %v19724_v26 }
 0xfd7   :  { %15059 = vmatprep.subr.bf16.mxu0 %v19724_v26  ;;  %15052 = vmatpush3.bf16.msra.mxu1 %v16592_v32 }
 0xfd8   :  { %15053 = vmatprep.subr.bf16.mxu1 %v19724_v26 }
 0xfd9   :  { %15040 = vmatmul.mubr.msk.bf16.vlgmr.msra.gmra.mrb[76].mxu0 %vm190_vm0, %v17993_v57 }
 0xfda   :  { %15063 = vmatprep.mubr.msk.bf16.mxu0 %vm17233_vm1, %v19724_v26  ;;  %15060 = vmatpush3.bf16.msra.mxu0 %v16594_v16 }
 0xfdb   :  { %15054 = vmatpush3.bf16.msra.mxu1 %v16593_v39  ;;  %15061 = vmatprep.subr.bf16.mxu0 %v19724_v26 }
 0xfdc   :  { %15067 = vmatprep.subr.bf16.mxu1 %v19724_v26 }
0x1098   :  { %v18288_v27 = vpop.f32.mrb[112].mxu1 }
0x1099   :  { %v15009_v45 = vpop.f32.mrb[113].mxu1 }
0x109a   :  { %v3853_v22 = vpop.f32.mrb[114].mxu1 }
0x109b   :  { %v15010_v62 = vpop.f32.mrb[115].mxu1  ;;  %v16595_v22 = vld [vmem:[%s17776_s29 + $0x10] sm:$0xff]  }
0x109c   :  { %v16597_v62 = vld [vmem:[%s17776_s29 + $0x18] sm:$0xff]  }
0x10a0   :  { %v4019_v4 = vpop.f32.mrb[64].mxu1 }
0x10a1   :  { %v16201_v57 = vadd.f32 %v17219_v47, %v4019_v4  ;;  %v15033_v12 = vpop.f32.mrb[65].mxu1  ;;  %v18318_v4 = vld [vmem:[%s17811_s16] sm:$0xff] }
0x10a2   :  { %v4022_v50 = vpop.f32.mrb[66].mxu1 }
0x10a3   :  { %v13100_v5 = vmul.f32 -1.442695, %v16201_v57  ;;  %v15034_v51 = vpop.f32.mrb[67].mxu1 }
0x10a5   :  { %16980 = vpow2.f32 %v13100_v5 }
0x10a8   :  { %v4145_v53 = vpop.f32.mrb[116].mxu1 }
0x10a9   :  { %v15049_v19 = vpop.f32.mrb[117].mxu1  ;;  %v4146_v41 = vadd.f32 %v18293_v38, %v4145_v53  ;;  %v16598_v53 = vld [vmem:[%s17776_s29 + $0x20] sm:$0xff]  }
0x10aa   :  { %v4148_v31 = vpop.f32.mrb[118].mxu1  ;;  %v16599_v19 = vld [vmem:[%s18006_s22 + $0x10] sm:$0xff]  }
0x10ab   :  { %v15050_v30 = vpop.f32.mrb[119].mxu1 }
0x10ac   :  { %v4082_v44 = vpop.f32.mrb[76].mxu0  ;;  %v16600_v30 = vld [vmem:[%s17776_s29 + $0x28] sm:$0xff]  }
0x10ad   :  { %v16202_v0 = vadd.f32 %v17220_v28, %v4082_v44  ;;  %v15041_v7 = vpop.f32.mrb[77].mxu0  ;;  %v16601_v44 = vld [vmem:[%s18006_s22 + $0x18] sm:$0xff]   ;;  %v16602_v28 = vld [vmem:[%s17788_s5] sm:$0xff]  }
0x10ae   :  { %v4085_v9 = vpop.f32.mrb[78].mxu0  ;;  %v16604_v7 = vld [vmem:[%s17788_s5 + $0x8] sm:$0xff]  }
0x10af   :  { %v16981_v46 = vpop.eup %16980  ;;  %v13108_v2 = vmul.f32 -1.442695, %v16202_v0  ;;  %v15042_v61 = vpop.f32.mrb[79].mxu0  ;;  %v16603_v0 = vld [vmem:[%s18006_s22 + $0x20] sm:$0xff]   ;;  %v16605_v9 = vld [vmem:[%s18006_s22 + $0x28] sm:$0xff]  }
0x10b0   :  { %v4029_v33 = vadd.f32 1.0, %v16981_v46  ;;  %v16606_v46 = vld [vmem:[%s17806_s10] sm:$0xff]  }
0x10b1   :  { %16982 = vpow2.f32 %v13108_v2  ;;  %v16607_v2 = vld [vmem:[%s17806_s10 + $0x8] sm:$0xff]   ;;  %v16608_v61 = vld [vmem:[%s18006_s22] sm:$0xff]  }
0x10b2   :  { %16984 = vrcp.f32 %v4029_v33  ;;  %v16609_v33 = vld [vmem:[%s18006_s22 + $0x8] sm:$0xff]  }
0x10bb   :  { %v16983_v60 = vpop.eup %16982 }
0x10bc   :  { %v16985_v42 = vpop.eup %16984  ;;  %v4092_v13 = vadd.f32 1.0, %v16983_v60  ;;  %v16610_v60 = vld [vmem:[%s18068_s8] sm:$0xff]  }
0x10bd   :  { %v4151_v59 = vmul.f32 %v16985_v42, %v4146_v41  ;;  %v16611_v41 = vld [vmem:[%s18068_s8 + $0x8] sm:$0xff]  }
0x10be   :  { %16986 = vrcp.f32 %v4092_v13 }
0x10bf   :  { %v4152_v23 = vadd.f32 %v4151_v59, %v2456_v24 }
0x10c1   :  { %16988 = vtanh.f32 %v4152_v23 }
0x10c8   :  { %v16987_v1 = vpop.eup %16986 }
0x10c9   :  { %v4154_v54 = vsub.f32 1.0, %v16987_v1  ;;  %v4156_v37 = vmul.f32 %v16987_v1, %v17989_v25  ;;  %v16596_v25 = vld [vmem:[%s17776_s29 + $0x8] sm:$0xff]  }
0x10ca   :  { %15062 = vmatpush3.bf16.msra.mxu0 %v16596_v25 }
0x10cb   :  { %v16989_v48 = vpop.eup %16988  ;;  %15075 = vmatprep.subr.bf16.mxu0 %v19724_v26 }
0x10cc   :  { %v4155_v32 = vmul.f32 %v16989_v48, %v4154_v54 }
0x10ce   :  { %v18299_v39 = vadd.f32 %v4156_v37, %v4155_v32 }
0x10d0   :  { %v18303_v45 = vpack.c.bf16 %v18299_v39, %v18299_v39 }
0x10d2   :  { %15056 = vmatmul.mubr.msk.bf16.vlgmr.msra.gmra.mrb[120].mxu1 %vm190_vm0, %v18303_v45 }
0x10d3   :  { %15071 = vmatprep.mubr.msk.bf16.mxu1 %vm17233_vm1, %v19724_v26  ;;  %15068 = vmatpush3.bf16.msra.mxu1 %v16595_v22 }
0x10d4   :  { %15069 = vmatprep.subr.bf16.mxu1 %v19724_v26 }
0x10d7   :  { %15070 = vmatpush3.bf16.msra.mxu1 %v16597_v62 }
0x10d8   :  { %15107 = vmatprep.subr.bf16.mxu1 %v19724_v26 }
0x11a5   :  { %v4213_v47 = vpop.f32.mrb[120].mxu1 }
0x11a6   :  { %v4214_v57 = vadd.f32 %v4213_v47, %v18318_v4  ;;  %v15057_v12 = vpop.f32.mrb[121].mxu1 }
0x11a7   :  { %v4216_v50 = vpop.f32.mrb[122].mxu1  ;;  %v17222_v12 = vld [vmem:[%s18079_s14] sm:$0xff] }
0x11a8   :  { %16990 = vtanh.f32 %v4214_v57  ;;  %v15058_v5 = vpop.f32.mrb[123].mxu1 }
0x11b2   :  { %v16991_v51 = vpop.eup %16990 }
0x11b3   :  { %v4220_v31 = vpack.c.bf16 %v16991_v51, %v16991_v51 }
0x11b5   :  { %15064 = vmatmul.mubr.msk.bf16.vlgmr.msra.gmra.mrb[116].mxu0 %vm190_vm0, %v4220_v31  ;;  %15072 = vmatmul.mubr.msk.bf16.vlgmr.msra.gmra.mrb[124].mxu1 %vm190_vm0, %v4220_v31 }
0x11b6   :  { %15076 = vmatpush3.bf16.msra.mxu0 %v16598_v53  ;;  %15108 = vmatpush3.bf16.msra.mxu1 %v16599_v19 }
0x11b7   :  { %15077 = vmatprep.subr.bf16.mxu0 %v19724_v26  ;;  %15109 = vmatprep.subr.bf16.mxu1 %v19724_v26 }
0x11b8   :  { %15079 = vmatprep.mubr.msk.bf16.mxu0 %vm17233_vm1, %v19724_v26  ;;  %15111 = vmatprep.mubr.msk.bf16.mxu1 %vm17233_vm1, %v19724_v26 }
0x11ba   :  { %15078 = vmatpush3.bf16.msra.mxu0 %v16600_v30  ;;  %15110 = vmatpush3.bf16.msra.mxu1 %v16601_v44 }
0x11bb   :  { %15083 = vmatprep.subr.bf16.mxu0 %v19724_v26  ;;  %15115 = vmatprep.subr.bf16.mxu1 %v19724_v26 }
0x11bd   :  { %15080 = vmatmul.mubr.msk.bf16.vlgmr.msra.gmra.mrb[120].mxu0 %vm190_vm0, %v4220_v31  ;;  %15112 = vmatmul.mubr.msk.bf16.vlgmr.msra.gmra.mrb[80].mxu1 %vm190_vm0, %v18094_v49 }
0x11be   :  { %15084 = vmatpush3.bf16.msra.mxu0 %v16602_v28  ;;  %15116 = vmatpush3.bf16.msra.mxu1 %v16603_v0 }
0x11bf   :  { %15085 = vmatprep.subr.bf16.mxu0 %v19724_v26  ;;  %15117 = vmatprep.subr.bf16.mxu1 %v19724_v26 }
0x11c0   :  { %15087 = vmatprep.mubr.msk.bf16.mxu0 %vm17233_vm1, %v19724_v26  ;;  %15119 = vmatprep.mubr.msk.bf16.mxu1 %vm17233_vm1, %v19724_v26 }
0x11c2   :  { %15086 = vmatpush3.bf16.msra.mxu0 %v16604_v7  ;;  %15118 = vmatpush3.bf16.msra.mxu1 %v16605_v9  ;;  %v17224_v9 = vld [vmem:[%s18079_s14 + $0x18] sm:$0xff] }
0x11c3   :  { %15091 = vmatprep.subr.bf16.mxu0 %v19724_v26  ;;  %15123 = vmatprep.subr.bf16.mxu1 %v19724_v26 }
0x11c5   :  { %15088 = vmatmul.mubr.msk.bf16.vlgmr.msra.gmra.mrb[80].mxu0 %vm190_vm0, %v18303_v45  ;;  %15120 = vmatmul.mubr.msk.bf16.vlgmr.msra.gmra.mrb[128].mxu1 %vm190_vm0, %v18094_v49 }
0x11c6   :  { %15092 = vmatpush3.bf16.msra.mxu0 %v16606_v46  ;;  %15095 = vmatprep.mubr.msk.bf16.mxu0 %vm17233_vm1, %v19724_v26 }
0x11c7   :  { %15093 = vmatprep.subr.bf16.mxu0 %v19724_v26  ;;  %15127 = vmatprep.mubr.msk.bf16.mxu1 %vm17233_vm1, %v19724_v26 }
0x11c8   :  { %15124 = vmatpush3.bf16.msra.mxu1 %v16610_v60 }
0x11c9   :  { %15125 = vmatprep.subr.bf16.mxu1 %v19724_v26 }
0x11ca   :  { %15094 = vmatpush3.bf16.msra.mxu0 %v16607_v2 }
0x11cb   :  { %15099 = vmatprep.subr.bf16.mxu0 %v19724_v26 }
0x11cc   :  { %15126 = vmatpush3.bf16.msra.mxu1 %v16611_v41 }
0x11cd   :  { %15131 = vmatprep.subr.bf16.mxu1 %v19724_v26 }
0x11d1   :  { %15096 = vmatmul.mubr.msk.bf16.vlgmr.msra.gmra.mrb[80].mxu0 %vm190_vm0, %v4220_v31  ;;  %v17223_v31 = vld [vmem:[%s18079_s14 + $0x8] sm:$0xff] }
0x11d2   :  { %15100 = vmatpush3.bf16.msra.mxu0 %v16608_v61  ;;  %15103 = vmatprep.mubr.msk.bf16.mxu0 %vm17233_vm1, %v19724_v26  ;;  %v17225_v61 = vld [vmem:[%s18079_s14 + $0x10] sm:$0xff] }
0x11d3   :  { %15101 = vmatprep.subr.bf16.mxu0 %v19724_v26 }
0x11d6   :  { %15102 = vmatpush3.bf16.msra.mxu0 %v16609_v33  ;;  %v2846_v33 = vadd.f32 %v17225_v61, %v18074_v55  ;;  %v16612_v55 = vld [vmem:[%s18103_s25] sm:$0xff]  }
0x11d7   :  { %15139 = vmatprep.subr.bf16.mxu0 %v19724_v26 }
0x11d9   :  { %15104 = vmatmul.mubr.msk.bf16.vlgmr.msra.gmra.mrb[84].mxu0 %vm190_vm0, %v18094_v49 }
0x11da   :  { %15143 = vmatprep.mubr.msk.bf16.mxu0 %vm17233_vm1, %v19724_v26 }
0x1290   :  { %v18377_v42 = vpop.f32.mrb[120].mxu0  ;;  %v4623_v13 = vpop.f32.mrb[80].mxu1 }
0x1291   :  { %v15081_v17 = vpop.f32.mrb[121].mxu0  ;;  %v15113_v24 = vpop.f32.mrb[81].mxu1  ;;  %v16204_v30 = vadd.f32 %v17223_v31, %v4623_v13  ;;  %v16623_v31 = vld [vmem:[%s18165_s4 + $0x8] sm:$0xff]  }
0x1292   :  { %v4392_v59 = vpop.f32.mrb[122].mxu0  ;;  %v4626_v23 = vpop.f32.mrb[82].mxu1 }
0x1293   :  { %v15082_v49 = vpop.f32.mrb[123].mxu0  ;;  %v15114_v1 = vpop.f32.mrb[83].mxu1  ;;  %v13156_v44 = vmul.f32 -1.442695, %v16204_v30 }
0x1298   :  { %v4686_v54 = vpop.f32.mrb[128].mxu1 }
0x1299   :  { %v15121_v48 = vpop.f32.mrb[129].mxu1  ;;  %v4687_v46 = vadd.f32 %v17224_v9, %v4686_v54  ;;  %v16613_v54 = vld [vmem:[%s18108_s1] sm:$0xff]  }
0x129a   :  { %v4689_v37 = vpop.f32.mrb[130].mxu1  ;;  %15140 = vmatpush3.bf16.msra.mxu0 %v16613_v54  ;;  %v16615_v48 = vld [vmem:[%s18108_s1 + $0x8] sm:$0xff]   ;;  %v16625_v54 = vld [vmem:[%s17295_s21 + $0x18] sm:$0xff]  }
0x129b   :  { %v15122_v32 = vpop.f32.mrb[131].mxu1  ;;  %15141 = vmatprep.subr.bf16.mxu0 %v19724_v26 }
0x129e   :  { %15142 = vmatpush3.bf16.msra.mxu0 %v16615_v48 }
0x129f   :  { %15155 = vmatprep.subr.bf16.mxu0 %v19724_v26 }
0x12a4   :  { %v4502_v16 = vpop.f32.mrb[80].mxu0 }
0x12a5   :  { %v18380_v22 = vadd.f32 %v4502_v16, %v17451_v29  ;;  %v15097_v25 = vpop.f32.mrb[81].mxu0 }
0x12a6   :  { %v4505_v62 = vpop.f32.mrb[82].mxu0 }
0x12a7   :  { %v15098_v47 = vpop.f32.mrb[83].mxu0 }
0x12ac   :  { %v4560_v57 = vpop.f32.mrb[84].mxu0 }
0x12ad   :  { %v16203_v50 = vadd.f32 %v17222_v12, %v4560_v57  ;;  %v15105_v5 = vpop.f32.mrb[85].mxu0  ;;  %v16616_v57 = vld [vmem:[%s18115_s12] sm:$0xff]  }
0x12ae   :  { %v4563_v51 = vpop.f32.mrb[86].mxu0  ;;  %v16619_v5 = vld [vmem:[%s17295_s21 + $0x8] sm:$0xff]  }
0x12af   :  { %v13148_v53 = vmul.f32 -1.442695, %v16203_v50  ;;  %v15106_v19 = vpop.f32.mrb[87].mxu0  ;;  %v16617_v50 = vld [vmem:[%s18115_s12 + $0x8] sm:$0xff]   ;;  %v16620_v51 = vld [vmem:[%s17295_s21 + $0x20] sm:$0xff]  }
0x12b0   :  { %v16622_v19 = vld [vmem:[%s18165_s4] sm:$0xff]  }
0x12b1   :  { %16992 = vpow2.f32 %v13148_v53  ;;  %v16621_v53 = vld [vmem:[%s17295_s21 + $0x28] sm:$0xff]  }
0x12b2   :  { %16994 = vpow2.f32 %v13156_v44 }
0x12bb   :  { %v16993_v28 = vpop.eup %16992 }
0x12bc   :  { %v4570_v29 = vadd.f32 1.0, %v16993_v28  ;;  %v16995_v0 = vpop.eup %16994 }
0x12bd   :  { %v4633_v7 = vadd.f32 1.0, %v16995_v0 }
0x12be   :  { %16996 = vrcp.f32 %v4570_v29 }
0x12bf   :  { %16998 = vrcp.f32 %v4633_v7 }
0x12c8   :  { %v16997_v2 = vpop.eup %16996 }
0x12c9   :  { %v4692_v60 = vmul.f32 %v16997_v2, %v4687_v46  ;;  %v16999_v13 = vpop.eup %16998 }
0x12ca   :  { %v4695_v17 = vsub.f32 1.0, %v16999_v13  ;;  %v4697_v59 = vmul.f32 %v16999_v13, %v18090_v58  ;;  %v16614_v58 = vld [vmem:[%s18103_s25 + $0x8] sm:$0xff]  }
0x12cb   :  { %v4693_v41 = vadd.f32 %v4692_v60, %v2846_v33 }
0x12cd   :  { %17000 = vtanh.f32 %v4693_v41 }
0x12d7   :  { %v17001_v24 = vpop.eup %17000 }
0x12d8   :  { %v4696_v23 = vmul.f32 %v17001_v24, %v4695_v17  ;;  %v16624_v24 = vld [vmem:[%s17295_s21 + $0x10] sm:$0xff]  }
0x12da   :  { %v18388_v49 = vadd.f32 %v4697_v59, %v4696_v23 }
0x12dc   :  { %v18392_v1 = vpack.c.bf16 %v18388_v49, %v18388_v49 }
0x12de   :  { %15128 = vmatmul.mubr.msk.bf16.vlgmr.msra.gmra.mrb[132].mxu1 %vm190_vm0, %v18392_v1 }
0x12df   :  { %15135 = vmatprep.mubr.msk.bf16.mxu1 %vm17233_vm1, %v19724_v26  ;;  %15132 = vmatpush3.bf16.msra.mxu1 %v16612_v55 }
0x12e0   :  { %15133 = vmatprep.subr.bf16.mxu1 %v19724_v26 }
0x12e3   :  { %15134 = vmatpush3.bf16.msra.mxu1 %v16614_v58 }
0x12e4   :  { %15147 = vmatprep.subr.bf16.mxu1 %v19724_v26 }
0x13b1   :  { %v4754_v37 = vpop.f32.mrb[132].mxu1 }
0x13b2   :  { %v4755_v32 = vadd.f32 %v4754_v37, %v18129_v18  ;;  %v15129_v16 = vpop.f32.mrb[133].mxu1  ;;  %v16618_v18 = vld [vmem:[%s17295_s21] sm:$0xff]  }
0x13b3   :  { %v4757_v25 = vpop.f32.mrb[134].mxu1 }
0x13b4   :  { %17002 = vtanh.f32 %v4755_v32  ;;  %v15130_v62 = vpop.f32.mrb[135].mxu1 }
0x13be   :  { %v17003_v47 = vpop.eup %17002 }
0x13bf   :  { %v4761_v12 = vpack.c.bf16 %v17003_v47, %v17003_v47 }
0x13c1   :  { %15136 = vmatmul.mubr.msk.bf16.vlgmr.msra.gmra.mrb[136].mxu1 %vm190_vm0, %v4761_v12  ;;  %15144 = vmatmul.mubr.msk.bf16.vlgmr.msra.gmra.mrb[124].mxu0 %vm190_vm0, %v4761_v12 }
0x13c2   :  { %15148 = vmatpush3.bf16.msra.mxu1 %v16616_v57  ;;  %15151 = vmatprep.mubr.msk.bf16.mxu1 %vm17233_vm1, %v19724_v26 }
0x13c3   :  { %15149 = vmatprep.subr.bf16.mxu1 %v19724_v26  ;;  %15159 = vmatprep.mubr.msk.bf16.mxu0 %vm17233_vm1, %v19724_v26 }
0x13c4   :  { %15156 = vmatpush3.bf16.msra.mxu0 %v16622_v19 }
0x13c5   :  { %15157 = vmatprep.subr.bf16.mxu0 %v19724_v26 }
0x13c6   :  { %15150 = vmatpush3.bf16.msra.mxu1 %v16617_v50 }
0x13c7   :  { %15163 = vmatprep.subr.bf16.mxu1 %v19724_v26 }
0x13c8   :  { %15158 = vmatpush3.bf16.msra.mxu0 %v16623_v31 }
0x13c9   :  { %15152 = vmatmul.mubr.msk.bf16.vlgmr.msra.gmra.mrb[140].mxu1 %vm190_vm0, %v18392_v1  ;;  %15171 = vmatprep.subr.bf16.mxu0 %v19724_v26 }
0x13ca   :  { %15164 = vmatpush3.bf16.msra.mxu1 %v16618_v18  ;;  %15167 = vmatprep.mubr.msk.bf16.mxu1 %vm17233_vm1, %v19724_v26 }
0x13cb   :  { %15165 = vmatprep.subr.bf16.mxu1 %v19724_v26 }
0x13ce   :  { %15166 = vmatpush3.bf16.msra.mxu1 %v16619_v5  ;;  %v16626_v5 = vld [vmem:[%s17373_s3] sm:$0xff]  }
0x13cf   :  { %15179 = vmatprep.subr.bf16.mxu1 %v19724_v26 }
0x13d1   :  { %15168 = vmatmul.mubr.msk.bf16.vlgmr.msra.gmra.mrb[144].mxu1 %vm190_vm0, %v18214_v6 }
0x13d2   :  { %15180 = vmatpush3.bf16.msra.mxu1 %v16620_v51  ;;  %15183 = vmatprep.mubr.msk.bf16.mxu1 %vm17233_vm1, %v19724_v26 }
0x13d3   :  { %15181 = vmatprep.subr.bf16.mxu1 %v19724_v26 }
0x13d6   :  { %15182 = vmatpush3.bf16.msra.mxu1 %v16621_v53 }
0x13d7   :  { %15195 = vmatprep.subr.bf16.mxu1 %v19724_v26 }
0x13d9   :  { %15184 = vmatmul.mubr.msk.bf16.vlgmr.msra.gmra.mrb[148].mxu1 %vm190_vm0, %v18214_v6 }
0x13da   :  { %15199 = vmatprep.mubr.msk.bf16.mxu1 %vm17233_vm1, %v19724_v26 }
0x1494   :  { %v4816_v30 = vpop.f32.mrb[136].mxu1  ;;  %v4877_v44 = vpop.f32.mrb[124].mxu0 }
0x1495   :  { %v4817_v28 = vadd.f32 %v4816_v30, %v18177_v36  ;;  %v15137_v29 = vpop.f32.mrb[137].mxu1  ;;  %v15145_v0 = vpop.f32.mrb[125].mxu0 }
0x1496   :  { %v4819_v7 = vpop.f32.mrb[138].mxu1  ;;  %v4880_v9 = vpop.f32.mrb[126].mxu0 }
0x1497   :  { %17004 = vtanh.f32 %v4817_v28  ;;  %v15138_v46 = vpop.f32.mrb[139].mxu1  ;;  %v15146_v2 = vpop.f32.mrb[127].mxu0 }
0x149c   :  { %v4929_v61 = vpop.f32.mrb[140].mxu1 }
0x149d   :  { %v4930_v33 = vadd.f32 %v4929_v61, %v4877_v44  ;;  %v15153_v60 = vpop.f32.mrb[141].mxu1 }
0x149e   :  { %v4932_v41 = vpop.f32.mrb[142].mxu1 }
0x149f   :  { %v15154_v13 = vpop.f32.mrb[143].mxu1 }
0x14a0   :  { %v16628_v13 = vld [vmem:[%s17503_s19] sm:$0xff]  }
0x14a1   :  { %v17005_v17 = vpop.eup %17004  ;;  %15196 = vmatpush3.bf16.msra.mxu1 %v16628_v13 }
0x14a2   :  { %v4935_v59 = vpack.c.bf16 %v17005_v17, %v17005_v17  ;;  %v16629_v17 = vld [vmem:[%s17503_s19 + $0x10] sm:$0xff]   ;;  %15197 = vmatprep.subr.bf16.mxu1 %v19724_v26 }
0x14a4   :  { %15160 = vmatmul.mubr.msk.bf16.vlgmr.msra.gmra.mrb[128].mxu0 %vm190_vm0, %v4935_v59  ;;  %v5050_v23 = vpop.f32.mrb[144].mxu1 }
0x14a5   :  { %v5056_v36 = vadd.f32 %v5050_v23, %v17428_v14  ;;  %15172 = vmatpush3.bf16.msra.mxu0 %v16624_v24  ;;  %v15169_v55 = vpop.f32.mrb[145].mxu1  ;;  %15175 = vmatprep.mubr.msk.bf16.mxu0 %vm17233_vm1, %v19724_v26  ;;  %v16631_v24 = vld [vmem:[%s17503_s19 + $0x18] sm:$0xff]  }
0x14a6   :  { %v5053_v58 = vpop.f32.mrb[146].mxu1  ;;  %15173 = vmatprep.subr.bf16.mxu0 %v19724_v26 }
0x14a7   :  { %v13182_v48 = vmul.f32 -1.442695, %v5056_v36  ;;  %v15170_v37 = vpop.f32.mrb[147].mxu1 }
0x14a8   :  { %v16633_v37 = vld [vmem:[%s17515_s24] sm:$0xff]  }
0x14a9   :  { %17006 = vpow2.f32 %v13182_v48  ;;  %15174 = vmatpush3.bf16.msra.mxu0 %v16625_v54  ;;  %v16632_v48 = vld [vmem:[%s17503_s19 + $0x20] sm:$0xff]  }
0x14aa   :  { %15187 = vmatprep.subr.bf16.mxu0 %v19724_v26 }
0x14ac   :  { %15176 = vmatmul.mubr.msk.bf16.vlgmr.msra.gmra.mrb[132].mxu0 %vm190_vm0, %v18214_v6  ;;  %v5176_v14 = vpop.f32.mrb[148].mxu1  ;;  %v16627_v6 = vld [vmem:[%s17373_s3 + $0x8] sm:$0xff]  }
0x14ad   :  { %v15185_v32 = vpop.f32.mrb[149].mxu1  ;;  %15191 = vmatprep.mubr.msk.bf16.mxu0 %vm17233_vm1, %v19724_v26  ;;  %v5177_v57 = vadd.f32 %v5176_v14, %v18193_v52  ;;  %15188 = vmatpush3.bf16.msra.mxu0 %v16626_v5  ;;  %v16644_v5 = vld [vmem:[%s17726_s17] sm:$0xff]  }
0x14ae   :  { %v5179_v16 = vpop.f32.mrb[150].mxu1  ;;  %15189 = vmatprep.subr.bf16.mxu0 %v19724_v26  ;;  %v16634_v32 = vld [vmem:[%s17503_s19 + $0x28] sm:$0xff]  }
0x14af   :  { %v15186_v25 = vpop.f32.mrb[151].mxu1  ;;  %v16635_v16 = vld [vmem:[%s17515_s24 + $0x8] sm:$0xff]  }
0x14b0   :  { %v16637_v25 = vld [vmem:[%s17533_s28] sm:$0xff]  }
0x14b1   :  { %15190 = vmatpush3.bf16.msra.mxu0 %v16627_v6  ;;  %v16645_v6 = vld [vmem:[%s17726_s17 + $0x8] sm:$0xff]  }
0x14b2   :  { %15203 = vmatprep.subr.bf16.mxu0 %v19724_v26 }
0x14b3   :  { %v17007_v62 = vpop.eup %17006 }
0x14b4   :  { %v5060_v47 = vadd.f32 1.0, %v17007_v62  ;;  %v16638_v62 = vld [vmem:[%s17646_s7 + $0x8] sm:$0xff]  }
0x14b6   :  { %17008 = vrcp.f32 %v5060_v47  ;;  %v16639_v47 = vld [vmem:[%s17533_s28 + $0x8] sm:$0xff]  }
0x14c0   :  { %v17009_v12 = vpop.eup %17008 }
0x14c1   :  { %v5182_v50 = vmul.f32 %v17009_v12, %v5177_v57  ;;  %v16640_v57 = vld [vmem:[%s17646_s7 + $0x20] sm:$0xff]   ;;  %v16641_v12 = vld [vmem:[%s17646_s7 + $0x10] sm:$0xff]  }
0x14c3   :  { %v5183_v18 = vadd.f32 %v5182_v50, %v17465_v56  ;;  %v16642_v50 = vld [vmem:[%s17646_s7 + $0x28] sm:$0xff]  }
0x1577   :  { %v4989_v51 = vpop.f32.mrb[128].mxu0 }
0x1578   :  { %v4995_v53 = vadd.f32 %v4989_v51, %v4930_v33  ;;  %v15161_v19 = vpop.f32.mrb[129].mxu0 }
0x1579   :  { %v4992_v31 = vpop.f32.mrb[130].mxu0 }
0x157a   :  { %v4997_v30 = vadd.f32 %v18082_v34, %v4995_v53  ;;  %v15162_v52 = vpop.f32.mrb[131].mxu0 }
0x157c   :  { %4998 = vst [vmem:[%s18204_s30 + $0x8] sm:$0xff] %v4997_v30  ;;  %v18542_v30 = vld [vmem:[%s17743_s23] sm:$0xff] }
0x157f   :  { %v5113_v44 = vpop.f32.mrb[132].mxu0 }
0x1580   :  { %v5119_v28 = vadd.f32 %v5113_v44, %v17431_v15  ;;  %v15177_v56 = vpop.f32.mrb[133].mxu0 }
0x1581   :  { %v5116_v29 = vpop.f32.mrb[134].mxu0 }
0x1582   :  { %v13190_v0 = vmul.f32 -1.442695, %v5119_v28  ;;  %v15178_v7 = vpop.f32.mrb[135].mxu0 }
0x1584   :  { %17010 = vpow2.f32 %v13190_v0 }
0x158e   :  { %v17011_v9 = vpop.eup %17010 }
0x158f   :  { %v5123_v46 = vadd.f32 1.0, %v17011_v9 }
0x1591   :  { %17012 = vrcp.f32 %v5123_v46  ;;  %v18546_v46 = vld [vmem:[%s17743_s23 + $0x8] sm:$0xff] }
0x1592   :  { %17014 = vtanh.f32 %v5183_v18  ;;  %v16643_v18 = vld [vmem:[%s17646_s7 + $0x18] sm:$0xff]  }
0x159b   :  { %v17013_v2 = vpop.eup %17012 }
0x159c   :  { %v5185_v34 = vsub.f32 1.0, %v17013_v2  ;;  %v17015_v61 = vpop.eup %17014  ;;  %v5187_v33 = vmul.f32 %v17013_v2, %v18210_v3  ;;  %v16630_v3 = vld [vmem:[%s17503_s19 + $0x8] sm:$0xff]  }
0x159d   :  { %15198 = vmatpush3.bf16.msra.mxu1 %v16630_v3 }
0x159e   :  { %v5186_v60 = vmul.f32 %v17015_v61, %v5185_v34  ;;  %15211 = vmatprep.subr.bf16.mxu1 %v19724_v26 }
0x15a0   :  { %v18464_v15 = vadd.f32 %v5187_v33, %v5186_v60 }
0x15a2   :  { %v18468_v41 = vpack.c.bf16 %v18464_v15, %v18464_v15 }
0x15a4   :  { %15192 = vmatmul.mubr.msk.bf16.vlgmr.msra.gmra.mrb[136].mxu0 %vm190_vm0, %v18468_v41 }
0x15a5   :  { %15207 = vmatprep.mubr.msk.bf16.mxu0 %vm17233_vm1, %v19724_v26  ;;  %15204 = vmatpush3.bf16.msra.mxu0 %v16629_v17 }
0x15a6   :  { %15205 = vmatprep.subr.bf16.mxu0 %v19724_v26 }
0x15a9   :  { %15206 = vmatpush3.bf16.msra.mxu0 %v16631_v24 }
0x15aa   :  { %15219 = vmatprep.subr.bf16.mxu0 %v19724_v26 }
0x1677   :  { %v5244_v59 = vpop.f32.mrb[136].mxu0 }
0x1678   :  { %v5245_v23 = vadd.f32 %v5244_v59, %v18229_v43  ;;  %v15193_v36 = vpop.f32.mrb[137].mxu0  ;;  %v16636_v43 = vld [vmem:[%s17646_s7] sm:$0xff]   ;;  %v18550_v59 = vld [vmem:[%s17743_s23 + $0x10] sm:$0xff] }
0x1679   :  { %v5247_v55 = vpop.f32.mrb[138].mxu0 }
0x167a   :  { %17016 = vtanh.f32 %v5245_v23  ;;  %v15194_v54 = vpop.f32.mrb[139].mxu0 }
0x1684   :  { %v17017_v58 = vpop.eup %17016 }
0x1685   :  { %v5251_v14 = vpack.c.bf16 %v17017_v58, %v17017_v58  ;;  %v3851_v58 = vadd.f32 %v18550_v59, %v18288_v27  ;;  %v16646_v27 = vld [vmem:[%s17776_s29] sm:$0xff]  }
0x1687   :  { %15200 = vmatmul.mubr.msk.bf16.vlgmr.msra.gmra.mrb[152].mxu1 %vm190_vm0, %v5251_v14  ;;  %15208 = vmatmul.mubr.msk.bf16.vlgmr.msra.gmra.mrb[140].mxu0 %vm190_vm0, %v5251_v14 }
0x1688   :  { %15212 = vmatpush3.bf16.msra.mxu1 %v16632_v48  ;;  %15220 = vmatpush3.bf16.msra.mxu0 %v16633_v37 }
0x1689   :  { %15213 = vmatprep.subr.bf16.mxu1 %v19724_v26  ;;  %15221 = vmatprep.subr.bf16.mxu0 %v19724_v26 }
0x168a   :  { %15215 = vmatprep.mubr.msk.bf16.mxu1 %vm17233_vm1, %v19724_v26  ;;  %15223 = vmatprep.mubr.msk.bf16.mxu0 %vm17233_vm1, %v19724_v26 }
0x168c   :  { %15214 = vmatpush3.bf16.msra.mxu1 %v16634_v32  ;;  %15222 = vmatpush3.bf16.msra.mxu0 %v16635_v16 }
0x168d   :  { %15235 = vmatprep.subr.bf16.mxu1 %v19724_v26  ;;  %15227 = vmatprep.subr.bf16.mxu0 %v19724_v26 }
0x168f   :  { %15216 = vmatmul.mubr.msk.bf16.vlgmr.msra.gmra.mrb[156].mxu1 %vm190_vm0, %v5251_v14  ;;  %15224 = vmatmul.mubr.msk.bf16.vlgmr.msra.gmra.mrb[144].mxu0 %vm190_vm0, %v5251_v14 }
0x1690   :  { %15236 = vmatpush3.bf16.msra.mxu1 %v16636_v43  ;;  %15228 = vmatpush3.bf16.msra.mxu0 %v16637_v25 }
0x1691   :  { %15237 = vmatprep.subr.bf16.mxu1 %v19724_v26  ;;  %15229 = vmatprep.subr.bf16.mxu0 %v19724_v26 }
0x1692   :  { %15239 = vmatprep.mubr.msk.bf16.mxu1 %vm17233_vm1, %v19724_v26  ;;  %15231 = vmatprep.mubr.msk.bf16.mxu0 %vm17233_vm1, %v19724_v26 }
0x1694   :  { %15238 = vmatpush3.bf16.msra.mxu1 %v16638_v62  ;;  %15230 = vmatpush3.bf16.msra.mxu0 %v16639_v47  ;;  %v16647_v47 = vld [vmem:[%s17776_s29 + $0x10] sm:$0xff]  }
0x1695   :  { %15251 = vmatprep.subr.bf16.mxu1 %v19724_v26  ;;  %15243 = vmatprep.subr.bf16.mxu0 %v19724_v26 }
0x1697   :  { %15240 = vmatmul.mubr.msk.bf16.vlgmr.msra.gmra.mrb[108].mxu1 %vm190_vm0, %v18303_v45 }
0x1698   :  { %15252 = vmatpush3.bf16.msra.mxu1 %v16640_v57  ;;  %15255 = vmatprep.mubr.msk.bf16.mxu1 %vm17233_vm1, %v19724_v26  ;;  %v16649_v57 = vld [vmem:[%s17776_s29 + $0x18] sm:$0xff]  }
0x1699   :  { %15253 = vmatprep.subr.bf16.mxu1 %v19724_v26 }
0x169b   :  { %15232 = vmatmul.mubr.msk.bf16.vlgmr.msra.gmra.mrb[144].mxu0 %vm190_vm0, %v18468_v41 }
0x169c   :  { %15244 = vmatpush3.bf16.msra.mxu0 %v16641_v12  ;;  %15254 = vmatpush3.bf16.msra.mxu1 %v16642_v50 }
0x169d   :  { %15245 = vmatprep.subr.bf16.mxu0 %v19724_v26  ;;  %15247 = vmatprep.mubr.msk.bf16.mxu0 %vm17233_vm1, %v19724_v26 }
0x169e   :  { %15259 = vmatprep.subr.bf16.mxu1 %v19724_v26 }
0x169f   :  { %15256 = vmatmul.mubr.msk.bf16.vlgmr.msra.gmra.mrb[160].mxu1 %vm190_vm0, %v18303_v45 }
0x16a0   :  { %15246 = vmatpush3.bf16.msra.mxu0 %v16643_v18  ;;  %15263 = vmatprep.mubr.msk.bf16.mxu1 %vm17233_vm1, %v19724_v26 }
0x16a1   :  { %15267 = vmatprep.subr.bf16.mxu0 %v19724_v26  ;;  %15260 = vmatpush3.bf16.msra.mxu1 %v16644_v5 }
0x16a2   :  { %15261 = vmatprep.subr.bf16.mxu1 %v19724_v26 }
0x16a3   :  { %15248 = vmatmul.mubr.msk.bf16.vlgmr.msra.gmra.mrb[108].mxu0 %vm190_vm0, %v18303_v45 }
0x16a4   :  { %15271 = vmatprep.mubr.msk.bf16.mxu0 %vm17233_vm1, %v19724_v26  ;;  %15268 = vmatpush3.bf16.msra.mxu0 %v16646_v27  ;;  %v18640_v27 = vld [vmem:[%s18079_s14 + $0x8] sm:$0xff] }
0x16a5   :  { %15262 = vmatpush3.bf16.msra.mxu1 %v16645_v6  ;;  %15269 = vmatprep.subr.bf16.mxu0 %v19724_v26 }
0x16a6   :  { %15275 = vmatprep.subr.bf16.mxu1 %v19724_v26 }
0x1762   :  { %v18539_v51 = vpop.f32.mrb[156].mxu1 }
0x1763   :  { %v15217_v53 = vpop.f32.mrb[157].mxu1 }
0x1764   :  { %v5423_v19 = vpop.f32.mrb[158].mxu1 }
0x1765   :  { %v15218_v31 = vpop.f32.mrb[159].mxu1  ;;  %v16650_v19 = vld [vmem:[%s17776_s29 + $0x20] sm:$0xff]  }
0x1766   :  { %v16651_v31 = vld [vmem:[%s18006_s22 + $0x10] sm:$0xff]  }
0x176a   :  { %v5589_v45 = vpop.f32.mrb[108].mxu1 }
0x176b   :  { %v16205_v52 = vadd.f32 %v5589_v45, %v18542_v30  ;;  %v15241_v44 = vpop.f32.mrb[109].mxu1 }
0x176c   :  { %v5592_v28 = vpop.f32.mrb[110].mxu1  ;;  %v16653_v44 = vld [vmem:[%s18006_s22 + $0x18] sm:$0xff]  }
0x176d   :  { %v13230_v56 = vmul.f32 -1.442695, %v16205_v52  ;;  %v15242_v29 = vpop.f32.mrb[111].mxu1  ;;  %v16652_v52 = vld [vmem:[%s17776_s29 + $0x28] sm:$0xff]   ;;  %v16655_v28 = vld [vmem:[%s18006_s22 + $0x20] sm:$0xff]  }
0x176e   :  { %v16657_v29 = vld [vmem:[%s18006_s22 + $0x28] sm:$0xff]  }
0x176f   :  { %17018 = vpow2.f32 %v13230_v56  ;;  %v16656_v56 = vld [vmem:[%s17788_s5 + $0x8] sm:$0xff]  }
0x1772   :  { %v5715_v0 = vpop.f32.mrb[160].mxu1 }
0x1773   :  { %v15257_v7 = vpop.f32.mrb[161].mxu1  ;;  %v5716_v36 = vadd.f32 %v18293_v38, %v5715_v0  ;;  %v16658_v0 = vld [vmem:[%s17806_s10] sm:$0xff]  }
0x1774   :  { %v5718_v9 = vpop.f32.mrb[162].mxu1  ;;  %v16659_v7 = vld [vmem:[%s17806_s10 + $0x8] sm:$0xff]  }
0x1775   :  { %v15258_v2 = vpop.f32.mrb[163].mxu1  ;;  %v16660_v9 = vld [vmem:[%s18006_s22] sm:$0xff]  }
0x1776   :  { %v5652_v34 = vpop.f32.mrb[108].mxu0  ;;  %v16661_v2 = vld [vmem:[%s18006_s22 + $0x8] sm:$0xff]  }
0x1777   :  { %v16206_v61 = vadd.f32 %v18546_v46, %v5652_v34  ;;  %v15249_v33 = vpop.f32.mrb[109].mxu0  ;;  %v16662_v34 = vld [vmem:[%s18068_s8] sm:$0xff]  }
0x1778   :  { %v5655_v60 = vpop.f32.mrb[110].mxu0 }
0x1779   :  { %v17019_v13 = vpop.eup %17018  ;;  %v13238_v17 = vmul.f32 -1.442695, %v16206_v61  ;;  %v15250_v3 = vpop.f32.mrb[111].mxu0  ;;  %v16663_v61 = vld [vmem:[%s18068_s8 + $0x8] sm:$0xff]  }
0x177a   :  { %v5599_v24 = vadd.f32 1.0, %v17019_v13 }
0x177b   :  { %17020 = vpow2.f32 %v13238_v17 }
0x177c   :  { %17022 = vrcp.f32 %v5599_v24 }
0x1785   :  { %v17021_v23 = vpop.eup %17020 }
0x1786   :  { %v17023_v55 = vpop.eup %17022  ;;  %v5662_v54 = vadd.f32 1.0, %v17021_v23 }
0x1787   :  { %v5721_v48 = vmul.f32 %v17023_v55, %v5716_v36 }
0x1788   :  { %17024 = vrcp.f32 %v5662_v54 }
0x1789   :  { %v5722_v37 = vadd.f32 %v5721_v48, %v3851_v58 }
0x178b   :  { %17026 = vtanh.f32 %v5722_v37 }
0x1792   :  { %v17025_v14 = vpop.eup %17024 }
0x1793   :  { %v5724_v32 = vsub.f32 1.0, %v17025_v14  ;;  %v5726_v43 = vmul.f32 %v17025_v14, %v18299_v39  ;;  %v16648_v39 = vld [vmem:[%s17776_s29 + $0x8] sm:$0xff]  }
0x1794   :  { %15270 = vmatpush3.bf16.msra.mxu0 %v16648_v39 }
0x1795   :  { %v17027_v16 = vpop.eup %17026  ;;  %15283 = vmatprep.subr.bf16.mxu0 %v19724_v26 }
0x1796   :  { %v5725_v25 = vmul.f32 %v17027_v16, %v5724_v32 }
0x1798   :  { %v18556_v38 = vadd.f32 %v5726_v43, %v5725_v25  ;;  %v18637_v43 = vld [vmem:[%s18079_s14] sm:$0xff] }
0x179a   :  { %v18560_v62 = vpack.c.bf16 %v18556_v38, %v18556_v38 }
0x179c   :  { %15264 = vmatmul.mubr.msk.bf16.vlgmr.msra.gmra.mrb[164].mxu1 %vm190_vm0, %v18560_v62 }
0x179d   :  { %15279 = vmatprep.mubr.msk.bf16.mxu1 %vm17233_vm1, %v19724_v26  ;;  %15276 = vmatpush3.bf16.msra.mxu1 %v16647_v47 }
0x179e   :  { %15277 = vmatprep.subr.bf16.mxu1 %v19724_v26 }
0x17a1   :  { %15278 = vmatpush3.bf16.msra.mxu1 %v16649_v57 }
0x17a2   :  { %15315 = vmatprep.subr.bf16.mxu1 %v19724_v26 }
0x186f   :  { %v5783_v12 = vpop.f32.mrb[164].mxu1 }
0x1870   :  { %v5784_v50 = vadd.f32 %v5783_v12, %v18318_v4  ;;  %v15265_v18 = vpop.f32.mrb[165].mxu1  ;;  %v16654_v4 = vld [vmem:[%s17788_s5] sm:$0xff]  }
0x1871   :  { %v5786_v5 = vpop.f32.mrb[166].mxu1 }
0x1872   :  { %17028 = vtanh.f32 %v5784_v50  ;;  %v15266_v6 = vpop.f32.mrb[167].mxu1 }
0x187c   :  { %v17029_v53 = vpop.eup %17028 }
0x187d   :  { %v5790_v45 = vpack.c.bf16 %v17029_v53, %v17029_v53 }
0x187f   :  { %15272 = vmatmul.mubr.msk.bf16.vlgmr.msra.gmra.mrb[148].mxu0 %vm190_vm0, %v5790_v45  ;;  %15280 = vmatmul.mubr.msk.bf16.vlgmr.msra.gmra.mrb[168].mxu1 %vm190_vm0, %v5790_v45 }
0x1880   :  { %15284 = vmatpush3.bf16.msra.mxu0 %v16650_v19  ;;  %15316 = vmatpush3.bf16.msra.mxu1 %v16651_v31  ;;  %v18645_v19 = vld [vmem:[%s18079_s14 + $0x18] sm:$0xff] }
0x1881   :  { %15285 = vmatprep.subr.bf16.mxu0 %v19724_v26  ;;  %15317 = vmatprep.subr.bf16.mxu1 %v19724_v26 }
0x1882   :  { %15287 = vmatprep.mubr.msk.bf16.mxu0 %vm17233_vm1, %v19724_v26  ;;  %15319 = vmatprep.mubr.msk.bf16.mxu1 %vm17233_vm1, %v19724_v26 }
0x1884   :  { %15286 = vmatpush3.bf16.msra.mxu0 %v16652_v52  ;;  %15318 = vmatpush3.bf16.msra.mxu1 %v16653_v44 }
0x1885   :  { %15291 = vmatprep.subr.bf16.mxu0 %v19724_v26  ;;  %15323 = vmatprep.subr.bf16.mxu1 %v19724_v26 }
0x1887   :  { %15288 = vmatmul.mubr.msk.bf16.vlgmr.msra.gmra.mrb[152].mxu0 %vm190_vm0, %v5790_v45  ;;  %15320 = vmatmul.mubr.msk.bf16.vlgmr.msra.gmra.mrb[124].mxu1 %vm190_vm0, %v18392_v1 }
0x1888   :  { %15292 = vmatpush3.bf16.msra.mxu0 %v16654_v4  ;;  %15324 = vmatpush3.bf16.msra.mxu1 %v16655_v28 }
0x1889   :  { %15293 = vmatprep.subr.bf16.mxu0 %v19724_v26  ;;  %15325 = vmatprep.subr.bf16.mxu1 %v19724_v26 }
0x188a   :  { %15295 = vmatprep.mubr.msk.bf16.mxu0 %vm17233_vm1, %v19724_v26  ;;  %15327 = vmatprep.mubr.msk.bf16.mxu1 %vm17233_vm1, %v19724_v26 }
0x188c   :  { %15294 = vmatpush3.bf16.msra.mxu0 %v16656_v56  ;;  %15326 = vmatpush3.bf16.msra.mxu1 %v16657_v29 }
0x188d   :  { %15299 = vmatprep.subr.bf16.mxu0 %v19724_v26  ;;  %15331 = vmatprep.subr.bf16.mxu1 %v19724_v26 }
0x188f   :  { %15296 = vmatmul.mubr.msk.bf16.vlgmr.msra.gmra.mrb[112].mxu0 %vm190_vm0, %v18560_v62  ;;  %15328 = vmatmul.mubr.msk.bf16.vlgmr.msra.gmra.mrb[172].mxu1 %vm190_vm0, %v18392_v1 }
0x1890   :  { %15300 = vmatpush3.bf16.msra.mxu0 %v16658_v0  ;;  %15303 = vmatprep.mubr.msk.bf16.mxu0 %vm17233_vm1, %v19724_v26 }
0x1891   :  { %15301 = vmatprep.subr.bf16.mxu0 %v19724_v26  ;;  %15335 = vmatprep.mubr.msk.bf16.mxu1 %vm17233_vm1, %v19724_v26 }
0x1892   :  { %15332 = vmatpush3.bf16.msra.mxu1 %v16662_v34 }
0x1893   :  { %15333 = vmatprep.subr.bf16.mxu1 %v19724_v26 }
0x1894   :  { %15302 = vmatpush3.bf16.msra.mxu0 %v16659_v7 }
0x1895   :  { %15307 = vmatprep.subr.bf16.mxu0 %v19724_v26 }
0x1896   :  { %15334 = vmatpush3.bf16.msra.mxu1 %v16663_v61 }
0x1897   :  { %15339 = vmatprep.subr.bf16.mxu1 %v19724_v26 }
0x189b   :  { %15304 = vmatmul.mubr.msk.bf16.vlgmr.msra.gmra.mrb[112].mxu0 %vm190_vm0, %v5790_v45  ;;  %v18648_v45 = vld [vmem:[%s18079_s14 + $0x10] sm:$0xff] }
0x189c   :  { %15308 = vmatpush3.bf16.msra.mxu0 %v16660_v9  ;;  %15311 = vmatprep.mubr.msk.bf16.mxu0 %vm17233_vm1, %v19724_v26  ;;  %v4390_v4 = vadd.f32 %v18648_v45, %v18377_v42  ;;  %v16664_v42 = vld [vmem:[%s18103_s25] sm:$0xff]  }
0x189d   :  { %15309 = vmatprep.subr.bf16.mxu0 %v19724_v26 }
0x18a0   :  { %15310 = vmatpush3.bf16.msra.mxu0 %v16661_v2 }
0x18a1   :  { %15347 = vmatprep.subr.bf16.mxu0 %v19724_v26 }
0x18a3   :  { %15312 = vmatmul.mubr.msk.bf16.vlgmr.msra.gmra.mrb[116].mxu0 %vm190_vm0, %v18392_v1 }
0x18a4   :  { %15351 = vmatprep.mubr.msk.bf16.mxu0 %vm17233_vm1, %v19724_v26 }
0x195a   :  { %v18631_v33 = vpop.f32.mrb[152].mxu0  ;;  %v6193_v60 = vpop.f32.mrb[124].mxu1 }
0x195b   :  { %v15289_v13 = vpop.f32.mrb[153].mxu0  ;;  %v15321_v17 = vpop.f32.mrb[125].mxu1  ;;  %v16208_v18 = vadd.f32 %v18640_v27, %v6193_v60  ;;  %v16665_v60 = vld [vmem:[%s18108_s1] sm:$0xff]  }
0x195c   :  { %v5962_v3 = vpop.f32.mrb[154].mxu0  ;;  %v6196_v1 = vpop.f32.mrb[126].mxu1  ;;  %15348 = vmatpush3.bf16.msra.mxu0 %v16665_v60  ;;  %v16667_v13 = vld [vmem:[%s18108_s1 + $0x8] sm:$0xff]   ;;  %v18673_v17 = vld [vmem:[%s18126_s20] sm:$0xff] }
0x195d   :  { %v15290_v24 = vpop.f32.mrb[155].mxu0  ;;  %v15322_v23 = vpop.f32.mrb[127].mxu1  ;;  %15349 = vmatprep.subr.bf16.mxu0 %v19724_v26 }
0x1960   :  { %15350 = vmatpush3.bf16.msra.mxu0 %v16667_v13 }
0x1961   :  { %15355 = vmatprep.subr.bf16.mxu0 %v19724_v26 }
0x1962   :  { %v6256_v36 = vpop.f32.mrb[172].mxu1 }
0x1963   :  { %v15329_v55 = vpop.f32.mrb[173].mxu1  ;;  %v6257_v52 = vadd.f32 %v18645_v19, %v6256_v36 }
0x1964   :  { %v6259_v54 = vpop.f32.mrb[174].mxu1 }
0x1965   :  { %v15330_v58 = vpop.f32.mrb[175].mxu1  ;;  %v16668_v54 = vld [vmem:[%s17295_s21] sm:$0xff]  }
0x1966   :  { %v16670_v58 = vld [vmem:[%s18115_s12] sm:$0xff]  }
0x196e   :  { %v6072_v48 = vpop.f32.mrb[112].mxu0 }
0x196f   :  { %v18634_v37 = vadd.f32 %v6072_v48, %v17455_v35  ;;  %v15305_v14 = vpop.f32.mrb[113].mxu0  ;;  %v13286_v35 = vmul.f32 -1.442695, %v16208_v18 }
0x1970   :  { %v6075_v32 = vpop.f32.mrb[114].mxu0  ;;  %v16669_v14 = vld [vmem:[%s17295_s21 + $0x8] sm:$0xff]  }
0x1971   :  { %v15306_v16 = vpop.f32.mrb[115].mxu0  ;;  %v16671_v32 = vld [vmem:[%s18115_s12 + $0x8] sm:$0xff]  }
0x1972   :  { %v16672_v16 = vld [vmem:[%s17295_s21 + $0x10] sm:$0xff]  }
0x1976   :  { %v6130_v25 = vpop.f32.mrb[116].mxu0 }
0x1977   :  { %v16207_v47 = vadd.f32 %v6130_v25, %v18637_v43  ;;  %v15313_v39 = vpop.f32.mrb[117].mxu0  ;;  %v16673_v25 = vld [vmem:[%s17295_s21 + $0x18] sm:$0xff]  }
0x1978   :  { %v6133_v57 = vpop.f32.mrb[118].mxu0  ;;  %v16675_v39 = vld [vmem:[%s17295_s21 + $0x28] sm:$0xff]  }
0x1979   :  { %v13278_v12 = vmul.f32 -1.442695, %v16207_v47  ;;  %v15314_v50 = vpop.f32.mrb[119].mxu0  ;;  %v16674_v47 = vld [vmem:[%s17295_s21 + $0x20] sm:$0xff]  }
0x197a   :  { %v16676_v57 = vld [vmem:[%s18165_s4] sm:$0xff]  }
0x197b   :  { %17030 = vpow2.f32 %v13278_v12  ;;  %v16677_v12 = vld [vmem:[%s18165_s4 + $0x8] sm:$0xff]   ;;  %v18719_v50 = vld [vmem:[%s18174_s11] sm:$0xff] }
0x197c   :  { %17032 = vpow2.f32 %v13286_v35 }
0x1985   :  { %v17031_v5 = vpop.eup %17030 }
0x1986   :  { %v6140_v6 = vadd.f32 1.0, %v17031_v5  ;;  %v17033_v53 = vpop.eup %17032 }
0x1987   :  { %v6203_v31 = vadd.f32 1.0, %v17033_v53 }
0x1988   :  { %17034 = vrcp.f32 %v6140_v6 }
0x1989   :  { %17036 = vrcp.f32 %v6203_v31 }
0x1992   :  { %v17035_v44 = vpop.eup %17034 }
0x1993   :  { %v6262_v28 = vmul.f32 %v17035_v44, %v6257_v52  ;;  %v17037_v29 = vpop.eup %17036 }
0x1994   :  { %v6265_v0 = vsub.f32 1.0, %v17037_v29  ;;  %v6267_v9 = vmul.f32 %v17037_v29, %v18388_v49  ;;  %v16666_v49 = vld [vmem:[%s18103_s25 + $0x8] sm:$0xff]   ;;  %v16678_v29 = vld [vmem:[%s17373_s3] sm:$0xff]  }
0x1995   :  { %v6263_v56 = vadd.f32 %v6262_v28, %v4390_v4 }
0x1997   :  { %17038 = vtanh.f32 %v6263_v56 }
0x19a1   :  { %v17039_v7 = vpop.eup %17038 }
0x19a2   :  { %v6266_v2 = vmul.f32 %v17039_v7, %v6265_v0 }
0x19a4   :  { %v18654_v34 = vadd.f32 %v6267_v9, %v6266_v2 }
0x19a6   :  { %v18658_v61 = vpack.c.bf16 %v18654_v34, %v18654_v34 }
0x19a8   :  { %15336 = vmatmul.mubr.msk.bf16.vlgmr.msra.gmra.mrb[176].mxu1 %vm190_vm0, %v18658_v61 }
0x19a9   :  { %15343 = vmatprep.mubr.msk.bf16.mxu1 %vm17233_vm1, %v19724_v26  ;;  %15340 = vmatpush3.bf16.msra.mxu1 %v16664_v42  ;;  %v16679_v42 = vld [vmem:[%s17373_s3 + $0x8] sm:$0xff]  }
0x19aa   :  { %15341 = vmatprep.subr.bf16.mxu1 %v19724_v26 }
0x19ad   :  { %15342 = vmatpush3.bf16.msra.mxu1 %v16666_v49 }
0x19ae   :  { %15371 = vmatprep.subr.bf16.mxu1 %v19724_v26 }
0x1a7b   :  { %v6324_v3 = vpop.f32.mrb[176].mxu1 }
0x1a7c   :  { %v6325_v1 = vadd.f32 %v6324_v3, %v18673_v17  ;;  %v15337_v24 = vpop.f32.mrb[177].mxu1 }
0x1a7d   :  { %v6327_v23 = vpop.f32.mrb[178].mxu1 }
0x1a7e   :  { %17040 = vtanh.f32 %v6325_v1  ;;  %v15338_v36 = vpop.f32.mrb[179].mxu1 }
0x1a88   :  { %v17041_v55 = vpop.eup %17040 }
0x1a89   :  { %v6331_v48 = vpack.c.bf16 %v17041_v55, %v17041_v55  ;;  %v18732_v55 = vld [vmem:[%s17483_s15] sm:$0xff] }
0x1a8b   :  { %15344 = vmatmul.mubr.msk.bf16.vlgmr.msra.gmra.mrb[180].mxu1 %vm190_vm0, %v6331_v48  ;;  %15352 = vmatmul.mubr.msk.bf16.vlgmr.msra.gmra.mrb[156].mxu0 %vm190_vm0, %v6331_v48 }
0x1a8c   :  { %15372 = vmatpush3.bf16.msra.mxu1 %v16668_v54  ;;  %15356 = vmatpush3.bf16.msra.mxu0 %v16670_v58 }
0x1a8d   :  { %15373 = vmatprep.subr.bf16.mxu1 %v19724_v26  ;;  %15375 = vmatprep.mubr.msk.bf16.mxu1 %vm17233_vm1, %v19724_v26 }
0x1a8e   :  { %15357 = vmatprep.subr.bf16.mxu0 %v19724_v26  ;;  %15359 = vmatprep.mubr.msk.bf16.mxu0 %vm17233_vm1, %v19724_v26 }
0x1a90   :  { %15374 = vmatpush3.bf16.msra.mxu1 %v16669_v14  ;;  %15358 = vmatpush3.bf16.msra.mxu0 %v16671_v32 }
0x1a91   :  { %15379 = vmatprep.subr.bf16.mxu1 %v19724_v26  ;;  %15363 = vmatprep.subr.bf16.mxu0 %v19724_v26 }
0x1a93   :  { %15376 = vmatmul.mubr.msk.bf16.vlgmr.msra.gmra.mrb[184].mxu1 %vm190_vm0, %v18468_v41 }
0x1a94   :  { %15380 = vmatpush3.bf16.msra.mxu1 %v16672_v16  ;;  %15383 = vmatprep.mubr.msk.bf16.mxu1 %vm17233_vm1, %v19724_v26 }
0x1a95   :  { %15381 = vmatprep.subr.bf16.mxu1 %v19724_v26 }
0x1a97   :  { %15360 = vmatmul.mubr.msk.bf16.vlgmr.msra.gmra.mrb[156].mxu0 %vm190_vm0, %v18658_v61 }
0x1a98   :  { %15382 = vmatpush3.bf16.msra.mxu1 %v16673_v25  ;;  %15367 = vmatprep.mubr.msk.bf16.mxu0 %vm17233_vm1, %v19724_v26 }
0x1a99   :  { %15387 = vmatprep.subr.bf16.mxu1 %v19724_v26  ;;  %15364 = vmatpush3.bf16.msra.mxu0 %v16676_v57 }
0x1a9a   :  { %15365 = vmatprep.subr.bf16.mxu0 %v19724_v26 }
0x1a9b   :  { %15384 = vmatmul.mubr.msk.bf16.vlgmr.msra.gmra.mrb[188].mxu1 %vm190_vm0, %v18468_v41 }
0x1a9c   :  { %15388 = vmatpush3.bf16.msra.mxu1 %v16674_v47  ;;  %15391 = vmatprep.mubr.msk.bf16.mxu1 %vm17233_vm1, %v19724_v26 }
0x1a9d   :  { %15389 = vmatprep.subr.bf16.mxu1 %v19724_v26  ;;  %15366 = vmatpush3.bf16.msra.mxu0 %v16677_v12 }
0x1a9e   :  { %15395 = vmatprep.subr.bf16.mxu0 %v19724_v26 }
0x1aa0   :  { %15390 = vmatpush3.bf16.msra.mxu1 %v16675_v39 }
0x1aa1   :  { %15403 = vmatprep.subr.bf16.mxu1 %v19724_v26 }
0x1aa3   :  { %15392 = vmatmul.mubr.msk.bf16.vlgmr.msra.gmra.mrb[192].mxu1 %vm190_vm0, %v18468_v41 }
0x1aa4   :  { %15407 = vmatprep.mubr.msk.bf16.mxu1 %vm17233_vm1, %v19724_v26 }
0x1b5e   :  { %v6386_v18 = vpop.f32.mrb[180].mxu1 }
0x1b5f   :  { %v6387_v35 = vadd.f32 %v6386_v18, %v18719_v50  ;;  %v15345_v5 = vpop.f32.mrb[181].mxu1 }
0x1b60   :  { %v6389_v6 = vpop.f32.mrb[182].mxu1  ;;  %v16683_v5 = vld [vmem:[%s17503_s19 + $0x18] sm:$0xff]  }
0x1b61   :  { %17042 = vtanh.f32 %v6387_v35  ;;  %v15346_v41 = vpop.f32.mrb[183].mxu1  ;;  %v16681_v35 = vld [vmem:[%s17503_s19 + $0x10] sm:$0xff]  }
0x1b66   :  { %v6620_v53 = vpop.f32.mrb[184].mxu1 }
0x1b67   :  { %v6626_v31 = vadd.f32 %v6620_v53, %v17440_v20  ;;  %v15377_v52 = vpop.f32.mrb[185].mxu1 }
0x1b68   :  { %v6623_v44 = vpop.f32.mrb[186].mxu1 }
0x1b69   :  { %v13312_v4 = vmul.f32 -1.442695, %v6626_v31  ;;  %v15378_v28 = vpop.f32.mrb[187].mxu1  ;;  %v18758_v44 = vld [vmem:[%s17538_s2] sm:$0xff] }
0x1b6b   :  { %v17043_v56 = vpop.eup %17042  ;;  %17044 = vpow2.f32 %v13312_v4 }
0x1b6c   :  { %v6505_v0 = vpack.c.bf16 %v17043_v56, %v17043_v56 }
0x1b6e   :  { %15368 = vmatmul.mubr.msk.bf16.vlgmr.msra.gmra.mrb[156].mxu0 %vm190_vm0, %v6505_v0  ;;  %v6683_v7 = vpop.f32.mrb[188].mxu1 }
0x1b6f   :  { %v6689_v9 = vadd.f32 %v6683_v7, %v17443_v21  ;;  %v15385_v2 = vpop.f32.mrb[189].mxu1  ;;  %15396 = vmatpush3.bf16.msra.mxu0 %v16678_v29  ;;  %15399 = vmatprep.mubr.msk.bf16.mxu0 %vm17233_vm1, %v19724_v26 }
0x1b70   :  { %v6686_v20 = vpop.f32.mrb[190].mxu1  ;;  %15397 = vmatprep.subr.bf16.mxu0 %v19724_v26 }
0x1b71   :  { %v13320_v60 = vmul.f32 -1.442695, %v6689_v9  ;;  %v15386_v49 = vpop.f32.mrb[191].mxu1  ;;  %v16684_v9 = vld [vmem:[%s17503_s19 + $0x20] sm:$0xff]   ;;  %v16687_v20 = vld [vmem:[%s17515_s24 + $0x8] sm:$0xff]  }
0x1b72   :  { %v16689_v49 = vld [vmem:[%s17533_s28] sm:$0xff]  }
0x1b73   :  { %17046 = vpow2.f32 %v13320_v60  ;;  %15398 = vmatpush3.bf16.msra.mxu0 %v16679_v42  ;;  %v16686_v42 = vld [vmem:[%s17503_s19 + $0x28] sm:$0xff]   ;;  %v16688_v60 = vld [vmem:[%s17646_s7] sm:$0xff]  }
0x1b74   :  { %15411 = vmatprep.subr.bf16.mxu0 %v19724_v26 }
0x1b75   :  { %v17045_v13 = vpop.eup %17044 }
0x1b76   :  { %v6630_v3 = vadd.f32 1.0, %v17045_v13  ;;  %v6746_v1 = vpop.f32.mrb[192].mxu1  ;;  %v16690_v13 = vld [vmem:[%s17646_s7 + $0x8] sm:$0xff]  }
0x1b77   :  { %v15393_v21 = vpop.f32.mrb[193].mxu1  ;;  %v6747_v58 = vadd.f32 %v6746_v1, %v18732_v55  ;;  %v16692_v1 = vld [vmem:[%s17646_s7 + $0x20] sm:$0xff]  }
0x1b78   :  { %17048 = vrcp.f32 %v6630_v3  ;;  %v6749_v24 = vpop.f32.mrb[194].mxu1  ;;  %v16691_v3 = vld [vmem:[%s17533_s28 + $0x8] sm:$0xff]   ;;  %v16693_v21 = vld [vmem:[%s17646_s7 + $0x10] sm:$0xff]  }
0x1b79   :  { %v15394_v23 = vpop.f32.mrb[195].mxu1  ;;  %v16694_v24 = vld [vmem:[%s17646_s7 + $0x28] sm:$0xff]  }
0x1b7a   :  { %v16695_v23 = vld [vmem:[%s17646_s7 + $0x18] sm:$0xff]  }
0x1b7d   :  { %v17047_v36 = vpop.eup %17046 }
0x1b7e   :  { %v6693_v54 = vadd.f32 1.0, %v17047_v36  ;;  %v16696_v36 = vld [vmem:[%s17726_s17] sm:$0xff]  }
0x1b80   :  { %17050 = vrcp.f32 %v6693_v54  ;;  %v16697_v54 = vld [vmem:[%s17726_s17 + $0x8] sm:$0xff]  }
0x1b82   :  { %v17049_v48 = vpop.eup %17048 }
0x1b83   :  { %v6752_v14 = vmul.f32 %v17049_v48, %v6747_v58 }
0x1b85   :  { %v6753_v32 = vadd.f32 %v6752_v14, %v17473_v8  ;;  %v16680_v8 = vld [vmem:[%s17503_s19] sm:$0xff]  }
0x1b86   :  { %15404 = vmatpush3.bf16.msra.mxu1 %v16680_v8 }
0x1b87   :  { %17052 = vtanh.f32 %v6753_v32  ;;  %15405 = vmatprep.subr.bf16.mxu1 %v19724_v26 }
0x1b8a   :  { %v17051_v16 = vpop.eup %17050 }
0x1b8b   :  { %v6755_v25 = vsub.f32 1.0, %v17051_v16  ;;  %v6757_v39 = vmul.f32 %v17051_v16, %v18464_v15  ;;  %v16682_v15 = vld [vmem:[%s17503_s19 + $0x8] sm:$0xff]  }
0x1b8c   :  { %15406 = vmatpush3.bf16.msra.mxu1 %v16682_v15 }
0x1b8d   :  { %15419 = vmatprep.subr.bf16.mxu1 %v19724_v26 }
0x1b91   :  { %v17053_v47 = vpop.eup %17052 }
0x1b92   :  { %v6756_v57 = vmul.f32 %v17053_v47, %v6755_v25 }
0x1b94   :  { %v18737_v12 = vadd.f32 %v6757_v39, %v6756_v57 }
0x1b96   :  { %v18741_v18 = vpack.c.bf16 %v18737_v12, %v18737_v12 }
0x1b98   :  { %15400 = vmatmul.mubr.msk.bf16.vlgmr.msra.gmra.mrb[160].mxu0 %vm190_vm0, %v18741_v18 }
0x1b99   :  { %15415 = vmatprep.mubr.msk.bf16.mxu0 %vm17233_vm1, %v19724_v26  ;;  %15412 = vmatpush3.bf16.msra.mxu0 %v16681_v35 }
0x1b9a   :  { %15413 = vmatprep.subr.bf16.mxu0 %v19724_v26 }
0x1b9d   :  { %15414 = vmatpush3.bf16.msra.mxu0 %v16683_v5 }
0x1b9e   :  { %15427 = vmatprep.subr.bf16.mxu0 %v19724_v26 }
0x1c41   :  { %v6559_v6 = vpop.f32.mrb[156].mxu0 }
0x1c42   :  { %v6567_v41 = vadd.f32 %v18380_v22, %v6559_v6  ;;  %v15369_v53 = vpop.f32.mrb[157].mxu0  ;;  %v16685_v22 = vld [vmem:[%s17515_s24] sm:$0xff]  }
0x1c43   :  { %v6562_v31 = vpop.f32.mrb[158].mxu0 }
0x1c44   :  { %6568 = vst [vmem:[%s18204_s30 + $0x10] sm:$0xff] %v6567_v41  ;;  %v15370_v52 = vpop.f32.mrb[159].mxu0 }
0x1c6b   :  { %v6814_v4 = vpop.f32.mrb[160].mxu0 }
0x1c6c   :  { %v6815_v28 = vadd.f32 %v6814_v4, %v18758_v44  ;;  %v15401_v56 = vpop.f32.mrb[161].mxu0 }
0x1c6d   :  { %v6817_v29 = vpop.f32.mrb[162].mxu0 }
0x1c6e   :  { %17054 = vtanh.f32 %v6815_v28  ;;  %v15402_v0 = vpop.f32.mrb[163].mxu0 }
0x1c78   :  { %v17055_v7 = vpop.eup %17054 }
0x1c79   :  { %v6821_v2 = vpack.c.bf16 %v17055_v7, %v17055_v7 }
0x1c7b   :  { %15408 = vmatmul.mubr.msk.bf16.vlgmr.msra.gmra.mrb[196].mxu1 %vm190_vm0, %v6821_v2  ;;  %15416 = vmatmul.mubr.msk.bf16.vlgmr.msra.gmra.mrb[164].mxu0 %vm190_vm0, %v6821_v2 }
0x1c7c   :  { %15420 = vmatpush3.bf16.msra.mxu1 %v16684_v9  ;;  %15428 = vmatpush3.bf16.msra.mxu0 %v16685_v22 }
0x1c7d   :  { %15421 = vmatprep.subr.bf16.mxu1 %v19724_v26  ;;  %15429 = vmatprep.subr.bf16.mxu0 %v19724_v26 }
0x1c7e   :  { %15423 = vmatprep.mubr.msk.bf16.mxu1 %vm17233_vm1, %v19724_v26  ;;  %15431 = vmatprep.mubr.msk.bf16.mxu0 %vm17233_vm1, %v19724_v26 }
0x1c80   :  { %15422 = vmatpush3.bf16.msra.mxu1 %v16686_v42  ;;  %15430 = vmatpush3.bf16.msra.mxu0 %v16687_v20 }
0x1c81   :  { %15443 = vmatprep.subr.bf16.mxu1 %v19724_v26  ;;  %15435 = vmatprep.subr.bf16.mxu0 %v19724_v26 }
0x1c83   :  { %15424 = vmatmul.mubr.msk.bf16.vlgmr.msra.gmra.mrb[200].mxu1 %vm190_vm0, %v6821_v2  ;;  %15432 = vmatmul.mubr.msk.bf16.vlgmr.msra.gmra.mrb[168].mxu0 %vm190_vm0, %v6821_v2 }
0x1c84   :  { %15444 = vmatpush3.bf16.msra.mxu1 %v16688_v60  ;;  %15436 = vmatpush3.bf16.msra.mxu0 %v16689_v49 }
0x1c85   :  { %15445 = vmatprep.subr.bf16.mxu1 %v19724_v26  ;;  %15437 = vmatprep.subr.bf16.mxu0 %v19724_v26 }
0x1c86   :  { %15447 = vmatprep.mubr.msk.bf16.mxu1 %vm17233_vm1, %v19724_v26  ;;  %15439 = vmatprep.mubr.msk.bf16.mxu0 %vm17233_vm1, %v19724_v26 }
0x1c88   :  { %15446 = vmatpush3.bf16.msra.mxu1 %v16690_v13  ;;  %15438 = vmatpush3.bf16.msra.mxu0 %v16691_v3 }
0x1c89   :  { %15459 = vmatprep.subr.bf16.mxu1 %v19724_v26  ;;  %15451 = vmatprep.subr.bf16.mxu0 %v19724_v26 }
0x1c8b   :  { %15448 = vmatmul.mubr.msk.bf16.vlgmr.msra.gmra.mrb[152].mxu1 %vm190_vm0, %v18560_v62 }
0x1c8c   :  { %15460 = vmatpush3.bf16.msra.mxu1 %v16692_v1  ;;  %15463 = vmatprep.mubr.msk.bf16.mxu1 %vm17233_vm1, %v19724_v26 }
0x1c8d   :  { %15461 = vmatprep.subr.bf16.mxu1 %v19724_v26 }
0x1c8f   :  { %15440 = vmatmul.mubr.msk.bf16.vlgmr.msra.gmra.mrb[168].mxu0 %vm190_vm0, %v18741_v18 }
0x1c90   :  { %15452 = vmatpush3.bf16.msra.mxu0 %v16693_v21  ;;  %15462 = vmatpush3.bf16.msra.mxu1 %v16694_v24  ;;  %v16701_v21 = vld [vmem:[%s17776_s29 + $0x18] sm:$0xff]   ;;  %v18847_v24 = vld [vmem:[%s17811_s16] sm:$0xff] }
0x1c91   :  { %15453 = vmatprep.subr.bf16.mxu0 %v19724_v26  ;;  %15455 = vmatprep.mubr.msk.bf16.mxu0 %vm17233_vm1, %v19724_v26 }
0x1c92   :  { %15467 = vmatprep.subr.bf16.mxu1 %v19724_v26 }
0x1c93   :  { %15464 = vmatmul.mubr.msk.bf16.vlgmr.msra.gmra.mrb[204].mxu1 %vm190_vm0, %v18560_v62 }
0x1c94   :  { %15454 = vmatpush3.bf16.msra.mxu0 %v16695_v23  ;;  %15471 = vmatprep.mubr.msk.bf16.mxu1 %vm17233_vm1, %v19724_v26 }
0x1c95   :  { %15475 = vmatprep.subr.bf16.mxu0 %v19724_v26  ;;  %15468 = vmatpush3.bf16.msra.mxu1 %v16696_v36 }
0x1c96   :  { %15469 = vmatprep.subr.bf16.mxu1 %v19724_v26 }
0x1c97   :  { %15456 = vmatmul.mubr.msk.bf16.vlgmr.msra.gmra.mrb[140].mxu0 %vm190_vm0, %v18560_v62 }
0x1c98   :  { %15479 = vmatprep.mubr.msk.bf16.mxu0 %vm17233_vm1, %v19724_v26 }
0x1c99   :  { %15470 = vmatpush3.bf16.msra.mxu1 %v16697_v54 }
0x1c9a   :  { %15483 = vmatprep.subr.bf16.mxu1 %v19724_v26 }
0x1d56   :  { %v18817_v58 = vpop.f32.mrb[200].mxu1 }
0x1d57   :  { %v15425_v48 = vpop.f32.mrb[201].mxu1 }
0x1d58   :  { %v6993_v14 = vpop.f32.mrb[202].mxu1 }
0x1d59   :  { %v15426_v32 = vpop.f32.mrb[203].mxu1 }
0x1d5e   :  { %v7159_v16 = vpop.f32.mrb[152].mxu1 }
0x1d5f   :  { %v16209_v25 = vadd.f32 %v7159_v16, %v18542_v30  ;;  %v15449_v62 = vpop.f32.mrb[153].mxu1  ;;  %v18822_v30 = vld [vmem:[%s17743_s23 + $0x18] sm:$0xff]  ;;  %v16702_v16 = vld [vmem:[%s17776_s29 + $0x20] sm:$0xff]  }
0x1d60   :  { %v7162_v47 = vpop.f32.mrb[154].mxu1 }
0x1d61   :  { %v13360_v39 = vmul.f32 -1.442695, %v16209_v25  ;;  %v15450_v57 = vpop.f32.mrb[155].mxu1  ;;  %v16703_v25 = vld [vmem:[%s18006_s22 + $0x10] sm:$0xff]   ;;  %v16704_v47 = vld [vmem:[%s17776_s29 + $0x28] sm:$0xff]  }
0x1d62   :  { %v16706_v57 = vld [vmem:[%s17788_s5] sm:$0xff]  }
0x1d63   :  { %17056 = vpow2.f32 %v13360_v39  ;;  %v16705_v39 = vld [vmem:[%s18006_s22 + $0x18] sm:$0xff]  }
0x1d66   :  { %v7285_v8 = vpop.f32.mrb[204].mxu1 }
0x1d67   :  { %v15465_v35 = vpop.f32.mrb[205].mxu1  ;;  %v7286_v0 = vadd.f32 %v18822_v30, %v7285_v8  ;;  %v16707_v8 = vld [vmem:[%s18006_s22 + $0x20] sm:$0xff]  }
0x1d68   :  { %v7288_v15 = vpop.f32.mrb[206].mxu1  ;;  %v16708_v35 = vld [vmem:[%s17788_s5 + $0x8] sm:$0xff]  }
0x1d69   :  { %v15466_v5 = vpop.f32.mrb[207].mxu1  ;;  %v16709_v15 = vld [vmem:[%s18006_s22 + $0x28] sm:$0xff]  }
0x1d6a   :  { %v7222_v6 = vpop.f32.mrb[140].mxu0  ;;  %v16710_v5 = vld [vmem:[%s17806_s10] sm:$0xff]  }
0x1d6b   :  { %v16210_v41 = vadd.f32 %v18546_v46, %v7222_v6  ;;  %v15457_v53 = vpop.f32.mrb[141].mxu0  ;;  %v5421_v46 = vadd.f32 %v18550_v59, %v18539_v51  ;;  %v16698_v51 = vld [vmem:[%s17776_s29] sm:$0xff]   ;;  %v16699_v59 = vld [vmem:[%s17776_s29 + $0x10] sm:$0xff]   ;;  %v16711_v6 = vld [vmem:[%s17806_s10 + $0x8] sm:$0xff]  }
0x1d6c   :  { %v7225_v31 = vpop.f32.mrb[142].mxu0  ;;  %15476 = vmatpush3.bf16.msra.mxu0 %v16698_v51  ;;  %v16713_v53 = vld [vmem:[%s18006_s22 + $0x8] sm:$0xff]  }
0x1d6d   :  { %v17057_v52 = vpop.eup %17056  ;;  %v13368_v4 = vmul.f32 -1.442695, %v16210_v41  ;;  %v15458_v28 = vpop.f32.mrb[143].mxu0  ;;  %15477 = vmatprep.subr.bf16.mxu0 %v19724_v26  ;;  %v16712_v41 = vld [vmem:[%s18006_s22] sm:$0xff]  }
0x1d6e   :  { %v7169_v56 = vadd.f32 1.0, %v17057_v52  ;;  %v16714_v31 = vld [vmem:[%s18068_s8] sm:$0xff]   ;;  %v16715_v52 = vld [vmem:[%s18068_s8 + $0x8] sm:$0xff]  }
0x1d6f   :  { %17058 = vpow2.f32 %v13368_v4 }
0x1d70   :  { %17060 = vrcp.f32 %v7169_v56 }
0x1d79   :  { %v17059_v29 = vpop.eup %17058 }
0x1d7a   :  { %v17061_v7 = vpop.eup %17060  ;;  %v7232_v9 = vadd.f32 1.0, %v17059_v29 }
0x1d7b   :  { %v7291_v22 = vmul.f32 %v17061_v7, %v7286_v0 }
0x1d7c   :  { %17062 = vrcp.f32 %v7232_v9 }
0x1d7d   :  { %v7292_v2 = vadd.f32 %v7291_v22, %v5421_v46 }
0x1d7f   :  { %17064 = vtanh.f32 %v7292_v2 }
0x1d86   :  { %v17063_v42 = vpop.eup %17062 }
0x1d87   :  { %v7294_v20 = vsub.f32 1.0, %v17063_v42  ;;  %v7296_v49 = vmul.f32 %v17063_v42, %v18556_v38  ;;  %v16700_v38 = vld [vmem:[%s17776_s29 + $0x8] sm:$0xff]  }
0x1d88   :  { %15478 = vmatpush3.bf16.msra.mxu0 %v16700_v38 }
0x1d89   :  { %v17065_v60 = vpop.eup %17064  ;;  %15491 = vmatprep.subr.bf16.mxu0 %v19724_v26 }
0x1d8a   :  { %v7295_v13 = vmul.f32 %v17065_v60, %v7294_v20 }
0x1d8c   :  { %v18828_v3 = vadd.f32 %v7296_v49, %v7295_v13 }
0x1d8e   :  { %v18832_v1 = vpack.c.bf16 %v18828_v3, %v18828_v3 }
0x1d90   :  { %15472 = vmatmul.mubr.msk.bf16.vlgmr.msra.gmra.mrb[208].mxu1 %vm190_vm0, %v18832_v1 }
0x1d91   :  { %15487 = vmatprep.mubr.msk.bf16.mxu1 %vm17233_vm1, %v19724_v26  ;;  %15484 = vmatpush3.bf16.msra.mxu1 %v16699_v59 }
0x1d92   :  { %15485 = vmatprep.subr.bf16.mxu1 %v19724_v26 }
0x1d95   :  { %15486 = vmatpush3.bf16.msra.mxu1 %v16701_v21 }
0x1d96   :  { %15523 = vmatprep.subr.bf16.mxu1 %v19724_v26 }
0x1e63   :  { %v7353_v23 = vpop.f32.mrb[208].mxu1 }
0x1e64   :  { %v7354_v36 = vadd.f32 %v7353_v23, %v18847_v24  ;;  %v15473_v54 = vpop.f32.mrb[209].mxu1 }
0x1e65   :  { %v7356_v48 = vpop.f32.mrb[210].mxu1 }
0x1e66   :  { %17066 = vtanh.f32 %v7354_v36  ;;  %v15474_v14 = vpop.f32.mrb[211].mxu1 }
0x1e70   :  { %v17067_v32 = vpop.eup %17066 }
0x1e71   :  { %v7360_v62 = vpack.c.bf16 %v17067_v32, %v17067_v32 }
0x1e73   :  { %15480 = vmatmul.mubr.msk.bf16.vlgmr.msra.gmra.mrb[172].mxu0 %vm190_vm0, %v7360_v62  ;;  %15488 = vmatmul.mubr.msk.bf16.vlgmr.msra.gmra.mrb[212].mxu1 %vm190_vm0, %v7360_v62 }
0x1e74   :  { %15492 = vmatpush3.bf16.msra.mxu0 %v16702_v16  ;;  %15524 = vmatpush3.bf16.msra.mxu1 %v16703_v25 }
0x1e75   :  { %15493 = vmatprep.subr.bf16.mxu0 %v19724_v26  ;;  %15525 = vmatprep.subr.bf16.mxu1 %v19724_v26 }
0x1e76   :  { %15495 = vmatprep.mubr.msk.bf16.mxu0 %vm17233_vm1, %v19724_v26  ;;  %15527 = vmatprep.mubr.msk.bf16.mxu1 %vm17233_vm1, %v19724_v26 }
0x1e78   :  { %15494 = vmatpush3.bf16.msra.mxu0 %v16704_v47  ;;  %15526 = vmatpush3.bf16.msra.mxu1 %v16705_v39 }
0x1e79   :  { %15499 = vmatprep.subr.bf16.mxu0 %v19724_v26  ;;  %15531 = vmatprep.subr.bf16.mxu1 %v19724_v26 }
0x1e7b   :  { %15496 = vmatmul.mubr.msk.bf16.vlgmr.msra.gmra.mrb[176].mxu0 %vm190_vm0, %v7360_v62  ;;  %15528 = vmatmul.mubr.msk.bf16.vlgmr.msra.gmra.mrb[168].mxu1 %vm190_vm0, %v18658_v61 }
0x1e7c   :  { %15500 = vmatpush3.bf16.msra.mxu0 %v16706_v57  ;;  %15532 = vmatpush3.bf16.msra.mxu1 %v16707_v8 }
0x1e7d   :  { %15501 = vmatprep.subr.bf16.mxu0 %v19724_v26  ;;  %15533 = vmatprep.subr.bf16.mxu1 %v19724_v26 }
0x1e7e   :  { %15503 = vmatprep.mubr.msk.bf16.mxu0 %vm17233_vm1, %v19724_v26  ;;  %15535 = vmatprep.mubr.msk.bf16.mxu1 %vm17233_vm1, %v19724_v26 }
0x1e80   :  { %15502 = vmatpush3.bf16.msra.mxu0 %v16708_v35  ;;  %15534 = vmatpush3.bf16.msra.mxu1 %v16709_v15 }
0x1e81   :  { %15507 = vmatprep.subr.bf16.mxu0 %v19724_v26  ;;  %15539 = vmatprep.subr.bf16.mxu1 %v19724_v26 }
0x1e83   :  { %15504 = vmatmul.mubr.msk.bf16.vlgmr.msra.gmra.mrb[144].mxu0 %vm190_vm0, %v18832_v1  ;;  %15536 = vmatmul.mubr.msk.bf16.vlgmr.msra.gmra.mrb[216].mxu1 %vm190_vm0, %v18658_v61 }
0x1e84   :  { %15508 = vmatpush3.bf16.msra.mxu0 %v16710_v5  ;;  %15511 = vmatprep.mubr.msk.bf16.mxu0 %vm17233_vm1, %v19724_v26 }
0x1e85   :  { %15509 = vmatprep.subr.bf16.mxu0 %v19724_v26  ;;  %15543 = vmatprep.mubr.msk.bf16.mxu1 %vm17233_vm1, %v19724_v26 }
0x1e86   :  { %15540 = vmatpush3.bf16.msra.mxu1 %v16714_v31 }
0x1e87   :  { %15541 = vmatprep.subr.bf16.mxu1 %v19724_v26 }
0x1e88   :  { %15510 = vmatpush3.bf16.msra.mxu0 %v16711_v6 }
0x1e89   :  { %15515 = vmatprep.subr.bf16.mxu0 %v19724_v26 }
0x1e8a   :  { %15542 = vmatpush3.bf16.msra.mxu1 %v16715_v52 }
0x1e8b   :  { %15547 = vmatprep.subr.bf16.mxu1 %v19724_v26 }
0x1e8f   :  { %15512 = vmatmul.mubr.msk.bf16.vlgmr.msra.gmra.mrb[144].mxu0 %vm190_vm0, %v7360_v62 }
0x1e90   :  { %15516 = vmatpush3.bf16.msra.mxu0 %v16712_v41  ;;  %15519 = vmatprep.mubr.msk.bf16.mxu0 %vm17233_vm1, %v19724_v26  ;;  %v16719_v41 = vld [vmem:[%s18108_s1 + $0x8] sm:$0xff]  }
0x1e91   :  { %15517 = vmatprep.subr.bf16.mxu0 %v19724_v26 }
0x1e94   :  { %15518 = vmatpush3.bf16.msra.mxu0 %v16713_v53 }
0x1e95   :  { %15555 = vmatprep.subr.bf16.mxu0 %v19724_v26 }
0x1e97   :  { %15520 = vmatmul.mubr.msk.bf16.vlgmr.msra.gmra.mrb[148].mxu0 %vm190_vm0, %v18658_v61 }
0x1e98   :  { %15559 = vmatprep.mubr.msk.bf16.mxu0 %vm17233_vm1, %v19724_v26 }
0x1f4e   :  { %v18906_v4 = vpop.f32.mrb[176].mxu0  ;;  %v7763_v28 = vpop.f32.mrb[168].mxu1 }
0x1f4f   :  { %v15497_v56 = vpop.f32.mrb[177].mxu0  ;;  %v15529_v29 = vpop.f32.mrb[169].mxu1  ;;  %v16212_v48 = vadd.f32 %v18640_v27, %v7763_v28 }
0x1f50   :  { %v7532_v0 = vpop.f32.mrb[178].mxu0  ;;  %v7766_v7 = vpop.f32.mrb[170].mxu1 }
0x1f51   :  { %v15498_v9 = vpop.f32.mrb[179].mxu0  ;;  %v15530_v61 = vpop.f32.mrb[171].mxu1  ;;  %v13416_v14 = vmul.f32 -1.442695, %v16212_v48  ;;  %v16720_v0 = vld [vmem:[%s18115_s12] sm:$0xff]  }
0x1f52   :  { %v16721_v9 = vld [vmem:[%s18115_s12 + $0x8] sm:$0xff]  }
0x1f53   :  { %v16723_v61 = vld [vmem:[%s17295_s21 + $0x8] sm:$0xff]  }
0x1f56   :  { %v7826_v46 = vpop.f32.mrb[216].mxu1 }
0x1f57   :  { %v15537_v22 = vpop.f32.mrb[217].mxu1  ;;  %v7827_v62 = vadd.f32 %v18645_v19, %v7826_v46  ;;  %v16724_v46 = vld [vmem:[%s17295_s21 + $0x20] sm:$0xff]  }
0x1f58   :  { %v7829_v2 = vpop.f32.mrb[218].mxu1  ;;  %v16725_v22 = vld [vmem:[%s17295_s21 + $0x28] sm:$0xff]  }
0x1f59   :  { %v15538_v42 = vpop.f32.mrb[219].mxu1  ;;  %v16726_v2 = vld [vmem:[%s18165_s4] sm:$0xff]  }
0x1f5a   :  { %v16727_v42 = vld [vmem:[%s18165_s4 + $0x8] sm:$0xff]  }
0x1f62   :  { %v7642_v20 = vpop.f32.mrb[144].mxu0 }
0x1f63   :  { %v18909_v60 = vadd.f32 %v7642_v20, %v17467_v63  ;;  %v15513_v49 = vpop.f32.mrb[145].mxu0 }
0x1f64   :  { %v7645_v13 = vpop.f32.mrb[146].mxu0 }
0x1f65   :  { %v15514_v51 = vpop.f32.mrb[147].mxu0 }
0x1f6a   :  { %v7700_v59 = vpop.f32.mrb[148].mxu0 }
0x1f6b   :  { %v16211_v38 = vadd.f32 %v7700_v59, %v18637_v43  ;;  %v15521_v21 = vpop.f32.mrb[149].mxu0  ;;  %v5960_v43 = vadd.f32 %v18648_v45, %v18631_v33  ;;  %v16716_v33 = vld [vmem:[%s18103_s25] sm:$0xff]  }
0x1f6c   :  { %v7703_v23 = vpop.f32.mrb[150].mxu0  ;;  %v16717_v45 = vld [vmem:[%s18108_s1] sm:$0xff]  }
0x1f6d   :  { %v13408_v36 = vmul.f32 -1.442695, %v16211_v38  ;;  %v15522_v54 = vpop.f32.mrb[151].mxu0  ;;  %15556 = vmatpush3.bf16.msra.mxu0 %v16717_v45 }
0x1f6e   :  { %15557 = vmatprep.subr.bf16.mxu0 %v19724_v26 }
0x1f6f   :  { %17068 = vpow2.f32 %v13408_v36 }
0x1f70   :  { %17070 = vpow2.f32 %v13416_v14 }
0x1f71   :  { %15558 = vmatpush3.bf16.msra.mxu0 %v16719_v41 }
0x1f72   :  { %15571 = vmatprep.subr.bf16.mxu0 %v19724_v26 }
0x1f79   :  { %v17069_v32 = vpop.eup %17068 }
0x1f7a   :  { %v7710_v16 = vadd.f32 1.0, %v17069_v32  ;;  %v17071_v63 = vpop.eup %17070 }
0x1f7b   :  { %v7773_v25 = vadd.f32 1.0, %v17071_v63 }
0x1f7c   :  { %17072 = vrcp.f32 %v7710_v16 }
0x1f7d   :  { %17074 = vrcp.f32 %v7773_v25  ;;  %v16728_v25 = vld [vmem:[%s17295_s21 + $0x10] sm:$0xff]  }
0x1f86   :  { %v17073_v47 = vpop.eup %17072 }
0x1f87   :  { %v7832_v39 = vmul.f32 %v17073_v47, %v7827_v62  ;;  %v17075_v27 = vpop.eup %17074 }
0x1f88   :  { %v7835_v8 = vsub.f32 1.0, %v17075_v27  ;;  %v7837_v15 = vmul.f32 %v17075_v27, %v18654_v34  ;;  %v16718_v34 = vld [vmem:[%s18103_s25 + $0x8] sm:$0xff]  }
0x1f89   :  { %v7833_v57 = vadd.f32 %v7832_v39, %v5960_v43  ;;  %v16729_v39 = vld [vmem:[%s17295_s21 + $0x18] sm:$0xff]  }
0x1f8b   :  { %17076 = vtanh.f32 %v7833_v57 }
0x1f95   :  { %v17077_v35 = vpop.eup %17076 }
0x1f96   :  { %v7836_v5 = vmul.f32 %v17077_v35, %v7835_v8 }
0x1f98   :  { %v18917_v6 = vadd.f32 %v7837_v15, %v7836_v5 }
0x1f9a   :  { %v18921_v19 = vpack.c.bf16 %v18917_v6, %v18917_v6 }
0x1f9c   :  { %15544 = vmatmul.mubr.msk.bf16.vlgmr.msra.gmra.mrb[220].mxu1 %vm190_vm0, %v18921_v19 }
0x1f9d   :  { %15551 = vmatprep.mubr.msk.bf16.mxu1 %vm17233_vm1, %v19724_v26  ;;  %15548 = vmatpush3.bf16.msra.mxu1 %v16716_v33 }
0x1f9e   :  { %15549 = vmatprep.subr.bf16.mxu1 %v19724_v26 }
0x1fa1   :  { %15550 = vmatpush3.bf16.msra.mxu1 %v16718_v34 }
0x1fa2   :  { %15563 = vmatprep.subr.bf16.mxu1 %v19724_v26 }
0x206f   :  { %v7894_v53 = vpop.f32.mrb[220].mxu1 }
0x2070   :  { %v7895_v31 = vadd.f32 %v7894_v53, %v18673_v17  ;;  %v15545_v52 = vpop.f32.mrb[221].mxu1  ;;  %v16722_v17 = vld [vmem:[%s17295_s21] sm:$0xff]  }
0x2071   :  { %v7897_v28 = vpop.f32.mrb[222].mxu1  ;;  %v16730_v52 = vld [vmem:[%s17373_s3] sm:$0xff]  }
0x2072   :  { %17078 = vtanh.f32 %v7895_v31  ;;  %v15546_v56 = vpop.f32.mrb[223].mxu1 }
0x207c   :  { %v17079_v29 = vpop.eup %17078 }
0x207d   :  { %v7901_v7 = vpack.c.bf16 %v17079_v29, %v17079_v29 }
0x207f   :  { %15552 = vmatmul.mubr.msk.bf16.vlgmr.msra.gmra.mrb[224].mxu1 %vm190_vm0, %v7901_v7  ;;  %15560 = vmatmul.mubr.msk.bf16.vlgmr.msra.gmra.mrb[180].mxu0 %vm190_vm0, %v7901_v7 }
0x2080   :  { %15564 = vmatpush3.bf16.msra.mxu1 %v16720_v0  ;;  %15567 = vmatprep.mubr.msk.bf16.mxu1 %vm17233_vm1, %v19724_v26 }
0x2081   :  { %15565 = vmatprep.subr.bf16.mxu1 %v19724_v26  ;;  %15575 = vmatprep.mubr.msk.bf16.mxu0 %vm17233_vm1, %v19724_v26 }
0x2082   :  { %15572 = vmatpush3.bf16.msra.mxu0 %v16726_v2 }
0x2083   :  { %15573 = vmatprep.subr.bf16.mxu0 %v19724_v26 }
0x2084   :  { %15566 = vmatpush3.bf16.msra.mxu1 %v16721_v9 }
0x2085   :  { %15579 = vmatprep.subr.bf16.mxu1 %v19724_v26 }
0x2086   :  { %15574 = vmatpush3.bf16.msra.mxu0 %v16727_v42 }
0x2087   :  { %15568 = vmatmul.mubr.msk.bf16.vlgmr.msra.gmra.mrb[228].mxu1 %vm190_vm0, %v18921_v19  ;;  %15587 = vmatprep.subr.bf16.mxu0 %v19724_v26 }
0x2088   :  { %15580 = vmatpush3.bf16.msra.mxu1 %v16722_v17  ;;  %15583 = vmatprep.mubr.msk.bf16.mxu1 %vm17233_vm1, %v19724_v26 }
0x2089   :  { %15581 = vmatprep.subr.bf16.mxu1 %v19724_v26 }
0x208c   :  { %15582 = vmatpush3.bf16.msra.mxu1 %v16723_v61 }
0x208d   :  { %15595 = vmatprep.subr.bf16.mxu1 %v19724_v26 }
0x208f   :  { %15584 = vmatmul.mubr.msk.bf16.vlgmr.msra.gmra.mrb[232].mxu1 %vm190_vm0, %v18741_v18 }
0x2090   :  { %15596 = vmatpush3.bf16.msra.mxu1 %v16724_v46  ;;  %15599 = vmatprep.mubr.msk.bf16.mxu1 %vm17233_vm1, %v19724_v26 }
0x2091   :  { %15597 = vmatprep.subr.bf16.mxu1 %v19724_v26 }
0x2094   :  { %15598 = vmatpush3.bf16.msra.mxu1 %v16725_v22 }
0x2095   :  { %15611 = vmatprep.subr.bf16.mxu1 %v19724_v26 }
0x2097   :  { %15600 = vmatmul.mubr.msk.bf16.vlgmr.msra.gmra.mrb[236].mxu1 %vm190_vm0, %v18741_v18 }
0x2098   :  { %15615 = vmatprep.mubr.msk.bf16.mxu1 %vm17233_vm1, %v19724_v26 }
0x2152   :  { %v7956_v20 = vpop.f32.mrb[224].mxu1  ;;  %v8017_v49 = vpop.f32.mrb[180].mxu0 }
0x2153   :  { %v7957_v13 = vadd.f32 %v7956_v20, %v18719_v50  ;;  %v15553_v51 = vpop.f32.mrb[225].mxu1  ;;  %v15561_v59 = vpop.f32.mrb[181].mxu0 }
0x2154   :  { %v7959_v38 = vpop.f32.mrb[226].mxu1  ;;  %v8020_v21 = vpop.f32.mrb[182].mxu0 }
0x2155   :  { %17080 = vtanh.f32 %v7957_v13  ;;  %v15554_v23 = vpop.f32.mrb[227].mxu1  ;;  %v15562_v36 = vpop.f32.mrb[183].mxu0  ;;  %v16732_v38 = vld [vmem:[%s17503_s19] sm:$0xff]   ;;  %v16733_v21 = vld [vmem:[%s17503_s19 + $0x10] sm:$0xff]  }
0x2156   :  { %15612 = vmatpush3.bf16.msra.mxu1 %v16732_v38  ;;  %v16735_v23 = vld [vmem:[%s17503_s19 + $0x18] sm:$0xff]  }
0x2157   :  { %15613 = vmatprep.subr.bf16.mxu1 %v19724_v26 }
0x215a   :  { %v8069_v54 = vpop.f32.mrb[228].mxu1 }
0x215b   :  { %v8070_v48 = vadd.f32 %v8069_v54, %v8017_v49  ;;  %v15569_v14 = vpop.f32.mrb[229].mxu1 }
0x215c   :  { %v8072_v32 = vpop.f32.mrb[230].mxu1 }
0x215d   :  { %v15570_v16 = vpop.f32.mrb[231].mxu1 }
0x215f   :  { %v17081_v63 = vpop.eup %17080 }
0x2160   :  { %v8075_v62 = vpack.c.bf16 %v17081_v63, %v17081_v63  ;;  %v16736_v63 = vld [vmem:[%s17503_s19 + $0x20] sm:$0xff]  }
0x2162   :  { %15576 = vmatmul.mubr.msk.bf16.vlgmr.msra.gmra.mrb[184].mxu0 %vm190_vm0, %v8075_v62  ;;  %v8190_v47 = vpop.f32.mrb[232].mxu1 }
0x2163   :  { %v8196_v50 = vadd.f32 %v8190_v47, %v17422_v10  ;;  %15588 = vmatpush3.bf16.msra.mxu0 %v16728_v25  ;;  %v15585_v43 = vpop.f32.mrb[233].mxu1  ;;  %15591 = vmatprep.mubr.msk.bf16.mxu0 %vm17233_vm1, %v19724_v26  ;;  %v16737_v25 = vld [vmem:[%s17515_s24] sm:$0xff]   ;;  %v16738_v47 = vld [vmem:[%s17503_s19 + $0x28] sm:$0xff]  }
0x2164   :  { %v8193_v57 = vpop.f32.mrb[234].mxu1  ;;  %15589 = vmatprep.subr.bf16.mxu0 %v19724_v26  ;;  %v16741_v43 = vld [vmem:[%s17533_s28] sm:$0xff]  }
0x2165   :  { %v13442_v27 = vmul.f32 -1.442695, %v8196_v50  ;;  %v15586_v8 = vpop.f32.mrb[235].mxu1  ;;  %v16739_v50 = vld [vmem:[%s17515_s24 + $0x8] sm:$0xff]  }
0x2166   :  { %v16743_v57 = vld [vmem:[%s17533_s28 + $0x8] sm:$0xff]   ;;  %v16745_v8 = vld [vmem:[%s17646_s7 + $0x10] sm:$0xff]  }
0x2167   :  { %17082 = vpow2.f32 %v13442_v27  ;;  %15590 = vmatpush3.bf16.msra.mxu0 %v16729_v39  ;;  %v16742_v39 = vld [vmem:[%s17646_s7 + $0x8] sm:$0xff]   ;;  %v16744_v27 = vld [vmem:[%s17646_s7 + $0x20] sm:$0xff]  }
0x2168   :  { %15603 = vmatprep.subr.bf16.mxu0 %v19724_v26 }
0x216a   :  { %15592 = vmatmul.mubr.msk.bf16.vlgmr.msra.gmra.mrb[188].mxu0 %vm190_vm0, %v18741_v18  ;;  %v8316_v10 = vpop.f32.mrb[236].mxu1  ;;  %v16731_v18 = vld [vmem:[%s17373_s3 + $0x8] sm:$0xff]  }
0x216b   :  { %v15601_v35 = vpop.f32.mrb[237].mxu1  ;;  %15607 = vmatprep.mubr.msk.bf16.mxu0 %vm17233_vm1, %v19724_v26  ;;  %v8317_v34 = vadd.f32 %v8316_v10, %v18732_v55  ;;  %15604 = vmatpush3.bf16.msra.mxu0 %v16730_v52  ;;  %v16746_v10 = vld [vmem:[%s17646_s7 + $0x28] sm:$0xff]  }
0x216c   :  { %v8319_v15 = vpop.f32.mrb[238].mxu1  ;;  %15605 = vmatprep.subr.bf16.mxu0 %v19724_v26  ;;  %v16747_v35 = vld [vmem:[%s17646_s7 + $0x18] sm:$0xff]  }
0x216d   :  { %v15602_v5 = vpop.f32.mrb[239].mxu1  ;;  %v16748_v15 = vld [vmem:[%s17726_s17] sm:$0xff]  }
0x216e   :  { %v16749_v5 = vld [vmem:[%s17726_s17 + $0x8] sm:$0xff]  }
0x216f   :  { %15606 = vmatpush3.bf16.msra.mxu0 %v16731_v18 }
0x2170   :  { %15619 = vmatprep.subr.bf16.mxu0 %v19724_v26 }
0x2171   :  { %v17083_v33 = vpop.eup %17082 }
0x2172   :  { %v8200_v45 = vadd.f32 1.0, %v17083_v33 }
0x2174   :  { %17084 = vrcp.f32 %v8200_v45 }
0x217e   :  { %v17085_v41 = vpop.eup %17084 }
0x217f   :  { %v8322_v53 = vmul.f32 %v17085_v41, %v8317_v34 }
0x2181   :  { %v8323_v31 = vadd.f32 %v8322_v53, %v17461_v40  ;;  %v19071_v53 = vld [vmem:[%s17743_s23] sm:$0xff] }
0x2235   :  { %v8129_v28 = vpop.f32.mrb[184].mxu0 }
0x2236   :  { %v8135_v56 = vadd.f32 %v8129_v28, %v8070_v48  ;;  %v15577_v29 = vpop.f32.mrb[185].mxu0 }
0x2237   :  { %v8132_v0 = vpop.f32.mrb[186].mxu0 }
0x2238   :  { %v8137_v7 = vadd.f32 %v18634_v37, %v8135_v56  ;;  %v15578_v55 = vpop.f32.mrb[187].mxu0 }
0x2239   :  { %v19075_v55 = vld [vmem:[%s17743_s23 + $0x8] sm:$0xff] }
0x223a   :  { %8138 = vst [vmem:[%s18204_s30 + $0x18] sm:$0xff] %v8137_v7 }
0x223d   :  { %v8253_v9 = vpop.f32.mrb[188].mxu0 }
0x223e   :  { %v8259_v17 = vadd.f32 %v8253_v9, %v17425_v11  ;;  %v15593_v40 = vpop.f32.mrb[189].mxu0 }
0x223f   :  { %v8256_v61 = vpop.f32.mrb[190].mxu0 }
0x2240   :  { %v13450_v46 = vmul.f32 -1.442695, %v8259_v17  ;;  %v15594_v22 = vpop.f32.mrb[191].mxu0 }
0x2242   :  { %17086 = vpow2.f32 %v13450_v46 }
0x224c   :  { %v17087_v2 = vpop.eup %17086 }
0x224d   :  { %v8263_v42 = vadd.f32 1.0, %v17087_v2 }
0x224f   :  { %17088 = vrcp.f32 %v8263_v42 }
0x2250   :  { %17090 = vtanh.f32 %v8323_v31 }
0x2259   :  { %v17089_v20 = vpop.eup %17088 }
0x225a   :  { %v8325_v37 = vsub.f32 1.0, %v17089_v20  ;;  %v17091_v49 = vpop.eup %17090  ;;  %v8327_v13 = vmul.f32 %v17089_v20, %v18737_v12  ;;  %v16734_v12 = vld [vmem:[%s17503_s19 + $0x8] sm:$0xff]  }
0x225b   :  { %15614 = vmatpush3.bf16.msra.mxu1 %v16734_v12 }
0x225c   :  { %v8326_v51 = vmul.f32 %v17091_v49, %v8325_v37  ;;  %15627 = vmatprep.subr.bf16.mxu1 %v19724_v26  ;;  %v19079_v37 = vld [vmem:[%s17743_s23 + $0x10] sm:$0xff] }
0x225e   :  { %v18993_v11 = vadd.f32 %v8327_v13, %v8326_v51 }
0x2260   :  { %v18997_v59 = vpack.c.bf16 %v18993_v11, %v18993_v11 }
0x2262   :  { %15608 = vmatmul.mubr.msk.bf16.vlgmr.msra.gmra.mrb[192].mxu0 %vm190_vm0, %v18997_v59 }
0x2263   :  { %15623 = vmatprep.mubr.msk.bf16.mxu0 %vm17233_vm1, %v19724_v26  ;;  %15620 = vmatpush3.bf16.msra.mxu0 %v16733_v21  ;;  %v6991_v21 = vadd.f32 %v19079_v37, %v18817_v58  ;;  %v16750_v58 = vld [vmem:[%s17776_s29] sm:$0xff]  }
0x2264   :  { %15621 = vmatprep.subr.bf16.mxu0 %v19724_v26 }
0x2267   :  { %15622 = vmatpush3.bf16.msra.mxu0 %v16735_v23 }
0x2268   :  { %15635 = vmatprep.subr.bf16.mxu0 %v19724_v26 }
0x2335   :  { %v8384_v36 = vpop.f32.mrb[192].mxu0 }
0x2336   :  { %v8385_v54 = vadd.f32 %v8384_v36, %v18758_v44  ;;  %v15609_v48 = vpop.f32.mrb[193].mxu0  ;;  %v16740_v44 = vld [vmem:[%s17646_s7] sm:$0xff]  }
0x2337   :  { %v8387_v14 = vpop.f32.mrb[194].mxu0 }
0x2338   :  { %17092 = vtanh.f32 %v8385_v54  ;;  %v15610_v32 = vpop.f32.mrb[195].mxu0 }
0x2342   :  { %v17093_v16 = vpop.eup %17092 }
0x2343   :  { %v8391_v62 = vpack.c.bf16 %v17093_v16, %v17093_v16 }
0x2345   :  { %15616 = vmatmul.mubr.msk.bf16.vlgmr.msra.gmra.mrb[240].mxu1 %vm190_vm0, %v8391_v62  ;;  %15624 = vmatmul.mubr.msk.bf16.vlgmr.msra.gmra.mrb[196].mxu0 %vm190_vm0, %v8391_v62 }
0x2346   :  { %15628 = vmatpush3.bf16.msra.mxu1 %v16736_v63  ;;  %15636 = vmatpush3.bf16.msra.mxu0 %v16737_v25  ;;  %v16751_v63 = vld [vmem:[%s17776_s29 + $0x10] sm:$0xff]   ;;  %v16753_v25 = vld [vmem:[%s17776_s29 + $0x18] sm:$0xff]  }
0x2347   :  { %15629 = vmatprep.subr.bf16.mxu1 %v19724_v26  ;;  %15637 = vmatprep.subr.bf16.mxu0 %v19724_v26 }
0x2348   :  { %15631 = vmatprep.mubr.msk.bf16.mxu1 %vm17233_vm1, %v19724_v26  ;;  %15639 = vmatprep.mubr.msk.bf16.mxu0 %vm17233_vm1, %v19724_v26 }
0x234a   :  { %15630 = vmatpush3.bf16.msra.mxu1 %v16738_v47  ;;  %15638 = vmatpush3.bf16.msra.mxu0 %v16739_v50 }
0x234b   :  { %15651 = vmatprep.subr.bf16.mxu1 %v19724_v26  ;;  %15643 = vmatprep.subr.bf16.mxu0 %v19724_v26 }
0x234d   :  { %15632 = vmatmul.mubr.msk.bf16.vlgmr.msra.gmra.mrb[244].mxu1 %vm190_vm0, %v8391_v62  ;;  %15640 = vmatmul.mubr.msk.bf16.vlgmr.msra.gmra.mrb[200].mxu0 %vm190_vm0, %v8391_v62 }
0x234e   :  { %15652 = vmatpush3.bf16.msra.mxu1 %v16740_v44  ;;  %15644 = vmatpush3.bf16.msra.mxu0 %v16741_v43 }
0x234f   :  { %15653 = vmatprep.subr.bf16.mxu1 %v19724_v26  ;;  %15645 = vmatprep.subr.bf16.mxu0 %v19724_v26 }
0x2350   :  { %15655 = vmatprep.mubr.msk.bf16.mxu1 %vm17233_vm1, %v19724_v26  ;;  %15647 = vmatprep.mubr.msk.bf16.mxu0 %vm17233_vm1, %v19724_v26 }
0x2352   :  { %15654 = vmatpush3.bf16.msra.mxu1 %v16742_v39  ;;  %15646 = vmatpush3.bf16.msra.mxu0 %v16743_v57  ;;  %v16754_v57 = vld [vmem:[%s17776_s29 + $0x20] sm:$0xff]  }
0x2353   :  { %15667 = vmatprep.subr.bf16.mxu1 %v19724_v26  ;;  %15659 = vmatprep.subr.bf16.mxu0 %v19724_v26 }
0x2355   :  { %15656 = vmatmul.mubr.msk.bf16.vlgmr.msra.gmra.mrb[196].mxu1 %vm190_vm0, %v18832_v1 }
0x2356   :  { %15668 = vmatpush3.bf16.msra.mxu1 %v16744_v27  ;;  %15671 = vmatprep.mubr.msk.bf16.mxu1 %vm17233_vm1, %v19724_v26  ;;  %v16755_v27 = vld [vmem:[%s18006_s22 + $0x10] sm:$0xff]  }
0x2357   :  { %15669 = vmatprep.subr.bf16.mxu1 %v19724_v26 }
0x2359   :  { %15648 = vmatmul.mubr.msk.bf16.vlgmr.msra.gmra.mrb[200].mxu0 %vm190_vm0, %v18997_v59 }
0x235a   :  { %15660 = vmatpush3.bf16.msra.mxu0 %v16745_v8  ;;  %15670 = vmatpush3.bf16.msra.mxu1 %v16746_v10  ;;  %v16756_v10 = vld [vmem:[%s17776_s29 + $0x28] sm:$0xff]  }
0x235b   :  { %15661 = vmatprep.subr.bf16.mxu0 %v19724_v26  ;;  %15663 = vmatprep.mubr.msk.bf16.mxu0 %vm17233_vm1, %v19724_v26 }
0x235c   :  { %15675 = vmatprep.subr.bf16.mxu1 %v19724_v26 }
0x235d   :  { %15672 = vmatmul.mubr.msk.bf16.vlgmr.msra.gmra.mrb[248].mxu1 %vm190_vm0, %v18832_v1 }
0x235e   :  { %15662 = vmatpush3.bf16.msra.mxu0 %v16747_v35  ;;  %15679 = vmatprep.mubr.msk.bf16.mxu1 %vm17233_vm1, %v19724_v26  ;;  %v16757_v35 = vld [vmem:[%s18006_s22 + $0x18] sm:$0xff]  }
0x235f   :  { %15683 = vmatprep.subr.bf16.mxu0 %v19724_v26  ;;  %15676 = vmatpush3.bf16.msra.mxu1 %v16748_v15  ;;  %v16759_v15 = vld [vmem:[%s18006_s22 + $0x20] sm:$0xff]  }
0x2360   :  { %15677 = vmatprep.subr.bf16.mxu1 %v19724_v26 }
0x2361   :  { %15664 = vmatmul.mubr.msk.bf16.vlgmr.msra.gmra.mrb[164].mxu0 %vm190_vm0, %v18832_v1 }
0x2362   :  { %15687 = vmatprep.mubr.msk.bf16.mxu0 %vm17233_vm1, %v19724_v26  ;;  %15684 = vmatpush3.bf16.msra.mxu0 %v16750_v58 }
0x2363   :  { %15678 = vmatpush3.bf16.msra.mxu1 %v16749_v5  ;;  %15685 = vmatprep.subr.bf16.mxu0 %v19724_v26  ;;  %v16760_v5 = vld [vmem:[%s17788_s5 + $0x8] sm:$0xff]  }
0x2364   :  { %15691 = vmatprep.subr.bf16.mxu1 %v19724_v26 }
0x2420   :  { %v19068_v33 = vpop.f32.mrb[244].mxu1 }
0x2421   :  { %v15633_v45 = vpop.f32.mrb[245].mxu1 }
0x2422   :  { %v8563_v34 = vpop.f32.mrb[246].mxu1  ;;  %v16761_v45 = vld [vmem:[%s18006_s22 + $0x28] sm:$0xff]  }
0x2423   :  { %v15634_v41 = vpop.f32.mrb[247].mxu1  ;;  %v16762_v34 = vld [vmem:[%s17806_s10] sm:$0xff]  }
0x2424   :  { %v16763_v41 = vld [vmem:[%s17806_s10 + $0x8] sm:$0xff]  }
0x2428   :  { %v8729_v1 = vpop.f32.mrb[196].mxu1 }
0x2429   :  { %v16213_v31 = vadd.f32 %v8729_v1, %v19071_v53  ;;  %v15657_v52 = vpop.f32.mrb[197].mxu1  ;;  %v16764_v1 = vld [vmem:[%s18006_s22] sm:$0xff]  }
0x242a   :  { %v8732_v18 = vpop.f32.mrb[198].mxu1  ;;  %v16766_v52 = vld [vmem:[%s18068_s8] sm:$0xff]  }
0x242b   :  { %v13490_v28 = vmul.f32 -1.442695, %v16213_v31  ;;  %v15658_v56 = vpop.f32.mrb[199].mxu1  ;;  %v16765_v31 = vld [vmem:[%s18006_s22 + $0x8] sm:$0xff]  }
0x242c   :  { %v16767_v18 = vld [vmem:[%s18068_s8 + $0x8] sm:$0xff]  }
0x242d   :  { %17094 = vpow2.f32 %v13490_v28 }
0x2430   :  { %v8855_v29 = vpop.f32.mrb[248].mxu1 }
0x2431   :  { %v15673_v0 = vpop.f32.mrb[249].mxu1  ;;  %v8856_v13 = vadd.f32 %v18822_v30, %v8855_v29 }
0x2432   :  { %v8858_v7 = vpop.f32.mrb[250].mxu1 }
0x2433   :  { %v15674_v9 = vpop.f32.mrb[251].mxu1 }
0x2434   :  { %v8792_v17 = vpop.f32.mrb[164].mxu0 }
0x2435   :  { %v16214_v40 = vadd.f32 %v19075_v55, %v8792_v17  ;;  %v15665_v61 = vpop.f32.mrb[165].mxu0 }
0x2436   :  { %v8795_v46 = vpop.f32.mrb[166].mxu0 }
0x2437   :  { %v17095_v22 = vpop.eup %17094  ;;  %v13498_v2 = vmul.f32 -1.442695, %v16214_v40  ;;  %v15666_v42 = vpop.f32.mrb[167].mxu0 }
0x2438   :  { %v8739_v20 = vadd.f32 1.0, %v17095_v22  ;;  %v19725_v42 = vld [vmem:[#allocation7_spill] sm:$0xff] }
0x2439   :  { %17096 = vpow2.f32 %v13498_v2 }
0x243a   :  { %17098 = vrcp.f32 %v8739_v20 }
0x2443   :  { %v17097_v49 = vpop.eup %17096 }
0x2444   :  { %v17099_v51 = vpop.eup %17098  ;;  %v8802_v38 = vadd.f32 1.0, %v17097_v49 }
0x2445   :  { %v8861_v12 = vmul.f32 %v17099_v51, %v8856_v13 }
0x2446   :  { %17100 = vrcp.f32 %v8802_v38  ;;  %v19166_v38 = vld [vmem:[%s18079_s14] sm:$0xff] }
0x2447   :  { %v8862_v23 = vadd.f32 %v8861_v12, %v6991_v21  ;;  %v19169_v12 = vld [vmem:[%s18079_s14 + $0x8] sm:$0xff] }
0x2449   :  { %17102 = vtanh.f32 %v8862_v23 }
0x2450   :  { %v17101_v36 = vpop.eup %17100 }
0x2451   :  { %v8864_v54 = vsub.f32 1.0, %v17101_v36  ;;  %v8866_v14 = vmul.f32 %v17101_v36, %v18828_v3  ;;  %v16752_v3 = vld [vmem:[%s17776_s29 + $0x8] sm:$0xff]  }
0x2452   :  { %15686 = vmatpush3.bf16.msra.mxu0 %v16752_v3 }
0x2453   :  { %v17103_v48 = vpop.eup %17102  ;;  %15699 = vmatprep.subr.bf16.mxu0 %v19724_v26 }
0x2454   :  { %v8865_v32 = vmul.f32 %v17103_v48, %v8864_v54 }
0x2456   :  { %v19085_v30 = vadd.f32 %v8866_v14, %v8865_v32 }
0x2458   :  { %v19089_v16 = vpack.c.bf16 %v19085_v30, %v19085_v30 }
0x245a   :  { %15680 = vmatmul.mubr.msk.bf16.vlgmr.msra.gmra.mrb[252].mxu1 %vm190_vm0, %v19089_v16 }
0x245b   :  { %15695 = vmatprep.mubr.msk.bf16.mxu1 %vm17233_vm1, %v19724_v26  ;;  %15692 = vmatpush3.bf16.msra.mxu1 %v16751_v63 }
0x245c   :  { %15693 = vmatprep.subr.bf16.mxu1 %v19724_v26 }
0x245f   :  { %15694 = vmatpush3.bf16.msra.mxu1 %v16753_v25 }
0x2460   :  { %15731 = vmatprep.subr.bf16.mxu1 %v19724_v26 }
0x252d   :  { %v8923_v62 = vpop.f32.mrb[252].mxu1 }
0x252e   :  { %v8924_v47 = vadd.f32 %v8923_v62, %v18847_v24  ;;  %v15681_v50 = vpop.f32.mrb[253].mxu1  ;;  %v16758_v24 = vld [vmem:[%s17788_s5] sm:$0xff]   ;;  %v19174_v62 = vld [vmem:[%s18079_s14 + $0x18] sm:$0xff] }
0x252f   :  { %v8926_v44 = vpop.f32.mrb[254].mxu1  ;;  %v19177_v50 = vld [vmem:[%s18079_s14 + $0x10] sm:$0xff] }
0x2530   :  { %17104 = vtanh.f32 %v8924_v47  ;;  %v15682_v43 = vpop.f32.mrb[255].mxu1 }
0x253a   :  { %v17105_v39 = vpop.eup %17104 }
0x253b   :  { %v8930_v8 = vpack.c.bf16 %v17105_v39, %v17105_v39  ;;  %v7530_v39 = vadd.f32 %v19177_v50, %v18906_v4  ;;  %v16768_v4 = vld [vmem:[%s18103_s25] sm:$0xff]  }
0x253d   :  { %15688 = vmatmul.mubr.msk.bf16.vlgmr.msra.gmra.mrb[204].mxu0 %vm190_vm0, %v8930_v8  ;;  %15696 = vmatmul.mubr.msk.bf16.vlgmr.msra.gmra.mrb[0].mxu1 %vm190_vm0, %v8930_v8 }
0x253e   :  { %15700 = vmatpush3.bf16.msra.mxu0 %v16754_v57  ;;  %15732 = vmatpush3.bf16.msra.mxu1 %v16755_v27 }
0x253f   :  { %15701 = vmatprep.subr.bf16.mxu0 %v19724_v26  ;;  %15733 = vmatprep.subr.bf16.mxu1 %v19724_v26 }
0x2540   :  { %15703 = vmatprep.mubr.msk.bf16.mxu0 %vm17233_vm1, %v19724_v26  ;;  %15735 = vmatprep.mubr.msk.bf16.mxu1 %vm17233_vm1, %v19724_v26 }
0x2542   :  { %15702 = vmatpush3.bf16.msra.mxu0 %v16756_v10  ;;  %15734 = vmatpush3.bf16.msra.mxu1 %v16757_v35 }
0x2543   :  { %15707 = vmatprep.subr.bf16.mxu0 %v19724_v26  ;;  %15739 = vmatprep.subr.bf16.mxu1 %v19724_v26 }
0x2545   :  { %15704 = vmatmul.mubr.msk.bf16.vlgmr.msra.gmra.mrb[208].mxu0 %vm190_vm0, %v8930_v8  ;;  %15736 = vmatmul.mubr.msk.bf16.vlgmr.msra.gmra.mrb[212].mxu1 %vm190_vm0, %v18921_v19 }
0x2546   :  { %15708 = vmatpush3.bf16.msra.mxu0 %v16758_v24  ;;  %15740 = vmatpush3.bf16.msra.mxu1 %v16759_v15 }
0x2547   :  { %15709 = vmatprep.subr.bf16.mxu0 %v19724_v26  ;;  %15741 = vmatprep.subr.bf16.mxu1 %v19724_v26 }
0x2548   :  { %15711 = vmatprep.mubr.msk.bf16.mxu0 %vm17233_vm1, %v19724_v26  ;;  %15743 = vmatprep.mubr.msk.bf16.mxu1 %vm17233_vm1, %v19724_v26 }
0x254a   :  { %15710 = vmatpush3.bf16.msra.mxu0 %v16760_v5  ;;  %15742 = vmatpush3.bf16.msra.mxu1 %v16761_v45 }
0x254b   :  { %15715 = vmatprep.subr.bf16.mxu0 %v19724_v26  ;;  %15747 = vmatprep.subr.bf16.mxu1 %v19724_v26 }
0x254d   :  { %15712 = vmatmul.mubr.msk.bf16.vlgmr.msra.gmra.mrb[168].mxu0 %vm190_vm0, %v19089_v16  ;;  %15744 = vmatmul.mubr.msk.bf16.vlgmr.msra.gmra.mrb[4].mxu1 %vm190_vm0, %v18921_v19 }
0x254e   :  { %15716 = vmatpush3.bf16.msra.mxu0 %v16762_v34  ;;  %15719 = vmatprep.mubr.msk.bf16.mxu0 %vm17233_vm1, %v19724_v26  ;;  %v16769_v34 = vld [vmem:[%s18108_s1] sm:$0xff]  }
0x254f   :  { %15717 = vmatprep.subr.bf16.mxu0 %v19724_v26  ;;  %15751 = vmatprep.mubr.msk.bf16.mxu1 %vm17233_vm1, %v19724_v26 }
0x2550   :  { %15748 = vmatpush3.bf16.msra.mxu1 %v16766_v52 }
0x2551   :  { %15749 = vmatprep.subr.bf16.mxu1 %v19724_v26 }
0x2552   :  { %15718 = vmatpush3.bf16.msra.mxu0 %v16763_v41  ;;  %v16771_v41 = vld [vmem:[%s18108_s1 + $0x8] sm:$0xff]  }
0x2553   :  { %15723 = vmatprep.subr.bf16.mxu0 %v19724_v26 }
0x2554   :  { %15750 = vmatpush3.bf16.msra.mxu1 %v16767_v18 }
0x2555   :  { %15755 = vmatprep.subr.bf16.mxu1 %v19724_v26 }
0x2559   :  { %15720 = vmatmul.mubr.msk.bf16.vlgmr.msra.gmra.mrb[168].mxu0 %vm190_vm0, %v8930_v8 }
0x255a   :  { %15724 = vmatpush3.bf16.msra.mxu0 %v16764_v1  ;;  %15727 = vmatprep.mubr.msk.bf16.mxu0 %vm17233_vm1, %v19724_v26  ;;  %v19202_v1 = vld [vmem:[%s18126_s20] sm:$0xff] }
0x255b   :  { %15725 = vmatprep.subr.bf16.mxu0 %v19724_v26 }
0x255e   :  { %15726 = vmatpush3.bf16.msra.mxu0 %v16765_v31 }
0x255f   :  { %15763 = vmatprep.subr.bf16.mxu0 %v19724_v26 }
0x2561   :  { %15728 = vmatmul.mubr.msk.bf16.vlgmr.msra.gmra.mrb[172].mxu0 %vm190_vm0, %v18921_v19 }
0x2562   :  { %15767 = vmatprep.mubr.msk.bf16.mxu0 %vm17233_vm1, %v19724_v26  ;;  %15764 = vmatpush3.bf16.msra.mxu0 %v16769_v34 }
0x2563   :  { %15765 = vmatprep.subr.bf16.mxu0 %v19724_v26 }
0x2566   :  { %15766 = vmatpush3.bf16.msra.mxu0 %v16771_v41 }
0x2567   :  { %15779 = vmatprep.subr.bf16.mxu0 %v19724_v26 }
0x2618   :  { %v19160_v28 = vpop.f32.mrb[208].mxu0  ;;  %v9333_v56 = vpop.f32.mrb[212].mxu1 }
0x2619   :  { %v15705_v29 = vpop.f32.mrb[209].mxu0  ;;  %v15737_v0 = vpop.f32.mrb[213].mxu1  ;;  %v16216_v32 = vadd.f32 %v19169_v12, %v9333_v56 }
0x261a   :  { %v9102_v7 = vpop.f32.mrb[210].mxu0  ;;  %v9336_v19 = vpop.f32.mrb[214].mxu1 }
0x261b   :  { %v15706_v9 = vpop.f32.mrb[211].mxu0  ;;  %v15738_v17 = vpop.f32.mrb[215].mxu1  ;;  %v13546_v58 = vmul.f32 -1.442695, %v16216_v32  ;;  %v16772_v7 = vld [vmem:[%s18115_s12] sm:$0xff]  }
0x261c   :  { %v16773_v9 = vld [vmem:[%s18115_s12 + $0x8] sm:$0xff]   ;;  %v16774_v17 = vld [vmem:[%s17295_s21] sm:$0xff]  }
0x2620   :  { %v9396_v40 = vpop.f32.mrb[4].mxu1 }
0x2621   :  { %v15745_v61 = vpop.f32.mrb[5].mxu1  ;;  %v9397_v44 = vadd.f32 %v19174_v62, %v9396_v40  ;;  %v16775_v40 = vld [vmem:[%s17295_s21 + $0x8] sm:$0xff]  }
0x2622   :  { %v9399_v46 = vpop.f32.mrb[6].mxu1  ;;  %v16776_v61 = vld [vmem:[%s17295_s21 + $0x20] sm:$0xff]  }
0x2623   :  { %v15746_v22 = vpop.f32.mrb[7].mxu1  ;;  %v16777_v46 = vld [vmem:[%s17295_s21 + $0x28] sm:$0xff]  }
0x2624   :  { %v16778_v22 = vld [vmem:[%s18165_s4] sm:$0xff]  }
0x262c   :  { %v9212_v2 = vpop.f32.mrb[168].mxu0 }
0x262d   :  { %v19163_v20 = vadd.f32 %v9212_v2, %v19725_v42  ;;  %v15721_v49 = vpop.f32.mrb[169].mxu0  ;;  %v16779_v2 = vld [vmem:[%s18165_s4 + $0x8] sm:$0xff]   ;;  %v19240_v42 = vld [vmem:[%s18174_s11] sm:$0xff] }
0x262e   :  { %v9215_v13 = vpop.f32.mrb[170].mxu0 }
0x262f   :  { %v15722_v51 = vpop.f32.mrb[171].mxu0 }
0x2634   :  { %v9270_v21 = vpop.f32.mrb[172].mxu0 }
0x2635   :  { %v16215_v23 = vadd.f32 %v9270_v21, %v19166_v38  ;;  %v15729_v36 = vpop.f32.mrb[173].mxu0 }
0x2636   :  { %v9273_v54 = vpop.f32.mrb[174].mxu0 }
0x2637   :  { %v13538_v48 = vmul.f32 -1.442695, %v16215_v23  ;;  %v15730_v14 = vpop.f32.mrb[175].mxu0 }
0x2639   :  { %17106 = vpow2.f32 %v13538_v48 }
0x263a   :  { %17108 = vpow2.f32 %v13546_v58 }
0x2643   :  { %v17107_v63 = vpop.eup %17106 }
0x2644   :  { %v9280_v3 = vadd.f32 1.0, %v17107_v63  ;;  %v17109_v25 = vpop.eup %17108 }
0x2645   :  { %v9343_v47 = vadd.f32 1.0, %v17109_v25 }
0x2646   :  { %17110 = vrcp.f32 %v9280_v3 }
0x2647   :  { %17112 = vrcp.f32 %v9343_v47 }
0x2650   :  { %v17111_v43 = vpop.eup %17110 }
0x2651   :  { %v9402_v57 = vmul.f32 %v17111_v43, %v9397_v44  ;;  %v17113_v8 = vpop.eup %17112  ;;  %v16780_v44 = vld [vmem:[%s17295_s21 + $0x10] sm:$0xff]  }
0x2652   :  { %v9405_v10 = vsub.f32 1.0, %v17113_v8  ;;  %v9407_v24 = vmul.f32 %v17113_v8, %v18917_v6  ;;  %v16770_v6 = vld [vmem:[%s18103_s25 + $0x8] sm:$0xff]  }
0x2653   :  { %v9403_v27 = vadd.f32 %v9402_v57, %v7530_v39  ;;  %v19726_v57 = vld [vmem:[#allocation2_spill] sm:$0xff] }
0x2655   :  { %17114 = vtanh.f32 %v9403_v27 }
0x265f   :  { %v17115_v35 = vpop.eup %17114 }
0x2660   :  { %v9406_v15 = vmul.f32 %v17115_v35, %v9405_v10  ;;  %v16781_v10 = vld [vmem:[%s17295_s21 + $0x18] sm:$0xff]  }
0x2662   :  { %v19183_v5 = vadd.f32 %v9407_v24, %v9406_v15 }
0x2664   :  { %v19187_v45 = vpack.c.bf16 %v19183_v5, %v19183_v5 }
0x2666   :  { %15752 = vmatmul.mubr.msk.bf16.vlgmr.msra.gmra.mrb[8].mxu1 %vm190_vm0, %v19187_v45 }
0x2667   :  { %15759 = vmatprep.mubr.msk.bf16.mxu1 %vm17233_vm1, %v19724_v26  ;;  %15756 = vmatpush3.bf16.msra.mxu1 %v16768_v4 }
0x2668   :  { %15757 = vmatprep.subr.bf16.mxu1 %v19724_v26 }
0x266b   :  { %15758 = vmatpush3.bf16.msra.mxu1 %v16770_v6 }
0x266c   :  { %15771 = vmatprep.subr.bf16.mxu1 %v19724_v26 }
0x2739   :  { %v9464_v31 = vpop.f32.mrb[8].mxu1 }
0x273a   :  { %v9465_v52 = vadd.f32 %v9464_v31, %v19202_v1  ;;  %v15753_v18 = vpop.f32.mrb[9].mxu1 }
0x273b   :  { %v9467_v56 = vpop.f32.mrb[10].mxu1  ;;  %v9709_v18 = vld [vmem:[%s17483_s15] sm:$0xff] }
0x273c   :  { %17116 = vtanh.f32 %v9465_v52  ;;  %v15754_v29 = vpop.f32.mrb[11].mxu1 }
0x2746   :  { %v17117_v0 = vpop.eup %17116 }
0x2747   :  { %v9471_v19 = vpack.c.bf16 %v17117_v0, %v17117_v0 }
0x2749   :  { %15760 = vmatmul.mubr.msk.bf16.vlgmr.msra.gmra.mrb[12].mxu1 %vm190_vm0, %v9471_v19  ;;  %15768 = vmatmul.mubr.msk.bf16.vlgmr.msra.gmra.mrb[212].mxu0 %vm190_vm0, %v9471_v19 }
0x274a   :  { %15772 = vmatpush3.bf16.msra.mxu1 %v16772_v7  ;;  %15775 = vmatprep.mubr.msk.bf16.mxu1 %vm17233_vm1, %v19724_v26  ;;  %v19727_v7 = vld [vmem:[#allocation5_spill] sm:$0xff] }
0x274b   :  { %15773 = vmatprep.subr.bf16.mxu1 %v19724_v26  ;;  %15783 = vmatprep.mubr.msk.bf16.mxu0 %vm17233_vm1, %v19724_v26 }
0x274c   :  { %15780 = vmatpush3.bf16.msra.mxu0 %v16778_v22 }
0x274d   :  { %15781 = vmatprep.subr.bf16.mxu0 %v19724_v26 }
0x274e   :  { %15774 = vmatpush3.bf16.msra.mxu1 %v16773_v9  ;;  %v16782_v9 = vld [vmem:[%s17373_s3] sm:$0xff]  }
0x274f   :  { %15787 = vmatprep.subr.bf16.mxu1 %v19724_v26 }
0x2750   :  { %15782 = vmatpush3.bf16.msra.mxu0 %v16779_v2 }
0x2751   :  { %15776 = vmatmul.mubr.msk.bf16.vlgmr.msra.gmra.mrb[16].mxu1 %vm190_vm0, %v19187_v45  ;;  %15795 = vmatprep.subr.bf16.mxu0 %v19724_v26 }
0x2752   :  { %15788 = vmatpush3.bf16.msra.mxu1 %v16774_v17  ;;  %15791 = vmatprep.mubr.msk.bf16.mxu1 %vm17233_vm1, %v19724_v26 }
0x2753   :  { %15789 = vmatprep.subr.bf16.mxu1 %v19724_v26 }
0x2756   :  { %15790 = vmatpush3.bf16.msra.mxu1 %v16775_v40 }
0x2757   :  { %15803 = vmatprep.subr.bf16.mxu1 %v19724_v26 }
0x2759   :  { %15792 = vmatmul.mubr.msk.bf16.vlgmr.msra.gmra.mrb[20].mxu1 %vm190_vm0, %v18997_v59 }
0x275a   :  { %15804 = vmatpush3.bf16.msra.mxu1 %v16776_v61  ;;  %15807 = vmatprep.mubr.msk.bf16.mxu1 %vm17233_vm1, %v19724_v26 }
0x275b   :  { %15805 = vmatprep.subr.bf16.mxu1 %v19724_v26 }
0x275e   :  { %15806 = vmatpush3.bf16.msra.mxu1 %v16777_v46 }
0x275f   :  { %15819 = vmatprep.subr.bf16.mxu1 %v19724_v26 }
0x2761   :  { %15808 = vmatmul.mubr.msk.bf16.vlgmr.msra.gmra.mrb[24].mxu1 %vm190_vm0, %v18997_v59 }
0x2762   :  { %15823 = vmatprep.mubr.msk.bf16.mxu1 %vm17233_vm1, %v19724_v26 }
0x281c   :  { %v9526_v49 = vpop.f32.mrb[12].mxu1  ;;  %v9587_v13 = vpop.f32.mrb[212].mxu0 }
0x281d   :  { %v9527_v51 = vadd.f32 %v9526_v49, %v19240_v42  ;;  %v15761_v21 = vpop.f32.mrb[13].mxu1  ;;  %v15769_v23 = vpop.f32.mrb[213].mxu0 }
0x281e   :  { %v9529_v36 = vpop.f32.mrb[14].mxu1  ;;  %v9590_v54 = vpop.f32.mrb[214].mxu0 }
0x281f   :  { %17118 = vtanh.f32 %v9527_v51  ;;  %v15762_v48 = vpop.f32.mrb[15].mxu1  ;;  %v15770_v14 = vpop.f32.mrb[215].mxu0 }
0x2824   :  { %v9639_v32 = vpop.f32.mrb[16].mxu1 }
0x2825   :  { %v9640_v58 = vadd.f32 %v9639_v32, %v9587_v13  ;;  %v15777_v63 = vpop.f32.mrb[17].mxu1  ;;  %v19728_v13 = vld [vmem:[#allocation3_spill] sm:$0xff] }
0x2826   :  { %v9642_v3 = vpop.f32.mrb[18].mxu1 }
0x2827   :  { %v15778_v25 = vpop.f32.mrb[19].mxu1 }
0x2829   :  { %v17119_v47 = vpop.eup %17118 }
0x282a   :  { %v9645_v43 = vpack.c.bf16 %v17119_v47, %v17119_v47 }
0x282c   :  { %15784 = vmatmul.mubr.msk.bf16.vlgmr.msra.gmra.mrb[216].mxu0 %vm190_vm0, %v9645_v43  ;;  %v9760_v39 = vpop.f32.mrb[20].mxu1  ;;  %v16785_v43 = vld [vmem:[%s17503_s19 + $0x10] sm:$0xff]  }
0x282d   :  { %v9766_v27 = vadd.f32 %v9760_v39, %v19726_v57  ;;  %15796 = vmatpush3.bf16.msra.mxu0 %v16780_v44  ;;  %v15793_v8 = vpop.f32.mrb[21].mxu1  ;;  %15799 = vmatprep.mubr.msk.bf16.mxu0 %vm17233_vm1, %v19724_v26  ;;  %v16784_v44 = vld [vmem:[%s17503_s19] sm:$0xff]   ;;  %v16787_v39 = vld [vmem:[%s17503_s19 + $0x18] sm:$0xff]  }
0x282e   :  { %v9763_v35 = vpop.f32.mrb[22].mxu1  ;;  %15797 = vmatprep.subr.bf16.mxu0 %v19724_v26  ;;  %15820 = vmatpush3.bf16.msra.mxu1 %v16784_v44  ;;  %v9904_v57 = vld [vmem:[%s17538_s2] sm:$0xff] }
0x282f   :  { %v13572_v24 = vmul.f32 -1.442695, %v9766_v27  ;;  %v15794_v15 = vpop.f32.mrb[23].mxu1  ;;  %15821 = vmatprep.subr.bf16.mxu1 %v19724_v26 }
0x2831   :  { %17120 = vpow2.f32 %v13572_v24  ;;  %15798 = vmatpush3.bf16.msra.mxu0 %v16781_v10 }
0x2832   :  { %15811 = vmatprep.subr.bf16.mxu0 %v19724_v26 }
0x2834   :  { %15800 = vmatmul.mubr.msk.bf16.vlgmr.msra.gmra.mrb[220].mxu0 %vm190_vm0, %v18997_v59  ;;  %v9886_v4 = vpop.f32.mrb[24].mxu1  ;;  %v16783_v59 = vld [vmem:[%s17373_s3 + $0x8] sm:$0xff]  }
0x2835   :  { %v15809_v34 = vpop.f32.mrb[25].mxu1  ;;  %15815 = vmatprep.mubr.msk.bf16.mxu0 %vm17233_vm1, %v19724_v26  ;;  %v9887_v56 = vadd.f32 %v9886_v4, %v9709_v18  ;;  %15812 = vmatpush3.bf16.msra.mxu0 %v16782_v9  ;;  %v16788_v4 = vld [vmem:[%s17503_s19 + $0x20] sm:$0xff]   ;;  %v16799_v9 = vld [vmem:[%s17646_s7 + $0x18] sm:$0xff]  }
0x2836   :  { %v9889_v6 = vpop.f32.mrb[26].mxu1  ;;  %15813 = vmatprep.subr.bf16.mxu0 %v19724_v26  ;;  %v16789_v34 = vld [vmem:[%s17515_s24] sm:$0xff]  }
0x2837   :  { %v15810_v41 = vpop.f32.mrb[27].mxu1  ;;  %v16793_v18 = vld [vmem:[%s17533_s28] sm:$0xff]  }
0x2838   :  { %v16790_v41 = vld [vmem:[%s17503_s19 + $0x28] sm:$0xff]  }
0x2839   :  { %15814 = vmatpush3.bf16.msra.mxu0 %v16783_v59  ;;  %v16800_v59 = vld [vmem:[%s17726_s17] sm:$0xff]  }
0x283a   :  { %15827 = vmatprep.subr.bf16.mxu0 %v19724_v26 }
0x283b   :  { %v17121_v31 = vpop.eup %17120 }
0x283c   :  { %v9770_v52 = vadd.f32 1.0, %v17121_v31  ;;  %v16791_v31 = vld [vmem:[%s17515_s24 + $0x8] sm:$0xff]  }
0x283e   :  { %17122 = vrcp.f32 %v9770_v52  ;;  %v16792_v52 = vld [vmem:[%s17646_s7] sm:$0xff]  }
0x2848   :  { %v17123_v29 = vpop.eup %17122 }
0x2849   :  { %v9892_v0 = vmul.f32 %v17123_v29, %v9887_v56  ;;  %v16794_v56 = vld [vmem:[%s17646_s7 + $0x8] sm:$0xff]  }
0x284a   :  { %v16795_v29 = vld [vmem:[%s17533_s28 + $0x8] sm:$0xff]  }
0x284b   :  { %v9893_v19 = vadd.f32 %v9892_v0, %v19727_v7  ;;  %v16796_v0 = vld [vmem:[%s17646_s7 + $0x20] sm:$0xff]   ;;  %v16797_v7 = vld [vmem:[%s17646_s7 + $0x10] sm:$0xff]  }
0x28ff   :  { %v9699_v17 = vpop.f32.mrb[216].mxu0 }
0x2900   :  { %v9705_v40 = vadd.f32 %v9699_v17, %v9640_v58  ;;  %v15785_v61 = vpop.f32.mrb[217].mxu0  ;;  %v16801_v17 = vld [vmem:[%s17726_s17 + $0x8] sm:$0xff]  }
0x2901   :  { %v9702_v46 = vpop.f32.mrb[218].mxu0 }
0x2902   :  { %v9707_v22 = vadd.f32 %v18909_v60, %v9705_v40  ;;  %v15786_v2 = vpop.f32.mrb[219].mxu0 }
0x2904   :  { %9708 = vst [vmem:[%s18204_s30 + $0x20] sm:$0xff] %v9707_v22 }
0x2907   :  { %v9823_v49 = vpop.f32.mrb[220].mxu0 }
0x2908   :  { %v9829_v51 = vadd.f32 %v9823_v49, %v19728_v13  ;;  %v15801_v21 = vpop.f32.mrb[221].mxu0 }
0x2909   :  { %v9826_v23 = vpop.f32.mrb[222].mxu0 }
0x290a   :  { %v13580_v36 = vmul.f32 -1.442695, %v9829_v51  ;;  %v15802_v54 = vpop.f32.mrb[223].mxu0 }
0x290c   :  { %17124 = vpow2.f32 %v13580_v36 }
0x2916   :  { %v17125_v48 = vpop.eup %17124 }
0x2917   :  { %v9833_v14 = vadd.f32 1.0, %v17125_v48 }
0x2919   :  { %17126 = vrcp.f32 %v9833_v14 }
0x291a   :  { %17128 = vtanh.f32 %v9893_v19  ;;  %v16798_v19 = vld [vmem:[%s17646_s7 + $0x28] sm:$0xff]  }
0x2923   :  { %v17127_v32 = vpop.eup %17126 }
0x2924   :  { %v9895_v60 = vsub.f32 1.0, %v17127_v32  ;;  %v17129_v58 = vpop.eup %17128  ;;  %v9897_v3 = vmul.f32 %v17127_v32, %v18993_v11  ;;  %v16786_v11 = vld [vmem:[%s17503_s19 + $0x8] sm:$0xff]  }
0x2925   :  { %15822 = vmatpush3.bf16.msra.mxu1 %v16786_v11 }
0x2926   :  { %v9896_v63 = vmul.f32 %v17129_v58, %v9895_v60  ;;  %15835 = vmatprep.subr.bf16.mxu1 %v19724_v26 }
0x2928   :  { %v9898_v25 = vadd.f32 %v9897_v3, %v9896_v63 }
0x292a   :  { %v19265_v47 = vpack.c.bf16 %v9898_v25, %v9898_v25 }
0x292c   :  { %15816 = vmatmul.mubr.msk.bf16.vlgmr.msra.gmra.mrb[224].mxu0 %vm190_vm0, %v19265_v47 }
0x292d   :  { %15831 = vmatprep.mubr.msk.bf16.mxu0 %vm17233_vm1, %v19724_v26  ;;  %15828 = vmatpush3.bf16.msra.mxu0 %v16785_v43 }
0x292e   :  { %15829 = vmatprep.subr.bf16.mxu0 %v19724_v26 }
0x2931   :  { %15830 = vmatpush3.bf16.msra.mxu0 %v16787_v39 }
0x2932   :  { %15843 = vmatprep.subr.bf16.mxu0 %v19724_v26 }
0x29ff   :  { %v9954_v27 = vpop.f32.mrb[224].mxu0 }
0x2a00   :  { %v9955_v8 = vadd.f32 %v9954_v27, %v9904_v57  ;;  %v15817_v10 = vpop.f32.mrb[225].mxu0 }
0x2a01   :  { %v9957_v35 = vpop.f32.mrb[226].mxu0 }
0x2a02   :  { %17130 = vtanh.f32 %v9955_v8  ;;  %v15818_v24 = vpop.f32.mrb[227].mxu0 }
0x2a0c   :  { %v17131_v15 = vpop.eup %17130 }
0x2a0d   :  { %v9961_v6 = vpack.c.bf16 %v17131_v15, %v17131_v15 }
0x2a0f   :  { %15824 = vmatmul.mubr.msk.bf16.vlgmr.msra.gmra.mrb[36].mxu1 %vm190_vm0, %v9961_v6  ;;  %15832 = vmatmul.mubr.msk.bf16.vlgmr.msra.gmra.mrb[228].mxu0 %vm190_vm0, %v9961_v6 }
0x2a10   :  { %15836 = vmatpush3.bf16.msra.mxu1 %v16788_v4  ;;  %15844 = vmatpush3.bf16.msra.mxu0 %v16789_v34 }
0x2a11   :  { %15837 = vmatprep.subr.bf16.mxu1 %v19724_v26  ;;  %15845 = vmatprep.subr.bf16.mxu0 %v19724_v26 }
0x2a12   :  { %15839 = vmatprep.mubr.msk.bf16.mxu1 %vm17233_vm1, %v19724_v26  ;;  %15847 = vmatprep.mubr.msk.bf16.mxu0 %vm17233_vm1, %v19724_v26 }
0x2a14   :  { %15838 = vmatpush3.bf16.msra.mxu1 %v16790_v41  ;;  %15846 = vmatpush3.bf16.msra.mxu0 %v16791_v31  ;;  %v19366_v41 = vld [vmem:[%s17811_s16] sm:$0xff] }
0x2a15   :  { %15859 = vmatprep.subr.bf16.mxu1 %v19724_v26  ;;  %15851 = vmatprep.subr.bf16.mxu0 %v19724_v26 }
0x2a17   :  { %15840 = vmatmul.mubr.msk.bf16.vlgmr.msra.gmra.mrb[44].mxu1 %vm190_vm0, %v9961_v6  ;;  %15848 = vmatmul.mubr.msk.bf16.vlgmr.msra.gmra.mrb[232].mxu0 %vm190_vm0, %v9961_v6  ;;  %v16805_v6 = vld [vmem:[%s17776_s29 + $0x18] sm:$0xff]  }
0x2a18   :  { %15860 = vmatpush3.bf16.msra.mxu1 %v16792_v52  ;;  %15852 = vmatpush3.bf16.msra.mxu0 %v16793_v18 }
0x2a19   :  { %15861 = vmatprep.subr.bf16.mxu1 %v19724_v26  ;;  %15853 = vmatprep.subr.bf16.mxu0 %v19724_v26 }
0x2a1a   :  { %15863 = vmatprep.mubr.msk.bf16.mxu1 %vm17233_vm1, %v19724_v26  ;;  %15855 = vmatprep.mubr.msk.bf16.mxu0 %vm17233_vm1, %v19724_v26 }
0x2a1c   :  { %15862 = vmatpush3.bf16.msra.mxu1 %v16794_v56  ;;  %15854 = vmatpush3.bf16.msra.mxu0 %v16795_v29 }
0x2a1d   :  { %15875 = vmatprep.subr.bf16.mxu1 %v19724_v26  ;;  %15867 = vmatprep.subr.bf16.mxu0 %v19724_v26 }
0x2a1f   :  { %15864 = vmatmul.mubr.msk.bf16.vlgmr.msra.gmra.mrb[240].mxu1 %vm190_vm0, %v19089_v16 }
0x2a20   :  { %15876 = vmatpush3.bf16.msra.mxu1 %v16796_v0  ;;  %15879 = vmatprep.mubr.msk.bf16.mxu1 %vm17233_vm1, %v19724_v26 }
0x2a21   :  { %15877 = vmatprep.subr.bf16.mxu1 %v19724_v26 }
0x2a23   :  { %15856 = vmatmul.mubr.msk.bf16.vlgmr.msra.gmra.mrb[232].mxu0 %vm190_vm0, %v19265_v47 }
0x2a24   :  { %15868 = vmatpush3.bf16.msra.mxu0 %v16797_v7  ;;  %15878 = vmatpush3.bf16.msra.mxu1 %v16798_v19  ;;  %v16806_v7 = vld [vmem:[%s17776_s29 + $0x20] sm:$0xff]   ;;  %v16807_v19 = vld [vmem:[%s18006_s22 + $0x10] sm:$0xff]  }
0x2a25   :  { %15869 = vmatprep.subr.bf16.mxu0 %v19724_v26  ;;  %15871 = vmatprep.mubr.msk.bf16.mxu0 %vm17233_vm1, %v19724_v26 }
0x2a26   :  { %15883 = vmatprep.subr.bf16.mxu1 %v19724_v26 }
0x2a27   :  { %15880 = vmatmul.mubr.msk.bf16.vlgmr.msra.gmra.mrb[28].mxu1 %vm190_vm0, %v19089_v16 }
0x2a28   :  { %15870 = vmatpush3.bf16.msra.mxu0 %v16799_v9  ;;  %15887 = vmatprep.mubr.msk.bf16.mxu1 %vm17233_vm1, %v19724_v26 }
0x2a29   :  { %15891 = vmatprep.subr.bf16.mxu0 %v19724_v26  ;;  %15884 = vmatpush3.bf16.msra.mxu1 %v16800_v59  ;;  %v16808_v59 = vld [vmem:[%s17776_s29 + $0x28] sm:$0xff]  }
0x2a2a   :  { %15885 = vmatprep.subr.bf16.mxu1 %v19724_v26 }
0x2a2b   :  { %15872 = vmatmul.mubr.msk.bf16.vlgmr.msra.gmra.mrb[196].mxu0 %vm190_vm0, %v19089_v16 }
0x2a2c   :  { %15895 = vmatprep.mubr.msk.bf16.mxu0 %vm17233_vm1, %v19724_v26 }
0x2a2d   :  { %15886 = vmatpush3.bf16.msra.mxu1 %v16801_v17  ;;  %v16809_v17 = vld [vmem:[%s18006_s22 + $0x18] sm:$0xff]  }
0x2a2e   :  { %15899 = vmatprep.subr.bf16.mxu1 %v19724_v26 }
0x2aea   :  { %v19336_v40 = vpop.f32.mrb[44].mxu1 }
0x2aeb   :  { %v15841_v61 = vpop.f32.mrb[45].mxu1 }
0x2aec   :  { %v10133_v46 = vpop.f32.mrb[46].mxu1  ;;  %v16810_v61 = vld [vmem:[%s17788_s5] sm:$0xff]  }
0x2aed   :  { %v15842_v22 = vpop.f32.mrb[47].mxu1  ;;  %v16811_v46 = vld [vmem:[%s18006_s22 + $0x20] sm:$0xff]  }
0x2aee   :  { %v16812_v22 = vld [vmem:[%s17788_s5 + $0x8] sm:$0xff]  }
0x2af2   :  { %v10299_v2 = vpop.f32.mrb[240].mxu1 }
0x2af3   :  { %v16217_v49 = vadd.f32 %v10299_v2, %v19071_v53  ;;  %v15865_v16 = vpop.f32.mrb[241].mxu1  ;;  %v19341_v53 = vld [vmem:[%s17743_s23 + $0x18] sm:$0xff]  ;;  %v16813_v2 = vld [vmem:[%s18006_s22 + $0x28] sm:$0xff]  }
0x2af4   :  { %v10302_v13 = vpop.f32.mrb[242].mxu1  ;;  %v16815_v16 = vld [vmem:[%s17806_s10 + $0x8] sm:$0xff]  }
0x2af5   :  { %v13620_v51 = vmul.f32 -1.442695, %v16217_v49  ;;  %v15866_v21 = vpop.f32.mrb[243].mxu1  ;;  %v16814_v49 = vld [vmem:[%s17806_s10] sm:$0xff]  }
0x2af6   :  { %v16816_v13 = vld [vmem:[%s18006_s22] sm:$0xff]  }
0x2af7   :  { %17132 = vpow2.f32 %v13620_v51  ;;  %v16817_v51 = vld [vmem:[%s18006_s22 + $0x8] sm:$0xff]   ;;  %v16818_v21 = vld [vmem:[%s18068_s8] sm:$0xff]  }
0x2afa   :  { %v10425_v23 = vpop.f32.mrb[28].mxu1 }
0x2afb   :  { %v15881_v36 = vpop.f32.mrb[29].mxu1  ;;  %v10426_v43 = vadd.f32 %v19341_v53, %v10425_v23  ;;  %v16819_v23 = vld [vmem:[%s18068_s8 + $0x8] sm:$0xff]  }
0x2afc   :  { %v10428_v54 = vpop.f32.mrb[30].mxu1 }
0x2afd   :  { %v15882_v48 = vpop.f32.mrb[31].mxu1 }
0x2afe   :  { %v10362_v14 = vpop.f32.mrb[196].mxu0 }
0x2aff   :  { %v16218_v32 = vadd.f32 %v19075_v55, %v10362_v14  ;;  %v15873_v60 = vpop.f32.mrb[197].mxu0  ;;  %v8561_v55 = vadd.f32 %v19079_v37, %v19068_v33  ;;  %v16802_v33 = vld [vmem:[%s17776_s29] sm:$0xff]   ;;  %v16803_v37 = vld [vmem:[%s17776_s29 + $0x10] sm:$0xff]  }
0x2b00   :  { %v10365_v58 = vpop.f32.mrb[198].mxu0  ;;  %15892 = vmatpush3.bf16.msra.mxu0 %v16802_v33 }
0x2b01   :  { %v17133_v63 = vpop.eup %17132  ;;  %v13628_v3 = vmul.f32 -1.442695, %v16218_v32  ;;  %v15874_v25 = vpop.f32.mrb[199].mxu0  ;;  %15893 = vmatprep.subr.bf16.mxu0 %v19724_v26 }
0x2b02   :  { %v10309_v47 = vadd.f32 1.0, %v17133_v63 }
0x2b03   :  { %17134 = vpow2.f32 %v13628_v3 }
0x2b04   :  { %17136 = vrcp.f32 %v10309_v47 }
0x2b0d   :  { %v17135_v44 = vpop.eup %17134 }
0x2b0e   :  { %v17137_v11 = vpop.eup %17136  ;;  %v10372_v39 = vadd.f32 1.0, %v17135_v44 }
0x2b0f   :  { %v10431_v57 = vmul.f32 %v17137_v11, %v10426_v43  ;;  %v19729_v43 = vld [vmem:[#allocation4_spill] sm:$0xff] }
0x2b10   :  { %17138 = vrcp.f32 %v10372_v39 }
0x2b11   :  { %v10432_v27 = vadd.f32 %v10431_v57, %v8561_v55 }
0x2b13   :  { %17140 = vtanh.f32 %v10432_v27 }
0x2b1a   :  { %v17139_v8 = vpop.eup %17138 }
0x2b1b   :  { %v10434_v10 = vsub.f32 1.0, %v17139_v8  ;;  %v10436_v15 = vmul.f32 %v17139_v8, %v19085_v30  ;;  %v16804_v30 = vld [vmem:[%s17776_s29 + $0x8] sm:$0xff]  }
0x2b1c   :  { %15894 = vmatpush3.bf16.msra.mxu0 %v16804_v30 }
0x2b1d   :  { %v17141_v35 = vpop.eup %17140  ;;  %15907 = vmatprep.subr.bf16.mxu0 %v19724_v26 }
0x2b1e   :  { %v10435_v24 = vmul.f32 %v17141_v35, %v10434_v10 }
0x2b20   :  { %v19347_v4 = vadd.f32 %v10436_v15, %v10435_v24 }
0x2b22   :  { %v19351_v34 = vpack.c.bf16 %v19347_v4, %v19347_v4 }
0x2b24   :  { %15888 = vmatmul.mubr.msk.bf16.vlgmr.msra.gmra.mrb[48].mxu1 %vm190_vm0, %v19351_v34 }
0x2b25   :  { %15903 = vmatprep.mubr.msk.bf16.mxu1 %vm17233_vm1, %v19724_v26  ;;  %15900 = vmatpush3.bf16.msra.mxu1 %v16803_v37 }
0x2b26   :  { %15901 = vmatprep.subr.bf16.mxu1 %v19724_v26 }
0x2b29   :  { %15902 = vmatpush3.bf16.msra.mxu1 %v16805_v6 }
0x2b2a   :  { %15939 = vmatprep.subr.bf16.mxu1 %v19724_v26 }
0x2bf7   :  { %v10493_v31 = vpop.f32.mrb[48].mxu1 }
0x2bf8   :  { %v10494_v52 = vadd.f32 %v10493_v31, %v19366_v41  ;;  %v15889_v18 = vpop.f32.mrb[49].mxu1 }
0x2bf9   :  { %v10496_v56 = vpop.f32.mrb[50].mxu1 }
0x2bfa   :  { %17142 = vtanh.f32 %v10494_v52  ;;  %v15890_v29 = vpop.f32.mrb[51].mxu1 }
0x2c04   :  { %v17143_v0 = vpop.eup %17142 }
0x2c05   :  { %v10500_v9 = vpack.c.bf16 %v17143_v0, %v17143_v0 }
0x2c07   :  { %15896 = vmatmul.mubr.msk.bf16.vlgmr.msra.gmra.mrb[236].mxu0 %vm190_vm0, %v10500_v9  ;;  %15904 = vmatmul.mubr.msk.bf16.vlgmr.msra.gmra.mrb[52].mxu1 %vm190_vm0, %v10500_v9 }
0x2c08   :  { %15908 = vmatpush3.bf16.msra.mxu0 %v16806_v7  ;;  %15940 = vmatpush3.bf16.msra.mxu1 %v16807_v19 }
0x2c09   :  { %15909 = vmatprep.subr.bf16.mxu0 %v19724_v26  ;;  %15941 = vmatprep.subr.bf16.mxu1 %v19724_v26 }
0x2c0a   :  { %15911 = vmatprep.mubr.msk.bf16.mxu0 %vm17233_vm1, %v19724_v26  ;;  %15943 = vmatprep.mubr.msk.bf16.mxu1 %vm17233_vm1, %v19724_v26 }
0x2c0c   :  { %15910 = vmatpush3.bf16.msra.mxu0 %v16808_v59  ;;  %15942 = vmatpush3.bf16.msra.mxu1 %v16809_v17 }
0x2c0d   :  { %15915 = vmatprep.subr.bf16.mxu0 %v19724_v26  ;;  %15947 = vmatprep.subr.bf16.mxu1 %v19724_v26 }
0x2c0f   :  { %15912 = vmatmul.mubr.msk.bf16.vlgmr.msra.gmra.mrb[240].mxu0 %vm190_vm0, %v10500_v9  ;;  %15944 = vmatmul.mubr.msk.bf16.vlgmr.msra.gmra.mrb[0].mxu1 %vm190_vm0, %v19187_v45 }
0x2c10   :  { %15916 = vmatpush3.bf16.msra.mxu0 %v16810_v61  ;;  %15948 = vmatpush3.bf16.msra.mxu1 %v16811_v46  ;;  %v16823_v61 = vld [vmem:[%s18108_s1 + $0x8] sm:$0xff]  }
0x2c11   :  { %15917 = vmatprep.subr.bf16.mxu0 %v19724_v26  ;;  %15949 = vmatprep.subr.bf16.mxu1 %v19724_v26 }
0x2c12   :  { %15919 = vmatprep.mubr.msk.bf16.mxu0 %vm17233_vm1, %v19724_v26  ;;  %15951 = vmatprep.mubr.msk.bf16.mxu1 %vm17233_vm1, %v19724_v26 }
0x2c14   :  { %15918 = vmatpush3.bf16.msra.mxu0 %v16812_v22  ;;  %15950 = vmatpush3.bf16.msra.mxu1 %v16813_v2 }
0x2c15   :  { %15923 = vmatprep.subr.bf16.mxu0 %v19724_v26  ;;  %15955 = vmatprep.subr.bf16.mxu1 %v19724_v26 }
0x2c17   :  { %15920 = vmatmul.mubr.msk.bf16.vlgmr.msra.gmra.mrb[200].mxu0 %vm190_vm0, %v19351_v34  ;;  %15952 = vmatmul.mubr.msk.bf16.vlgmr.msra.gmra.mrb[32].mxu1 %vm190_vm0, %v19187_v45 }
0x2c18   :  { %15924 = vmatpush3.bf16.msra.mxu0 %v16814_v49  ;;  %15927 = vmatprep.mubr.msk.bf16.mxu0 %vm17233_vm1, %v19724_v26 }
0x2c19   :  { %15925 = vmatprep.subr.bf16.mxu0 %v19724_v26  ;;  %15959 = vmatprep.mubr.msk.bf16.mxu1 %vm17233_vm1, %v19724_v26 }
0x2c1a   :  { %15956 = vmatpush3.bf16.msra.mxu1 %v16818_v21 }
0x2c1b   :  { %15957 = vmatprep.subr.bf16.mxu1 %v19724_v26 }
0x2c1c   :  { %15926 = vmatpush3.bf16.msra.mxu0 %v16815_v16 }
0x2c1d   :  { %15931 = vmatprep.subr.bf16.mxu0 %v19724_v26 }
0x2c1e   :  { %15958 = vmatpush3.bf16.msra.mxu1 %v16819_v23  ;;  %v16825_v23 = vld [vmem:[%s18115_s12 + $0x8] sm:$0xff]  }
0x2c1f   :  { %15963 = vmatprep.subr.bf16.mxu1 %v19724_v26 }
0x2c23   :  { %15928 = vmatmul.mubr.msk.bf16.vlgmr.msra.gmra.mrb[200].mxu0 %vm190_vm0, %v10500_v9 }
0x2c24   :  { %15932 = vmatpush3.bf16.msra.mxu0 %v16816_v13  ;;  %15935 = vmatprep.mubr.msk.bf16.mxu0 %vm17233_vm1, %v19724_v26 }
0x2c25   :  { %15933 = vmatprep.subr.bf16.mxu0 %v19724_v26 }
0x2c28   :  { %15934 = vmatpush3.bf16.msra.mxu0 %v16817_v51  ;;  %v16824_v51 = vld [vmem:[%s18115_s12] sm:$0xff]  }
0x2c29   :  { %15971 = vmatprep.subr.bf16.mxu0 %v19724_v26 }
0x2c2b   :  { %15936 = vmatmul.mubr.msk.bf16.vlgmr.msra.gmra.mrb[204].mxu0 %vm190_vm0, %v19187_v45 }
0x2c2c   :  { %15975 = vmatprep.mubr.msk.bf16.mxu0 %vm17233_vm1, %v19724_v26 }
0x2ce2   :  { %v19425_v36 = vpop.f32.mrb[240].mxu0  ;;  %v10903_v54 = vpop.f32.mrb[0].mxu1 }
0x2ce3   :  { %v15913_v48 = vpop.f32.mrb[241].mxu0  ;;  %v15945_v14 = vpop.f32.mrb[1].mxu1  ;;  %v16220_v33 = vadd.f32 %v19169_v12, %v10903_v54  ;;  %v16827_v54 = vld [vmem:[%s17646_s7 + $0x8] sm:$0xff]  }
0x2ce4   :  { %v10672_v32 = vpop.f32.mrb[242].mxu0  ;;  %v10906_v60 = vpop.f32.mrb[2].mxu1  ;;  %v16828_v48 = vld [vmem:[%s17646_s7 + $0x20] sm:$0xff]   ;;  %v16829_v14 = vld [vmem:[%s17646_s7 + $0x28] sm:$0xff]  }
0x2ce5   :  { %v15914_v58 = vpop.f32.mrb[243].mxu0  ;;  %v15946_v45 = vpop.f32.mrb[3].mxu1  ;;  %v13676_v37 = vmul.f32 -1.442695, %v16220_v33  ;;  %v16830_v32 = vld [vmem:[%s18165_s4] sm:$0xff]   ;;  %v16831_v60 = vld [vmem:[%s18165_s4 + $0x8] sm:$0xff]  }
0x2ce6   :  { %v9966_v33 = vld [vmem:[%s17743_s23] sm:$0xff] }
0x2cea   :  { %v10966_v63 = vpop.f32.mrb[32].mxu1 }
0x2ceb   :  { %v15953_v3 = vpop.f32.mrb[33].mxu1  ;;  %v10967_v18 = vadd.f32 %v19174_v62, %v10966_v63 }
0x2cec   :  { %v10969_v25 = vpop.f32.mrb[34].mxu1 }
0x2ced   :  { %v15954_v47 = vpop.f32.mrb[35].mxu1 }
0x2cf6   :  { %v10782_v44 = vpop.f32.mrb[200].mxu0 }
0x2cf7   :  { %v19428_v11 = vadd.f32 %v10782_v44, %v19729_v43  ;;  %v15929_v39 = vpop.f32.mrb[201].mxu0 }
0x2cf8   :  { %v10785_v55 = vpop.f32.mrb[202].mxu0 }
0x2cf9   :  { %v15930_v57 = vpop.f32.mrb[203].mxu0 }
0x2cfe   :  { %v10840_v27 = vpop.f32.mrb[204].mxu0 }
0x2cff   :  { %v16219_v8 = vadd.f32 %v10840_v27, %v19166_v38  ;;  %v15937_v10 = vpop.f32.mrb[205].mxu0  ;;  %v9100_v38 = vadd.f32 %v19177_v50, %v19160_v28  ;;  %v16820_v28 = vld [vmem:[%s18103_s25] sm:$0xff]  }
0x2d00   :  { %v10843_v35 = vpop.f32.mrb[206].mxu0  ;;  %v16821_v50 = vld [vmem:[%s18108_s1] sm:$0xff]  }
0x2d01   :  { %v13668_v24 = vmul.f32 -1.442695, %v16219_v8  ;;  %v15938_v15 = vpop.f32.mrb[207].mxu0  ;;  %15972 = vmatpush3.bf16.msra.mxu0 %v16821_v50 }
0x2d02   :  { %15973 = vmatprep.subr.bf16.mxu0 %v19724_v26 }
0x2d03   :  { %17144 = vpow2.f32 %v13668_v24  ;;  %v16832_v24 = vld [vmem:[%s17646_s7 + $0x10] sm:$0xff]  }
0x2d04   :  { %17146 = vpow2.f32 %v13676_v37 }
0x2d05   :  { %15974 = vmatpush3.bf16.msra.mxu0 %v16823_v61  ;;  %v16835_v61 = vld [vmem:[%s17726_s17 + $0x8] sm:$0xff]  }
0x2d06   :  { %15987 = vmatprep.subr.bf16.mxu0 %v19724_v26 }
0x2d0d   :  { %v17145_v30 = vpop.eup %17144 }
0x2d0e   :  { %v10850_v6 = vadd.f32 1.0, %v17145_v30  ;;  %v17147_v31 = vpop.eup %17146 }
0x2d0f   :  { %v10913_v52 = vadd.f32 1.0, %v17147_v31 }
0x2d10   :  { %17148 = vrcp.f32 %v10850_v6  ;;  %v16833_v6 = vld [vmem:[%s17646_s7 + $0x18] sm:$0xff]  }
0x2d11   :  { %17150 = vrcp.f32 %v10913_v52 }
0x2d1a   :  { %v17149_v56 = vpop.eup %17148 }
0x2d1b   :  { %v10972_v29 = vmul.f32 %v17149_v56, %v10967_v18  ;;  %v17151_v12 = vpop.eup %17150 }
0x2d1c   :  { %v10975_v7 = vsub.f32 1.0, %v17151_v12  ;;  %v10977_v9 = vmul.f32 %v17151_v12, %v19183_v5  ;;  %v16822_v5 = vld [vmem:[%s18103_s25 + $0x8] sm:$0xff]  }
0x2d1d   :  { %v10973_v0 = vadd.f32 %v10972_v29, %v9100_v38 }
0x2d1f   :  { %17152 = vtanh.f32 %v10973_v0 }
0x2d29   :  { %v17153_v19 = vpop.eup %17152 }
0x2d2a   :  { %v10976_v59 = vmul.f32 %v17153_v19, %v10975_v7  ;;  %v13606_v19 = vld [vmem:[%s17743_s23 + $0x10] sm:$0xff] }
0x2d2c   :  { %v19436_v17 = vadd.f32 %v10977_v9, %v10976_v59 }
0x2d2e   :  { %v19440_v62 = vpack.c.bf16 %v19436_v17, %v19436_v17 }
0x2d30   :  { %15960 = vmatmul.mubr.msk.bf16.vlgmr.msra.gmra.mrb[60].mxu1 %vm190_vm0, %v19440_v62 }
0x2d31   :  { %15967 = vmatprep.mubr.msk.bf16.mxu1 %vm17233_vm1, %v19724_v26  ;;  %15964 = vmatpush3.bf16.msra.mxu1 %v16820_v28  ;;  %v10131_v28 = vadd.f32 %v13606_v19, %v19336_v40  ;;  %v13598_v40 = vld [vmem:[%s17743_s23 + $0x8] sm:$0xff] }
0x2d32   :  { %15965 = vmatprep.subr.bf16.mxu1 %v19724_v26 }
0x2d35   :  { %15966 = vmatpush3.bf16.msra.mxu1 %v16822_v5  ;;  %v16834_v5 = vld [vmem:[%s17726_s17] sm:$0xff]  }
0x2d36   :  { %15979 = vmatprep.subr.bf16.mxu1 %v19724_v26 }
0x2e03   :  { %v11034_v46 = vpop.f32.mrb[60].mxu1 }
0x2e04   :  { %v11035_v22 = vadd.f32 %v11034_v46, %v19202_v1  ;;  %v15961_v2 = vpop.f32.mrb[61].mxu1  ;;  %v16826_v1 = vld [vmem:[%s17646_s7] sm:$0xff]  }
0x2e05   :  { %v11037_v49 = vpop.f32.mrb[62].mxu1 }
0x2e06   :  { %17154 = vtanh.f32 %v11035_v22  ;;  %v15962_v16 = vpop.f32.mrb[63].mxu1 }
0x2e10   :  { %v17155_v13 = vpop.eup %17154 }
0x2e11   :  { %v11041_v21 = vpack.c.bf16 %v17155_v13, %v17155_v13 }
0x2e13   :  { %15968 = vmatmul.mubr.msk.bf16.vlgmr.msra.gmra.mrb[68].mxu1 %vm190_vm0, %v11041_v21  ;;  %15976 = vmatmul.mubr.msk.bf16.vlgmr.msra.gmra.mrb[244].mxu0 %vm190_vm0, %v11041_v21 }
0x2e14   :  { %15980 = vmatpush3.bf16.msra.mxu1 %v16824_v51  ;;  %15983 = vmatprep.mubr.msk.bf16.mxu1 %vm17233_vm1, %v19724_v26 }
0x2e15   :  { %15981 = vmatprep.subr.bf16.mxu1 %v19724_v26  ;;  %15991 = vmatprep.mubr.msk.bf16.mxu0 %vm17233_vm1, %v19724_v26 }
0x2e16   :  { %15988 = vmatpush3.bf16.msra.mxu0 %v16830_v32 }
0x2e17   :  { %15989 = vmatprep.subr.bf16.mxu0 %v19724_v26 }
0x2e18   :  { %15982 = vmatpush3.bf16.msra.mxu1 %v16825_v23 }
0x2e19   :  { %15995 = vmatprep.subr.bf16.mxu1 %v19724_v26 }
0x2e1a   :  { %15990 = vmatpush3.bf16.msra.mxu0 %v16831_v60 }
0x2e1b   :  { %15984 = vmatmul.mubr.msk.bf16.vlgmr.msra.gmra.mrb[40].mxu1 %vm190_vm0, %v19440_v62  ;;  %16003 = vmatprep.subr.bf16.mxu0 %v19724_v26 }
0x2e1c   :  { %15996 = vmatpush3.bf16.msra.mxu1 %v16826_v1  ;;  %15999 = vmatprep.mubr.msk.bf16.mxu1 %vm17233_vm1, %v19724_v26 }
0x2e1d   :  { %15997 = vmatprep.subr.bf16.mxu1 %v19724_v26 }
0x2e20   :  { %15998 = vmatpush3.bf16.msra.mxu1 %v16827_v54 }
0x2e21   :  { %16011 = vmatprep.subr.bf16.mxu1 %v19724_v26 }
0x2e23   :  { %16000 = vmatmul.mubr.msk.bf16.vlgmr.msra.gmra.mrb[36].mxu1 %vm190_vm0, %v19351_v34 }
0x2e24   :  { %16012 = vmatpush3.bf16.msra.mxu1 %v16828_v48  ;;  %16015 = vmatprep.mubr.msk.bf16.mxu1 %vm17233_vm1, %v19724_v26 }
0x2e25   :  { %16013 = vmatprep.subr.bf16.mxu1 %v19724_v26 }
0x2e28   :  { %16014 = vmatpush3.bf16.msra.mxu1 %v16829_v14 }
0x2e29   :  { %16027 = vmatprep.subr.bf16.mxu1 %v19724_v26 }
0x2e2b   :  { %16016 = vmatmul.mubr.msk.bf16.vlgmr.msra.gmra.mrb[72].mxu1 %vm190_vm0, %v19351_v34 }
0x2e2c   :  { %16031 = vmatprep.mubr.msk.bf16.mxu1 %vm17233_vm1, %v19724_v26 }
0x2ee6   :  { %v11096_v58 = vpop.f32.mrb[68].mxu1  ;;  %v11157_v45 = vpop.f32.mrb[244].mxu0 }
0x2ee7   :  { %v11097_v63 = vadd.f32 %v11096_v58, %v19240_v42  ;;  %v15969_v3 = vpop.f32.mrb[69].mxu1  ;;  %v15977_v25 = vpop.f32.mrb[245].mxu0 }
0x2ee8   :  { %v11099_v47 = vpop.f32.mrb[70].mxu1  ;;  %v11160_v44 = vpop.f32.mrb[246].mxu0  ;;  %v16836_v25 = vld [vmem:[%s17776_s29 + $0x10] sm:$0xff]  }
0x2ee9   :  { %17156 = vtanh.f32 %v11097_v63  ;;  %v15970_v43 = vpop.f32.mrb[71].mxu1  ;;  %v15978_v39 = vpop.f32.mrb[247].mxu0  ;;  %v16837_v47 = vld [vmem:[%s17776_s29] sm:$0xff]   ;;  %v16838_v44 = vld [vmem:[%s17776_s29 + $0x18] sm:$0xff]  }
0x2eea   :  { %16028 = vmatpush3.bf16.msra.mxu1 %v16837_v47  ;;  %v16839_v43 = vld [vmem:[%s17776_s29 + $0x8] sm:$0xff]  }
0x2eeb   :  { %16029 = vmatprep.subr.bf16.mxu1 %v19724_v26 }
0x2eee   :  { %v11209_v55 = vpop.f32.mrb[40].mxu1  ;;  %16030 = vmatpush3.bf16.msra.mxu1 %v16839_v43 }
0x2eef   :  { %v11210_v57 = vadd.f32 %v11209_v55, %v11157_v45  ;;  %v15985_v27 = vpop.f32.mrb[41].mxu1  ;;  %16043 = vmatprep.subr.bf16.mxu1 %v19724_v26 }
0x2ef0   :  { %v11212_v8 = vpop.f32.mrb[42].mxu1 }
0x2ef1   :  { %v15986_v10 = vpop.f32.mrb[43].mxu1 }
0x2ef2   :  { %v16840_v10 = vld [vmem:[%s17788_s5] sm:$0xff]  }
0x2ef3   :  { %v17157_v35 = vpop.eup %17156 }
0x2ef4   :  { %v11215_v15 = vpack.c.bf16 %v17157_v35, %v17157_v35  ;;  %v16841_v35 = vld [vmem:[%s17776_s29 + $0x20] sm:$0xff]  }
0x2ef6   :  { %15992 = vmatmul.mubr.msk.bf16.vlgmr.msra.gmra.mrb[248].mxu0 %vm190_vm0, %v11215_v15  ;;  %v11330_v42 = vpop.f32.mrb[36].mxu1  ;;  %v16842_v15 = vld [vmem:[%s17788_s5 + $0x8] sm:$0xff]  }
0x2ef7   :  { %v16221_v37 = vadd.f32 %v11330_v42, %v9966_v33  ;;  %16004 = vmatpush3.bf16.msra.mxu0 %v16832_v24  ;;  %v16001_v30 = vpop.f32.mrb[37].mxu1  ;;  %16007 = vmatprep.mubr.msk.bf16.mxu0 %vm17233_vm1, %v19724_v26  ;;  %v16843_v33 = vld [vmem:[%s17776_s29 + $0x28] sm:$0xff]   ;;  %v16845_v42 = vld [vmem:[%s18006_s22 + $0x10] sm:$0xff]  }
0x2ef8   :  { %v11333_v31 = vpop.f32.mrb[38].mxu1  ;;  %16005 = vmatprep.subr.bf16.mxu0 %v19724_v26  ;;  %v16847_v30 = vld [vmem:[%s17806_s10 + $0x8] sm:$0xff]  }
0x2ef9   :  { %v13703_v52 = vmul.f32 -1.442695, %v16221_v37  ;;  %v16002_v18 = vpop.f32.mrb[39].mxu1  ;;  %v16846_v37 = vld [vmem:[%s18006_s22 + $0x18] sm:$0xff]   ;;  %v16849_v31 = vld [vmem:[%s18006_s22] sm:$0xff]  }
0x2efa   :  { %v16851_v18 = vld [vmem:[%s18006_s22 + $0x8] sm:$0xff]  }
0x2efb   :  { %17158 = vpow2.f32 %v13703_v52  ;;  %16006 = vmatpush3.bf16.msra.mxu0 %v16833_v6  ;;  %v16848_v6 = vld [vmem:[%s18006_s22 + $0x20] sm:$0xff]   ;;  %v16850_v52 = vld [vmem:[%s18006_s22 + $0x28] sm:$0xff]  }
0x2efc   :  { %16019 = vmatprep.subr.bf16.mxu0 %v19724_v26 }
0x2efe   :  { %16008 = vmatmul.mubr.msk.bf16.vlgmr.msra.gmra.mrb[228].mxu0 %vm190_vm0, %v19351_v34  ;;  %v11456_v56 = vpop.f32.mrb[72].mxu1 }
0x2eff   :  { %v16017_v38 = vpop.f32.mrb[73].mxu1  ;;  %16023 = vmatprep.mubr.msk.bf16.mxu0 %vm17233_vm1, %v19724_v26  ;;  %v11457_v9 = vadd.f32 %v19341_v53, %v11456_v56  ;;  %16020 = vmatpush3.bf16.msra.mxu0 %v16834_v5  ;;  %v16852_v56 = vld [vmem:[%s18068_s8] sm:$0xff]  }
0x2f00   :  { %v11459_v29 = vpop.f32.mrb[74].mxu1  ;;  %16021 = vmatprep.subr.bf16.mxu0 %v19724_v26  ;;  %v16853_v38 = vld [vmem:[%s18068_s8 + $0x8] sm:$0xff]  }
0x2f01   :  { %v16018_v0 = vpop.f32.mrb[75].mxu1 }
0x2f03   :  { %16022 = vmatpush3.bf16.msra.mxu0 %v16835_v61 }
0x2f04   :  { %16035 = vmatprep.subr.bf16.mxu0 %v19724_v26 }
0x2f05   :  { %v17159_v12 = vpop.eup %17158 }
0x2f06   :  { %v11340_v7 = vadd.f32 1.0, %v17159_v12 }
0x2f08   :  { %17160 = vrcp.f32 %v11340_v7 }
0x2f12   :  { %v17161_v59 = vpop.eup %17160 }
0x2f13   :  { %v11462_v34 = vmul.f32 %v17161_v59, %v11457_v9 }
0x2f15   :  { %v11463_v50 = vadd.f32 %v11462_v34, %v10131_v28  ;;  %v19730_v34 = vld [vmem:[#allocation6_spill] sm:$0xff] }
0x2fc9   :  { %v11269_v46 = vpop.f32.mrb[248].mxu0 }
0x2fca   :  { %v11275_v22 = vadd.f32 %v11269_v46, %v11210_v57  ;;  %v15993_v2 = vpop.f32.mrb[249].mxu0 }
0x2fcb   :  { %v11272_v49 = vpop.f32.mrb[250].mxu0 }
0x2fcc   :  { %v11277_v53 = vadd.f32 %v19163_v20, %v11275_v22  ;;  %v15994_v16 = vpop.f32.mrb[251].mxu0 }
0x2fce   :  { %11278 = vst [vmem:[%s18204_s30 + $0x28] sm:$0xff] %v11277_v53  ;;  %v19586_v53 = vld [vmem:[%s18079_s14] sm:$0xff] }
0x2fd1   :  { %v11393_v13 = vpop.f32.mrb[228].mxu0 }
0x2fd2   :  { %v16222_v51 = vadd.f32 %v13598_v40, %v11393_v13  ;;  %v16009_v21 = vpop.f32.mrb[229].mxu0  ;;  %v19589_v13 = vld [vmem:[%s18079_s14 + $0x8] sm:$0xff] }
0x2fd3   :  { %v11396_v23 = vpop.f32.mrb[230].mxu0 }
0x2fd4   :  { %v13711_v1 = vmul.f32 -1.442695, %v16222_v51  ;;  %v16010_v54 = vpop.f32.mrb[231].mxu0 }
0x2fd6   :  { %17162 = vpow2.f32 %v13711_v1 }
0x2fe0   :  { %v17163_v48 = vpop.eup %17162 }
0x2fe1   :  { %v11403_v14 = vadd.f32 1.0, %v17163_v48 }
0x2fe3   :  { %17164 = vrcp.f32 %v11403_v14 }
0x2fe4   :  { %17166 = vtanh.f32 %v11463_v50 }
0x2fed   :  { %v17165_v32 = vpop.eup %17164 }
0x2fee   :  { %v11465_v20 = vsub.f32 1.0, %v17165_v32  ;;  %v17167_v60 = vpop.eup %17166  ;;  %v11467_v45 = vmul.f32 %v17165_v32, %v19347_v4 }
0x2ff0   :  { %v11466_v58 = vmul.f32 %v17167_v60, %v11465_v20 }
0x2ff2   :  { %v11468_v63 = vadd.f32 %v11467_v45, %v11466_v58  ;;  %v19594_v58 = vld [vmem:[%s18079_s14 + $0x18] sm:$0xff] }
0x2ff4   :  { %v11469_v3 = vpack.c.bf16 %v11468_v63, %v11468_v63  ;;  %v19597_v63 = vld [vmem:[%s18079_s14 + $0x10] sm:$0xff] }
0x2ff5   :  { %v10670_v47 = vadd.f32 %v19597_v63, %v19425_v36  ;;  %v16854_v36 = vld [vmem:[%s18103_s25] sm:$0xff]  }
0x2ff6   :  { %16024 = vmatmul.mubr.msk.bf16.vlgmr.msra.gmra.mrb[252].mxu0 %vm190_vm0, %v11469_v3 }
0x2ff7   :  { %16039 = vmatprep.mubr.msk.bf16.mxu0 %vm17233_vm1, %v19724_v26  ;;  %16036 = vmatpush3.bf16.msra.mxu0 %v16836_v25 }
0x2ff8   :  { %16037 = vmatprep.subr.bf16.mxu0 %v19724_v26 }
0x2ffb   :  { %16038 = vmatpush3.bf16.msra.mxu0 %v16838_v44 }
0x2ffc   :  { %16051 = vmatprep.subr.bf16.mxu0 %v19724_v26 }
0x30c9   :  { %v11524_v4 = vpop.f32.mrb[252].mxu0 }
0x30ca   :  { %v11525_v39 = vadd.f32 %v11524_v4, %v19366_v41  ;;  %v16025_v55 = vpop.f32.mrb[253].mxu0  ;;  %v16844_v41 = vld [vmem:[%s17806_s10] sm:$0xff]  }
0x30cb   :  { %v11527_v57 = vpop.f32.mrb[254].mxu0 }
0x30cc   :  { %17168 = vtanh.f32 %v11525_v39  ;;  %v16026_v27 = vpop.f32.mrb[255].mxu0 }
0x30d6   :  { %v17169_v8 = vpop.eup %17168 }
0x30d7   :  { %v11531_v24 = vpack.c.bf16 %v17169_v8, %v17169_v8 }
0x30d9   :  { %16032 = vmatmul.mubr.msk.bf16.vlgmr.msra.gmra.mrb[76].mxu1 %vm190_vm0, %v11531_v24  ;;  %16040 = vmatmul.mubr.msk.bf16.vlgmr.msra.gmra.mrb[0].mxu0 %vm190_vm0, %v11531_v24 }
0x30da   :  { %16052 = vmatpush3.bf16.msra.mxu0 %v16840_v10  ;;  %16044 = vmatpush3.bf16.msra.mxu1 %v16841_v35  ;;  %v16855_v35 = vld [vmem:[%s18108_s1] sm:$0xff]  }
0x30db   :  { %16053 = vmatprep.subr.bf16.mxu0 %v19724_v26  ;;  %16045 = vmatprep.subr.bf16.mxu1 %v19724_v26 }
0x30dc   :  { %16047 = vmatprep.mubr.msk.bf16.mxu1 %vm17233_vm1, %v19724_v26  ;;  %16055 = vmatprep.mubr.msk.bf16.mxu0 %vm17233_vm1, %v19724_v26 }
0x30de   :  { %16054 = vmatpush3.bf16.msra.mxu0 %v16842_v15  ;;  %16046 = vmatpush3.bf16.msra.mxu1 %v16843_v33  ;;  %v19622_v15 = vld [vmem:[%s18126_s20] sm:$0xff] }
0x30df   :  { %16059 = vmatprep.subr.bf16.mxu0 %v19724_v26  ;;  %16075 = vmatprep.subr.bf16.mxu1 %v19724_v26 }
0x30e1   :  { %16048 = vmatmul.mubr.msk.bf16.vlgmr.msra.gmra.mrb[56].mxu1 %vm190_vm0, %v11531_v24  ;;  %16056 = vmatmul.mubr.msk.bf16.vlgmr.msra.gmra.mrb[232].mxu0 %vm190_vm0, %v11469_v3 }
0x30e2   :  { %16060 = vmatpush3.bf16.msra.mxu0 %v16844_v41  ;;  %16076 = vmatpush3.bf16.msra.mxu1 %v16845_v42 }
0x30e3   :  { %16077 = vmatprep.subr.bf16.mxu1 %v19724_v26  ;;  %16061 = vmatprep.subr.bf16.mxu0 %v19724_v26 }
0x30e4   :  { %16079 = vmatprep.mubr.msk.bf16.mxu1 %vm17233_vm1, %v19724_v26  ;;  %16063 = vmatprep.mubr.msk.bf16.mxu0 %vm17233_vm1, %v19724_v26 }
0x30e6   :  { %16078 = vmatpush3.bf16.msra.mxu1 %v16846_v37  ;;  %16062 = vmatpush3.bf16.msra.mxu0 %v16847_v30 }
0x30e7   :  { %16083 = vmatprep.subr.bf16.mxu1 %v19724_v26  ;;  %16067 = vmatprep.subr.bf16.mxu0 %v19724_v26 }
0x30e9   :  { %16080 = vmatmul.mubr.msk.bf16.vlgmr.msra.gmra.mrb[52].mxu1 %vm190_vm0, %v19440_v62 }
0x30ea   :  { %16084 = vmatpush3.bf16.msra.mxu1 %v16848_v6  ;;  %16087 = vmatprep.mubr.msk.bf16.mxu1 %vm17233_vm1, %v19724_v26 }
0x30eb   :  { %16085 = vmatprep.subr.bf16.mxu1 %v19724_v26 }
0x30ed   :  { %16064 = vmatmul.mubr.msk.bf16.vlgmr.msra.gmra.mrb[232].mxu0 %vm190_vm0, %v11531_v24  ;;  %v16857_v24 = vld [vmem:[%s18108_s1 + $0x8] sm:$0xff]  }
0x30ee   :  { %16068 = vmatpush3.bf16.msra.mxu0 %v16849_v31  ;;  %16086 = vmatpush3.bf16.msra.mxu1 %v16850_v52  ;;  %v16858_v31 = vld [vmem:[%s18006_s22 + $0x10] sm:$0xff]   ;;  %v16859_v52 = vld [vmem:[%s18115_s12] sm:$0xff]  }
0x30ef   :  { %16069 = vmatprep.subr.bf16.mxu0 %v19724_v26  ;;  %16071 = vmatprep.mubr.msk.bf16.mxu0 %vm17233_vm1, %v19724_v26 }
0x30f0   :  { %16091 = vmatprep.subr.bf16.mxu1 %v19724_v26 }
0x30f1   :  { %16088 = vmatmul.mubr.msk.bf16.vlgmr.msra.gmra.mrb[84].mxu1 %vm190_vm0, %v19440_v62 }
0x30f2   :  { %16070 = vmatpush3.bf16.msra.mxu0 %v16851_v18  ;;  %16095 = vmatprep.mubr.msk.bf16.mxu1 %vm17233_vm1, %v19724_v26 }
0x30f3   :  { %16099 = vmatprep.subr.bf16.mxu0 %v19724_v26  ;;  %16092 = vmatpush3.bf16.msra.mxu1 %v16852_v56  ;;  %v16860_v56 = vld [vmem:[%s18006_s22 + $0x18] sm:$0xff]  }
0x30f4   :  { %16093 = vmatprep.subr.bf16.mxu1 %v19724_v26 }
0x30f5   :  { %16072 = vmatmul.mubr.msk.bf16.vlgmr.msra.gmra.mrb[236].mxu0 %vm190_vm0, %v19440_v62 }
0x30f6   :  { %16103 = vmatprep.mubr.msk.bf16.mxu0 %vm17233_vm1, %v19724_v26  ;;  %16100 = vmatpush3.bf16.msra.mxu0 %v16854_v36 }
0x30f7   :  { %16094 = vmatpush3.bf16.msra.mxu1 %v16853_v38  ;;  %16101 = vmatprep.subr.bf16.mxu0 %v19724_v26  ;;  %v16861_v38 = vld [vmem:[%s18115_s12 + $0x8] sm:$0xff]  }
0x30f8   :  { %16107 = vmatprep.subr.bf16.mxu1 %v19724_v26 }
0x31b4   :  { %v19580_v29 = vpop.f32.mrb[56].mxu1 }
0x31b5   :  { %v16049_v0 = vpop.f32.mrb[57].mxu1 }
0x31b6   :  { %v11703_v12 = vpop.f32.mrb[58].mxu1  ;;  %v16862_v0 = vld [vmem:[%s18006_s22 + $0x20] sm:$0xff]  }
0x31b7   :  { %v16050_v7 = vpop.f32.mrb[59].mxu1  ;;  %v16863_v12 = vld [vmem:[%s18006_s22 + $0x28] sm:$0xff]  }
0x31b8   :  { %v16864_v7 = vld [vmem:[%s18165_s4] sm:$0xff]  }
0x31bc   :  { %v11934_v19 = vpop.f32.mrb[52].mxu1 }
0x31bd   :  { %v16081_v62 = vpop.f32.mrb[53].mxu1  ;;  %v16224_v48 = vadd.f32 %v19589_v13, %v11934_v19  ;;  %v16865_v19 = vld [vmem:[%s18165_s4 + $0x8] sm:$0xff]  }
0x31be   :  { %v11937_v9 = vpop.f32.mrb[54].mxu1  ;;  %v19660_v62 = vld [vmem:[%s18174_s11] sm:$0xff] }
0x31bf   :  { %v16082_v59 = vpop.f32.mrb[55].mxu1  ;;  %v13759_v14 = vmul.f32 -1.442695, %v16224_v48  ;;  %v16868_v48 = vld [vmem:[%s18068_s8] sm:$0xff]  }
0x31c0   :  { %v11813_v28 = vpop.f32.mrb[232].mxu0 }
0x31c1   :  { %v19583_v50 = vadd.f32 %v11813_v28, %v19730_v34  ;;  %v16065_v5 = vpop.f32.mrb[233].mxu0 }
0x31c2   :  { %v11816_v61 = vpop.f32.mrb[234].mxu0 }
0x31c3   :  { %v16066_v46 = vpop.f32.mrb[235].mxu0 }
0x31c4   :  { %v11997_v22 = vpop.f32.mrb[84].mxu1 }
0x31c5   :  { %v16089_v2 = vpop.f32.mrb[85].mxu1  ;;  %v11998_v3 = vadd.f32 %v19594_v58, %v11997_v22 }
0x31c6   :  { %v12000_v49 = vpop.f32.mrb[86].mxu1 }
0x31c7   :  { %v16090_v16 = vpop.f32.mrb[87].mxu1 }
0x31c8   :  { %v11871_v40 = vpop.f32.mrb[236].mxu0  ;;  %v16866_v16 = vld [vmem:[%s18006_s22] sm:$0xff]  }
0x31c9   :  { %v16223_v51 = vadd.f32 %v11871_v40, %v19586_v53  ;;  %v16073_v21 = vpop.f32.mrb[237].mxu0 }
0x31ca   :  { %v11874_v23 = vpop.f32.mrb[238].mxu0 }
0x31cb   :  { %v13751_v1 = vmul.f32 -1.442695, %v16223_v51  ;;  %v16074_v54 = vpop.f32.mrb[239].mxu0  ;;  %v16867_v23 = vld [vmem:[%s18006_s22 + $0x8] sm:$0xff]  }
0x31cd   :  { %17170 = vpow2.f32 %v13751_v1 }
0x31ce   :  { %17172 = vpow2.f32 %v13759_v14  ;;  %v16869_v14 = vld [vmem:[%s18068_s8 + $0x8] sm:$0xff]  }
0x31d7   :  { %v17171_v32 = vpop.eup %17170 }
0x31d8   :  { %v11881_v20 = vadd.f32 1.0, %v17171_v32  ;;  %v17173_v60 = vpop.eup %17172 }
0x31d9   :  { %v11944_v45 = vadd.f32 1.0, %v17173_v60 }
0x31da   :  { %17174 = vrcp.f32 %v11881_v20 }
0x31db   :  { %17176 = vrcp.f32 %v11944_v45 }
0x31e4   :  { %v17175_v25 = vpop.eup %17174 }
0x31e5   :  { %v12003_v44 = vmul.f32 %v17175_v25, %v11998_v3  ;;  %v17177_v4 = vpop.eup %17176 }
0x31e6   :  { %v12006_v39 = vsub.f32 1.0, %v17177_v4  ;;  %v12008_v57 = vmul.f32 %v17177_v4, %v19436_v17  ;;  %v16856_v17 = vld [vmem:[%s18103_s25 + $0x8] sm:$0xff]  }
0x31e7   :  { %v12004_v43 = vadd.f32 %v12003_v44, %v10670_v47  ;;  %16102 = vmatpush3.bf16.msra.mxu0 %v16856_v17 }
0x31e8   :  { %16139 = vmatprep.subr.bf16.mxu0 %v19724_v26 }
0x31e9   :  { %17178 = vtanh.f32 %v12004_v43 }
0x31f3   :  { %v17179_v55 = vpop.eup %17178 }
0x31f4   :  { %v12007_v27 = vmul.f32 %v17179_v55, %v12006_v39 }
0x31f6   :  { %v19603_v8 = vadd.f32 %v12008_v57, %v12007_v27 }
0x31f8   :  { %v19607_v10 = vpack.c.bf16 %v19603_v8, %v19603_v8 }
0x31fa   :  { %16096 = vmatmul.mubr.msk.bf16.vlgmr.msra.gmra.mrb[88].mxu1 %vm190_vm0, %v19607_v10 }
0x31fb   :  { %16111 = vmatprep.mubr.msk.bf16.mxu1 %vm17233_vm1, %v19724_v26  ;;  %16108 = vmatpush3.bf16.msra.mxu1 %v16855_v35 }
0x31fc   :  { %16109 = vmatprep.subr.bf16.mxu1 %v19724_v26 }
0x31ff   :  { %16110 = vmatpush3.bf16.msra.mxu1 %v16857_v24 }
0x3200   :  { %16115 = vmatprep.subr.bf16.mxu1 %v19724_v26 }
0x32cd   :  { %v12065_v33 = vpop.f32.mrb[88].mxu1 }
0x32ce   :  { %v12066_v41 = vadd.f32 %v12065_v33, %v19622_v15  ;;  %v16097_v42 = vpop.f32.mrb[89].mxu1 }
0x32cf   :  { %v12068_v37 = vpop.f32.mrb[90].mxu1 }
0x32d0   :  { %17180 = vtanh.f32 %v12066_v41  ;;  %v16098_v30 = vpop.f32.mrb[91].mxu1 }
0x32da   :  { %v17181_v6 = vpop.eup %17180 }
0x32db   :  { %v12072_v18 = vpack.c.bf16 %v17181_v6, %v17181_v6 }
0x32dd   :  { %16104 = vmatmul.mubr.msk.bf16.vlgmr.msra.gmra.mrb[4].mxu0 %vm190_vm0, %v12072_v18  ;;  %16112 = vmatmul.mubr.msk.bf16.vlgmr.msra.gmra.mrb[92].mxu1 %vm190_vm0, %v12072_v18 }
0x32de   :  { %16140 = vmatpush3.bf16.msra.mxu0 %v16858_v31  ;;  %16116 = vmatpush3.bf16.msra.mxu1 %v16859_v52  ;;  %v16872_v31 = vld [vmem:[%s18103_s25 + $0x8] sm:$0xff]  }
0x32df   :  { %16141 = vmatprep.subr.bf16.mxu0 %v19724_v26  ;;  %16143 = vmatprep.mubr.msk.bf16.mxu0 %vm17233_vm1, %v19724_v26  ;;  %v16873_v52 = vld [vmem:[%s18108_s1 + $0x8] sm:$0xff]  }
0x32e0   :  { %16117 = vmatprep.subr.bf16.mxu1 %v19724_v26  ;;  %16119 = vmatprep.mubr.msk.bf16.mxu1 %vm17233_vm1, %v19724_v26 }
0x32e2   :  { %16142 = vmatpush3.bf16.msra.mxu0 %v16860_v56  ;;  %16118 = vmatpush3.bf16.msra.mxu1 %v16861_v38 }
0x32e3   :  { %16147 = vmatprep.subr.bf16.mxu0 %v19724_v26  ;;  %16123 = vmatprep.subr.bf16.mxu1 %v19724_v26 }
0x32e5   :  { %16144 = vmatmul.mubr.msk.bf16.vlgmr.msra.gmra.mrb[0].mxu0 %vm190_vm0, %v19607_v10 }
0x32e6   :  { %16148 = vmatpush3.bf16.msra.mxu0 %v16862_v0  ;;  %16151 = vmatprep.mubr.msk.bf16.mxu0 %vm17233_vm1, %v19724_v26 }
0x32e7   :  { %16149 = vmatprep.subr.bf16.mxu0 %v19724_v26 }
0x32e9   :  { %16120 = vmatmul.mubr.msk.bf16.vlgmr.msra.gmra.mrb[92].mxu1 %vm190_vm0, %v19607_v10 }
0x32ea   :  { %16150 = vmatpush3.bf16.msra.mxu0 %v16863_v12  ;;  %16127 = vmatprep.mubr.msk.bf16.mxu1 %vm17233_vm1, %v19724_v26 }
0x32eb   :  { %16155 = vmatprep.subr.bf16.mxu0 %v19724_v26  ;;  %16124 = vmatpush3.bf16.msra.mxu1 %v16864_v7  ;;  %v16874_v7 = vld [vmem:[%s18115_s12] sm:$0xff]  }
0x32ec   :  { %16125 = vmatprep.subr.bf16.mxu1 %v19724_v26 }
0x32ed   :  { %16152 = vmatmul.mubr.msk.bf16.vlgmr.msra.gmra.mrb[8].mxu0 %vm190_vm0, %v19607_v10 }
0x32ee   :  { %16159 = vmatprep.mubr.msk.bf16.mxu0 %vm17233_vm1, %v19724_v26  ;;  %16156 = vmatpush3.bf16.msra.mxu0 %v16868_v48 }
0x32ef   :  { %16126 = vmatpush3.bf16.msra.mxu1 %v16865_v19  ;;  %16157 = vmatprep.subr.bf16.mxu0 %v19724_v26 }
0x32f0   :  { %16131 = vmatprep.subr.bf16.mxu1 %v19724_v26 }
0x32f2   :  { %16158 = vmatpush3.bf16.msra.mxu0 %v16869_v14 }
0x32f3   :  { %16163 = vmatprep.subr.bf16.mxu0 %v19724_v26 }
0x33b0   :  { %v12127_v9 = vpop.f32.mrb[4].mxu0 }
0x33b1   :  { %v12128_v59 = vadd.f32 %v12127_v9, %v19660_v62  ;;  %v16105_v28 = vpop.f32.mrb[5].mxu0  ;;  %v16875_v9 = vld [vmem:[%s18115_s12 + $0x8] sm:$0xff]  }
0x33b2   :  { %v12130_v34 = vpop.f32.mrb[6].mxu0 }
0x33b3   :  { %17182 = vtanh.f32 %v12128_v59  ;;  %v16106_v5 = vpop.f32.mrb[7].mxu0  ;;  %v16877_v59 = vld [vmem:[%s18165_s4 + $0x8] sm:$0xff]  }
0x33b8   :  { %v12424_v61 = vpop.f32.mrb[0].mxu0 }
0x33b9   :  { %v16145_v46 = vpop.f32.mrb[1].mxu0  ;;  %v16226_v55 = vadd.f32 %v19589_v13, %v12424_v61 }
0x33ba   :  { %v12427_v22 = vpop.f32.mrb[2].mxu0 }
0x33bb   :  { %v16146_v2 = vpop.f32.mrb[3].mxu0  ;;  %v13794_v57 = vmul.f32 -1.442695, %v16226_v55 }
0x33bd   :  { %v17183_v49 = vpop.eup %17182 }
0x33be   :  { %v12246_v40 = vpack.c.bf16 %v17183_v49, %v17183_v49 }
0x33c0   :  { %16128 = vmatmul.mubr.msk.bf16.vlgmr.msra.gmra.mrb[92].mxu1 %vm190_vm0, %v12246_v40  ;;  %v12487_v51 = vpop.f32.mrb[8].mxu0 }
0x33c1   :  { %16132 = vmatpush3.bf16.msra.mxu1 %v16866_v16  ;;  %v16153_v21 = vpop.f32.mrb[9].mxu0  ;;  %16135 = vmatprep.mubr.msk.bf16.mxu1 %vm17233_vm1, %v19724_v26  ;;  %v12488_v35 = vadd.f32 %v19594_v58, %v12487_v51 }
0x33c2   :  { %v12490_v1 = vpop.f32.mrb[10].mxu0  ;;  %16133 = vmatprep.subr.bf16.mxu1 %v19724_v26 }
0x33c3   :  { %v16154_v54 = vpop.f32.mrb[11].mxu0 }
0x33c5   :  { %16134 = vmatpush3.bf16.msra.mxu1 %v16867_v23 }
0x33c6   :  { %16171 = vmatprep.subr.bf16.mxu1 %v19724_v26 }
0x33c8   :  { %16136 = vmatmul.mubr.msk.bf16.vlgmr.msra.gmra.mrb[76].mxu1 %vm190_vm0, %v19607_v10 }
0x33c9   :  { %16175 = vmatprep.mubr.msk.bf16.mxu1 %vm17233_vm1, %v19724_v26 }
0x3493   :  { %v12300_v32 = vpop.f32.mrb[92].mxu1 }
0x3494   :  { %v12308_v20 = vadd.f32 %v19428_v11, %v12300_v32  ;;  %v16129_v60 = vpop.f32.mrb[93].mxu1 }
0x3495   :  { %v12303_v45 = vpop.f32.mrb[94].mxu1 }
0x3496   :  { %12309 = vst [vmem:[%s18204_s30 + $0x30] sm:$0xff] %v12308_v20  ;;  %v16130_v3 = vpop.f32.mrb[95].mxu1 }
0x349b   :  { %v12361_v25 = vpop.f32.mrb[76].mxu1 }
0x349c   :  { %v16225_v47 = vadd.f32 %v12361_v25, %v19586_v53  ;;  %v16137_v44 = vpop.f32.mrb[77].mxu1  ;;  %v11701_v53 = vadd.f32 %v19597_v63, %v19580_v29  ;;  %v16870_v29 = vld [vmem:[%s18103_s25] sm:$0xff]  }
0x349d   :  { %v12364_v43 = vpop.f32.mrb[78].mxu1  ;;  %v16871_v63 = vld [vmem:[%s18108_s1] sm:$0xff]  }
0x349e   :  { %v13786_v4 = vmul.f32 -1.442695, %v16225_v47  ;;  %v16138_v39 = vpop.f32.mrb[79].mxu1  ;;  %16172 = vmatpush3.bf16.msra.mxu1 %v16871_v63 }
0x349f   :  { %16173 = vmatprep.subr.bf16.mxu1 %v19724_v26 }
0x34a0   :  { %17184 = vpow2.f32 %v13786_v4 }
0x34a1   :  { %17186 = vpow2.f32 %v13794_v57 }
0x34a2   :  { %16174 = vmatpush3.bf16.msra.mxu1 %v16873_v52 }
0x34a3   :  { %16187 = vmatprep.subr.bf16.mxu1 %v19724_v26 }
0x34aa   :  { %v17185_v27 = vpop.eup %17184 }
0x34ab   :  { %v12371_v10 = vadd.f32 1.0, %v17185_v27  ;;  %v17187_v11 = vpop.eup %17186 }
0x34ac   :  { %v12434_v36 = vadd.f32 1.0, %v17187_v11 }
0x34ad   :  { %17188 = vrcp.f32 %v12371_v10 }
0x34ae   :  { %17190 = vrcp.f32 %v12434_v36 }
0x34b7   :  { %v17189_v17 = vpop.eup %17188 }
0x34b8   :  { %v12493_v24 = vmul.f32 %v17189_v17, %v12488_v35  ;;  %v17191_v13 = vpop.eup %17190 }
0x34b9   :  { %v12496_v41 = vsub.f32 1.0, %v17191_v13  ;;  %v12498_v37 = vmul.f32 %v17191_v13, %v19603_v8 }
0x34ba   :  { %v12494_v33 = vadd.f32 %v12493_v24, %v11701_v53 }
0x34bc   :  { %17192 = vtanh.f32 %v12494_v33 }
0x34c6   :  { %v17193_v42 = vpop.eup %17192 }
0x34c7   :  { %v12497_v30 = vmul.f32 %v17193_v42, %v12496_v41 }
0x34c9   :  { %v12499_v6 = vadd.f32 %v12498_v37, %v12497_v30 }
0x34cb   :  { %v12500_v58 = vpack.c.bf16 %v12499_v6, %v12499_v6 }
0x34cd   :  { %16160 = vmatmul.mubr.msk.bf16.vlgmr.msra.gmra.mrb[12].mxu0 %vm190_vm0, %v12500_v58 }
0x34ce   :  { %16167 = vmatprep.mubr.msk.bf16.mxu0 %vm17233_vm1, %v19724_v26  ;;  %16164 = vmatpush3.bf16.msra.mxu0 %v16870_v29 }
0x34cf   :  { %16165 = vmatprep.subr.bf16.mxu0 %v19724_v26 }
0x34d2   :  { %16166 = vmatpush3.bf16.msra.mxu0 %v16872_v31 }
0x34d3   :  { %16179 = vmatprep.subr.bf16.mxu0 %v19724_v26 }
0x35a0   :  { %v12555_v8 = vpop.f32.mrb[12].mxu0 }
0x35a1   :  { %v12556_v18 = vadd.f32 %v12555_v8, %v19622_v15  ;;  %v16161_v56 = vpop.f32.mrb[13].mxu0  ;;  %v16876_v15 = vld [vmem:[%s18165_s4] sm:$0xff]  }
0x35a2   :  { %v12558_v38 = vpop.f32.mrb[14].mxu0 }
0x35a3   :  { %17194 = vtanh.f32 %v12556_v18  ;;  %v16162_v0 = vpop.f32.mrb[15].mxu0 }
0x35ad   :  { %v17195_v12 = vpop.eup %17194 }
0x35ae   :  { %v12562_v19 = vpack.c.bf16 %v17195_v12, %v17195_v12 }
0x35b0   :  { %16168 = vmatmul.mubr.msk.bf16.vlgmr.msra.gmra.mrb[16].mxu0 %vm190_vm0, %v12562_v19  ;;  %16176 = vmatmul.mubr.msk.bf16.vlgmr.msra.gmra.mrb[96].mxu1 %vm190_vm0, %v12562_v19 }
0x35b1   :  { %16180 = vmatpush3.bf16.msra.mxu0 %v16874_v7  ;;  %16183 = vmatprep.mubr.msk.bf16.mxu0 %vm17233_vm1, %v19724_v26 }
0x35b2   :  { %16181 = vmatprep.subr.bf16.mxu0 %v19724_v26  ;;  %16191 = vmatprep.mubr.msk.bf16.mxu1 %vm17233_vm1, %v19724_v26 }
0x35b3   :  { %16188 = vmatpush3.bf16.msra.mxu1 %v16876_v15 }
0x35b4   :  { %16189 = vmatprep.subr.bf16.mxu1 %v19724_v26 }
0x35b5   :  { %16182 = vmatpush3.bf16.msra.mxu0 %v16875_v9 }
0x35b7   :  { %16190 = vmatpush3.bf16.msra.mxu1 %v16877_v59 }
0x35b8   :  { %16184 = vmatmul.mubr.msk.bf16.vlgmr.msra.gmra.mrb[20].mxu0 %vm190_vm0, %v12500_v58 }
0x3683   :  { %v12617_v28 = vpop.f32.mrb[16].mxu0  ;;  %v12678_v34 = vpop.f32.mrb[96].mxu1 }
0x3684   :  { %v12618_v5 = vadd.f32 %v12617_v28, %v19660_v62  ;;  %v16169_v61 = vpop.f32.mrb[17].mxu0  ;;  %v16177_v46 = vpop.f32.mrb[97].mxu1 }
0x3685   :  { %v12620_v22 = vpop.f32.mrb[18].mxu0  ;;  %v12681_v2 = vpop.f32.mrb[98].mxu1 }
0x3686   :  { %17196 = vtanh.f32 %v12618_v5  ;;  %v16170_v49 = vpop.f32.mrb[19].mxu0  ;;  %v16178_v16 = vpop.f32.mrb[99].mxu1 }
0x368b   :  { %v12730_v40 = vpop.f32.mrb[20].mxu0 }
0x368c   :  { %v12731_v51 = vadd.f32 %v12730_v40, %v12678_v34  ;;  %v16185_v21 = vpop.f32.mrb[21].mxu0 }
0x368d   :  { %v12733_v23 = vpop.f32.mrb[22].mxu0 }
0x368e   :  { %v16186_v1 = vpop.f32.mrb[23].mxu0 }
0x3690   :  { %v17197_v26 = vpop.eup %17196 }
0x3691   :  { %v12736_v54 = vpack.c.bf16 %v17197_v26, %v17197_v26 }
0x3693   :  { %16192 = vmatmul.mubr.msk.bf16.vlgmr.msra.gmra.mrb[100].mxu1 %vm190_vm0, %v12736_v54 }
0x3766   :  { %v12790_v48 = vpop.f32.mrb[100].mxu1 }
0x3767   :  { %v12796_v14 = vadd.f32 %v12790_v48, %v12731_v51  ;;  %v16193_v62 = vpop.f32.mrb[101].mxu1 }
0x3768   :  { %v12793_v32 = vpop.f32.mrb[102].mxu1 }
0x3769   :  { %v12798_v20 = vadd.f32 %v19583_v50, %v12796_v14  ;;  %v16194_v60 = vpop.f32.mrb[103].mxu1 }
0x376b   :  { %12799 = vst [vmem:[%s18204_s30 + $0x38] sm:$0xff] %v12798_v20 }

</bundles_post_ra>
